<compile_context>
chip_gen: v6e
topology: v6e:2x2x1
jax: 0.10.0
libtpu: 0.0.40
codegen_flags: <defaults>
</compile_context>

<pallas_src>
import jax
import jax.numpy as jnp
import numpy as np
from jax.experimental import pallas as pl
from jax.experimental.pallas import tpu as pltpu

EPS = 1e-5
MM_DTYPE = jnp.bfloat16  # dot-operand dtype (MXU); set to jnp.float32 for exact f32 dots


def _zero_pad_hw(v):
    """Zero-pad a (N, H, W, C) value by 1 on each side of H and W (value-level)."""
    N, H, W, C = v.shape
    zw = jnp.zeros((N, H, 1, C), v.dtype)
    v = jnp.concatenate([zw, v, zw], axis=2)          # (N, H, W+2, C)
    zh = jnp.zeros((N, 1, W + 2, C), v.dtype)
    return jnp.concatenate([zh, v, zh], axis=1)       # (N, H+2, W+2, C)


def make_branch_kernel(stride, has_shortcut):
    def kernel(*refs):
        (x_ref, g1_ref, b1_ref, w1_ref, g2_ref, b2_ref, w2_ref, o_ref) = refs[:8]
        scratch = refs[8:]
        pad2_ref = scratch[0] if scratch else None

        N, H, W, Cin = x_ref.shape
        Cout = w1_ref.shape[1]
        Cpad = o_ref.shape[1]
        Ho = (H - 1) // stride + 1
        Wo = (W - 1) // stride + 1

        x = x_ref[...]                                    # f32 (N, H, W, Cin)

        # ---- BN1 (batch stats) folded to scale/shift, + ReLU -----------------
        # NOTE: single-pass E[(x-mean)^2] variance in f32 (adequate at these scales).
        mean1 = jnp.mean(x, axis=(0, 1, 2), keepdims=True)
        var1 = jnp.mean((x - mean1) ** 2, axis=(0, 1, 2), keepdims=True)
        scale1 = g1_ref[...].reshape(1, 1, 1, Cin) * jax.lax.rsqrt(var1 + EPS)
        shift1 = b1_ref[...].reshape(1, 1, 1, Cin) - mean1 * scale1
        act1 = jnp.maximum(x * scale1 + shift1, 0.0)

        # ---- Conv1: 3x3, stride 1, pad 1, as ONE im2col matmul ---------------
        p1 = _zero_pad_hw(act1)                           # (N, H+2, W+2, Cin) value
        cols1 = jnp.concatenate(
            [p1[:, kh:kh + H, kw:kw + W, :].reshape(N * H * W, Cin)
             for kh in range(3) for kw in range(3)], axis=-1)       # (NHW, 9*Cin)
        y1 = jnp.dot(cols1.astype(MM_DTYPE), w1_ref[...],
                     preferred_element_type=jnp.float32)            # (NHW, Cout) f32

        # ---- BN2 + ReLU on the flat (NHW, Cout) activation --------------------
        mean2 = jnp.mean(y1, axis=0, keepdims=True)
        var2 = jnp.mean((y1 - mean2) ** 2, axis=0, keepdims=True)
        scale2 = g2_ref[...] * jax.lax.rsqrt(var2 + EPS)            # (1, Cout)
        shift2 = b2_ref[...] - mean2 * scale2
        act2 = jnp.maximum(y1 * scale2 + shift2, 0.0)               # (NHW, Cout)

        # ---- Conv2 (3x3, stride, pad 1) + shortcut 1x1 conv: ONE fused matmul --
        p2 = _zero_pad_hw(act2.reshape(N, H, W, Cout))    # (N, H+2, W+2, Cout)
        if stride == 1:
            patches2 = [p2[:, kh:kh + Ho, kw:kw + Wo, :]
                        for kh in range(3) for kw in range(3)]
        else:
            # TODO(synk): strided subsampling still uses pl.ds reads through a VMEM
            # scratch ref; a value-level strided slice / (Wo, stride) reshape-split is
            # not reliably lowered, so we keep the known-good ref path here.
            pad2_ref[...] = p2                            # single full store
            patches2 = [pad2_ref[:, pl.ds(kh, Ho, stride), pl.ds(kw, Wo, stride), :]
                        for kh in range(3) for kw in range(3)]
        col_blocks = [p.reshape(N * Ho * Wo, Cout) for p in patches2]  # 9 x (NHoWo, Cout)

        if has_shortcut:
            # Append the (strided) shortcut input columns; its 1x1-conv weight has been
            # appended to w2_ref in the wrapper, so one dot produces conv2 + shortcut.
            if stride == 1:
                xs = x
            else:
                xs = x_ref[:, pl.ds(0, Ho, stride), pl.ds(0, Wo, stride), :]
            col_blocks.append(xs.reshape(N * Ho * Wo, Cin))

        cols2 = jnp.concatenate(col_blocks, axis=-1)      # (NHoWo, 9*Cout [+ Cin])
        out = jnp.dot(cols2.astype(MM_DTYPE), w2_ref[...],
                      preferred_element_type=jnp.float32)             # (NHoWo, Cpad)

        if not has_shortcut:
            # identity shortcut only exists in the module when Cin==Cout and stride==1
            x2d = x.reshape(N * H * W, Cin)
            if Cpad > Cin:
                x2d = jnp.concatenate(
                    [x2d, jnp.zeros((N * H * W, Cpad - Cin), jnp.float32)], axis=-1)
            out = out + x2d

        o_ref[...] = out                                  # full-width, lane-dense store

    return kernel


def branch_forward(x_nchw, g1, b1, w1_oihw, g2, b2, w2_oihw, ws_oihw, stride):
    """Pallas implementation of Branch.forward. Inputs/outputs are NCHW."""
    N, Cin, H, W = x_nchw.shape
    Cout = w1_oihw.shape[0]
    Ho = (H - 1) // stride + 1
    Wo = (W - 1) // stride + 1
    Cpad = ((Cout + 127) // 128) * 128     # lane-dense output channel width

    has_shortcut = ws_oihw is not None
    if not has_shortcut:
        assert stride == 1 and Cin == Cout, (
            "nn.Sequential() shortcut implies stride == 1 and in_cha == out_cha")

    # glue: layout conversion (NCHW -> NHWC, OIHW -> flattened im2col HWIO), bf16 weights,
    # shortcut weight fused onto the conv2 weight so the kernel needs a single final dot.
    x_nhwc = jnp.transpose(x_nchw, (0, 2, 3, 1)).astype(jnp.float32)
    w1f = jnp.transpose(w1_oihw, (2, 3, 1, 0)).reshape(9 * Cin, Cout).astype(MM_DTYPE)
    w2f = jnp.transpose(w2_oihw, (2, 3, 1, 0)).reshape(9 * Cout, Cout)
    if has_shortcut:
        wsf = jnp.transpose(ws_oihw[:, :, 0, 0], (1, 0))              # (Cin, Cout)
        w2f = jnp.concatenate([w2f, wsf], axis=0)                     # (9*Cout+Cin, Cout)
    w2f = jnp.pad(w2f, ((0, 0), (0, Cpad - Cout))).astype(MM_DTYPE)

    g1r = g1.reshape(1, Cin).astype(jnp.float32)
    b1r = b1.reshape(1, Cin).astype(jnp.float32)
    g2r = g2.reshape(1, Cout).astype(jnp.float32)
    b2r = b2.reshape(1, Cout).astype(jnp.float32)

    inputs = [x_nhwc, g1r, b1r, w1f, g2r, b2r, w2f]

    scratch_shapes = []
    if stride > 1:
        scratch_shapes.append(pltpu.VMEM((N, H + 2, W + 2, Cout), jnp.float32))

    k2 = 9 * Cout + (Cin if has_shortcut else 0)
    flops = (2 * N * H * W * 9 * Cin * Cout
             + 2 * N * Ho * Wo * k2 * Cpad)
    bytes_accessed = (sum(int(np.prod(a.shape)) * a.dtype.itemsize for a in inputs)
                      + N * Ho * Wo * Cpad * 4)
    cost = pl.CostEstimate(flops=int(flops), transcendentals=int(Cin + Cout),
                           bytes_accessed=int(bytes_accessed))

    vmem = pl.BlockSpec(memory_space=pltpu.MemorySpace.VMEM)
    # TODO(synk): for production shapes add a grid over batch / output-row tiles with
    # dimension_semantics=("parallel",...) (BN1 stats hoisted, two-pass BN2) so work
    # shards across both v7x TensorCores and stays inside the 64 MiB v7x VMEM budget.
    out2d = pl.pallas_call(
        make_branch_kernel(stride, has_shortcut),
        out_shape=jax.ShapeDtypeStruct((N * Ho * Wo, Cpad), jnp.float32),
        in_specs=[vmem] * len(inputs),
        out_specs=vmem,
        scratch_shapes=scratch_shapes,
        cost_estimate=cost,
    )(*inputs)

    out = out2d[:, :Cout].reshape(N, Ho, Wo, Cout)
    return jnp.transpose(out, (0, 3, 1, 2))  # back to NCHW


def reference_forward(x, g1, b1, w1, g2, b2, w2, ws, stride):
    """Pure-JAX f32 reference mirroring the PyTorch module (training-mode BN)."""
    def bn_relu(t, g, b):
        m = jnp.mean(t, axis=(0, 2, 3), keepdims=True)
        v = jnp.mean((t - m) ** 2, axis=(0, 2, 3), keepdims=True)
        out = (t - m) / jnp.sqrt(v + EPS) * g.reshape(1, -1, 1, 1) + b.reshape(1, -1, 1, 1)
        return jnp.maximum(out, 0.0)

    dn = ("NCHW", "OIHW", "NCHW")
    a1 = bn_relu(x, g1, b1)
    y1 = jax.lax.conv_general_dilated(a1, w1, (1, 1), ((1, 1), (1, 1)),
                                      dimension_numbers=dn)
    a2 = bn_relu(y1, g2, b2)
    y2 = jax.lax.conv_general_dilated(a2, w2, (stride, stride), ((1, 1), (1, 1)),
                                      dimension_numbers=dn)
    if ws is None:
        sc = x  # identity shortcut: only valid for stride == 1 and Cin == Cout
    else:
        sc = jax.lax.conv_general_dilated(x, ws, (stride, stride), ((0, 0), (0, 0)),
                                          dimension_numbers=dn)
    return y2 + sc


if __name__ == "__main__":
    # Branch(in_cha=4, out_cha=8, kernel_size=3, stride=2, padding=1, in_size=16)
    in_cha, out_cha, stride = 4, 8, 2
    N, H, W = 2, 16, 16

    key = jax.random.PRNGKey(0)
    k1, k2, k3, k4, k5, k6, k7, kx = jax.random.split(key, 8)
    w1 = jax.random.normal(k1, (out_cha, in_cha, 3, 3), jnp.float32) * 0.1   # OIHW
    w2 = jax.random.normal(k2, (out_cha, out_cha, 3, 3), jnp.float32) * 0.1  # OIHW
    ws = jax.random.normal(k3, (out_cha, in_cha, 1, 1), jnp.float32) * 0.1   # OIHW shortcut
    g1 = 1.0 + 0.1 * jax.random.normal(k4, (in_cha,), jnp.float32)
    b1 = 0.1 * jax.random.normal(k5, (in_cha,), jnp.float32)
    g2 = 1.0 + 0.1 * jax.random.normal(k6, (out_cha,), jnp.float32)
    b2 = 0.1 * jax.random.normal(k7, (out_cha,), jnp.float32)
    x = jax.random.normal(kx, (N, in_cha, H, W), jnp.float32)

    out = branch_forward(x, g1, b1, w1, g2, b2, w2, ws, stride)
    out = jax.block_until_ready(out)

    ref = jax.block_until_ready(
        reference_forward(x, g1, b1, w1, g2, b2, w2, ws, stride))

    # Tolerance accounts for bf16 dot operands (f32 accumulate) vs the f32 reference.
    np.testing.assert_allclose(np.asarray(out), np.asarray(ref), atol=2e-2, rtol=2e-2)
    assert out.shape == (N, out_cha, (H - 1) // stride + 1, (W - 1) // stride + 1)

    print("KERNEL_OK")
</pallas_src>

<mosaic_0001>
module attributes {stable_mosaic.version = 11 : i64} {
  func.func @kernel(%arg0: memref<2x16x16x4xf32, #tpu.memory_space<vmem>>, %arg1: memref<1x4xf32, #tpu.memory_space<vmem>>, %arg2: memref<1x4xf32, #tpu.memory_space<vmem>>, %arg3: memref<36x8xbf16, #tpu.memory_space<vmem>>, %arg4: memref<1x8xf32, #tpu.memory_space<vmem>>, %arg5: memref<1x8xf32, #tpu.memory_space<vmem>>, %arg6: memref<76x128xbf16, #tpu.memory_space<vmem>>, %arg7: memref<128x128xf32, #tpu.memory_space<vmem>>, %arg8: memref<2x18x18x8xf32, #tpu.memory_space<vmem>>) attributes {dimension_semantics = [], scalar_prefetch = 0 : i64, scratch_operands = 1 : i64, tpu.core_type = #tpu.core_type<tc>} {
    %c0 = arith.constant 0 : index
    %c0_0 = arith.constant 0 : index
    %c0_1 = arith.constant 0 : index
    %c0_2 = arith.constant 0 : index
    %0 = vector.load %arg0[%c0, %c0_0, %c0_1, %c0_2] : memref<2x16x16x4xf32, #tpu.memory_space<vmem>>, vector<2x16x16x4xf32>
    %cst = arith.constant dense<0.000000e+00> : vector<4xf32>
    %1 = vector.multi_reduction <add>, %0, %cst [0, 1, 2] : vector<2x16x16x4xf32> to vector<4xf32>
    %2 = vector.shape_cast %1 : vector<4xf32> to vector<1x1x1x4xf32>
    %cst_3 = arith.constant 5.120000e+02 : f32
    %3 = vector.broadcast %cst_3 : f32 to vector<1x1x1x4xf32>
    %4 = arith.divf %2, %3 : vector<1x1x1x4xf32>
    %5 = vector.broadcast %4 : vector<1x1x1x4xf32> to vector<2x16x16x4xf32>
    %6 = arith.subf %0, %5 : vector<2x16x16x4xf32>
    %7 = arith.mulf %6, %6 : vector<2x16x16x4xf32>
    %cst_4 = arith.constant dense<0.000000e+00> : vector<4xf32>
    %8 = vector.multi_reduction <add>, %7, %cst_4 [0, 1, 2] : vector<2x16x16x4xf32> to vector<4xf32>
    %9 = vector.shape_cast %8 : vector<4xf32> to vector<1x1x1x4xf32>
    %cst_5 = arith.constant 5.120000e+02 : f32
    %10 = vector.broadcast %cst_5 : f32 to vector<1x1x1x4xf32>
    %11 = arith.divf %9, %10 : vector<1x1x1x4xf32>
    %c0_6 = arith.constant 0 : index
    %c0_7 = arith.constant 0 : index
    %12 = vector.load %arg1[%c0_6, %c0_7] : memref<1x4xf32, #tpu.memory_space<vmem>>, vector<1x4xf32>
    %13 = vector.shape_cast %12 : vector<1x4xf32> to vector<1x1x1x4xf32>
    %cst_8 = arith.constant 9.99999974E-6 : f32
    %14 = vector.broadcast %cst_8 : f32 to vector<1x1x1x4xf32>
    %15 = arith.addf %11, %14 : vector<1x1x1x4xf32>
    %16 = math.rsqrt %15 : vector<1x1x1x4xf32>
    %17 = arith.mulf %13, %16 : vector<1x1x1x4xf32>
    %c0_9 = arith.constant 0 : index
    %c0_10 = arith.constant 0 : index
    %18 = vector.load %arg2[%c0_9, %c0_10] : memref<1x4xf32, #tpu.memory_space<vmem>>, vector<1x4xf32>
    %19 = vector.shape_cast %18 : vector<1x4xf32> to vector<1x1x1x4xf32>
    %20 = arith.mulf %4, %17 : vector<1x1x1x4xf32>
    %21 = arith.subf %19, %20 : vector<1x1x1x4xf32>
    %22 = vector.broadcast %17 : vector<1x1x1x4xf32> to vector<2x16x16x4xf32>
    %23 = arith.mulf %0, %22 : vector<2x16x16x4xf32>
    %24 = vector.broadcast %21 : vector<1x1x1x4xf32> to vector<2x16x16x4xf32>
    %25 = arith.addf %23, %24 : vector<2x16x16x4xf32>
    %cst_11 = arith.constant 0.000000e+00 : f32
    %26 = vector.broadcast %cst_11 : f32 to vector<2x16x16x4xf32>
    %27 = arith.maximumf %25, %26 : vector<2x16x16x4xf32>
    %cst_12 = arith.constant 0.000000e+00 : f32
    %28 = vector.broadcast %cst_12 : f32 to vector<2x16x1x4xf32>
    %29 = tpu.concatenate %28, %27, %28 in 2 : vector<2x16x1x4xf32>, vector<2x16x16x4xf32>, vector<2x16x1x4xf32> -> vector<2x16x18x4xf32>
    %cst_13 = arith.constant 0.000000e+00 : f32
    %30 = vector.broadcast %cst_13 : f32 to vector<2x1x18x4xf32>
    %31 = tpu.concatenate %30, %29, %30 in 1 : vector<2x1x18x4xf32>, vector<2x16x18x4xf32>, vector<2x1x18x4xf32> -> vector<2x18x18x4xf32>
    %32 = vector.extract_strided_slice %31 {offsets = [0, 0, 0, 0], sizes = [2, 16, 16, 4], strides = [1, 1, 1, 1]} : vector<2x18x18x4xf32> to vector<2x16x16x4xf32>
    %33 = vector.shape_cast %32 : vector<2x16x16x4xf32> to vector<512x4xf32>
    %34 = vector.extract_strided_slice %31 {offsets = [0, 0, 1, 0], sizes = [2, 16, 16, 4], strides = [1, 1, 1, 1]} : vector<2x18x18x4xf32> to vector<2x16x16x4xf32>
    %35 = vector.shape_cast %34 : vector<2x16x16x4xf32> to vector<512x4xf32>
    %36 = vector.extract_strided_slice %31 {offsets = [0, 0, 2, 0], sizes = [2, 16, 16, 4], strides = [1, 1, 1, 1]} : vector<2x18x18x4xf32> to vector<2x16x16x4xf32>
    %37 = vector.shape_cast %36 : vector<2x16x16x4xf32> to vector<512x4xf32>
    %38 = vector.extract_strided_slice %31 {offsets = [0, 1, 0, 0], sizes = [2, 16, 16, 4], strides = [1, 1, 1, 1]} : vector<2x18x18x4xf32> to vector<2x16x16x4xf32>
    %39 = vector.shape_cast %38 : vector<2x16x16x4xf32> to vector<512x4xf32>
    %40 = vector.extract_strided_slice %31 {offsets = [0, 1, 1, 0], sizes = [2, 16, 16, 4], strides = [1, 1, 1, 1]} : vector<2x18x18x4xf32> to vector<2x16x16x4xf32>
    %41 = vector.shape_cast %40 : vector<2x16x16x4xf32> to vector<512x4xf32>
    %42 = vector.extract_strided_slice %31 {offsets = [0, 1, 2, 0], sizes = [2, 16, 16, 4], strides = [1, 1, 1, 1]} : vector<2x18x18x4xf32> to vector<2x16x16x4xf32>
    %43 = vector.shape_cast %42 : vector<2x16x16x4xf32> to vector<512x4xf32>
    %44 = vector.extract_strided_slice %31 {offsets = [0, 2, 0, 0], sizes = [2, 16, 16, 4], strides = [1, 1, 1, 1]} : vector<2x18x18x4xf32> to vector<2x16x16x4xf32>
    %45 = vector.shape_cast %44 : vector<2x16x16x4xf32> to vector<512x4xf32>
    %46 = vector.extract_strided_slice %31 {offsets = [0, 2, 1, 0], sizes = [2, 16, 16, 4], strides = [1, 1, 1, 1]} : vector<2x18x18x4xf32> to vector<2x16x16x4xf32>
    %47 = vector.shape_cast %46 : vector<2x16x16x4xf32> to vector<512x4xf32>
    %48 = vector.extract_strided_slice %31 {offsets = [0, 2, 2, 0], sizes = [2, 16, 16, 4], strides = [1, 1, 1, 1]} : vector<2x18x18x4xf32> to vector<2x16x16x4xf32>
    %49 = vector.shape_cast %48 : vector<2x16x16x4xf32> to vector<512x4xf32>
    %50 = tpu.concatenate %33, %35, %37, %39, %41, %43, %45, %47, %49 in 1 : vector<512x4xf32>, vector<512x4xf32>, vector<512x4xf32>, vector<512x4xf32>, vector<512x4xf32>, vector<512x4xf32>, vector<512x4xf32>, vector<512x4xf32>, vector<512x4xf32> -> vector<512x36xf32>
    %51 = arith.truncf %50 : vector<512x36xf32> to vector<512x36xbf16>
    %c0_14 = arith.constant 0 : index
    %c0_15 = arith.constant 0 : index
    %52 = vector.load %arg3[%c0_14, %c0_15] : memref<36x8xbf16, #tpu.memory_space<vmem>>, vector<36x8xbf16>
    %cst_16 = arith.constant dense<0.000000e+00> : vector<512x8xf32>
    %53 = tpu.matmul %51, %52, %cst_16 {dimension_numbers = #tpu.dot_dimension_numbers<[1], [0], [0], [1], [0, 0, 1, 1], [], []>} : vector<512x36xbf16>, vector<36x8xbf16>, vector<512x8xf32> -> vector<512x8xf32>
    %cst_17 = arith.constant dense<0.000000e+00> : vector<8xf32>
    %54 = vector.multi_reduction <add>, %53, %cst_17 [0] : vector<512x8xf32> to vector<8xf32>
    %55 = vector.shape_cast %54 : vector<8xf32> to vector<1x8xf32>
    %cst_18 = arith.constant 5.120000e+02 : f32
    %56 = vector.broadcast %cst_18 : f32 to vector<1x8xf32>
    %57 = arith.divf %55, %56 : vector<1x8xf32>
    %58 = vector.broadcast %57 : vector<1x8xf32> to vector<512x8xf32>
    %59 = arith.subf %53, %58 : vector<512x8xf32>
    %60 = arith.mulf %59, %59 : vector<512x8xf32>
    %cst_19 = arith.constant dense<0.000000e+00> : vector<8xf32>
    %61 = vector.multi_reduction <add>, %60, %cst_19 [0] : vector<512x8xf32> to vector<8xf32>
    %62 = vector.shape_cast %61 : vector<8xf32> to vector<1x8xf32>
    %cst_20 = arith.constant 5.120000e+02 : f32
    %63 = vector.broadcast %cst_20 : f32 to vector<1x8xf32>
    %64 = arith.divf %62, %63 : vector<1x8xf32>
    %c0_21 = arith.constant 0 : index
    %c0_22 = arith.constant 0 : index
    %65 = vector.load %arg4[%c0_21, %c0_22] : memref<1x8xf32, #tpu.memory_space<vmem>>, vector<1x8xf32>
    %cst_23 = arith.constant 9.99999974E-6 : f32
    %66 = vector.broadcast %cst_23 : f32 to vector<1x8xf32>
    %67 = arith.addf %64, %66 : vector<1x8xf32>
    %68 = math.rsqrt %67 : vector<1x8xf32>
    %69 = arith.mulf %65, %68 : vector<1x8xf32>
    %c0_24 = arith.constant 0 : index
    %c0_25 = arith.constant 0 : index
    %70 = vector.load %arg5[%c0_24, %c0_25] : memref<1x8xf32, #tpu.memory_space<vmem>>, vector<1x8xf32>
    %71 = arith.mulf %57, %69 : vector<1x8xf32>
    %72 = arith.subf %70, %71 : vector<1x8xf32>
    %73 = vector.broadcast %69 : vector<1x8xf32> to vector<512x8xf32>
    %74 = arith.mulf %53, %73 : vector<512x8xf32>
    %75 = vector.broadcast %72 : vector<1x8xf32> to vector<512x8xf32>
    %76 = arith.addf %74, %75 : vector<512x8xf32>
    %cst_26 = arith.constant 0.000000e+00 : f32
    %77 = vector.broadcast %cst_26 : f32 to vector<512x8xf32>
    %78 = arith.maximumf %76, %77 : vector<512x8xf32>
    %79 = vector.shape_cast %78 : vector<512x8xf32> to vector<2x16x16x8xf32>
    %cst_27 = arith.constant 0.000000e+00 : f32
    %80 = vector.broadcast %cst_27 : f32 to vector<2x16x1x8xf32>
    %81 = tpu.concatenate %80, %79, %80 in 2 : vector<2x16x1x8xf32>, vector<2x16x16x8xf32>, vector<2x16x1x8xf32> -> vector<2x16x18x8xf32>
    %cst_28 = arith.constant 0.000000e+00 : f32
    %82 = vector.broadcast %cst_28 : f32 to vector<2x1x18x8xf32>
    %83 = tpu.concatenate %82, %81, %82 in 1 : vector<2x1x18x8xf32>, vector<2x16x18x8xf32>, vector<2x1x18x8xf32> -> vector<2x18x18x8xf32>
    %c0_29 = arith.constant 0 : index
    %c0_30 = arith.constant 0 : index
    %c0_31 = arith.constant 0 : index
    %c0_32 = arith.constant 0 : index
    %84 = vector.load %arg8[%c0_29, %c0_30, %c0_31, %c0_32] : memref<2x18x18x8xf32, #tpu.memory_space<vmem>>, vector<2x18x18x8xf32>
    tpu.vector_store %arg8[%c0_29, %c0_30, %c0_31, %c0_32], %83 {strides = array<i32>} : memref<2x18x18x8xf32, #tpu.memory_space<vmem>>, vector<2x18x18x8xf32>,
    %c0_33 = arith.constant 0 : index
    %c0_34 = arith.constant 0 : index
    %c0_35 = arith.constant 0 : index
    %c0_36 = arith.constant 0 : index
    %85 = tpu.strided_load %arg8[%c0_33, %c0_34, %c0_35, %c0_36] {strides = array<i32: 1, 2, 2, 1>} : memref<2x18x18x8xf32, #tpu.memory_space<vmem>>, vector<2x8x8x8xf32>
    %c0_37 = arith.constant 0 : index
    %c0_38 = arith.constant 0 : index
    %c1 = arith.constant 1 : index
    %c0_39 = arith.constant 0 : index
    %86 = tpu.strided_load %arg8[%c0_37, %c0_38, %c1, %c0_39] {strides = array<i32: 1, 2, 2, 1>} : memref<2x18x18x8xf32, #tpu.memory_space<vmem>>, vector<2x8x8x8xf32>
    %c0_40 = arith.constant 0 : index
    %c0_41 = arith.constant 0 : index
    %c2 = arith.constant 2 : index
    %c0_42 = arith.constant 0 : index
    %87 = tpu.strided_load %arg8[%c0_40, %c0_41, %c2, %c0_42] {strides = array<i32: 1, 2, 2, 1>} : memref<2x18x18x8xf32, #tpu.memory_space<vmem>>, vector<2x8x8x8xf32>
    %c0_43 = arith.constant 0 : index
    %c1_44 = arith.constant 1 : index
    %c0_45 = arith.constant 0 : index
    %c0_46 = arith.constant 0 : index
    %88 = tpu.strided_load %arg8[%c0_43, %c1_44, %c0_45, %c0_46] {strides = array<i32: 1, 2, 2, 1>} : memref<2x18x18x8xf32, #tpu.memory_space<vmem>>, vector<2x8x8x8xf32>
    %c0_47 = arith.constant 0 : index
    %c1_48 = arith.constant 1 : index
    %c1_49 = arith.constant 1 : index
    %c0_50 = arith.constant 0 : index
    %89 = tpu.strided_load %arg8[%c0_47, %c1_48, %c1_49, %c0_50] {strides = array<i32: 1, 2, 2, 1>} : memref<2x18x18x8xf32, #tpu.memory_space<vmem>>, vector<2x8x8x8xf32>
    %c0_51 = arith.constant 0 : index
    %c1_52 = arith.constant 1 : index
    %c2_53 = arith.constant 2 : index
    %c0_54 = arith.constant 0 : index
    %90 = tpu.strided_load %arg8[%c0_51, %c1_52, %c2_53, %c0_54] {strides = array<i32: 1, 2, 2, 1>} : memref<2x18x18x8xf32, #tpu.memory_space<vmem>>, vector<2x8x8x8xf32>
    %c0_55 = arith.constant 0 : index
    %c2_56 = arith.constant 2 : index
    %c0_57 = arith.constant 0 : index
    %c0_58 = arith.constant 0 : index
    %91 = tpu.strided_load %arg8[%c0_55, %c2_56, %c0_57, %c0_58] {strides = array<i32: 1, 2, 2, 1>} : memref<2x18x18x8xf32, #tpu.memory_space<vmem>>, vector<2x8x8x8xf32>
    %c0_59 = arith.constant 0 : index
    %c2_60 = arith.constant 2 : index
    %c1_61 = arith.constant 1 : index
    %c0_62 = arith.constant 0 : index
    %92 = tpu.strided_load %arg8[%c0_59, %c2_60, %c1_61, %c0_62] {strides = array<i32: 1, 2, 2, 1>} : memref<2x18x18x8xf32, #tpu.memory_space<vmem>>, vector<2x8x8x8xf32>
    %c0_63 = arith.constant 0 : index
    %c2_64 = arith.constant 2 : index
    %c2_65 = arith.constant 2 : index
    %c0_66 = arith.constant 0 : index
    %93 = tpu.strided_load %arg8[%c0_63, %c2_64, %c2_65, %c0_66] {strides = array<i32: 1, 2, 2, 1>} : memref<2x18x18x8xf32, #tpu.memory_space<vmem>>, vector<2x8x8x8xf32>
    %94 = vector.shape_cast %85 : vector<2x8x8x8xf32> to vector<128x8xf32>
    %95 = vector.shape_cast %86 : vector<2x8x8x8xf32> to vector<128x8xf32>
    %96 = vector.shape_cast %87 : vector<2x8x8x8xf32> to vector<128x8xf32>
    %97 = vector.shape_cast %88 : vector<2x8x8x8xf32> to vector<128x8xf32>
    %98 = vector.shape_cast %89 : vector<2x8x8x8xf32> to vector<128x8xf32>
    %99 = vector.shape_cast %90 : vector<2x8x8x8xf32> to vector<128x8xf32>
    %100 = vector.shape_cast %91 : vector<2x8x8x8xf32> to vector<128x8xf32>
    %101 = vector.shape_cast %92 : vector<2x8x8x8xf32> to vector<128x8xf32>
    %102 = vector.shape_cast %93 : vector<2x8x8x8xf32> to vector<128x8xf32>
    %c0_67 = arith.constant 0 : index
    %c0_68 = arith.constant 0 : index
    %c0_69 = arith.constant 0 : index
    %c0_70 = arith.constant 0 : index
    %103 = tpu.strided_load %arg0[%c0_67, %c0_68, %c0_69, %c0_70] {strides = array<i32: 1, 2, 2, 1>} : memref<2x16x16x4xf32, #tpu.memory_space<vmem>>, vector<2x8x8x4xf32>
    %104 = vector.shape_cast %103 : vector<2x8x8x4xf32> to vector<128x4xf32>
    %105 = tpu.concatenate %94, %95, %96, %97, %98, %99, %100, %101, %102, %104 in 1 : vector<128x8xf32>, vector<128x8xf32>, vector<128x8xf32>, vector<128x8xf32>, vector<128x8xf32>, vector<128x8xf32>, vector<128x8xf32>, vector<128x8xf32>, vector<128x8xf32>, vector<128x4xf32> -> vector<128x76xf32>
    %106 = arith.truncf %105 : vector<128x76xf32> to vector<128x76xbf16>
    %c0_71 = arith.constant 0 : index
    %c0_72 = arith.constant 0 : index
    %107 = vector.load %arg6[%c0_71, %c0_72] : memref<76x128xbf16, #tpu.memory_space<vmem>>, vector<76x128xbf16>
    %cst_73 = arith.constant dense<0.000000e+00> : vector<128x128xf32>
    %108 = tpu.matmul %106, %107, %cst_73 {dimension_numbers = #tpu.dot_dimension_numbers<[1], [0], [0], [1], [0, 0, 1, 1], [], []>} : vector<128x76xbf16>, vector<76x128xbf16>, vector<128x128xf32> -> vector<128x128xf32>
    %c0_74 = arith.constant 0 : index
    %c0_75 = arith.constant 0 : index
    %109 = vector.load %arg7[%c0_74, %c0_75] : memref<128x128xf32, #tpu.memory_space<vmem>>, vector<128x128xf32>
    tpu.vector_store %arg7[%c0_74, %c0_75], %108 {strides = array<i32>} : memref<128x128xf32, #tpu.memory_space<vmem>>, vector<128x128xf32>,
    return
  }
}

</mosaic_0001>

<bundles_post_ra>
// kernel: tpu_custom_call.1
= control target key start
LH: loop header
LB: loop body
LE: loop exit
PB: predicated region body
PF: predicated region fallthrough
CT: control target
= control target key end

     0   :  { %vm92_vm0 = vcmask 31744   ;;  %s14233_s0 = inlined_call_operand.vmem [shape: f32[2,16,16,4], index: 0, kind: input, shape index: {}]   ;;  %s14234_s1 = inlined_call_operand.vmem [shape: f32[1,4], index: 1, kind: input, shape index: {}]   ;;  %s14235_s2 = inlined_call_operand.vmem [shape: f32[1,4], index: 2, kind: input, shape index: {}]   ;;  %s14236_s3 = inlined_call_operand.vmem [shape: bf16[36,8], index: 3, kind: input, shape index: {}]   ;;  %s14237_s4 = inlined_call_operand.vmem [shape: f32[1,8], index: 4, kind: input, shape index: {}]   ;;  %s14238_s5 = inlined_call_operand.vmem [shape: f32[1,8], index: 5, kind: input, shape index: {}]   ;;  %s14239_s6 = inlined_call_operand.vmem [shape: bf16[76,128], index: 6, kind: input, shape index: {}]   ;;  %s14240_s7 = inlined_call_operand.hbm [shape: f32[128,128], index: 7, kind: output, shape index: {}]  }
   0x1   :  { %v8199_v0 = vld [vmem:[%s14233_s0] sm:$0xff]  ;;  %v8204_v1 = vld [vmem:[%s14233_s0 + $0x8] sm:$0xff]  ;;  %v8209_v2 = vld [vmem:[%s14233_s0 + $0x10] sm:$0xff] }
   0x2   :  { %14717 = vst [vmem:[#allocation6_spill] sm:$0xff] %v8199_v0  ;;  %14718 = vst [vmem:[#allocation7_spill] sm:$0xff] %v8204_v1  ;;  %v8214_v3 = vld [vmem:[%s14233_s0 + $0x18] sm:$0xff]  ;;  %v93_v4 = vsel %vm92_vm0, %v8199_v0, 0.0  ;;  %v94_v5 = vsel %vm92_vm0, %v8204_v1, 0.0  ;;  %v96_v6 = vsel %vm92_vm0, %v8209_v2, 0.0 }
   0x3   :  { %14719 = vst [vmem:[#allocation8_spill] sm:$0xff] %v8214_v3  ;;  %v8225_v7 = vld [vmem:[%s14233_s0 + $0x20] sm:$0xff]  ;;  %v95_v8 = vadd.f32 %v94_v5, %v93_v4  ;;  %v98_v9 = vsel %vm92_vm0, %v8214_v3, 0.0  ;;  %v8232_v10 = vld [vmem:[%s14233_s0 + $0x28] sm:$0xff]  ;;  %v8239_v13 = vld [vmem:[%s14233_s0 + $0x30] sm:$0xff] }
   0x4   :  { %14720 = vst [vmem:[#allocation9_spill] sm:$0xff] %v8225_v7  ;;  %14721 = vst [vmem:[#allocation10_spill] sm:$0xff] %v8232_v10  ;;  %v100_v12 = vsel %vm92_vm0, %v8225_v7, 0.0  ;;  %v102_v15 = vsel %vm92_vm0, %v8232_v10, 0.0  ;;  %v8246_v16 = vld [vmem:[%s14233_s0 + $0x38] sm:$0xff]  ;;  %v104_v18 = vsel %vm92_vm0, %v8239_v13, 0.0 }
   0x5   :  { %v97_v11 = vadd.f32 %v96_v6, %v95_v8  ;;  %14722 = vst [vmem:[#allocation11_spill] sm:$0xff] %v8239_v13  ;;  %v8253_v19 = vld [vmem:[%s14233_s0 + $0x40] sm:$0xff]  ;;  %v106_v21 = vsel %vm92_vm0, %v8246_v16, 0.0  ;;  %v8260_v22 = vld [vmem:[%s14233_s0 + $0x48] sm:$0xff]  ;;  %v8267_v25 = vld [vmem:[%s14233_s0 + $0x50] sm:$0xff] }
   0x6   :  { %v108_v24 = vsel %vm92_vm0, %v8253_v19, 0.0  ;;  %v110_v27 = vsel %vm92_vm0, %v8260_v22, 0.0  ;;  %v8274_v28 = vld [vmem:[%s14233_s0 + $0x58] sm:$0xff]  ;;  %v112_v30 = vsel %vm92_vm0, %v8267_v25, 0.0  ;;  %v8281_v31 = vld [vmem:[%s14233_s0 + $0x60] sm:$0xff]  ;;  %v8286_v33 = vld [vmem:[%s14233_s0 + $0x68] sm:$0xff] }
   0x7   :  { %v99_v14 = vadd.f32 %v98_v9, %v97_v11  ;;  %v8291_v34 = vld [vmem:[%s14233_s0 + $0x70] sm:$0xff]  ;;  %v114_v35 = vsel %vm92_vm0, %v8274_v28, 0.0  ;;  %v116_v37 = vsel %vm92_vm0, %v8281_v31, 0.0  ;;  %v8300_v38 = vld [vmem:[%s14233_s0 + $0x78] sm:$0xff]  ;;  %v118_v40 = vsel %vm92_vm0, %v8286_v33, 0.0  ;;  %v8309_v42 = vld [vmem:[%s14233_s0 + $0x80] sm:$0xff] }
   0x8   :  { %v120_v41 = vsel %vm92_vm0, %v8291_v34, 0.0  ;;  %v122_v45 = vsel %vm92_vm0, %v8300_v38, 0.0 }
   0x9   :  { %v101_v17 = vadd.f32 %v100_v12, %v99_v14 }
   0xb   :  { %v103_v20 = vadd.f32 %v102_v15, %v101_v17 }
   0xd   :  { %v105_v23 = vadd.f32 %v104_v18, %v103_v20 }
   0xf   :  { %v107_v26 = vadd.f32 %v106_v21, %v105_v23 }
  0x11   :  { %v109_v29 = vadd.f32 %v108_v24, %v107_v26 }
  0x13   :  { %v111_v32 = vadd.f32 %v110_v27, %v109_v29 }
  0x15   :  { %v113_v36 = vadd.f32 %v112_v30, %v111_v32 }
  0x17   :  { %v115_v39 = vadd.f32 %v114_v35, %v113_v36 }
  0x19   :  { %v117_v43 = vadd.f32 %v116_v37, %v115_v39 }
  0x1b   :  { %v119_v44 = vadd.f32 %v118_v40, %v117_v43 }
  0x1c   :  { %12 = vsyncpa [#allocation4], 0  ;;  %v8316_v46 = vld [vmem:[%s14233_s0 + $0x88] sm:$0xff]  ;;  %v124_v48 = vsel %vm92_vm0, %v8309_v42, 0.0  ;;  %v8323_v49 = vld [vmem:[%s14233_s0 + $0x90] sm:$0xff]  ;;  %vm2963_vm1 = vcmask 64512  }
  0x1d   :  { %v121_v47 = vadd.f32 %v120_v41, %v119_v44  ;;  %v126_v51 = vsel %vm92_vm0, %v8316_v46, 0.0  ;;  %v8330_v52 = vld [vmem:[%s14233_s0 + $0x98] sm:$0xff]  ;;  %v128_v54 = vsel %vm92_vm0, %v8323_v49, 0.0  ;;  %v8337_v55 = vld [vmem:[%s14233_s0 + $0xa0] sm:$0xff]  ;;  %v8344_v58 = vld [vmem:[%s14233_s0 + $0xa8] sm:$0xff]  ;;  %vm4786_vm2 = vcmask 58368  }
  0x1e   :  { %v130_v57 = vsel %vm92_vm0, %v8330_v52, 0.0  ;;  %v132_v60 = vsel %vm92_vm0, %v8337_v55, 0.0  ;;  %v8351_v61 = vld [vmem:[%s14233_s0 + $0xb0] sm:$0xff]  ;;  %v134_v63 = vsel %vm92_vm0, %v8344_v58, 0.0  ;;  %v8358_v4 = vld [vmem:[%s14233_s0 + $0xb8] sm:$0xff]  ;;  %v8365_v8 = vld [vmem:[%s14233_s0 + $0xc0] sm:$0xff] }
  0x1f   :  { %v123_v50 = vadd.f32 %v122_v45, %v121_v47  ;;  %v136_v6 = vsel %vm92_vm0, %v8351_v61, 0.0  ;;  %v138_v11 = vsel %vm92_vm0, %v8358_v4, 0.0  ;;  %v8372_v12 = vld [vmem:[%s14233_s0 + $0xc8] sm:$0xff]  ;;  %v140_v15 = vsel %vm92_vm0, %v8365_v8, 0.0  ;;  %v8379_v17 = vld [vmem:[%s14233_s0 + $0xd0] sm:$0xff]  ;;  %v8386_v21 = vld [vmem:[%s14233_s0 + $0xd8] sm:$0xff] }
  0x20   :  { %v142_v20 = vsel %vm92_vm0, %v8372_v12, 0.0  ;;  %v144_v24 = vsel %vm92_vm0, %v8379_v17, 0.0  ;;  %v8393_v26 = vld [vmem:[%s14233_s0 + $0xe0] sm:$0xff]  ;;  %v146_v29 = vsel %vm92_vm0, %v8386_v21, 0.0  ;;  %v8400_v30 = vld [vmem:[%s14233_s0 + $0xe8] sm:$0xff]  ;;  %v8407_v36 = vld [vmem:[%s14233_s0 + $0xf0] sm:$0xff] }
  0x21   :  { %v125_v53 = vadd.f32 %v124_v48, %v123_v50  ;;  %v148_v35 = vsel %vm92_vm0, %v8393_v26, 0.0  ;;  %v150_v39 = vsel %vm92_vm0, %v8400_v30, 0.0  ;;  %v8414_v40 = vld [vmem:[%s14233_s0 + $0xf8] sm:$0xff]  ;;  %v152_v43 = vsel %vm92_vm0, %v8407_v36, 0.0  ;;  %v8421_v44 = vld [vmem:[%s14233_s0 + $0x100] sm:$0xff]  ;;  %v8428_v48 = vld [vmem:[%s14233_s0 + $0x108] sm:$0xff] }
  0x22   :  { %v154_v47 = vsel %vm92_vm0, %v8414_v40, 0.0  ;;  %vm765_vm3 = vcmask 1040384   ;;  %s8142_s21 = smov 24   ;;  %vm1081_vm4 = vcmask 1046528   ;;  %vm1234_vm5 = vcmask 1045504   ;;  %s8144_s22 = smov 8  }
  0x23   :  { %v127_v56 = vadd.f32 %v126_v51, %v125_v53  ;;  %v156_v51 = vsel %vm92_vm0, %v8421_v44, 0.0  ;;  %v8435_v53 = vld [vmem:[%s14233_s0 + $0x110] sm:$0xff]  ;;  %s8145_s23 = smov 16   ;;  %vm3564_vm6 = vcmask 1041408   ;;  %s8146_s30 = smov 20   ;;  %vm3025_vm7 = vcmask 97280  }
  0x24   :  { %s8147_s8 = smov 28   ;;  %vm3090_vm8 = vcmask 130048   ;;  %vm3155_vm9 = vcmask 162816   ;;  %vm3220_vm10 = vcmask 195584   ;;  %vm3285_vm11 = vcmask 228352   ;;  %s8149_s13 = smov 72  }
  0x25   :  { %v129_v59 = vadd.f32 %v128_v54, %v127_v56  ;;  %v158_v56 = vsel %vm92_vm0, %v8428_v48, 0.0  ;;  %vm3350_vm12 = vcmask 261120   ;;  %vm3467_vm13 = vcmask 293888   ;;  %s8152_s17 = smov 56  }
  0x26   :  { %vm5851_vm14 = vcmask 326656   ;;  %vm5868_vm15 = vcmask 392192  }
  0x27   :  { %v131_v62 = vadd.f32 %v130_v57, %v129_v59  ;;  %v8442_v57 = vld [vmem:[%s14233_s0 + $0x118] sm:$0xff] }
  0x29   :  { %v133_v5 = vadd.f32 %v132_v60, %v131_v62  ;;  %v160_v60 = vsel %vm92_vm0, %v8435_v53, 0.0  ;;  %v8449_v62 = vld [vmem:[%s14233_s0 + $0x120] sm:$0xff] }
  0x2b   :  { %v135_v9 = vadd.f32 %v134_v63, %v133_v5  ;;  %v162_v5 = vsel %vm92_vm0, %v8442_v57, 0.0 }
  0x2d   :  { %v137_v14 = vadd.f32 %v136_v6, %v135_v9  ;;  %v8456_v6 = vld [vmem:[%s14233_s0 + $0x128] sm:$0xff] }
  0x2f   :  { %v139_v18 = vadd.f32 %v138_v11, %v137_v14  ;;  %v164_v11 = vsel %vm92_vm0, %v8449_v62, 0.0  ;;  %v8463_v14 = vld [vmem:[%s14233_s0 + $0x130] sm:$0xff] }
  0x31   :  { %v141_v23 = vadd.f32 %v140_v15, %v139_v18  ;;  %v166_v18 = vsel %vm92_vm0, %v8456_v6, 0.0 }
  0x33   :  { %v143_v27 = vadd.f32 %v142_v20, %v141_v23  ;;  %v8470_v20 = vld [vmem:[%s14233_s0 + $0x138] sm:$0xff] }
  0x35   :  { %v145_v32 = vadd.f32 %v144_v24, %v143_v27  ;;  %v168_v24 = vsel %vm92_vm0, %v8463_v14, 0.0  ;;  %v8477_v27 = vld [vmem:[%s14233_s0 + $0x140] sm:$0xff] }
  0x37   :  { %v147_v37 = vadd.f32 %v146_v29, %v145_v32  ;;  %v170_v32 = vsel %vm92_vm0, %v8470_v20, 0.0 }
  0x39   :  { %v149_v41 = vadd.f32 %v148_v35, %v147_v37  ;;  %v8484_v35 = vld [vmem:[%s14233_s0 + $0x148] sm:$0xff] }
  0x3b   :  { %v151_v45 = vadd.f32 %v150_v39, %v149_v41  ;;  %v172_v39 = vsel %vm92_vm0, %v8477_v27, 0.0  ;;  %v8491_v41 = vld [vmem:[%s14233_s0 + $0x150] sm:$0xff] }
  0x3d   :  { %v153_v50 = vadd.f32 %v152_v43, %v151_v45  ;;  %v174_v45 = vsel %vm92_vm0, %v8484_v35, 0.0 }
  0x3f   :  { %v155_v54 = vadd.f32 %v154_v47, %v153_v50  ;;  %v8498_v47 = vld [vmem:[%s14233_s0 + $0x158] sm:$0xff] }
  0x41   :  { %v157_v59 = vadd.f32 %v156_v51, %v155_v54  ;;  %v176_v51 = vsel %vm92_vm0, %v8491_v41, 0.0  ;;  %v8505_v54 = vld [vmem:[%s14233_s0 + $0x160] sm:$0xff] }
  0x43   :  { %v159_v63 = vadd.f32 %v158_v56, %v157_v59  ;;  %v178_v59 = vsel %vm92_vm0, %v8498_v47, 0.0 }
  0x45   :  { %v161_v9 = vadd.f32 %v160_v60, %v159_v63  ;;  %v8512_v60 = vld [vmem:[%s14233_s0 + $0x168] sm:$0xff] }
  0x47   :  { %v163_v15 = vadd.f32 %v162_v5, %v161_v9  ;;  %v180_v5 = vsel %vm92_vm0, %v8505_v54, 0.0  ;;  %v8519_v9 = vld [vmem:[%s14233_s0 + $0x170] sm:$0xff] }
  0x49   :  { %v165_v23 = vadd.f32 %v164_v11, %v163_v15  ;;  %v182_v15 = vsel %vm92_vm0, %v8512_v60, 0.0 }
  0x4b   :  { %v167_v29 = vadd.f32 %v166_v18, %v165_v23  ;;  %v8526_v18 = vld [vmem:[%s14233_s0 + $0x178] sm:$0xff] }
  0x4d   :  { %v169_v37 = vadd.f32 %v168_v24, %v167_v29  ;;  %v184_v24 = vsel %vm92_vm0, %v8519_v9, 0.0  ;;  %v8533_v29 = vld [vmem:[%s14233_s0 + $0x180] sm:$0xff] }
  0x4f   :  { %v171_v43 = vadd.f32 %v170_v32, %v169_v37  ;;  %v186_v37 = vsel %vm92_vm0, %v8526_v18, 0.0 }
  0x51   :  { %v173_v50 = vadd.f32 %v172_v39, %v171_v43  ;;  %v8540_v39 = vld [vmem:[%s14233_s0 + $0x188] sm:$0xff] }
  0x52   :  { %14723 = vst [vmem:[#allocation12_spill] sm:$0xff] %v8540_v39 }
  0x53   :  { %v175_v56 = vadd.f32 %v174_v45, %v173_v50  ;;  %v188_v45 = vsel %vm92_vm0, %v8533_v29, 0.0  ;;  %v8547_v50 = vld [vmem:[%s14233_s0 + $0x190] sm:$0xff] }
  0x54   :  { %14724 = vst [vmem:[#allocation13_spill] sm:$0xff] %v8547_v50 }
  0x55   :  { %v177_v63 = vadd.f32 %v176_v51, %v175_v56  ;;  %v190_v56 = vsel %vm92_vm0, %v8540_v39, 0.0 }
  0x57   :  { %v179_v11 = vadd.f32 %v178_v59, %v177_v63  ;;  %v8554_v59 = vld [vmem:[%s14233_s0 + $0x198] sm:$0xff] }
  0x58   :  { %14725 = vst [vmem:[#allocation14_spill] sm:$0xff] %v8554_v59 }
  0x59   :  { %v181_v23 = vadd.f32 %v180_v5, %v179_v11  ;;  %v192_v5 = vsel %vm92_vm0, %v8547_v50, 0.0  ;;  %v8561_v11 = vld [vmem:[%s14233_s0 + $0x1a0] sm:$0xff] }
  0x5a   :  { %14726 = vst [vmem:[#allocation15_spill] sm:$0xff] %v8561_v11 }
  0x5b   :  { %v183_v32 = vadd.f32 %v182_v15, %v181_v23  ;;  %v194_v23 = vsel %vm92_vm0, %v8554_v59, 0.0 }
  0x5d   :  { %v185_v43 = vadd.f32 %v184_v24, %v183_v32  ;;  %v8568_v24 = vld [vmem:[%s14233_s0 + $0x1a8] sm:$0xff] }
  0x5e   :  { %14727 = vst [vmem:[#allocation16_spill] sm:$0xff] %v8568_v24 }
  0x5f   :  { %v187_v51 = vadd.f32 %v186_v37, %v185_v43  ;;  %v196_v37 = vsel %vm92_vm0, %v8561_v11, 0.0  ;;  %v8575_v43 = vld [vmem:[%s14233_s0 + $0x1b0] sm:$0xff] }
  0x60   :  { %14728 = vst [vmem:[#allocation17_spill] sm:$0xff] %v8575_v43 }
  0x61   :  { %v189_v63 = vadd.f32 %v188_v45, %v187_v51  ;;  %v198_v51 = vsel %vm92_vm0, %v8568_v24, 0.0 }
  0x63   :  { %v191_v15 = vadd.f32 %v190_v56, %v189_v63  ;;  %v8582_v56 = vld [vmem:[%s14233_s0 + $0x1b8] sm:$0xff] }
  0x64   :  { %14729 = vst [vmem:[#allocation18_spill] sm:$0xff] %v8582_v56 }
  0x65   :  { %v193_v32 = vadd.f32 %v192_v5, %v191_v15  ;;  %v200_v5 = vsel %vm92_vm0, %v8575_v43, 0.0  ;;  %v8589_v15 = vld [vmem:[%s14233_s0 + $0x1c0] sm:$0xff] }
  0x66   :  { %14730 = vst [vmem:[#allocation19_spill] sm:$0xff] %v8589_v15 }
  0x67   :  { %v195_v45 = vadd.f32 %v194_v23, %v193_v32  ;;  %v202_v23 = vsel %vm92_vm0, %v8582_v56, 0.0  ;;  %v8596_v32 = vld [vmem:[%s14233_s0 + $0x1c8] sm:$0xff] }
  0x68   :  { %14731 = vst [vmem:[#allocation20_spill] sm:$0xff] %v8596_v32 }
  0x69   :  { %v197_v63 = vadd.f32 %v196_v37, %v195_v45  ;;  %v204_v37 = vsel %vm92_vm0, %v8589_v15, 0.0  ;;  %v8603_v45 = vld [vmem:[%s14233_s0 + $0x1d0] sm:$0xff] }
  0x6a   :  { %14732 = vst [vmem:[#allocation21_spill] sm:$0xff] %v8603_v45 }
  0x6b   :  { %v199_v11 = vadd.f32 %v198_v51, %v197_v63  ;;  %v206_v51 = vsel %vm92_vm0, %v8596_v32, 0.0  ;;  %v8610_v63 = vld [vmem:[%s14233_s0 + $0x1d8] sm:$0xff] }
  0x6c   :  { %14733 = vst [vmem:[#allocation22_spill] sm:$0xff] %v8610_v63  ;;  %v210_v15 = vsel %vm92_vm0, %v8610_v63, 0.0 }
  0x6d   :  { %v201_v24 = vadd.f32 %v200_v5, %v199_v11  ;;  %v208_v11 = vsel %vm92_vm0, %v8603_v45, 0.0 }
  0x6f   :  { %v203_v43 = vadd.f32 %v202_v23, %v201_v24  ;;  %v8619_v24 = vld [vmem:[%s14233_s0 + $0x1e0] sm:$0xff] }
  0x70   :  { %14734 = vst [vmem:[#allocation23_spill] sm:$0xff] %v8619_v24  ;;  %v212_v59 = vsel %vm92_vm0, %v8619_v24, 0.0 }
  0x71   :  { %v205_v56 = vadd.f32 %v204_v37, %v203_v43  ;;  %v8626_v43 = vld [vmem:[%s14233_s0 + $0x1e8] sm:$0xff] }
  0x72   :  { %14735 = vst [vmem:[#allocation24_spill] sm:$0xff] %v8626_v43 }
  0x73   :  { %v207_v5 = vadd.f32 %v206_v51, %v205_v56  ;;  %v214_v56 = vsel %vm92_vm0, %v8626_v43, 0.0  ;;  %v8633_v51 = vld [vmem:[%s14233_s0 + $0x1f0] sm:$0xff] }
  0x74   :  { %14736 = vst [vmem:[#allocation25_spill] sm:$0xff] %v8633_v51 }
  0x75   :  { %v209_v23 = vadd.f32 %v208_v11, %v207_v5  ;;  %v8640_v11 = vld [vmem:[%s14233_s0 + $0x1f8] sm:$0xff] }
  0x77   :  { %v211_v32 = vadd.f32 %v210_v15, %v209_v23  ;;  %v216_v15 = vsel %vm92_vm0, %v8633_v51, 0.0 }
  0x79   :  { %v213_v37 = vadd.f32 %v212_v59, %v211_v32  ;;  %v218_v59 = vsel %vm92_vm0, %v8640_v11, 0.0 }
  0x7b   :  { %v215_v63 = vadd.f32 %v214_v56, %v213_v37 }
  0x7d   :  { %v217_v5 = vadd.f32 %v216_v15, %v215_v63 }
  0x7f   :  { %v219_v32 = vadd.f32 %v218_v59, %v217_v5 }
  0x81   :  { %v220_v23 = vrot.slane %v219_v32, 4 }
  0x83   :  { %v221_v43 = vadd.f32 %v220_v23, %v219_v32 }
  0x85   :  { %v222_v24 = vrot.slane %v221_v43, 2 }
  0x87   :  { %v223_v45 = vadd.f32 %v222_v24, %v221_v43 }
  0x89   :  { %v224_v50 = vrot.slane %v223_v45, 1 }
  0x8b   :  { %v225_v39 = vadd.f32 %v224_v50, %v223_v45 }
  0x8d   :  { %v8644_v37 = vmul.f32 0.001953125, %v225_v39 }
  0x8f   :  { %v228_v56 = vsub.f32 %v8199_v0, %v8644_v37  ;;  %v229_v51 = vsub.f32 %v8204_v1, %v8644_v37  ;;  %v230_v63 = vsub.f32 %v8209_v2, %v8644_v37  ;;  %v231_v15 = vsub.f32 %v8214_v3, %v8644_v37 }
  0x90   :  { %v232_v5 = vsub.f32 %v8225_v7, %v8644_v37  ;;  %v233_v39 = vsub.f32 %v8232_v10, %v8644_v37  ;;  %v234_v59 = vsub.f32 %v8239_v13, %v8644_v37 }
  0x91   :  { %v292_v24 = vmul.f32 %v228_v56, %v228_v56  ;;  %v293_v43 = vmul.f32 %v229_v51, %v229_v51  ;;  %v294_v50 = vmul.f32 %v230_v63, %v230_v63  ;;  %v295_v45 = vmul.f32 %v231_v15, %v231_v15 }
  0x92   :  { %v296_v32 = vmul.f32 %v232_v5, %v232_v5  ;;  %v235_v56 = vsub.f32 %v8246_v16, %v8644_v37  ;;  %v297_v51 = vmul.f32 %v233_v39, %v233_v39  ;;  %v236_v15 = vsub.f32 %v8253_v19, %v8644_v37 }
  0x93   :  { %v356_v23 = vsel %vm92_vm0, %v292_v24, 0.0  ;;  %v357_v1 = vsel %vm92_vm0, %v293_v43, 0.0  ;;  %v359_v0 = vsel %vm92_vm0, %v294_v50, 0.0  ;;  %v361_v63 = vsel %vm92_vm0, %v295_v45, 0.0 }
  0x94   :  { %v358_v3 = vadd.f32 %v357_v1, %v356_v23  ;;  %v298_v10 = vmul.f32 %v234_v59, %v234_v59  ;;  %v363_v5 = vsel %vm92_vm0, %v296_v32, 0.0  ;;  %v237_v24 = vsub.f32 %v8260_v22, %v8644_v37 }
  0x95   :  { %v299_v43 = vmul.f32 %v235_v56, %v235_v56  ;;  %v365_v1 = vsel %vm92_vm0, %v297_v51, 0.0  ;;  %v238_v39 = vsub.f32 %v8267_v25, %v8644_v37  ;;  %v300_v23 = vmul.f32 %v236_v15, %v236_v15 }
  0x96   :  { %v360_v7 = vadd.f32 %v359_v0, %v358_v3  ;;  %v367_v0 = vsel %vm92_vm0, %v298_v10, 0.0  ;;  %v239_v45 = vsub.f32 %v8274_v28, %v8644_v37  ;;  %v301_v59 = vmul.f32 %v237_v24, %v237_v24 }
  0x97   :  { %v240_v56 = vsub.f32 %v8281_v31, %v8644_v37  ;;  %v241_v15 = vsub.f32 %v8286_v33, %v8644_v37  ;;  %v242_v24 = vsub.f32 %v8291_v34, %v8644_v37  ;;  %v243_v31 = vsub.f32 %v8300_v38, %v8644_v37 }
  0x98   :  { %v362_v13 = vadd.f32 %v361_v63, %v360_v7  ;;  %v369_v7 = vsel %vm92_vm0, %v299_v43, 0.0  ;;  %v302_v63 = vmul.f32 %v238_v39, %v238_v39  ;;  %v373_v10 = vsel %vm92_vm0, %v301_v59, 0.0 }
  0x99   :  { %v305_v39 = vmul.f32 %v241_v15, %v241_v15  ;;  %v244_v33 = vsub.f32 %v8309_v42, %v8644_v37  ;;  %v247_v42 = vsub.f32 %v8330_v52, %v8644_v37  ;;  %v250_v52 = vsub.f32 %v8351_v61, %v8644_v37 }
  0x9a   :  { %v364_v50 = vadd.f32 %v363_v5, %v362_v13  ;;  %v371_v13 = vsel %vm92_vm0, %v300_v23, 0.0  ;;  %v303_v5 = vmul.f32 %v239_v45, %v239_v45  ;;  %v375_v43 = vsel %vm92_vm0, %v302_v63, 0.0 }
  0x9b   :  { %v306_v45 = vmul.f32 %v242_v24, %v242_v24  ;;  %v381_v63 = vsel %vm92_vm0, %v305_v39, 0.0  ;;  %v308_v15 = vmul.f32 %v244_v33, %v244_v33  ;;  %v311_v39 = vmul.f32 %v247_v42, %v247_v42 }
  0x9c   :  { %v366_v3 = vadd.f32 %v365_v1, %v364_v50  ;;  %v304_v50 = vmul.f32 %v240_v56, %v240_v56  ;;  %v377_v23 = vsel %vm92_vm0, %v303_v5, 0.0  ;;  %v307_v56 = vmul.f32 %v243_v31, %v243_v31 }
  0x9d   :  { %v383_v5 = vsel %vm92_vm0, %v306_v45, 0.0  ;;  %v253_v61 = vsub.f32 %v8372_v12, %v8644_v37  ;;  %v256_v12 = vsub.f32 %v8393_v26, %v8644_v37  ;;  %v259_v26 = vsub.f32 %v8414_v40, %v8644_v37 }
  0x9e   :  { %v368_v32 = vadd.f32 %v367_v0, %v366_v3  ;;  %v379_v59 = vsel %vm92_vm0, %v304_v50, 0.0  ;;  %v385_v24 = vsel %vm92_vm0, %v307_v56, 0.0  ;;  %v262_v40 = vsub.f32 %v8435_v53, %v8644_v37 }
  0x9f   :  { %v265_v53 = vsub.f32 %v8456_v6, %v8644_v37  ;;  %v268_v6 = vsub.f32 %v8477_v27, %v8644_v37  ;;  %v271_v27 = vsub.f32 %v8498_v47, %v8644_v37  ;;  %v274_v47 = vsub.f32 %v8519_v9, %v8644_v37  ;;  %v14737_v9 = vld [vmem:[#allocation12_spill] sm:$0xff] }
  0xa0   :  { %v370_v51 = vadd.f32 %v369_v7, %v368_v32  ;;  %v245_v32 = vsub.f32 %v8316_v46, %v8644_v37  ;;  %v248_v46 = vsub.f32 %v8337_v55, %v8644_v37  ;;  %v251_v55 = vsub.f32 %v8358_v4, %v8644_v37 }
  0xa1   :  { %v254_v4 = vsub.f32 %v8379_v17, %v8644_v37  ;;  %v257_v17 = vsub.f32 %v8400_v30, %v8644_v37  ;;  %v260_v30 = vsub.f32 %v8421_v44, %v8644_v37  ;;  %v263_v44 = vsub.f32 %v8442_v57, %v8644_v37 }
  0xa2   :  { %v372_v1 = vadd.f32 %v371_v13, %v370_v51  ;;  %v246_v51 = vsub.f32 %v8323_v49, %v8644_v37  ;;  %v249_v49 = vsub.f32 %v8344_v58, %v8644_v37  ;;  %v312_v33 = vmul.f32 %v248_v46, %v248_v46 }
  0xa3   :  { %v252_v58 = vsub.f32 %v8365_v8, %v8644_v37  ;;  %v255_v8 = vsub.f32 %v8386_v21, %v8644_v37  ;;  %v258_v21 = vsub.f32 %v8407_v36, %v8644_v37  ;;  %v261_v36 = vsub.f32 %v8428_v48, %v8644_v37 }
  0xa4   :  { %v374_v0 = vadd.f32 %v373_v10, %v372_v1  ;;  %v309_v1 = vmul.f32 %v245_v32, %v245_v32  ;;  %v393_v32 = vsel %vm92_vm0, %v311_v39, 0.0  ;;  %v264_v48 = vsub.f32 %v8449_v62, %v8644_v37 }
  0xa5   :  { %v316_v42 = vmul.f32 %v252_v58, %v252_v58  ;;  %v319_v39 = vmul.f32 %v255_v8, %v255_v8  ;;  %v266_v57 = vsub.f32 %v8463_v14, %v8644_v37  ;;  %v267_v62 = vsub.f32 %v8470_v20, %v8644_v37 }
  0xa6   :  { %v376_v3 = vadd.f32 %v375_v43, %v374_v0  ;;  %v310_v43 = vmul.f32 %v246_v51, %v246_v51  ;;  %v387_v0 = vsel %vm92_vm0, %v308_v15, 0.0  ;;  %v315_v15 = vmul.f32 %v251_v55, %v251_v55 }
  0xa7   :  { %v409_v55 = vsel %vm92_vm0, %v319_v39, 0.0  ;;  %v269_v14 = vsub.f32 %v8484_v35, %v8644_v37  ;;  %v270_v20 = vsub.f32 %v8491_v41, %v8644_v37  ;;  %v272_v35 = vsub.f32 %v8505_v54, %v8644_v37 }
  0xa8   :  { %v378_v7 = vadd.f32 %v377_v23, %v376_v3  ;;  %v389_v23 = vsel %vm92_vm0, %v309_v1, 0.0  ;;  %v391_v45 = vsel %vm92_vm0, %v310_v43, 0.0  ;;  %v401_v46 = vsel %vm92_vm0, %v315_v15, 0.0 }
  0xa9   :  { %v273_v41 = vsub.f32 %v8512_v60, %v8644_v37  ;;  %v275_v54 = vsub.f32 %v8526_v18, %v8644_v37  ;;  %v276_v60 = vsub.f32 %v8533_v29, %v8644_v37  ;;  %v14738_v18 = vld [vmem:[#allocation13_spill] sm:$0xff]  ;;  %v14739_v29 = vld [vmem:[#allocation14_spill] sm:$0xff] }
  0xaa   :  { %v380_v13 = vadd.f32 %v379_v59, %v378_v7  ;;  %v313_v7 = vmul.f32 %v249_v49, %v249_v49 }
  0xac   :  { %v382_v10 = vadd.f32 %v381_v63, %v380_v13  ;;  %v314_v63 = vmul.f32 %v250_v52, %v250_v52  ;;  %v395_v13 = vsel %vm92_vm0, %v312_v33, 0.0  ;;  %v320_v52 = vmul.f32 %v256_v12, %v256_v12 }
  0xad   :  { %v328_v12 = vmul.f32 %v264_v48, %v264_v48 }
  0xae   :  { %v384_v50 = vadd.f32 %v383_v5, %v382_v10  ;;  %v397_v5 = vsel %vm92_vm0, %v313_v7, 0.0  ;;  %v399_v1 = vsel %vm92_vm0, %v314_v63, 0.0  ;;  %v323_v63 = vmul.f32 %v259_v26, %v259_v26 }
  0xaf   :  { %v332_v26 = vmul.f32 %v268_v6, %v268_v6 }
  0xb0   :  { %v386_v31 = vadd.f32 %v385_v24, %v384_v50  ;;  %v317_v50 = vmul.f32 %v253_v61, %v253_v61  ;;  %v324_v61 = vmul.f32 %v260_v30, %v260_v30 }
  0xb2   :  { %v388_v3 = vadd.f32 %v387_v0, %v386_v31  ;;  %v318_v0 = vmul.f32 %v254_v4, %v254_v4  ;;  %v403_v31 = vsel %vm92_vm0, %v316_v42, 0.0  ;;  %v417_v4 = vsel %vm92_vm0, %v323_v63, 0.0 }
  0xb3   :  { %v335_v63 = vmul.f32 %v271_v27, %v271_v27  ;;  %v14743_v27 = vld [vmem:[#allocation18_spill] sm:$0xff] }
  0xb4   :  { %v390_v59 = vadd.f32 %v389_v23, %v388_v3  ;;  %v405_v23 = vsel %vm92_vm0, %v317_v50, 0.0  ;;  %v407_v33 = vsel %vm92_vm0, %v318_v0, 0.0  ;;  %v327_v50 = vmul.f32 %v263_v44, %v263_v44 }
  0xb5   :  { %v441_v44 = vsel %vm92_vm0, %v335_v63, 0.0 }
  0xb6   :  { %v392_v56 = vadd.f32 %v391_v45, %v390_v59  ;;  %v321_v59 = vmul.f32 %v257_v17, %v257_v17  ;;  %v425_v17 = vsel %vm92_vm0, %v327_v50, 0.0  ;;  %v278_v50 = vsub.f32 %v14738_v18, %v8644_v37 }
  0xb8   :  { %v394_v51 = vadd.f32 %v393_v32, %v392_v56  ;;  %v322_v32 = vmul.f32 %v258_v21, %v258_v21  ;;  %v411_v56 = vsel %vm92_vm0, %v320_v52, 0.0  ;;  %v331_v52 = vmul.f32 %v267_v62, %v267_v62 }
  0xba   :  { %v396_v10 = vadd.f32 %v395_v13, %v394_v51  ;;  %v413_v13 = vsel %vm92_vm0, %v321_v59, 0.0  ;;  %v415_v15 = vsel %vm92_vm0, %v322_v32, 0.0  ;;  %v433_v30 = vsel %vm92_vm0, %v331_v52, 0.0 }
  0xbc   :  { %v398_v24 = vadd.f32 %v397_v5, %v396_v10  ;;  %v325_v10 = vmul.f32 %v261_v36, %v261_v36 }
  0xbe   :  { %v400_v43 = vadd.f32 %v399_v1, %v398_v24  ;;  %v326_v1 = vmul.f32 %v262_v40, %v262_v40  ;;  %v419_v24 = vsel %vm92_vm0, %v324_v61, 0.0  ;;  %v336_v40 = vmul.f32 %v272_v35, %v272_v35 }
  0xc0   :  { %v402_v49 = vadd.f32 %v401_v46, %v400_v43  ;;  %v421_v46 = vsel %vm92_vm0, %v325_v10, 0.0  ;;  %v423_v0 = vsel %vm92_vm0, %v326_v1, 0.0  ;;  %v277_v1 = vsub.f32 %v14737_v9, %v8644_v37 }
  0xc2   :  { %v404_v3 = vadd.f32 %v403_v31, %v402_v49  ;;  %v329_v49 = vmul.f32 %v265_v53, %v265_v53 }
  0xc4   :  { %v406_v45 = vadd.f32 %v405_v23, %v404_v3  ;;  %v330_v23 = vmul.f32 %v266_v57, %v266_v57  ;;  %v427_v3 = vsel %vm92_vm0, %v328_v12, 0.0  ;;  %v279_v12 = vsub.f32 %v14739_v29, %v8644_v37 }
  0xc6   :  { %v408_v7 = vadd.f32 %v407_v33, %v406_v45  ;;  %v429_v33 = vsel %vm92_vm0, %v329_v49, 0.0  ;;  %v431_v59 = vsel %vm92_vm0, %v330_v23, 0.0  ;;  %v14740_v49 = vld [vmem:[#allocation15_spill] sm:$0xff] }
  0xc8   :  { %v410_v58 = vadd.f32 %v409_v55, %v408_v7  ;;  %v333_v7 = vmul.f32 %v269_v14, %v269_v14  ;;  %v343_v14 = vmul.f32 %v279_v12, %v279_v12  ;;  %v14750_v12 = vld [vmem:[#allocation25_spill] sm:$0xff] }
  0xca   :  { %v412_v51 = vadd.f32 %v411_v56, %v410_v58  ;;  %v334_v56 = vmul.f32 %v270_v20, %v270_v20  ;;  %v435_v58 = vsel %vm92_vm0, %v332_v26, 0.0 }
  0xcc   :  { %v414_v5 = vadd.f32 %v413_v13, %v412_v51  ;;  %v437_v13 = vsel %vm92_vm0, %v333_v7, 0.0  ;;  %v439_v61 = vsel %vm92_vm0, %v334_v56, 0.0  ;;  %v283_v7 = vsub.f32 %v14743_v27, %v8644_v37  ;;  %v14744_v56 = vld [vmem:[#allocation19_spill] sm:$0xff] }
  0xce   :  { %v416_v42 = vadd.f32 %v415_v15, %v414_v5  ;;  %v337_v5 = vmul.f32 %v273_v41, %v273_v41 }
  0xd0   :  { %v418_v8 = vadd.f32 %v417_v4, %v416_v42  ;;  %v338_v4 = vmul.f32 %v274_v47, %v274_v47  ;;  %v443_v42 = vsel %vm92_vm0, %v336_v40, 0.0  ;;  %v347_v47 = vmul.f32 %v283_v7, %v283_v7 }
  0xd2   :  { %v420_v43 = vadd.f32 %v419_v24, %v418_v8  ;;  %v339_v24 = vmul.f32 %v275_v54, %v275_v54  ;;  %v445_v8 = vsel %vm92_vm0, %v337_v5, 0.0 }
  0xd4   :  { %v422_v31 = vadd.f32 %v421_v46, %v420_v43  ;;  %v340_v46 = vmul.f32 %v276_v60, %v276_v60  ;;  %v447_v43 = vsel %vm92_vm0, %v338_v4, 0.0  ;;  %v14747_v60 = vld [vmem:[#allocation22_spill] sm:$0xff] }
  0xd5   :  { %v287_v4 = vsub.f32 %v14747_v60, %v8644_v37 }
  0xd6   :  { %v424_v39 = vadd.f32 %v423_v0, %v422_v31  ;;  %v341_v0 = vmul.f32 %v277_v1, %v277_v1  ;;  %v449_v31 = vsel %vm92_vm0, %v339_v24, 0.0  ;;  %v451_v6 = vsel %vm92_vm0, %v340_v46, 0.0  ;;  %v14748_v1 = vld [vmem:[#allocation23_spill] sm:$0xff] }
  0xd7   :  { %v288_v24 = vsub.f32 %v14748_v1, %v8644_v37  ;;  %v14755_v1 = vld [vmem:[#allocation11_spill] sm:$0xff] }
  0xd8   :  { %v426_v21 = vadd.f32 %v425_v17, %v424_v39  ;;  %v280_v17 = vsub.f32 %v14740_v49, %v8644_v37  ;;  %v342_v39 = vmul.f32 %v278_v50, %v278_v50  ;;  %v453_v52 = vsel %vm92_vm0, %v341_v0, 0.0  ;;  %v14749_v50 = vld [vmem:[#allocation24_spill] sm:$0xff] }
  0xd9   :  { %v289_v46 = vsub.f32 %v14749_v50, %v8644_v37  ;;  %v290_v0 = vsub.f32 %v14750_v12, %v8644_v37  ;;  %v14757_v50 = vld [vmem:[#allocation10_spill] sm:$0xff] }
  0xda   :  { %v428_v45 = vadd.f32 %v427_v3, %v426_v21  ;;  %v14741_v3 = vld [vmem:[#allocation16_spill] sm:$0xff]  ;;  %v344_v26 = vmul.f32 %v280_v17, %v280_v17  ;;  %v291_v17 = vsub.f32 %v8640_v11, %v8644_v37 }
  0xdb   :  { %v281_v21 = vsub.f32 %v14741_v3, %v8644_v37  ;;  %v354_v3 = vmul.f32 %v290_v0, %v290_v0 }
  0xdc   :  { %v430_v55 = vadd.f32 %v429_v33, %v428_v45  ;;  %v14742_v45 = vld [vmem:[#allocation17_spill] sm:$0xff]  ;;  %v459_v41 = vsel %vm92_vm0, %v344_v26, 0.0 }
  0xdd   :  { %v282_v20 = vsub.f32 %v14742_v45, %v8644_v37 }
  0xde   :  { %v432_v32 = vadd.f32 %v431_v59, %v430_v55  ;;  %v455_v59 = vsel %vm92_vm0, %v342_v39, 0.0  ;;  %v353_v39 = vmul.f32 %v289_v46, %v289_v46 }
  0xe0   :  { %v434_v36 = vadd.f32 %v433_v30, %v432_v32  ;;  %v345_v30 = vmul.f32 %v281_v21, %v281_v21  ;;  %v457_v32 = vsel %vm92_vm0, %v343_v14, 0.0 }
  0xe2   :  { %v436_v51 = vadd.f32 %v435_v58, %v434_v36  ;;  %v284_v58 = vsub.f32 %v14744_v56, %v8644_v37  ;;  %v346_v36 = vmul.f32 %v282_v20, %v282_v20  ;;  %v461_v40 = vsel %vm92_vm0, %v345_v30, 0.0 }
  0xe3   :  { %v479_v20 = vsel %vm92_vm0, %v354_v3, 0.0 }
  0xe4   :  { %v438_v15 = vadd.f32 %v437_v13, %v436_v51  ;;  %v14745_v13 = vld [vmem:[#allocation20_spill] sm:$0xff]  ;;  %v348_v5 = vmul.f32 %v284_v58, %v284_v58 }
  0xe5   :  { %v285_v51 = vsub.f32 %v14745_v13, %v8644_v37  ;;  %v490_v13 = vld [vmem:[%s14234_s1] sm:$0x1]  ;;  %s8141_s1 = smov 12  }
  0xe6   :  { %v440_v10 = vadd.f32 %v439_v61, %v438_v15  ;;  %v14746_v15 = vld [vmem:[#allocation21_spill] sm:$0xff] }
  0xe7   :  { %v286_v54 = vsub.f32 %v14746_v15, %v8644_v37 }
  0xe8   :  { %v442_v48 = vadd.f32 %v441_v44, %v440_v10  ;;  %v463_v44 = vsel %vm92_vm0, %v346_v36, 0.0 }
  0xea   :  { %v444_v53 = vadd.f32 %v443_v42, %v442_v48  ;;  %v349_v42 = vmul.f32 %v285_v51, %v285_v51  ;;  %v465_v48 = vsel %vm92_vm0, %v347_v47, 0.0 }
  0xec   :  { %v446_v57 = vadd.f32 %v445_v8, %v444_v53  ;;  %v350_v8 = vmul.f32 %v286_v54, %v286_v54  ;;  %v467_v53 = vsel %vm92_vm0, %v348_v5, 0.0  ;;  %v14261_v5 = vmov 0.0  }
  0xed   :  { %4784 = vst.msk [vmem:[#allocation2] sm:$0xff] %vm2963_vm1, %v14261_v5  ;;  %4785 = vst.msk [vmem:[#allocation2 + $0x8] sm:$0xff] %vm2963_vm1, %v14261_v5 }
  0xee   :  { %v448_v62 = vadd.f32 %v447_v43, %v446_v57  ;;  %v351_v43 = vmul.f32 %v287_v4, %v287_v4  ;;  %v469_v57 = vsel %vm92_vm0, %v349_v42, 0.0  ;;  %4787 = vst.msk [vmem:[#allocation2 + $0x10] sm:$0x3] %vm4786_vm2, %v14261_v5  ;;  %4841 = vst.msk [vmem:[#allocation2 + $0x1c0] sm:$0x3] %vm4786_vm2, %v14261_v5  ;;  %v14753_v4 = vld [vmem:[#allocation6_spill] sm:$0xff] }
  0xef   :  { %4839 = vst.msk [vmem:[#allocation2 + $0x1b0] sm:$0xff] %vm2963_vm1, %v14261_v5  ;;  %4840 = vst.msk [vmem:[#allocation2 + $0x1b8] sm:$0xff] %vm2963_vm1, %v14261_v5 }
  0xf0   :  { %v450_v23 = vadd.f32 %v449_v31, %v448_v62  ;;  %v352_v31 = vmul.f32 %v288_v24, %v288_v24  ;;  %v471_v62 = vsel %vm92_vm0, %v350_v8, 0.0 }
  0xf2   :  { %v452_v33 = vadd.f32 %v451_v6, %v450_v23  ;;  %v473_v6 = vsel %vm92_vm0, %v351_v43, 0.0  ;;  %v475_v21 = vsel %vm92_vm0, %v352_v31, 0.0 }
  0xf4   :  { %v454_v55 = vadd.f32 %v453_v52, %v452_v33  ;;  %v355_v52 = vmul.f32 %v291_v17, %v291_v17  ;;  %v477_v33 = vsel %vm92_vm0, %v353_v39, 0.0 }
  0xf6   :  { %v456_v35 = vadd.f32 %v455_v59, %v454_v55  ;;  %v481_v59 = vsel %vm92_vm0, %v355_v52, 0.0 }
  0xf8   :  { %v458_v63 = vadd.f32 %v457_v32, %v456_v35 }
  0xfa   :  { %v460_v61 = vadd.f32 %v459_v41, %v458_v63  ;;  %v498_v41 = vlaneseq }
  0xfc   :  { %v462_v10 = vadd.f32 %v461_v40, %v460_v61  ;;  %v499_v63 = vshrl.u32 %v498_v41, 7  ;;  %v494_v61 = vld [vmem:[%s14235_s2] sm:$0x1]  ;;  %s8153_s2 = smov 64  }
  0xfe   :  { %v464_v9 = vadd.f32 %v463_v44, %v462_v10  ;;  %v8841_v51 = vsub.s32 0, %v499_v63  ;;  %v14752_v10 = vld [vmem:[#allocation8_spill] sm:$0xff] }
 0x100   :  { %v466_v18 = vadd.f32 %v465_v48, %v464_v9  ;;  %14751 = vst [vmem:[#allocation12_spill] sm:$0xff] %v8841_v51  ;;  %v14754_v48 = vld [vmem:[#allocation7_spill] sm:$0xff] }
 0x102   :  { %v468_v29 = vadd.f32 %v467_v53, %v466_v18  ;;  %v14756_v53 = vld [vmem:[#allocation9_spill] sm:$0xff] }
 0x104   :  { %v470_v49 = vadd.f32 %v469_v57, %v468_v29 }
 0x106   :  { %v472_v23 = vadd.f32 %v471_v62, %v470_v49 }
 0x108   :  { %v474_v14 = vadd.f32 %v473_v6, %v472_v23 }
 0x10a   :  { %v476_v45 = vadd.f32 %v475_v21, %v474_v14 }
 0x10c   :  { %v478_v26 = vadd.f32 %v477_v33, %v476_v45 }
 0x10e   :  { %v480_v55 = vadd.f32 %v479_v20, %v478_v26 }
 0x110   :  { %v482_v27 = vadd.f32 %v481_v59, %v480_v55 }
 0x112   :  { %v483_v11 = vrot.slane %v482_v27, 4 }
 0x114   :  { %v484_v7 = vadd.f32 %v483_v11, %v482_v27 }
 0x116   :  { %v485_v30 = vrot.slane %v484_v7, 2 }
 0x118   :  { %v486_v32 = vadd.f32 %v485_v30, %v484_v7 }
 0x11a   :  { %v487_v35 = vrot.slane %v486_v32, 1 }
 0x11c   :  { %v488_v56 = vadd.f32 %v487_v35, %v486_v32 }
 0x11e   :  { %v489_v58 = vmul.f32 0.001953125, %v488_v56 }
 0x120   :  { %v491_v36 = vadd.f32 1e-05, %v489_v58 }
 0x122   :  { %8064 = vrsqrt.f32 %v491_v36 }
 0x12f   :  { %v8065_v47 = vpop.eup %8064 }
 0x130   :  { %v493_v40 = vmul.f32 %v8065_v47, %v490_v13 }
 0x132   :  { %v495_v15 = vmul.f32 %v493_v40, %v8644_v37  ;;  %v8848_v54 = vrot.slane %v493_v40, %v8841_v51 }
 0x134   :  { %v496_v37 = vsub.f32 %v494_v61, %v495_v15  ;;  %v505_v44 = vmul.f32 %v8848_v54, %v8209_v2  ;;  %v506_v60 = vmul.f32 %v8848_v54, %v14752_v10  ;;  %v503_v42 = vmul.f32 %v8848_v54, %v14753_v4 }
 0x135   :  { %v504_v9 = vmul.f32 %v8848_v54, %v14754_v48  ;;  %v509_v24 = vmul.f32 %v8848_v54, %v14755_v1  ;;  %v510_v8 = vmul.f32 %v8848_v54, %v8246_v16  ;;  %v507_v18 = vmul.f32 %v8848_v54, %v14756_v53  ;;  %v8068_v48 = vld [vmem:[%s14233_s0 + $0x60] sm:$0xff]  ;;  %v8069_v1 = vld [vmem:[%s14233_s0 + $0x68] sm:$0xff] }
 0x136   :  { %v8877_v2 = vrot.slane %v496_v37, %v8841_v51  ;;  %v508_v46 = vmul.f32 %v8848_v54, %v14757_v50  ;;  %v513_v43 = vmul.f32 %v8848_v54, %v8267_v25  ;;  %v514_v57 = vmul.f32 %v8848_v54, %v8274_v28 }
 0x137   :  { %v511_v29 = vmul.f32 %v8848_v54, %v8253_v19  ;;  %v512_v16 = vmul.f32 %v8848_v54, %v8260_v22  ;;  %v517_v12 = vmul.f32 %v8848_v54, %v8291_v34  ;;  %v518_v0 = vmul.f32 %v8848_v54, %v8300_v38 }
 0x138   :  { %v575_v31 = vadd.f32 %v8877_v2, %v505_v44  ;;  %v576_v62 = vadd.f32 %v8877_v2, %v506_v60  ;;  %v573_v25 = vadd.f32 %v8877_v2, %v503_v42  ;;  %v574_v28 = vadd.f32 %v8877_v2, %v504_v9 }
 0x139   :  { %v579_v49 = vadd.f32 %v8877_v2, %v509_v24  ;;  %v580_v19 = vadd.f32 %v8877_v2, %v510_v8  ;;  %v577_v22 = vadd.f32 %v8877_v2, %v507_v18  ;;  %v578_v17 = vadd.f32 %v8877_v2, %v508_v46 }
 0x13a   :  { %v639_v34 = vmax.f32 %v575_v31, 0.0  ;;  %v640_v39 = vmax.f32 %v576_v62, 0.0  ;;  %v637_v6 = vmax.f32 %v573_v25, 0.0  ;;  %v638_v38 = vmax.f32 %v574_v28, 0.0 }
 0x13b   :  { %v643_v23 = vmax.f32 %v579_v49, 0.0  ;;  %v644_v3 = vmax.f32 %v580_v19, 0.0  ;;  %v641_v21 = vmax.f32 %v577_v22, 0.0  ;;  %v642_v14 = vmax.f32 %v578_v17, 0.0 }
 0x13c   :  { %v769_v52 = vrot.slane %v639_v34, 7  ;;  %v8901_v33 = vrot.slane %v640_v39, 7  ;;  %v766_v45 = vrot.slane %v637_v6, 7  ;;  %v8903_v20 = vrot.slane %v638_v38, 7 }
 0x13d   :  { %v775_v26 = vrot.slane %v643_v23, 7  ;;  %v8905_v59 = vrot.slane %v644_v3, 7  ;;  %v772_v55 = vrot.slane %v641_v21, 7  ;;  %v8907_v27 = vrot.slane %v642_v14, 7  ;;  %v8070_v3 = vld [vmem:[%s14233_s0 + $0x90] sm:$0xff]  ;;  %v8071_v14 = vld [vmem:[%s14233_s0 + $0x98] sm:$0xff] }
 0x13e   :  { %v8911_v11 = vsel %vm765_vm3, %v769_v52, %v8901_v33  ;;  %v8914_v7 = vsel %vm765_vm3, 0.0, %v769_v52  ;;  %v8918_v30 = vsel %vm765_vm3, %v766_v45, %v8903_v20  ;;  %v8921_v32 = vsel %vm765_vm3, 0.0, %v766_v45  ;;  %v8072_v45 = vld [vmem:[%s14233_s0 + $0x80] sm:$0xff] }
 0x13f   :  { %14758 = vst [vmem:[#allocation13_spill] sm:$0xff] %v8911_v11  ;;  %14759 = vst [vmem:[#allocation14_spill] sm:$0xff] %v8914_v7  ;;  %v8925_v35 = vpack.i.bf16 %v8911_v11, %v8914_v7  ;;  %v6466_v56 = vpack.i.bf16 %v8918_v30, %v8921_v32  ;;  %v8931_v58 = vsel %vm765_vm3, %v775_v26, %v8905_v59  ;;  %v8934_v36 = vsel %vm765_vm3, 0.0, %v775_v26 }
 0x140   :  { %14760 = vst [vmem:[#allocation15_spill] sm:$0xff] %v8918_v30  ;;  %14761 = vst [vmem:[#allocation16_spill] sm:$0xff] %v8921_v32  ;;  %v8938_v41 = vpack.i.bf16 %v8931_v58, %v8934_v36  ;;  %v8942_v63 = vsel %vm765_vm3, %v772_v55, %v8907_v27  ;;  %v8945_v13 = vsel %vm765_vm3, 0.0, %v772_v55  ;;  %v583_v47 = vadd.f32 %v8877_v2, %v513_v43  ;;  %v8073_v55 = vld [vmem:[%s14233_s0 + $0x88] sm:$0xff] }
 0x141   :  { %14762 = vst [vmem:[#allocation17_spill] sm:$0xff] %v8931_v58  ;;  %14763 = vst [vmem:[#allocation18_spill] sm:$0xff] %v8934_v36  ;;  %6472 = vrot.lane.b32.xlu1 %v8925_v35, %s8141_s1  ;;  %6467 = vrot.lane.b32.xlu0 %v6466_v56, %s8141_s1  ;;  %v8953_v40 = vpack.i.bf16 %v8942_v63, %v8945_v13  ;;  %v584_v61 = vadd.f32 %v8877_v2, %v514_v57 }
 0x142   :  { %14764 = vst [vmem:[#allocation19_spill] sm:$0xff] %v8942_v63  ;;  %14765 = vst [vmem:[#allocation20_spill] sm:$0xff] %v8945_v13  ;;  %v581_v15 = vadd.f32 %v8877_v2, %v511_v29  ;;  %v647_v37 = vmax.f32 %v583_v47, 0.0  ;;  %v582_v44 = vadd.f32 %v8877_v2, %v512_v16  ;;  %v587_v10 = vadd.f32 %v8877_v2, %v517_v12 }
 0x143   :  { %v588_v60 = vadd.f32 %v8877_v2, %v518_v0  ;;  %v648_v4 = vmax.f32 %v584_v61, 0.0  ;;  %v515_v9 = vmul.f32 %v8068_v48, %v8848_v54  ;;  %v516_v24 = vmul.f32 %v8069_v1, %v8848_v54 }
 0x144   :  { %v645_v42 = vmax.f32 %v581_v15, 0.0  ;;  %v781_v8 = vrot.slane %v647_v37, 7  ;;  %v646_v53 = vmax.f32 %v582_v44, 0.0  ;;  %v651_v18 = vmax.f32 %v587_v10, 0.0  ;;  %v8074_v15 = vld [vmem:[%s14233_s0 + $0xb0] sm:$0xff]  ;;  %v8075_v44 = vld [vmem:[%s14233_s0 + $0xb8] sm:$0xff] }
 0x145   :  { %v652_v50 = vmax.f32 %v588_v60, 0.0  ;;  %6482 = vrot.lane.b32.xlu1 %v8938_v41, %s8141_s1  ;;  %6477 = vrot.lane.b32.xlu0 %v8953_v40, %s8141_s1  ;;  %v8972_v46 = vrot.slane %v648_v4, 7  ;;  %v585_v57 = vadd.f32 %v8877_v2, %v515_v9  ;;  %v586_v29 = vadd.f32 %v8877_v2, %v516_v24 }
 0x146   :  { %v778_v43 = vrot.slane %v645_v42, 7  ;;  %v8977_v16 = vsel %vm765_vm3, 0.0, %v781_v8  ;;  %v8979_v12 = vrot.slane %v646_v53, 7  ;;  %v787_v0 = vrot.slane %v651_v18, 7 }
 0x147   :  { %14766 = vst [vmem:[#allocation21_spill] sm:$0xff] %v8977_v16  ;;  %v8981_v31 = vrot.slane %v652_v50, 7  ;;  %v8985_v62 = vsel %vm765_vm3, %v781_v8, %v8972_v46  ;;  %v649_v28 = vmax.f32 %v585_v57, 0.0  ;;  %v650_v49 = vmax.f32 %v586_v29, 0.0  ;;  %v8076_v8 = vld [vmem:[%s14233_s0 + $0xa0] sm:$0xff]  ;;  %v8077_v57 = vld [vmem:[%s14233_s0 + $0xa8] sm:$0xff] }
 0x148   :  { %14768 = vst [vmem:[#allocation23_spill] sm:$0xff] %v8985_v62  ;;  %v8988_v25 = vsel %vm765_vm3, 0.0, %v778_v43  ;;  %v8992_v19 = vpack.i.bf16 %v8985_v62, %v8977_v16  ;;  %v8996_v22 = vsel %vm765_vm3, %v778_v43, %v8979_v12  ;;  %v9003_v34 = vsel %vm765_vm3, 0.0, %v787_v0 }
 0x149   :  { %14767 = vst [vmem:[#allocation22_spill] sm:$0xff] %v8981_v31  ;;  %14769 = vst [vmem:[#allocation24_spill] sm:$0xff] %v8988_v25  ;;  %v9000_v17 = vsel %vm765_vm3, %v787_v0, %v8981_v31  ;;  %v9007_v39 = vpack.i.bf16 %v8996_v22, %v8988_v25  ;;  %v784_v38 = vrot.slane %v649_v28, 7  ;;  %v9013_v23 = vrot.slane %v650_v49, 7 }
 0x14a   :  { %14770 = vst [vmem:[#allocation25_spill] sm:$0xff] %v8996_v22  ;;  %14771 = vst [vmem:[#allocation8_spill] sm:$0xff] %v9000_v17  ;;  %v9011_v6 = vpack.i.bf16 %v9000_v17, %v9003_v34  ;;  %6492 = vrot.lane.b32.xlu1 %v8992_v19, %s8141_s1  ;;  %v521_v21 = vmul.f32 %v8070_v3, %v8848_v54  ;;  %v522_v52 = vmul.f32 %v8071_v14, %v8848_v54 }
 0x14b   :  { %14772 = vst [vmem:[#allocation6_spill] sm:$0xff] %v9003_v34  ;;  %v519_v26 = vmul.f32 %v8072_v45, %v8848_v54  ;;  %v520_v56 = vmul.f32 %v8073_v55, %v8848_v54  ;;  %6487 = vrot.lane.b32.xlu0 %v9007_v39, %s8141_s1  ;;  %v9037_v47 = vsel %vm765_vm3, %v784_v38, %v9013_v23  ;;  %v9040_v61 = vsel %vm765_vm3, 0.0, %v784_v38 }
 0x14c   :  { %14773 = vst [vmem:[#allocation7_spill] sm:$0xff] %v9037_v47  ;;  %14774 = vst [vmem:[#allocation11_spill] sm:$0xff] %v9040_v61  ;;  %v525_v37 = vmul.f32 %v8074_v15, %v8848_v54  ;;  %v526_v10 = vmul.f32 %v8075_v44, %v8848_v54  ;;  %v9052_v60 = vpack.i.bf16 %v9037_v47, %v9040_v61 }
 0x14d   :  { %v591_v4 = vadd.f32 %v8877_v2, %v521_v21  ;;  %v592_v42 = vadd.f32 %v8877_v2, %v522_v52  ;;  %v589_v48 = vadd.f32 %v8877_v2, %v519_v26  ;;  %v590_v9 = vadd.f32 %v8877_v2, %v520_v56 }
 0x14e   :  { %v595_v1 = vadd.f32 %v8877_v2, %v525_v37  ;;  %v596_v24 = vadd.f32 %v8877_v2, %v526_v10  ;;  %v523_v53 = vmul.f32 %v8076_v8, %v8848_v54  ;;  %6502 = vrot.lane.b32.xlu1 %v9011_v6, %s8141_s1  ;;  %v524_v29 = vmul.f32 %v8077_v57, %v8848_v54 }
 0x14f   :  { %v655_v18 = vmax.f32 %v591_v4, 0.0  ;;  %v656_v50 = vmax.f32 %v592_v42, 0.0  ;;  %v653_v43 = vmax.f32 %v589_v48, 0.0  ;;  %6497 = vrot.lane.b32.xlu0 %v9052_v60, %s8141_s1  ;;  %v654_v0 = vmax.f32 %v590_v9, 0.0 }
 0x150   :  { %v659_v28 = vmax.f32 %v595_v1, 0.0  ;;  %v660_v49 = vmax.f32 %v596_v24, 0.0  ;;  %v593_v38 = vadd.f32 %v8877_v2, %v523_v53  ;;  %v594_v52 = vadd.f32 %v8877_v2, %v524_v29  ;;  %v8080_v29 = vld [vmem:[%s14233_s0 + $0xc0] sm:$0xff] }
 0x151   :  { %v793_v3 = vrot.slane %v655_v18, 7  ;;  %v9073_v21 = vrot.slane %v656_v50, 7  ;;  %v790_v14 = vrot.slane %v653_v43, 7  ;;  %v9076_v45 = vrot.slane %v654_v0, 7  ;;  %v8078_v18 = vld [vmem:[%s14233_s0 + $0xd0] sm:$0xff]  ;;  %v8079_v43 = vld [vmem:[%s14233_s0 + $0xd8] sm:$0xff] }
 0x152   :  { %v799_v26 = vrot.slane %v659_v28, 7  ;;  %v9078_v55 = vrot.slane %v660_v49, 7  ;;  %v657_v56 = vmax.f32 %v593_v38, 0.0  ;;  %v658_v10 = vmax.f32 %v594_v52, 0.0  ;;  %v8081_v28 = vld [vmem:[%s14233_s0 + $0xc8] sm:$0xff] }
 0x153   :  { %14775 = vst [vmem:[#allocation9_spill] sm:$0xff] %v9073_v21  ;;  %14776 = vst [vmem:[#allocation10_spill] sm:$0xff] %v9076_v45  ;;  %v9082_v15 = vsel %vm765_vm3, %v793_v3, %v9073_v21  ;;  %v9085_v37 = vsel %vm765_vm3, 0.0, %v793_v3  ;;  %v9088_v44 = vsel %vm765_vm3, 0.0, %v790_v14  ;;  %v9096_v42 = vsel %vm765_vm3, %v790_v14, %v9076_v45  ;;  %v8082_v14 = vld [vmem:[%s14233_s0 + $0xf0] sm:$0xff] }
 0x154   :  { %14777 = vst [vmem:[#allocation26_spill] sm:$0xff] %v9078_v55  ;;  %14778 = vst [vmem:[#allocation27_spill] sm:$0xff] %v9082_v15  ;;  %v9092_v4 = vpack.i.bf16 %v9082_v15, %v9085_v37  ;;  %v9100_v48 = vsel %vm765_vm3, %v799_v26, %v9078_v55  ;;  %v9103_v9 = vsel %vm765_vm3, 0.0, %v799_v26  ;;  %v9107_v1 = vpack.i.bf16 %v9096_v42, %v9088_v44  ;;  %v8083_v26 = vld [vmem:[%s14233_s0 + $0xf8] sm:$0xff] }
 0x155   :  { %14779 = vst [vmem:[#allocation28_spill] sm:$0xff] %v9085_v37  ;;  %14780 = vst [vmem:[#allocation29_spill] sm:$0xff] %v9088_v44  ;;  %v9111_v24 = vpack.i.bf16 %v9100_v48, %v9103_v9  ;;  %v796_v8 = vrot.slane %v657_v56, 7  ;;  %v9113_v53 = vrot.slane %v658_v10, 7  ;;  %v529_v50 = vmul.f32 %v8078_v18, %v8848_v54 }
 0x156   :  { %14781 = vst [vmem:[#allocation30_spill] sm:$0xff] %v9096_v42  ;;  %14782 = vst [vmem:[#allocation31_spill] sm:$0xff] %v9100_v48  ;;  %6512 = vrot.lane.b32.xlu1 %v9092_v4, %s8141_s1  ;;  %v530_v57 = vmul.f32 %v8079_v43, %v8848_v54  ;;  %v527_v0 = vmul.f32 %v8080_v29, %v8848_v54  ;;  %v528_v49 = vmul.f32 %v8081_v28, %v8848_v54 }
 0x157   :  { %14783 = vst [vmem:[#allocation32_spill] sm:$0xff] %v9103_v9  ;;  %14784 = vst [vmem:[#allocation33_spill] sm:$0xff] %v9113_v53  ;;  %6507 = vrot.lane.b32.xlu0 %v9107_v1, %s8141_s1  ;;  %v9137_v38 = vsel %vm765_vm3, %v796_v8, %v9113_v53  ;;  %v9140_v3 = vsel %vm765_vm3, 0.0, %v796_v8  ;;  %v533_v52 = vmul.f32 %v8082_v14, %v8848_v54 }
 0x158   :  { %14785 = vst [vmem:[#allocation34_spill] sm:$0xff] %v9137_v38  ;;  %14786 = vst [vmem:[#allocation35_spill] sm:$0xff] %v9140_v3  ;;  %v534_v56 = vmul.f32 %v8083_v26, %v8848_v54  ;;  %v9152_v10 = vpack.i.bf16 %v9137_v38, %v9140_v3  ;;  %v599_v18 = vadd.f32 %v8877_v2, %v529_v50  ;;  %v8084_v26 = vld [vmem:[%s14233_s0 + $0xe0] sm:$0xff] }
 0x159   :  { %v600_v8 = vadd.f32 %v8877_v2, %v530_v57  ;;  %v597_v43 = vadd.f32 %v8877_v2, %v527_v0  ;;  %v598_v29 = vadd.f32 %v8877_v2, %v528_v49  ;;  %v603_v28 = vadd.f32 %v8877_v2, %v533_v52  ;;  %v8085_v0 = vld [vmem:[%s14233_s0 + $0xe8] sm:$0xff] }
 0x15a   :  { %v604_v14 = vadd.f32 %v8877_v2, %v534_v56  ;;  %v531_v5 = vmul.f32 %v8084_v26, %v8848_v54  ;;  %6522 = vrot.lane.b32.xlu1 %v9111_v24, %s8141_s1  ;;  %v663_v50 = vmax.f32 %v599_v18, 0.0  ;;  %v532_v49 = vmul.f32 %v8085_v0, %v8848_v54 }
 0x15b   :  { %v664_v51 = vmax.f32 %v600_v8, 0.0  ;;  %v661_v57 = vmax.f32 %v597_v43, 0.0  ;;  %6517 = vrot.lane.b32.xlu0 %v9152_v10, %s8141_s1  ;;  %v662_v52 = vmax.f32 %v598_v29, 0.0  ;;  %v667_v56 = vmax.f32 %v603_v28, 0.0 }
 0x15c   :  { %v668_v3 = vmax.f32 %v604_v14, 0.0  ;;  %v601_v26 = vadd.f32 %v8877_v2, %v531_v5  ;;  %v805_v48 = vrot.slane %v663_v50, 7  ;;  %v602_v8 = vadd.f32 %v8877_v2, %v532_v49 }
 0x15d   :  { %v9173_v55 = vrot.slane %v664_v51, 7  ;;  %v802_v18 = vrot.slane %v661_v57, 7  ;;  %v9176_v43 = vrot.slane %v662_v52, 7  ;;  %v811_v9 = vrot.slane %v667_v56, 7 }
 0x15e   :  { %v9178_v38 = vrot.slane %v668_v3, 7  ;;  %v665_v0 = vmax.f32 %v601_v26, 0.0  ;;  %v9185_v29 = vsel %vm765_vm3, 0.0, %v805_v48  ;;  %v666_v51 = vmax.f32 %v602_v8, 0.0  ;;  %v8087_v26 = vld [vmem:[%s14233_s0 + $0x118] sm:$0xff]  ;;  %v8088_v8 = vld [vmem:[%s14233_s0 + $0x100] sm:$0xff] }
 0x15f   :  { %14787 = vst [vmem:[#allocation36_spill] sm:$0xff] %v9173_v55  ;;  %14788 = vst [vmem:[#allocation37_spill] sm:$0xff] %v9176_v43  ;;  %v9182_v21 = vsel %vm765_vm3, %v805_v48, %v9173_v55  ;;  %v9188_v5 = vsel %vm765_vm3, 0.0, %v802_v18  ;;  %v9196_v3 = vsel %vm765_vm3, %v802_v18, %v9176_v43  ;;  %v9203_v50 = vsel %vm765_vm3, 0.0, %v811_v9 }
 0x160   :  { %14789 = vst [vmem:[#allocation38_spill] sm:$0xff] %v9178_v38  ;;  %14790 = vst [vmem:[#allocation39_spill] sm:$0xff] %v9182_v21  ;;  %v9192_v28 = vpack.i.bf16 %v9182_v21, %v9185_v29  ;;  %v9200_v14 = vsel %vm765_vm3, %v811_v9, %v9178_v38  ;;  %v9207_v48 = vpack.i.bf16 %v9196_v3, %v9188_v5  ;;  %v808_v49 = vrot.slane %v665_v0, 7  ;;  %v8086_v9 = vld [vmem:[%s14233_s0 + $0x110] sm:$0xff] }
 0x161   :  { %14791 = vst [vmem:[#allocation40_spill] sm:$0xff] %v9185_v29  ;;  %14792 = vst [vmem:[#allocation41_spill] sm:$0xff] %v9188_v5  ;;  %v9213_v57 = vpack.i.bf16 %v9200_v14, %v9203_v50  ;;  %v9215_v52 = vrot.slane %v666_v51, 7  ;;  %v537_v56 = vmul.f32 %v8086_v9, %v8848_v54  ;;  %v538_v18 = vmul.f32 %v8087_v26, %v8848_v54  ;;  %v8089_v51 = vld [vmem:[%s14233_s0 + $0x108] sm:$0xff]  ;;  %v8090_v26 = vld [vmem:[%s14233_s0 + $0x130] sm:$0xff] }
 0x162   :  { %14793 = vst [vmem:[#allocation42_spill] sm:$0xff] %v9196_v3  ;;  %14794 = vst [vmem:[#allocation43_spill] sm:$0xff] %v9200_v14  ;;  %6532 = vrot.lane.b32.xlu1 %v9192_v28, %s8141_s1  ;;  %6527 = vrot.lane.b32.xlu0 %v9207_v48, %s8141_s1  ;;  %v535_v0 = vmul.f32 %v8088_v8, %v8848_v54  ;;  %v536_v38 = vmul.f32 %v8089_v51, %v8848_v54  ;;  %v9240_v14 = vsel %vm765_vm3, 0.0, %v808_v49  ;;  %v8091_v8 = vld [vmem:[%s14233_s0 + $0x138] sm:$0xff] }
 0x163   :  { %14795 = vst [vmem:[#allocation44_spill] sm:$0xff] %v9203_v50  ;;  %14796 = vst [vmem:[#allocation45_spill] sm:$0xff] %v9213_v57  ;;  %v9237_v9 = vsel %vm765_vm3, %v808_v49, %v9215_v52  ;;  %v541_v50 = vmul.f32 %v8090_v26, %v8848_v54  ;;  %v542_v55 = vmul.f32 %v8091_v8, %v8848_v54  ;;  %v8092_v8 = vld [vmem:[%s14233_s0 + $0x120] sm:$0xff] }
 0x164   :  { %14797 = vst [vmem:[#allocation46_spill] sm:$0xff] %v9215_v52  ;;  %14798 = vst [vmem:[#allocation47_spill] sm:$0xff] %v9237_v9  ;;  %v9252_v51 = vpack.i.bf16 %v9237_v9, %v9240_v14  ;;  %v607_v52 = vadd.f32 %v8877_v2, %v537_v56  ;;  %v608_v49 = vadd.f32 %v8877_v2, %v538_v18 }
 0x165   :  { %14799 = vst [vmem:[#allocation48_spill] sm:$0xff] %v9240_v14  ;;  %v605_v5 = vadd.f32 %v8877_v2, %v535_v0  ;;  %v606_v26 = vadd.f32 %v8877_v2, %v536_v38  ;;  %v611_v21 = vadd.f32 %v8877_v2, %v541_v50  ;;  %v612_v29 = vadd.f32 %v8877_v2, %v542_v55  ;;  %v8093_v38 = vld [vmem:[%s14233_s0 + $0x128] sm:$0xff] }
 0x166   :  { %6542 = vrot.lane.b32.xlu1 %v9213_v57, %s8141_s1  ;;  %v539_v14 = vmul.f32 %v8092_v8, %v8848_v54  ;;  %6537 = vrot.lane.b32.xlu0 %v9252_v51, %s8141_s1  ;;  %v671_v56 = vmax.f32 %v607_v52, 0.0  ;;  %v672_v18 = vmax.f32 %v608_v49, 0.0  ;;  %v540_v50 = vmul.f32 %v8093_v38, %v8848_v54 }
 0x167   :  { %v669_v0 = vmax.f32 %v605_v5, 0.0  ;;  %v670_v57 = vmax.f32 %v606_v26, 0.0  ;;  %v675_v55 = vmax.f32 %v611_v21, 0.0  ;;  %v676_v9 = vmax.f32 %v612_v29, 0.0 }
 0x168   :  { %v609_v3 = vadd.f32 %v8877_v2, %v539_v14  ;;  %v817_v43 = vrot.slane %v671_v56, 7  ;;  %v9273_v53 = vrot.slane %v672_v18, 7  ;;  %v610_v44 = vadd.f32 %v8877_v2, %v540_v50 }
 0x169   :  { %v814_v8 = vrot.slane %v669_v0, 7  ;;  %v9276_v52 = vrot.slane %v670_v57, 7  ;;  %v823_v5 = vrot.slane %v675_v55, 7  ;;  %v9278_v49 = vrot.slane %v676_v9, 7  ;;  %v8094_v0 = vld [vmem:[%s14233_s0 + $0x150] sm:$0xff]  ;;  %v8095_v55 = vld [vmem:[%s14233_s0 + $0x158] sm:$0xff] }
 0x16a   :  { %14800 = vst [vmem:[#allocation49_spill] sm:$0xff] %v9273_v53  ;;  %v673_v15 = vmax.f32 %v609_v3, 0.0  ;;  %v9282_v38 = vsel %vm765_vm3, %v817_v43, %v9273_v53  ;;  %v9285_v21 = vsel %vm765_vm3, 0.0, %v817_v43  ;;  %v674_v14 = vmax.f32 %v610_v44, 0.0  ;;  %v8100_v53 = vld [vmem:[%s14233_s0 + $0x160] sm:$0xff] }
 0x16b   :  { %14801 = vst [vmem:[#allocation50_spill] sm:$0xff] %v9278_v49  ;;  %14802 = vst [vmem:[#allocation51_spill] sm:$0xff] %v9282_v38  ;;  %v9288_v29 = vsel %vm765_vm3, 0.0, %v814_v8  ;;  %v6551_v26 = vpack.i.bf16 %v9282_v38, %v9285_v21  ;;  %v9294_v57 = vsel %vm765_vm3, %v814_v8, %v9276_v52  ;;  %v9298_v3 = vsel %vm765_vm3, %v823_v5, %v9278_v49 }
 0x16c   :  { %14803 = vst [vmem:[#allocation52_spill] sm:$0xff] %v9285_v21  ;;  %14804 = vst [vmem:[#allocation53_spill] sm:$0xff] %v9288_v29  ;;  %v9301_v9 = vsel %vm765_vm3, 0.0, %v823_v5  ;;  %v6546_v43 = vpack.i.bf16 %v9294_v57, %v9288_v29  ;;  %v820_v56 = vrot.slane %v673_v15, 7  ;;  %v9307_v18 = vrot.slane %v674_v14, 7  ;;  %v8096_v15 = vld [vmem:[%s14233_s0 + $0x140] sm:$0xff] }
 0x16d   :  { %14805 = vst [vmem:[#allocation54_spill] sm:$0xff] %v9294_v57  ;;  %14806 = vst [vmem:[#allocation55_spill] sm:$0xff] %v9298_v3  ;;  %v6561_v44 = vpack.i.bf16 %v9298_v3, %v9301_v9  ;;  %6552 = vrot.lane.b32.xlu1 %v6551_v26, %s8141_s1  ;;  %v545_v50 = vmul.f32 %v8094_v0, %v8848_v54  ;;  %v546_v8 = vmul.f32 %v8095_v55, %v8848_v54  ;;  %v8097_v14 = vld [vmem:[%s14233_s0 + $0x148] sm:$0xff]  ;;  %v8099_v3 = vld [vmem:[%s14233_s0 + $0x178] sm:$0xff] }
 0x16e   :  { %14807 = vst [vmem:[#allocation56_spill] sm:$0xff] %v9301_v9  ;;  %14808 = vst [vmem:[#allocation57_spill] sm:$0xff] %v9307_v18  ;;  %v543_v5 = vmul.f32 %v8096_v15, %v8848_v54  ;;  %v544_v26 = vmul.f32 %v8097_v14, %v8848_v54  ;;  %6547 = vrot.lane.b32.xlu0 %v6546_v43, %s8141_s1  ;;  %v9329_v0 = vsel %vm765_vm3, %v820_v56, %v9307_v18  ;;  %v8098_v9 = vld [vmem:[%s14233_s0 + $0x170] sm:$0xff] }
 0x16f   :  { %14809 = vst [vmem:[#allocation58_spill] sm:$0xff] %v9329_v0  ;;  %v9332_v55 = vsel %vm765_vm3, 0.0, %v820_v56  ;;  %v549_v15 = vmul.f32 %v8098_v9, %v8848_v54  ;;  %v550_v14 = vmul.f32 %v8099_v3, %v8848_v54  ;;  %v615_v18 = vadd.f32 %v8877_v2, %v545_v50 }
 0x170   :  { %14810 = vst [vmem:[#allocation59_spill] sm:$0xff] %v9332_v55  ;;  %v6556_v43 = vpack.i.bf16 %v9329_v0, %v9332_v55  ;;  %v616_v56 = vadd.f32 %v8877_v2, %v546_v8  ;;  %v613_v21 = vadd.f32 %v8877_v2, %v543_v5  ;;  %v614_v38 = vadd.f32 %v8877_v2, %v544_v26  ;;  %v8101_v8 = vld [vmem:[%s14233_s0 + $0x168] sm:$0xff] }
 0x171   :  { %v619_v49 = vadd.f32 %v8877_v2, %v549_v15  ;;  %v620_v9 = vadd.f32 %v8877_v2, %v550_v14  ;;  %v547_v3 = vmul.f32 %v8100_v53, %v8848_v54  ;;  %6562 = vrot.lane.b32.xlu1 %v6561_v44, %s8141_s1  ;;  %v679_v0 = vmax.f32 %v615_v18, 0.0 }
 0x172   :  { %v680_v50 = vmax.f32 %v616_v56, 0.0  ;;  %v677_v55 = vmax.f32 %v613_v21, 0.0  ;;  %v548_v5 = vmul.f32 %v8101_v8, %v8848_v54  ;;  %6557 = vrot.lane.b32.xlu0 %v6556_v43, %s8141_s1  ;;  %v678_v26 = vmax.f32 %v614_v38, 0.0 }
 0x173   :  { %v683_v15 = vmax.f32 %v619_v49, 0.0  ;;  %v684_v14 = vmax.f32 %v620_v9, 0.0  ;;  %v617_v37 = vadd.f32 %v8877_v2, %v547_v3  ;;  %v829_v31 = vrot.slane %v679_v0, 7 }
 0x174   :  { %v9361_v53 = vrot.slane %v680_v50, 7  ;;  %v826_v44 = vrot.slane %v677_v55, 7  ;;  %v618_v18 = vadd.f32 %v8877_v2, %v548_v5  ;;  %v9364_v21 = vrot.slane %v678_v26, 7  ;;  %v8102_v26 = vld [vmem:[%s14233_s0 + $0x190] sm:$0xff] }
 0x175   :  { %v835_v56 = vrot.slane %v683_v15, 7  ;;  %v9366_v42 = vrot.slane %v684_v14, 7  ;;  %v681_v45 = vmax.f32 %v617_v37, 0.0  ;;  %v9373_v49 = vsel %vm765_vm3, 0.0, %v829_v31  ;;  %v8103_v14 = vld [vmem:[%s14233_s0 + $0x198] sm:$0xff] }
 0x176   :  { %14811 = vst [vmem:[#allocation60_spill] sm:$0xff] %v9361_v53  ;;  %14812 = vst [vmem:[#allocation61_spill] sm:$0xff] %v9364_v21  ;;  %v9370_v43 = vsel %vm765_vm3, %v829_v31, %v9361_v53  ;;  %v9376_v38 = vsel %vm765_vm3, 0.0, %v826_v44  ;;  %v682_v0 = vmax.f32 %v618_v18, 0.0  ;;  %v9382_v9 = vsel %vm765_vm3, %v826_v44, %v9364_v21  ;;  %v8108_v21 = vld [vmem:[%s14233_s0 + $0x1a0] sm:$0xff] }
 0x177   :  { %14813 = vst [vmem:[#allocation62_spill] sm:$0xff] %v9366_v42  ;;  %14814 = vst [vmem:[#allocation63_spill] sm:$0xff] %v9370_v43  ;;  %v6571_v55 = vpack.i.bf16 %v9370_v43, %v9373_v49  ;;  %v9386_v37 = vsel %vm765_vm3, %v835_v56, %v9366_v42  ;;  %v9389_v3 = vsel %vm765_vm3, 0.0, %v835_v56  ;;  %v6566_v31 = vpack.i.bf16 %v9382_v9, %v9376_v38  ;;  %v8105_v56 = vld [vmem:[%s14233_s0 + $0x188] sm:$0xff] }
 0x178   :  { %14815 = vst [vmem:[#allocation64_spill] sm:$0xff] %v9373_v49  ;;  %14816 = vst [vmem:[#allocation65_spill] sm:$0xff] %v9376_v38  ;;  %v6581_v50 = vpack.i.bf16 %v9386_v37, %v9389_v3  ;;  %v832_v8 = vrot.slane %v681_v45, 7  ;;  %v9395_v5 = vrot.slane %v682_v0, 7  ;;  %v553_v15 = vmul.f32 %v8102_v26, %v8848_v54  ;;  %v8104_v45 = vld [vmem:[%s14233_s0 + $0x180] sm:$0xff] }
 0x179   :  { %14817 = vst [vmem:[#allocation66_spill] sm:$0xff] %v9382_v9  ;;  %14818 = vst [vmem:[#allocation67_spill] sm:$0xff] %v9386_v37  ;;  %6572 = vrot.lane.b32.xlu1 %v6571_v55, %s8141_s1  ;;  %v554_v44 = vmul.f32 %v8103_v14, %v8848_v54  ;;  %v551_v18 = vmul.f32 %v8104_v45, %v8848_v54  ;;  %v552_v0 = vmul.f32 %v8105_v56, %v8848_v54  ;;  %v8106_v14 = vld [vmem:[%s14233_s0 + $0x1b0] sm:$0xff] }
 0x17a   :  { %14819 = vst [vmem:[#allocation68_spill] sm:$0xff] %v9389_v3  ;;  %14820 = vst [vmem:[#allocation69_spill] sm:$0xff] %v9395_v5  ;;  %6567 = vrot.lane.b32.xlu0 %v6566_v31, %s8141_s1  ;;  %v9417_v55 = vsel %vm765_vm3, %v832_v8, %v9395_v5  ;;  %v9420_v26 = vsel %vm765_vm3, 0.0, %v832_v8  ;;  %v557_v45 = vmul.f32 %v8106_v14, %v8848_v54  ;;  %v8107_v3 = vld [vmem:[%s14233_s0 + $0x1b8] sm:$0xff] }
 0x17b   :  { %14821 = vst [vmem:[#allocation70_spill] sm:$0xff] %v9417_v55  ;;  %14822 = vst [vmem:[#allocation71_spill] sm:$0xff] %v9420_v26  ;;  %v558_v56 = vmul.f32 %v8107_v3, %v8848_v54  ;;  %v6576_v31 = vpack.i.bf16 %v9417_v55, %v9420_v26  ;;  %v623_v5 = vadd.f32 %v8877_v2, %v553_v15 }
 0x17c   :  { %v624_v8 = vadd.f32 %v8877_v2, %v554_v44  ;;  %v621_v37 = vadd.f32 %v8877_v2, %v551_v18  ;;  %v622_v49 = vadd.f32 %v8877_v2, %v552_v0  ;;  %v627_v42 = vadd.f32 %v8877_v2, %v557_v45  ;;  %v8109_v44 = vld [vmem:[%s14233_s0 + $0x1a8] sm:$0xff] }
 0x17d   :  { %v628_v14 = vadd.f32 %v8877_v2, %v558_v56  ;;  %v555_v3 = vmul.f32 %v8108_v21, %v8848_v54  ;;  %6582 = vrot.lane.b32.xlu1 %v6581_v50, %s8141_s1  ;;  %v687_v55 = vmax.f32 %v623_v5, 0.0  ;;  %v556_v18 = vmul.f32 %v8109_v44, %v8848_v54 }
 0x17e   :  { %v688_v15 = vmax.f32 %v624_v8, 0.0  ;;  %v685_v26 = vmax.f32 %v621_v37, 0.0  ;;  %6577 = vrot.lane.b32.xlu0 %v6576_v31, %s8141_s1  ;;  %v686_v0 = vmax.f32 %v622_v49, 0.0  ;;  %v691_v45 = vmax.f32 %v627_v42, 0.0 }
 0x17f   :  { %v692_v56 = vmax.f32 %v628_v14, 0.0  ;;  %v625_v43 = vadd.f32 %v8877_v2, %v555_v3  ;;  %v841_v53 = vrot.slane %v687_v55, 7  ;;  %v626_v5 = vadd.f32 %v8877_v2, %v556_v18 }
 0x180   :  { %v9449_v21 = vrot.slane %v688_v15, 7  ;;  %v838_v50 = vrot.slane %v685_v26, 7  ;;  %v9452_v37 = vrot.slane %v686_v0, 7  ;;  %v847_v8 = vrot.slane %v691_v45, 7  ;;  %v8110_v0 = vld [vmem:[%s14233_s0 + $0x1d0] sm:$0xff] }
 0x181   :  { %v9454_v9 = vrot.slane %v692_v56, 7  ;;  %v689_v38 = vmax.f32 %v625_v43, 0.0  ;;  %v9461_v42 = vsel %vm765_vm3, 0.0, %v841_v53  ;;  %v690_v55 = vmax.f32 %v626_v5, 0.0  ;;  %v8111_v56 = vld [vmem:[%s14233_s0 + $0x1d8] sm:$0xff] }
 0x182   :  { %14823 = vst [vmem:[#allocation72_spill] sm:$0xff] %v9449_v21  ;;  %14824 = vst [vmem:[#allocation73_spill] sm:$0xff] %v9452_v37  ;;  %v9458_v31 = vsel %vm765_vm3, %v841_v53, %v9449_v21  ;;  %v9464_v49 = vsel %vm765_vm3, 0.0, %v838_v50  ;;  %v9470_v14 = vsel %vm765_vm3, %v838_v50, %v9452_v37  ;;  %v9477_v3 = vsel %vm765_vm3, 0.0, %v847_v8  ;;  %v8116_v37 = vld [vmem:[%s14233_s0 + $0x1e0] sm:$0xff] }
 0x183   :  { %14825 = vst [vmem:[#allocation74_spill] sm:$0xff] %v9454_v9  ;;  %14826 = vst [vmem:[#allocation75_spill] sm:$0xff] %v9458_v31  ;;  %v6591_v26 = vpack.i.bf16 %v9458_v31, %v9461_v42  ;;  %v9474_v43 = vsel %vm765_vm3, %v847_v8, %v9454_v9  ;;  %v6586_v53 = vpack.i.bf16 %v9470_v14, %v9464_v49  ;;  %v844_v44 = vrot.slane %v689_v38, 7  ;;  %v8112_v38 = vld [vmem:[%s14233_s0 + $0x1c0] sm:$0xff]  ;;  %v8113_v8 = vld [vmem:[%s14233_s0 + $0x1c8] sm:$0xff] }
 0x184   :  { %14827 = vst [vmem:[#allocation76_spill] sm:$0xff] %v9461_v42  ;;  %14828 = vst [vmem:[#allocation77_spill] sm:$0xff] %v9464_v49  ;;  %v6601_v15 = vpack.i.bf16 %v9474_v43, %v9477_v3  ;;  %v9483_v18 = vrot.slane %v690_v55, 7  ;;  %v561_v45 = vmul.f32 %v8110_v0, %v8848_v54  ;;  %v562_v50 = vmul.f32 %v8111_v56, %v8848_v54  ;;  %v8114_v56 = vld [vmem:[%s14233_s0 + $0x1f0] sm:$0xff] }
 0x185   :  { %14829 = vst [vmem:[#allocation78_spill] sm:$0xff] %v9470_v14  ;;  %14830 = vst [vmem:[#allocation79_spill] sm:$0xff] %v9474_v43  ;;  %6592 = vrot.lane.b32.xlu1 %v6591_v26, %s8141_s1  ;;  %v559_v5 = vmul.f32 %v8112_v38, %v8848_v54  ;;  %v560_v55 = vmul.f32 %v8113_v8, %v8848_v54  ;;  %6587 = vrot.lane.b32.xlu0 %v6586_v53, %s8141_s1  ;;  %v9508_v0 = vsel %vm765_vm3, 0.0, %v844_v44 }
 0x186   :  { %14831 = vst [vmem:[#allocation80_spill] sm:$0xff] %v9477_v3  ;;  %14832 = vst [vmem:[#allocation81_spill] sm:$0xff] %v9483_v18  ;;  %v9505_v26 = vsel %vm765_vm3, %v844_v44, %v9483_v18  ;;  %v565_v38 = vmul.f32 %v8114_v56, %v8848_v54  ;;  %v8115_v3 = vld [vmem:[%s14233_s0 + $0x1f8] sm:$0xff]  ;;  %v631_v43 = vadd.f32 %v8877_v2, %v561_v45 }
 0x187   :  { %14833 = vst [vmem:[#allocation82_spill] sm:$0xff] %v9505_v26  ;;  %14834 = vst [vmem:[#allocation83_spill] sm:$0xff] %v9508_v0  ;;  %v566_v8 = vmul.f32 %v8115_v3, %v8848_v54  ;;  %v6596_v53 = vpack.i.bf16 %v9505_v26, %v9508_v0  ;;  %v632_v44 = vadd.f32 %v8877_v2, %v562_v50  ;;  %v8117_v50 = vld [vmem:[%s14233_s0 + $0x1e8] sm:$0xff] }
 0x188   :  { %v629_v18 = vadd.f32 %v8877_v2, %v559_v5  ;;  %v630_v9 = vadd.f32 %v8877_v2, %v560_v55  ;;  %v635_v42 = vadd.f32 %v8877_v2, %v565_v38  ;;  %v563_v3 = vmul.f32 %v8116_v37, %v8848_v54 }
 0x189   :  { %v636_v56 = vadd.f32 %v8877_v2, %v566_v8  ;;  %6602 = vrot.lane.b32.xlu1 %v6601_v15, %s8141_s1  ;;  %v695_v26 = vmax.f32 %v631_v43, 0.0  ;;  %v696_v45 = vmax.f32 %v632_v44, 0.0  ;;  %v564_v5 = vmul.f32 %v8117_v50, %v8848_v54  ;;  %6597 = vrot.lane.b32.xlu0 %v6596_v53, %s8141_s1 }
 0x18a   :  { %v693_v0 = vmax.f32 %v629_v18, 0.0  ;;  %v694_v55 = vmax.f32 %v630_v9, 0.0  ;;  %v699_v38 = vmax.f32 %v635_v42, 0.0  ;;  %v633_v31 = vadd.f32 %v8877_v2, %v563_v3 }
 0x18b   :  { %v700_v8 = vmax.f32 %v636_v56, 0.0  ;;  %v853_v21 = vrot.slane %v695_v26, 7  ;;  %v9537_v37 = vrot.slane %v696_v45, 7  ;;  %v634_v43 = vadd.f32 %v8877_v2, %v564_v5 }
 0x18c   :  { %v850_v15 = vrot.slane %v693_v0, 7  ;;  %v9540_v18 = vrot.slane %v694_v55, 7  ;;  %v859_v44 = vrot.slane %v699_v38, 7  ;;  %v697_v49 = vmax.f32 %v633_v31, 0.0 }
 0x18d   :  { %v9542_v14 = vrot.slane %v700_v8, 7  ;;  %v9546_v54 = vsel %vm765_vm3, %v853_v21, %v9537_v37  ;;  %v9549_v9 = vsel %vm765_vm3, 0.0, %v853_v21  ;;  %v698_v26 = vmax.f32 %v634_v43, 0.0 }
 0x18e   :  { %14836 = vst [vmem:[#allocation85_spill] sm:$0xff] %v9546_v54  ;;  %14837 = vst [vmem:[#allocation86_spill] sm:$0xff] %v9549_v9  ;;  %v9552_v42 = vsel %vm765_vm3, 0.0, %v850_v15  ;;  %v6611_v2 = vpack.i.bf16 %v9546_v54, %v9549_v9  ;;  %v9558_v0 = vsel %vm765_vm3, %v850_v15, %v9540_v18  ;;  %v9565_v53 = vsel %vm765_vm3, 0.0, %v859_v44 }
 0x18f   :  { %14835 = vst [vmem:[#allocation84_spill] sm:$0xff] %v9542_v14  ;;  %14838 = vst [vmem:[#allocation87_spill] sm:$0xff] %v9552_v42  ;;  %v9562_v31 = vsel %vm765_vm3, %v859_v44, %v9542_v14  ;;  %v6606_v21 = vpack.i.bf16 %v9558_v0, %v9552_v42  ;;  %v856_v3 = vrot.slane %v697_v49, 7  ;;  %v9572_v45 = vrot.slane %v698_v26, 7 }
 0x190   :  { %14839 = vst [vmem:[#allocation88_spill] sm:$0xff] %v9558_v0  ;;  %14840 = vst [vmem:[#allocation89_spill] sm:$0xff] %v9562_v31  ;;  %6612 = vrot.lane.b32.xlu1 %v6611_v2, %s8141_s1  ;;  %v6621_v56 = vpack.i.bf16 %v9562_v31, %v9565_v53  ;;  %v1084_v49 = vrot.slane %v8921_v32, 1  ;;  %v1085_v38 = vrot.slane %v8918_v30, 1  ;;  %v9592_v8 = vsel %vm765_vm3, %v8903_v20, 0.0 }
 0x191   :  { %14841 = vst [vmem:[#allocation90_spill] sm:$0xff] %v9565_v53  ;;  %6607 = vrot.lane.b32.xlu0 %v6606_v21, %s8141_s1  ;;  %v9577_v50 = vsel %vm765_vm3, %v856_v3, %v9572_v45  ;;  %v9580_v5 = vsel %vm765_vm3, 0.0, %v856_v3  ;;  %v1087_v15 = vrot.slane %v9592_v8, 1  ;;  %v1094_v44 = vrot.slane %v8945_v13, 1 }
 0x192   :  { %14842 = vst [vmem:[#allocation91_spill] sm:$0xff] %v9577_v50  ;;  %14843 = vst [vmem:[#allocation92_spill] sm:$0xff] %v9580_v5  ;;  %v6616_v55 = vpack.i.bf16 %v9577_v50, %v9580_v5  ;;  %v9600_v43 = vsel %vm1081_vm4, %v1084_v49, %v1085_v38  ;;  %v1100_v21 = vrot.slane %v8931_v58, 1  ;;  %v1120_v20 = vrot.slane %v9000_v17, 1  ;;  %v14892_v17 = vld [vmem:[#allocation39_spill] sm:$0xff] }
 0x193   :  { %14844 = vst [vmem:[#allocation93_spill] sm:$0xff] %v9600_v43 }
 0x194   :  { %6622 = vrot.lane.b32.xlu1 %v6621_v56, %s8141_s1 }
 0x195   :  { %6617 = vrot.lane.b32.xlu0 %v6616_v55, %s8141_s1  ;;  %s8143_s1 = smov 4  }
 0x198   :  { %6627 = vrot.lane.b32.xlu1 %v8925_v35, %s8142_s21  ;;  %v9603_v35 = vsel %vm1081_vm4, %v1085_v38, %v1087_v15  ;;  %v1105_v38 = vrot.slane %v8996_v22, 1 }
 0x199   :  { %6632 = vrot.lane.b32.xlu0 %v8953_v40, %s8142_s21  ;;  %14845 = vst [vmem:[#allocation94_spill] sm:$0xff] %v9603_v35  ;;  %v1090_v40 = vrot.slane %v8911_v11, 1 }
 0x19c   :  { %6637 = vrot.lane.b32.xlu1 %v8938_v41, %s8142_s21  ;;  %v9615_v41 = vsel %vm765_vm3, %v8901_v33, 0.0 }
 0x19d   :  { %6642 = vrot.lane.b32.xlu0 %v9007_v39, %s8142_s21  ;;  %v1092_v39 = vrot.slane %v9615_v41, 1 }
 0x19f   :  { %v9634_v33 = vsel %vm1081_vm4, %v1090_v40, %v1092_v39  ;;  %v1109_v39 = vrot.slane %v8977_v16, 1 }
 0x1a0   :  { %6647 = vrot.lane.b32.xlu1 %v8992_v19, %s8142_s21  ;;  %v1095_v19 = vrot.slane %v8942_v63, 1  ;;  %14846 = vst [vmem:[#allocation95_spill] sm:$0xff] %v9634_v33 }
 0x1a1   :  { %6652 = vrot.lane.b32.xlu0 %v9052_v60, %s8142_s21  ;;  %v9627_v60 = vsel %vm765_vm3, %v8907_v27, 0.0  ;;  %v1099_v27 = vrot.slane %v8934_v36, 1 }
 0x1a2   :  { %v1097_v26 = vrot.slane %v9627_v60, 1  ;;  %v9641_v2 = vsel %vm1081_vm4, %v1094_v44, %v1095_v19  ;;  %v9680_v44 = vsel %vm765_vm3, %v8972_v46, 0.0 }
 0x1a3   :  { %14849 = vst [vmem:[#allocation97_spill] sm:$0xff] %v9641_v2  ;;  %v6706_v56 = vpack.i.bf16 %v9641_v2, %v9634_v33  ;;  %v9662_v49 = vsel %vm1081_vm4, %v1099_v27, %v1100_v21  ;;  %v1115_v27 = vrot.slane %v9037_v47, 1  ;;  %v1112_v31 = vrot.slane %v9680_v44, 1 }
 0x1a4   :  { %6662 = vrot.lane.b32.xlu1 %v9107_v1, %s8142_s21  ;;  %v9659_v55 = vsel %vm1081_vm4, %v1095_v19, %v1097_v26  ;;  %14851 = vst [vmem:[#allocation99_spill] sm:$0xff] %v9662_v49  ;;  %v1160_v19 = vrot.slane %v9294_v57, 1 }
 0x1a5   :  { %6657 = vrot.lane.b32.xlu0 %v9011_v6, %s8142_s21  ;;  %v14847_v6 = vmov 0.0   ;;  %14850 = vst [vmem:[#allocation98_spill] sm:$0xff] %v9659_v55 }
 0x1a6   :  { %v9637_v1 = vrot.slane %v14847_v6, 1 }
 0x1a8   :  { %6672 = vrot.lane.b32.xlu1 %v9152_v10, %s8142_s21  ;;  %14848 = vst [vmem:[#allocation96_spill] sm:$0xff] %v9637_v1  ;;  %v1089_v10 = vrot.slane %v8914_v7, 1  ;;  %v6696_v3 = vpack.i.bf16 %v9600_v43, %v9637_v1  ;;  %v14856_v43 = vld [vmem:[#allocation10_spill] sm:$0xff] }
 0x1a9   :  { %6667 = vrot.lane.b32.xlu0 %v9092_v4, %s8142_s21  ;;  %v9650_v4 = vsel %vm765_vm3, %v8979_v12, 0.0  ;;  %v9669_v12 = vsel %vm765_vm3, %v8905_v59, 0.0  ;;  %v1110_v59 = vrot.slane %v8985_v62, 1  ;;  %v9715_v33 = vsel %vm765_vm3, %v14856_v43, 0.0 }
 0x1aa   :  { %v1107_v15 = vrot.slane %v9650_v4, 1  ;;  %v1102_v26 = vrot.slane %v9669_v12, 1  ;;  %14857 = vst [vmem:[#allocation10_spill] sm:$0xff] %v9715_v33 }
 0x1ab   :  { %v9711_v2 = vsel %vm1081_vm4, %v1109_v39, %v1110_v59 }
 0x1ac   :  { %6682 = vrot.lane.b32.xlu1 %v9207_v48, %s8142_s21  ;;  %v9665_v48 = vsel %vm1081_vm4, %v1089_v10, %v1090_v40  ;;  %v1104_v40 = vrot.slane %v8988_v25, 1  ;;  %v1119_v10 = vrot.slane %v9003_v34, 1  ;;  %v9706_v1 = vsel %vm1081_vm4, %v1105_v38, %v1107_v15  ;;  %14855 = vst [vmem:[#allocation103_spill] sm:$0xff] %v9711_v2  ;;  %v14888_v34 = vld [vmem:[#allocation31_spill] sm:$0xff] }
 0x1ad   :  { %6677 = vrot.lane.b32.xlu0 %v9111_v24, %s8142_s21  ;;  %14852 = vst [vmem:[#allocation100_spill] sm:$0xff] %v9665_v48  ;;  %v9673_v24 = vsel %vm765_vm3, %v9013_v23, 0.0  ;;  %v1159_v23 = vrot.slane %v9288_v29, 1  ;;  %v6701_v53 = vpack.i.bf16 %v9665_v48, %v9603_v35  ;;  %14854 = vst [vmem:[#allocation102_spill] sm:$0xff] %v9706_v1  ;;  %v9725_v15 = vsel %vm1081_vm4, %v1100_v21, %v1102_v26  ;;  %v14872_v48 = vld [vmem:[#allocation27_spill] sm:$0xff] }
 0x1ae   :  { %14853 = vst [vmem:[#allocation101_spill] sm:$0xff] %v9673_v24  ;;  %v1117_v46 = vrot.slane %v9673_v24, 1  ;;  %14860 = vst [vmem:[#allocation106_spill] sm:$0xff] %v9725_v15  ;;  %v14889_v24 = vld [vmem:[#allocation35_spill] sm:$0xff] }
 0x1b0   :  { %6692 = vrot.lane.b32.xlu1 %v9252_v51, %s8142_s21  ;;  %v9695_v51 = vsel %vm765_vm3, %v9276_v52, 0.0  ;;  %v1114_v52 = vrot.slane %v9040_v61, 1  ;;  %v9731_v39 = vsel %vm1081_vm4, %v1115_v27, %v1117_v46  ;;  %v1127_v46 = vrot.slane %v9715_v33, 1 }
 0x1b1   :  { %6687 = vrot.lane.b32.xlu0 %v9192_v28, %s8142_s21  ;;  %v1162_v14 = vrot.slane %v9695_v51, 1  ;;  %v6711_v28 = vpack.i.bf16 %v9662_v49, %v9659_v55  ;;  %v9718_v55 = vsel %vm1081_vm4, %v1159_v23, %v1160_v19  ;;  %14862 = vst [vmem:[#allocation108_spill] sm:$0xff] %v9731_v39  ;;  %v9736_v23 = vsel %vm1081_vm4, %v1119_v10, %v1120_v20  ;;  %v14866_v49 = vld [vmem:[#allocation22_spill] sm:$0xff]  ;;  %v14871_v10 = vld [vmem:[#allocation28_spill] sm:$0xff] }
 0x1b2   :  { %14858 = vst [vmem:[#allocation104_spill] sm:$0xff] %v9718_v55  ;;  %14863 = vst [vmem:[#allocation109_spill] sm:$0xff] %v9736_v23  ;;  %v9744_v21 = vsel %vm765_vm3, %v14866_v49, 0.0  ;;  %v9751_v26 = vsel %vm1081_vm4, %v1114_v52, %v1115_v27  ;;  %v1129_v43 = vrot.slane %v14871_v10, 1  ;;  %v14873_v27 = vld [vmem:[#allocation29_spill] sm:$0xff]  ;;  %v6731_v10 = vpack.i.bf16 %v9736_v23, %v9731_v39  ;;  %v14883_v39 = vld [vmem:[#allocation34_spill] sm:$0xff] }
 0x1b3   :  { %v9721_v35 = vsel %vm1081_vm4, %v1160_v19, %v1162_v14  ;;  %v9739_v14 = vsel %vm1081_vm4, %v1110_v59, %v1112_v31  ;;  %v14865_v19 = vld [vmem:[#allocation30_spill] sm:$0xff]  ;;  %14867 = vst [vmem:[#allocation22_spill] sm:$0xff] %v9744_v21  ;;  %14870 = vst [vmem:[#allocation113_spill] sm:$0xff] %v9751_v26  ;;  %v1130_v31 = vrot.slane %v14872_v48, 1  ;;  %v6721_v59 = vpack.i.bf16 %v9711_v2, %v9706_v1  ;;  %v14881_v48 = vld [vmem:[#allocation37_spill] sm:$0xff] }
 0x1b4   :  { %6707 = vrot.lane.b32.xlu1 %v6706_v56, %s8143_s1  ;;  %14859 = vst [vmem:[#allocation105_spill] sm:$0xff] %v9721_v35  ;;  %v9728_v56 = vsel %vm1081_vm4, %v1104_v40, %v1105_v38  ;;  %14864 = vst [vmem:[#allocation110_spill] sm:$0xff] %v9739_v14  ;;  %v9746_v38 = vpop.permute.xlu1 %6472  ;;  %v9748_v40 = vpop.permute.xlu0 %6467  ;;  %v1124_v52 = vrot.slane %v14873_v27, 1  ;;  %v9788_v23 = vsel %vm765_vm3, %v14881_v48, 0.0 }
 0x1b5   :  { %6697 = vrot.lane.b32.xlu0 %v6696_v3, %s8143_s1  ;;  %14861 = vst [vmem:[#allocation107_spill] sm:$0xff] %v9728_v56  ;;  %v1125_v3 = vrot.slane %v14865_v19, 1  ;;  %14868 = vst [vmem:[#allocation111_spill] sm:$0xff] %v9746_v38  ;;  %v6716_v49 = vpack.i.bf16 %v9728_v56, %v9725_v15  ;;  %v14874_v38 = vld [vmem:[#allocation33_spill] sm:$0xff]  ;;  %v9780_v2 = vsel %vm1081_vm4, %v1129_v43, %v1130_v31  ;;  %v14890_v19 = vld [vmem:[#allocation42_spill] sm:$0xff]  ;;  %v1147_v27 = vrot.slane %v9788_v23, 1 }
 0x1b6   :  { %14869 = vst [vmem:[#allocation112_spill] sm:$0xff] %v9748_v40  ;;  %v1122_v40 = vrot.slane %v9744_v21, 1  ;;  %v9766_v33 = vsel %vm765_vm3, %v14874_v38, 0.0  ;;  %14879 = vst [vmem:[#allocation117_spill] sm:$0xff] %v9780_v2  ;;  %v14880_v15 = vld [vmem:[#allocation9_spill] sm:$0xff] }
 0x1b7   :  { %14875 = vst [vmem:[#allocation33_spill] sm:$0xff] %v9766_v33  ;;  %v9777_v56 = vsel %vm1081_vm4, %v1125_v3, %v1127_v46  ;;  %v9784_v38 = vsel %vm765_vm3, %v14880_v15, 0.0  ;;  %14882 = vst [vmem:[#allocation9_spill] sm:$0xff] %v9788_v23  ;;  %v9803_v48 = vsel %vm1081_vm4, %v1124_v52, %v1125_v3  ;;  %v14894_v3 = vld [vmem:[#allocation46_spill] sm:$0xff] }
 0x1b8   :  { %6712 = vrot.lane.b32.xlu1 %v6711_v28, %s8143_s1  ;;  %v6726_v28 = vpack.i.bf16 %v9751_v26, %v9739_v14  ;;  %v9772_v1 = vpop.permute.xlu1 %6482  ;;  %14878 = vst [vmem:[#allocation116_spill] sm:$0xff] %v9777_v56  ;;  %v14884_v26 = vld [vmem:[#allocation32_spill] sm:$0xff]  ;;  %v14885_v14 = vld [vmem:[#allocation26_spill] sm:$0xff]  ;;  %v9800_v15 = vsel %vm1081_vm4, %v1120_v20, %v1122_v40  ;;  %v14893_v40 = vld [vmem:[#allocation41_spill] sm:$0xff]  ;;  %v9816_v52 = vsel %vm765_vm3, %v14894_v3, 0.0 }
 0x1b9   :  { %6702 = vrot.lane.b32.xlu0 %v6701_v53, %s8143_s1  ;;  %14876 = vst [vmem:[#allocation114_spill] sm:$0xff] %v9772_v1  ;;  %v9774_v53 = vpop.permute.xlu0 %6477  ;;  %v1135_v1 = vrot.slane %v14883_v39, 1  ;;  %v1139_v46 = vrot.slane %v14884_v26, 1  ;;  %v9796_v43 = vsel %vm765_vm3, %v14885_v14, 0.0  ;;  %14886 = vst [vmem:[#allocation37_spill] sm:$0xff] %v9800_v15  ;;  %v1134_v39 = vrot.slane %v14889_v24, 1 }
 0x1ba   :  { %14877 = vst [vmem:[#allocation115_spill] sm:$0xff] %v9774_v53  ;;  %v1137_v53 = vrot.slane %v9766_v33, 1  ;;  %14887 = vst [vmem:[#allocation26_spill] sm:$0xff] %v9803_v48  ;;  %v1132_v33 = vrot.slane %v9784_v38, 1  ;;  %v1145_v26 = vrot.slane %v14890_v19, 1  ;;  %v14891_v14 = vld [vmem:[#allocation40_spill] sm:$0xff]  ;;  %v6741_v19 = vpack.i.bf16 %v9780_v2, %v9777_v56 }
 0x1bb   :  { %v1149_v21 = vrot.slane %v14891_v14, 1  ;;  %v1142_v20 = vrot.slane %v9796_v43, 1  ;;  %v1144_v16 = vrot.slane %v14893_v40, 1  ;;  %14895 = vst [vmem:[#allocation46_spill] sm:$0xff] %v9816_v52  ;;  %v6736_v14 = vpack.i.bf16 %v9803_v48, %v9800_v15 }
 0x1bc   :  { %6722 = vrot.lane.b32.xlu1 %v6721_v59, %s8143_s1  ;;  %v1140_v59 = vrot.slane %v14888_v34, 1  ;;  %v9818_v34 = vpop.permute.xlu1 %6492  ;;  %v9842_v2 = vsel %vm1081_vm4, %v1130_v31, %v1132_v33 }
 0x1bd   :  { %6717 = vrot.lane.b32.xlu0 %v6716_v49, %s8143_s1  ;;  %v1150_v49 = vrot.slane %v14892_v17, 1  ;;  %14896 = vst [vmem:[#allocation118_spill] sm:$0xff] %v9818_v34  ;;  %v9825_v23 = vpop.permute.xlu0 %6487  ;;  %v9829_v17 = vsel %vm1081_vm4, %v1135_v1, %v1137_v53  ;;  %v9835_v34 = vsel %vm1081_vm4, %v1134_v39, %v1135_v1  ;;  %14903 = vst [vmem:[#allocation123_spill] sm:$0xff] %v9842_v2  ;;  %v1157_v53 = vrot.slane %v9816_v52, 1 }
 0x1be   :  { %14897 = vst [vmem:[#allocation119_spill] sm:$0xff] %v9825_v23  ;;  %14898 = vst [vmem:[#allocation120_spill] sm:$0xff] %v9829_v17  ;;  %v9832_v3 = vsel %vm1081_vm4, %v1139_v46, %v1140_v59  ;;  %v9845_v23 = vsel %vm1081_vm4, %v1145_v26, %v1147_v27  ;;  %v9853_v1 = vsel %vm1081_vm4, %v1140_v59, %v1142_v20  ;;  %v14910_v27 = vld [vmem:[#allocation49_spill] sm:$0xff] }
 0x1bf   :  { %14899 = vst [vmem:[#allocation121_spill] sm:$0xff] %v9832_v3  ;;  %14900 = vst [vmem:[#allocation122_spill] sm:$0xff] %v9835_v34  ;;  %v9850_v46 = vsel %vm1081_vm4, %v1149_v21, %v1150_v49  ;;  %v9856_v39 = vsel %vm1081_vm4, %v1144_v16, %v1145_v26  ;;  %v6751_v33 = vpack.i.bf16 %v9832_v3, %v9829_v17  ;;  %v9865_v15 = vsel %vm765_vm3, %v14910_v27, 0.0  ;;  %v14915_v27 = vld [vmem:[#allocation50_spill] sm:$0xff] }
 0x1c0   :  { %6732 = vrot.lane.b32.xlu1 %v6731_v10, %s8143_s1  ;;  %v14901_v10 = vld [vmem:[#allocation36_spill] sm:$0xff]  ;;  %14904 = vst [vmem:[#allocation124_spill] sm:$0xff] %v9845_v23  ;;  %14906 = vst [vmem:[#allocation125_spill] sm:$0xff] %v9850_v46  ;;  %v9867_v21 = vpop.permute.xlu1 %6502  ;;  %v6746_v16 = vpack.i.bf16 %v9835_v34, %v9842_v2  ;;  %v6756_v59 = vpack.i.bf16 %v9856_v39, %v9853_v1  ;;  %v9883_v3 = vsel %vm765_vm3, %v14915_v27, 0.0  ;;  %v14919_v34 = vld [vmem:[#allocation59_spill] sm:$0xff] }
 0x1c1   :  { %6727 = vrot.lane.b32.xlu0 %v6726_v28, %s8143_s1  ;;  %v9839_v40 = vsel %vm765_vm3, %v14901_v10, 0.0  ;;  %v14905_v28 = vld [vmem:[#allocation47_spill] sm:$0xff]  ;;  %14907 = vst [vmem:[#allocation126_spill] sm:$0xff] %v9853_v1  ;;  %14908 = vst [vmem:[#allocation127_spill] sm:$0xff] %v9856_v39  ;;  %v14909_v10 = vld [vmem:[#allocation48_spill] sm:$0xff]  ;;  %v9872_v26 = vpop.permute.xlu0 %6497  ;;  %v1169_v2 = vrot.slane %v14919_v34, 1 }
 0x1c2   :  { %14902 = vst [vmem:[#allocation36_spill] sm:$0xff] %v9839_v40  ;;  %v1155_v56 = vrot.slane %v14905_v28, 1  ;;  %v1154_v48 = vrot.slane %v14909_v10, 1  ;;  %v1152_v31 = vrot.slane %v9839_v40, 1  ;;  %14911 = vst [vmem:[#allocation49_spill] sm:$0xff] %v9865_v15  ;;  %v14922_v39 = vld [vmem:[#allocation52_spill] sm:$0xff] }
 0x1c3   :  { %14912 = vst [vmem:[#allocation128_spill] sm:$0xff] %v9867_v21  ;;  %14913 = vst [vmem:[#allocation129_spill] sm:$0xff] %v9872_v26  ;;  %v14918_v21 = vld [vmem:[#allocation51_spill] sm:$0xff]  ;;  %v1167_v26 = vrot.slane %v9865_v15, 1  ;;  %v1164_v1 = vrot.slane %v14922_v39, 1  ;;  %v14923_v27 = vld [vmem:[#allocation57_spill] sm:$0xff] }
 0x1c4   :  { %6742 = vrot.lane.b32.xlu1 %v6741_v19, %s8143_s1  ;;  %v6761_v19 = vpack.i.bf16 %v9850_v46, %v9845_v23  ;;  %v9879_v20 = vsel %vm1081_vm4, %v1155_v56, %v1157_v53  ;;  %14916 = vst [vmem:[#allocation50_spill] sm:$0xff] %v9883_v3  ;;  %v1165_v17 = vrot.slane %v14918_v21, 1  ;;  %v9893_v46 = vsel %vm1081_vm4, %v1150_v49, %v1152_v31  ;;  %v14921_v53 = vld [vmem:[#allocation58_spill] sm:$0xff]  ;;  %v14926_v34 = vld [vmem:[#allocation65_spill] sm:$0xff] }
 0x1c5   :  { %6737 = vrot.lane.b32.xlu0 %v6736_v14, %s8143_s1  ;;  %14914 = vst [vmem:[#allocation130_spill] sm:$0xff] %v9879_v20  ;;  %v9886_v14 = vsel %vm1081_vm4, %v1154_v48, %v1155_v56  ;;  %14920 = vst [vmem:[#allocation132_spill] sm:$0xff] %v9893_v46  ;;  %v1170_v23 = vrot.slane %v14921_v53, 1  ;;  %v9899_v52 = vsel %vm765_vm3, %v14923_v27, 0.0  ;;  %v14925_v56 = vld [vmem:[#allocation55_spill] sm:$0xff]  ;;  %v1177_v15 = vrot.slane %v9883_v3, 1 }
 0x1c6   :  { %14917 = vst [vmem:[#allocation131_spill] sm:$0xff] %v9886_v14  ;;  %14924 = vst [vmem:[#allocation57_spill] sm:$0xff] %v9899_v52  ;;  %v1175_v48 = vrot.slane %v14925_v56, 1  ;;  %v1179_v21 = vrot.slane %v14926_v34, 1  ;;  %v1172_v31 = vrot.slane %v9899_v52, 1  ;;  %v14929_v53 = vld [vmem:[#allocation56_spill] sm:$0xff]  ;;  %v6766_v34 = vpack.i.bf16 %v9886_v14, %v9893_v46 }
 0x1c7   :  { %v1174_v39 = vrot.slane %v14929_v53, 1  ;;  %v14931_v27 = vld [vmem:[#allocation60_spill] sm:$0xff]  ;;  %v9926_v3 = vsel %vm1081_vm4, %v1169_v2, %v1170_v23 }
 0x1c8   :  { %6752 = vrot.lane.b32.xlu1 %v6751_v33, %s8143_s1  ;;  %v14927_v33 = vld [vmem:[#allocation66_spill] sm:$0xff]  ;;  %v9906_v49 = vpop.permute.xlu1 %6512  ;;  %v9914_v40 = vsel %vm765_vm3, %v14931_v27, 0.0  ;;  %14933 = vst [vmem:[#allocation135_spill] sm:$0xff] %v9926_v3  ;;  %v9932_v27 = vsel %vm1081_vm4, %v1175_v48, %v1177_v15  ;;  %v9944_v2 = vsel %vm1081_vm4, %v1170_v23, %v1172_v31 }
 0x1c9   :  { %6747 = vrot.lane.b32.xlu0 %v6746_v16, %s8143_s1  ;;  %v1180_v28 = vrot.slane %v14927_v33, 1  ;;  %14928 = vst [vmem:[#allocation133_spill] sm:$0xff] %v9906_v49  ;;  %v9910_v10 = vpop.permute.xlu0 %6507  ;;  %v6771_v16 = vpack.i.bf16 %v9718_v55, %v9879_v20  ;;  %v9922_v49 = vsel %vm1081_vm4, %v1165_v17, %v1167_v26  ;;  %14935 = vst [vmem:[#allocation137_spill] sm:$0xff] %v9932_v27  ;;  %v14937_v55 = vld [vmem:[#allocation63_spill] sm:$0xff]  ;;  %v1187_v14 = vrot.slane %v9914_v40, 1  ;;  %v14938_v26 = vld [vmem:[#allocation61_spill] sm:$0xff] }
 0x1ca   :  { %14930 = vst [vmem:[#allocation134_spill] sm:$0xff] %v9910_v10  ;;  %14932 = vst [vmem:[#allocation60_spill] sm:$0xff] %v9922_v49  ;;  %v9929_v10 = vsel %vm1081_vm4, %v1164_v1, %v1165_v17  ;;  %v1185_v20 = vrot.slane %v14937_v55, 1  ;;  %v9941_v46 = vsel %vm765_vm3, %v14938_v26, 0.0  ;;  %v9947_v17 = vsel %vm1081_vm4, %v1174_v39, %v1175_v48  ;;  %v14946_v31 = vld [vmem:[#allocation62_spill] sm:$0xff]  ;;  %v14948_v48 = vld [vmem:[#allocation71_spill] sm:$0xff] }
 0x1cb   :  { %14934 = vst [vmem:[#allocation136_spill] sm:$0xff] %v9929_v10  ;;  %14939 = vst [vmem:[#allocation61_spill] sm:$0xff] %v9941_v46  ;;  %v9954_v15 = vpack.i.bf16 %v9926_v3, %v9922_v49  ;;  %v9966_v39 = vsel %vm765_vm3, %v14946_v31, 0.0  ;;  %v14949_v26 = vld [vmem:[#allocation70_spill] sm:$0xff]  ;;  %v1182_v49 = vrot.slane %v9941_v46, 1  ;;  %v1237_v46 = vrot.slane %v8921_v32, 2 }
 0x1cc   :  { %6762 = vrot.lane.b32.xlu1 %v6761_v19, %s8143_s1  ;;  %v9935_v19 = vsel %vm1081_vm4, %v1179_v21, %v1180_v28  ;;  %14940 = vst [vmem:[#allocation139_spill] sm:$0xff] %v9944_v2  ;;  %14941 = vst [vmem:[#allocation140_spill] sm:$0xff] %v9947_v17  ;;  %v9949_v1 = vpop.permute.xlu1 %6522  ;;  %v6776_v21 = vpack.i.bf16 %v9929_v10, %v9721_v35  ;;  %v1190_v3 = vrot.slane %v14949_v26, 1  ;;  %v14953_v10 = vld [vmem:[#allocation67_spill] sm:$0xff]  ;;  %v14955_v26 = vld [vmem:[#allocation77_spill] sm:$0xff] }
 0x1cd   :  { %6757 = vrot.lane.b32.xlu0 %v6756_v59, %s8143_s1  ;;  %14936 = vst [vmem:[#allocation138_spill] sm:$0xff] %v9935_v19  ;;  %14942 = vst [vmem:[#allocation141_spill] sm:$0xff] %v9949_v1  ;;  %v9960_v59 = vpack.i.bf16 %v9935_v19, %v9932_v27  ;;  %v9962_v23 = vpop.permute.xlu0 %6517  ;;  %v14950_v1 = vld [vmem:[#allocation64_spill] sm:$0xff]  ;;  %v9975_v19 = vpack.i.bf16 %v9947_v17, %v9944_v2  ;;  %v9978_v27 = vsel %vm1081_vm4, %v1185_v20, %v1187_v14  ;;  %v14956_v2 = vld [vmem:[#allocation78_spill] sm:$0xff] }
 0x1ce   :  { %14943 = vst [vmem:[#allocation142_spill] sm:$0xff] %v9954_v15  ;;  %14945 = vst [vmem:[#allocation144_spill] sm:$0xff] %v9962_v23  ;;  %v1184_v35 = vrot.slane %v14950_v1, 1  ;;  %v1195_v31 = vrot.slane %v14953_v10, 1  ;;  %v14954_v23 = vld [vmem:[#allocation69_spill] sm:$0xff]  ;;  %v1199_v55 = vrot.slane %v14955_v26, 1  ;;  %v10002_v32 = vsel %vm1081_vm4, %v1180_v28, %v1182_v49 }
 0x1cf   :  { %14944 = vst [vmem:[#allocation143_spill] sm:$0xff] %v9960_v59  ;;  %14947 = vst [vmem:[#allocation62_spill] sm:$0xff] %v9966_v39  ;;  %v1238_v1 = vrot.slane %v8918_v30, 2  ;;  %v1200_v14 = vrot.slane %v14956_v2, 1  ;;  %v14957_v17 = vld [vmem:[#allocation72_spill] sm:$0xff] }
 0x1d0   :  { %6772 = vrot.lane.b32.xlu1 %v6771_v16, %s8143_s1  ;;  %v1189_v16 = vrot.slane %v14948_v48, 1  ;;  %14951 = vst [vmem:[#allocation145_spill] sm:$0xff] %v9975_v19  ;;  %14952 = vst [vmem:[#allocation146_spill] sm:$0xff] %v9978_v27  ;;  %v1197_v48 = vrot.slane %v9966_v39, 1  ;;  %v9994_v10 = vsel %vm765_vm3, %v14957_v17, 0.0  ;;  %v10005_v30 = vsel %vm1081_vm4, %v1184_v35, %v1185_v20  ;;  %v14963_v17 = vld [vmem:[#allocation68_spill] sm:$0xff] }
 0x1d1   :  { %6767 = vrot.lane.b32.xlu0 %v6766_v34, %s8143_s1  ;;  %v9983_v34 = vsel %vm765_vm3, %v14954_v23, 0.0  ;;  %14958 = vst [vmem:[#allocation69_spill] sm:$0xff] %v9994_v10  ;;  %v1240_v23 = vrot.slane %v9592_v8, 2  ;;  %14960 = vst [vmem:[#allocation147_spill] sm:$0xff] %v10002_v32  ;;  %v1194_v33 = vrot.slane %v14963_v17, 1  ;;  %v14965_v8 = vld [vmem:[#allocation75_spill] sm:$0xff]  ;;  %v10022_v49 = vsel %vm1234_vm5, %v1237_v46, %v1238_v1 }
 0x1d2   :  { %v9999_v26 = vsel %vm1081_vm4, %v1189_v16, %v1190_v3  ;;  %14961 = vst [vmem:[#allocation148_spill] sm:$0xff] %v10005_v30  ;;  %v1205_v53 = vrot.slane %v14965_v8, 1  ;;  %v14967_v16 = vld [vmem:[#allocation73_spill] sm:$0xff]  ;;  %v1207_v28 = vrot.slane %v9994_v10, 1  ;;  %v14968_v35 = vld [vmem:[#allocation82_spill] sm:$0xff] }
 0x1d3   :  { %14959 = vst [vmem:[#allocation72_spill] sm:$0xff] %v9999_v26  ;;  %v10017_v39 = vsel %vm765_vm3, %v14967_v16, 0.0  ;;  %v1210_v20 = vrot.slane %v14968_v35, 1  ;;  %14969 = vst [vmem:[#allocation73_spill] sm:$0xff] %v10022_v49  ;;  %v10034_v16 = vsel %vm1081_vm4, %v1195_v31, %v1197_v48  ;;  %v10057_v46 = vsel %vm1081_vm4, %v1194_v33, %v1195_v31  ;;  %v14986_v33 = vld [vmem:[#allocation79_spill] sm:$0xff] }
 0x1d4   :  { %6782 = vrot.lane.b32.xlu1 %v9954_v15, %s8143_s1  ;;  %v1192_v15 = vrot.slane %v9983_v34, 1  ;;  %v10008_v2 = vpop.permute.xlu1 %6532  ;;  %v10011_v56 = vpop.permute.xlu0 %6527  ;;  %14972 = vst [vmem:[#allocation153_spill] sm:$0xff] %v10034_v16  ;;  %14979 = vst [vmem:[#allocation157_spill] sm:$0xff] %v10057_v46 }
 0x1d5   :  { %6777 = vrot.lane.b32.xlu0 %v6776_v21, %s8143_s1  ;;  %14962 = vst [vmem:[#allocation149_spill] sm:$0xff] %v10008_v2  ;;  %14964 = vst [vmem:[#allocation150_spill] sm:$0xff] %v10011_v56  ;;  %v14966_v21 = vld [vmem:[#allocation83_spill] sm:$0xff]  ;;  %v10025_v2 = vsel %vm1234_vm5, %v1238_v1, %v1240_v23  ;;  %v10031_v56 = vpack.i.bf16 %v9999_v26, %v9978_v27  ;;  %v10045_v1 = vpack.i.bf16 %v10005_v30, %v10002_v32  ;;  %v14975_v26 = vld [vmem:[#allocation76_spill] sm:$0xff] }
 0x1d6   :  { %v1209_v52 = vrot.slane %v14966_v21, 1  ;;  %14970 = vst [vmem:[#allocation151_spill] sm:$0xff] %v10025_v2  ;;  %v10037_v21 = vsel %vm1081_vm4, %v1199_v55, %v1200_v14  ;;  %v1202_v23 = vrot.slane %v10017_v39, 1  ;;  %v14976_v27 = vld [vmem:[#allocation74_spill] sm:$0xff]  ;;  %v10054_v55 = vsel %vm1081_vm4, %v1190_v3, %v1192_v15 }
 0x1d7   :  { %14971 = vst [vmem:[#allocation152_spill] sm:$0xff] %v10031_v56  ;;  %14973 = vst [vmem:[#allocation154_spill] sm:$0xff] %v10037_v21  ;;  %v10051_v48 = vsel %vm765_vm3, %v14976_v27, 0.0  ;;  %v10064_v32 = vsel %vm1081_vm4, %v1205_v53, %v1207_v28  ;;  %v14984_v27 = vld [vmem:[#allocation81_spill] sm:$0xff]  ;;  %v1215_v15 = vrot.slane %v14986_v33, 1  ;;  %v1219_v28 = vrot.slane %v9552_v42, 1 }
 0x1d8   :  { %6792 = vrot.lane.b32.xlu1 %v9960_v59, %s8143_s1  ;;  %14974 = vst [vmem:[#allocation155_spill] sm:$0xff] %v10045_v1  ;;  %v1204_v59 = vrot.slane %v14975_v26, 1  ;;  %14977 = vst [vmem:[#allocation74_spill] sm:$0xff] %v10051_v48  ;;  %v10067_v30 = vsel %vm1081_vm4, %v1209_v52, %v1210_v20  ;;  %v10069_v10 = vpop.permute.xlu1 %6542  ;;  %v10073_v35 = vsel %vm765_vm3, %v14984_v27, 0.0  ;;  %v10077_v3 = vpop.permute.xlu0 %6537  ;;  %v1217_v31 = vrot.slane %v10051_v48, 1  ;;  %v15057_v48 = vld [vmem:[#allocation49_spill] sm:$0xff] }
 0x1d9   :  { %6787 = vrot.lane.b32.xlu0 %v9975_v19, %s8143_s1  ;;  %14978 = vst [vmem:[#allocation156_spill] sm:$0xff] %v10054_v55  ;;  %v10061_v19 = vpack.i.bf16 %v10037_v21, %v10034_v16  ;;  %14981 = vst [vmem:[#allocation159_spill] sm:$0xff] %v10064_v32  ;;  %v1220_v52 = vrot.slane %v9558_v0, 1  ;;  %v10087_v27 = vpack.i.bf16 %v10057_v46, %v10054_v55  ;;  %v1212_v21 = vrot.slane %v10073_v35, 1 }
 0x1da   :  { %14982 = vst [vmem:[#allocation160_spill] sm:$0xff] %v10067_v30  ;;  %14983 = vst [vmem:[#allocation161_spill] sm:$0xff] %v10069_v10  ;;  %v10090_v10 = vsel %vm1081_vm4, %v1200_v14, %v1202_v23  ;;  %v10099_v42 = vsel %vm765_vm3, %v9537_v37, 0.0  ;;  %v10107_v55 = vsel %vm765_vm3, %v9540_v18, 0.0  ;;  %v1225_v14 = vrot.slane %v9546_v54, 1 }
 0x1db   :  { %14980 = vst [vmem:[#allocation158_spill] sm:$0xff] %v10061_v19  ;;  %14985 = vst [vmem:[#allocation81_spill] sm:$0xff] %v10077_v3  ;;  %v10093_v3 = vsel %vm1081_vm4, %v1204_v59, %v1205_v53  ;;  %v10116_v59 = vsel %vm1081_vm4, %v1215_v15, %v1217_v31  ;;  %v10119_v37 = vsel %vm1081_vm4, %v1219_v28, %v1220_v52  ;;  %v1227_v23 = vrot.slane %v10099_v42, 1 }
 0x1dc   :  { %6802 = vrot.lane.b32.xlu1 %v10031_v56, %s8143_s1  ;;  %14987 = vst [vmem:[#allocation162_spill] sm:$0xff] %v10087_v27  ;;  %14988 = vst [vmem:[#allocation163_spill] sm:$0xff] %v10090_v10  ;;  %v14990_v56 = vld [vmem:[#allocation80_spill] sm:$0xff]  ;;  %v10113_v53 = vpack.i.bf16 %v10093_v3, %v10090_v10  ;;  %v1230_v10 = vrot.slane %v9577_v50, 1  ;;  %v10131_v31 = vsel %vm1081_vm4, %v1210_v20, %v1212_v21 }
 0x1dd   :  { %6797 = vrot.lane.b32.xlu0 %v10045_v1, %s8143_s1  ;;  %14989 = vst [vmem:[#allocation164_spill] sm:$0xff] %v10093_v3  ;;  %v1214_v16 = vrot.slane %v14990_v56, 1  ;;  %14991 = vst [vmem:[#allocation165_spill] sm:$0xff] %v10099_v42  ;;  %v10103_v1 = vpack.i.bf16 %v10067_v30, %v10064_v32  ;;  %v1229_v30 = vrot.slane %v9580_v5, 1  ;;  %v1224_v32 = vrot.slane %v9549_v9, 1  ;;  %v15056_v42 = vld [vmem:[#allocation55_spill] sm:$0xff] }
 0x1de   :  { %14993 = vst [vmem:[#allocation167_spill] sm:$0xff] %v10113_v53  ;;  %14994 = vst [vmem:[#allocation168_spill] sm:$0xff] %v10116_v59  ;;  %v10152_v20 = vsel %vm1081_vm4, %v1225_v14, %v1227_v23  ;;  %v1243_v23 = vrot.slane %v8911_v11, 2 }
 0x1df   :  { %14992 = vst [vmem:[#allocation166_spill] sm:$0xff] %v10103_v1  ;;  %14995 = vst [vmem:[#allocation169_spill] sm:$0xff] %v10119_v37  ;;  %v10124_v18 = vpop.permute.xlu1 %6552  ;;  %v10134_v28 = vsel %vm1081_vm4, %v1214_v16, %v1215_v15  ;;  %v10155_v16 = vsel %vm1081_vm4, %v1229_v30, %v1230_v10  ;;  %v10158_v15 = vsel %vm1081_vm4, %v1224_v32, %v1225_v14  ;;  %v1245_v30 = vrot.slane %v9615_v41, 2 }
 0x1e0   :  { %6812 = vrot.lane.b32.xlu1 %v10061_v19, %s8143_s1  ;;  %14996 = vst [vmem:[#allocation170_spill] sm:$0xff] %v10124_v18  ;;  %14997 = vst [vmem:[#allocation171_spill] sm:$0xff] %v10131_v31  ;;  %v10136_v3 = vpop.permute.xlu0 %6547  ;;  %v1222_v19 = vrot.slane %v10107_v55, 1  ;;  %v10143_v18 = vpack.i.bf16 %v10119_v37, %v10116_v59  ;;  %v10149_v21 = vpack.i.bf16 %v10134_v28, %v10131_v31  ;;  %v10166_v59 = vrot.slane %v14847_v6, 2 }
 0x1e1   :  { %6807 = vrot.lane.b32.xlu0 %v10087_v27, %s8143_s1  ;;  %14998 = vst [vmem:[#allocation172_spill] sm:$0xff] %v10134_v28  ;;  %14999 = vst [vmem:[#allocation173_spill] sm:$0xff] %v10136_v3  ;;  %v10170_v31 = vsel %vm765_vm3, %v9572_v45, 0.0  ;;  %v1247_v32 = vrot.slane %v8945_v13, 2  ;;  %v10183_v14 = vpack.i.bf16 %v10155_v16, %v10152_v20 }
 0x1e2   :  { %15000 = vst [vmem:[#allocation174_spill] sm:$0xff] %v10143_v18  ;;  %15001 = vst [vmem:[#allocation175_spill] sm:$0xff] %v10149_v21  ;;  %v1232_v41 = vrot.slane %v10170_v31, 1 }
 0x1e3   :  { %15002 = vst [vmem:[#allocation176_spill] sm:$0xff] %v10152_v20  ;;  %15003 = vst [vmem:[#allocation177_spill] sm:$0xff] %v10155_v16  ;;  %v10163_v37 = vpop.permute.xlu1 %6562 }
 0x1e4   :  { %6822 = vrot.lane.b32.xlu1 %v10103_v1, %s8143_s1  ;;  %15004 = vst [vmem:[#allocation178_spill] sm:$0xff] %v10158_v15  ;;  %v10161_v1 = vsel %vm1081_vm4, %v1220_v52, %v1222_v19  ;;  %15006 = vst [vmem:[#allocation180_spill] sm:$0xff] %v10163_v37  ;;  %v10173_v28 = vpop.permute.xlu0 %6557  ;;  %v1248_v19 = vrot.slane %v8942_v63, 2  ;;  %v1242_v52 = vrot.slane %v8914_v7, 2  ;;  %v1255_v37 = vrot.slane %v9669_v12, 2  ;;  %v15031_v7 = vld [vmem:[#allocation28_spill] sm:$0xff] }
 0x1e5   :  { %6817 = vrot.lane.b32.xlu0 %v10113_v53, %s8143_s1  ;;  %15005 = vst [vmem:[#allocation179_spill] sm:$0xff] %v10161_v1  ;;  %15007 = vst [vmem:[#allocation181_spill] sm:$0xff] %v10166_v59  ;;  %v10189_v45 = vpack.i.bf16 %v10158_v15, %v10161_v1  ;;  %v10197_v53 = vsel %vm1234_vm5, %v1243_v23, %v1245_v30  ;;  %v1257_v15 = vrot.slane %v8988_v25, 2  ;;  %v1258_v12 = vrot.slane %v8996_v22, 2  ;;  %v15023_v25 = vld [vmem:[#allocation30_spill] sm:$0xff]  ;;  %v15037_v63 = vld [vmem:[#allocation33_spill] sm:$0xff] }
 0x1e6   :  { %15008 = vst [vmem:[#allocation182_spill] sm:$0xff] %v10170_v31  ;;  %15009 = vst [vmem:[#allocation183_spill] sm:$0xff] %v10173_v28  ;;  %v1253_v28 = vrot.slane %v8931_v58, 2  ;;  %v10200_v16 = vsel %vm1234_vm5, %v1247_v32, %v1248_v19  ;;  %v10203_v20 = vsel %vm1234_vm5, %v1242_v52, %v1243_v23  ;;  %v1252_v30 = vrot.slane %v8934_v36, 2  ;;  %v15038_v36 = vld [vmem:[#allocation32_spill] sm:$0xff] }
 0x1e7   :  { %15010 = vst [vmem:[#allocation184_spill] sm:$0xff] %v10183_v14  ;;  %15011 = vst [vmem:[#allocation185_spill] sm:$0xff] %v10189_v45  ;;  %v10216_v32 = vsel %vm1081_vm4, %v1230_v10, %v1232_v41  ;;  %v1313_v52 = vrot.slane %v9294_v57, 2  ;;  %v1265_v10 = vrot.slane %v9680_v44, 2  ;;  %v1267_v41 = vrot.slane %v9040_v61, 2 }
 0x1e8   :  { %6832 = vrot.lane.b32.xlu1 %v10143_v18, %s8143_s1  ;;  %v6846_v18 = vpack.i.bf16 %v10022_v49, %v10166_v59  ;;  %15013 = vst [vmem:[#allocation187_spill] sm:$0xff] %v10216_v32  ;;  %v10227_v46 = vsel %vm1234_vm5, %v1253_v28, %v1255_v37  ;;  %v1312_v57 = vrot.slane %v9288_v29, 2  ;;  %v10242_v37 = vsel %vm1234_vm5, %v1252_v30, %v1253_v28  ;;  %v15016_v29 = vld [vmem:[#allocation21_spill] sm:$0xff]  ;;  %v15021_v28 = vld [vmem:[#allocation22_spill] sm:$0xff] }
 0x1e9   :  { %6827 = vrot.lane.b32.xlu0 %v10149_v21, %s8143_s1  ;;  %v1250_v21 = vrot.slane %v9627_v60, 2  ;;  %v6851_v60 = vpack.i.bf16 %v10203_v20, %v10025_v2  ;;  %v1260_v44 = vrot.slane %v9650_v4, 2  ;;  %v1262_v61 = vrot.slane %v15016_v29, 2  ;;  %v15022_v4 = vld [vmem:[#allocation29_spill] sm:$0xff]  ;;  %v15030_v59 = vld [vmem:[#allocation10_spill] sm:$0xff] }
 0x1ea   :  { %v1275_v30 = vrot.slane %v15021_v28, 2  ;;  %v1277_v58 = vrot.slane %v15022_v4, 2  ;;  %v15025_v28 = vld [vmem:[#allocation6_spill] sm:$0xff]  ;;  %v1287_v29 = vrot.slane %v14889_v24, 2  ;;  %v1292_v11 = vrot.slane %v15038_v36, 2 }
 0x1eb   :  { %v10207_v1 = vpop.permute.xlu1 %6572  ;;  %v10239_v27 = vsel %vm1234_vm5, %v1248_v19, %v1250_v21  ;;  %v10255_v21 = vsel %vm1234_vm5, %v1312_v57, %v1313_v52 }
 0x1ec   :  { %6842 = vrot.lane.b32.xlu1 %v10183_v14, %s8143_s1  ;;  %15012 = vst [vmem:[#allocation186_spill] sm:$0xff] %v10207_v1  ;;  %v10218_v23 = vpop.permute.xlu0 %6567  ;;  %v1315_v1 = vrot.slane %v9695_v51, 2  ;;  %v6856_v14 = vpack.i.bf16 %v10200_v16, %v10197_v53  ;;  %v10236_v51 = vsel %vm1234_vm5, %v1257_v15, %v1258_v12  ;;  %15019 = vst [vmem:[#allocation191_spill] sm:$0xff] %v10255_v21 }
 0x1ed   :  { %6837 = vrot.lane.b32.xlu0 %v10189_v45, %s8143_s1  ;;  %15014 = vst [vmem:[#allocation188_spill] sm:$0xff] %v10218_v23  ;;  %v1263_v45 = vrot.slane %v8985_v62, 2  ;;  %v1268_v23 = vrot.slane %v9037_v47, 2  ;;  %v15017_v47 = vld [vmem:[#allocation8_spill] sm:$0xff] }
 0x1ee   :  { %v10252_v15 = vsel %vm1234_vm5, %v1313_v52, %v1315_v1  ;;  %v6866_v52 = vpack.i.bf16 %v10236_v51, %v10227_v46 }
 0x1ef   :  { %v10247_v62 = vpop.permute.xlu1 %6582  ;;  %15018 = vst [vmem:[#allocation190_spill] sm:$0xff] %v10252_v15  ;;  %v10265_v22 = vsel %vm1234_vm5, %v1263_v45, %v1265_v10  ;;  %v10268_v1 = vsel %vm1234_vm5, %v1267_v41, %v1268_v23  ;;  %v10279_v10 = vsel %vm1234_vm5, %v1258_v12, %v1260_v44  ;;  %v1285_v44 = vrot.slane %v9784_v38, 2 }
 0x1f0   :  { %6847 = vrot.lane.b32.xlu1 %v6846_v18, %s8144_s22  ;;  %15015 = vst [vmem:[#allocation189_spill] sm:$0xff] %v10247_v62  ;;  %v1273_v18 = vrot.slane %v15017_v47, 2  ;;  %v10257_v19 = vpop.permute.xlu0 %6577  ;;  %v15024_v47 = vld [vmem:[#allocation101_spill] sm:$0xff]  ;;  %v6861_v62 = vpack.i.bf16 %v10242_v37, %v10239_v27  ;;  %v6876_v41 = vpack.i.bf16 %v10268_v1, %v10265_v22 }
 0x1f1   :  { %1531 = vrot.lane.b32.xlu0 %v10216_v32, %s8143_s1  ;;  %15020 = vst [vmem:[#allocation192_spill] sm:$0xff] %v10257_v19  ;;  %v1278_v32 = vrot.slane %v15023_v25, 2  ;;  %v1270_v57 = vrot.slane %v15024_v47, 2  ;;  %v1272_v19 = vrot.slane %v15025_v28, 2  ;;  %v10284_v47 = vsel %vm1234_vm5, %v1262_v61, %v1263_v45  ;;  %v15027_v28 = vld [vmem:[#allocation27_spill] sm:$0xff] }
 0x1f2   :  { %v1283_v12 = vrot.slane %v15027_v28, 2  ;;  %v6871_v38 = vpack.i.bf16 %v10284_v47, %v10279_v10 }
 0x1f3   :  { %v10290_v4 = vsel %vm1234_vm5, %v1277_v58, %v1278_v32  ;;  %v10304_v45 = vsel %vm1234_vm5, %v1272_v19, %v1273_v18  ;;  %v15029_v58 = vld [vmem:[#allocation34_spill] sm:$0xff]  ;;  %v1295_v19 = vrot.slane %v9796_v43, 2  ;;  %v15035_v43 = vld [vmem:[#allocation41_spill] sm:$0xff] }
 0x1f4   :  { %6857 = vrot.lane.b32.xlu1 %v6856_v14, %s8144_s22  ;;  %v10287_v14 = vsel %vm1234_vm5, %v1273_v18, %v1275_v30  ;;  %v1288_v30 = vrot.slane %v15029_v58, 2  ;;  %v10322_v28 = vsel %vm1234_vm5, %v1283_v12, %v1285_v44  ;;  %v1290_v44 = vrot.slane %v15037_v63, 2  ;;  %v15042_v63 = vld [vmem:[#allocation47_spill] sm:$0xff] }
 0x1f5   :  { %6852 = vrot.lane.b32.xlu0 %v6851_v60, %s8144_s22  ;;  %v10295_v60 = vsel %vm1234_vm5, %v1268_v23, %v1270_v57  ;;  %v1282_v23 = vrot.slane %v15031_v7, 2  ;;  %v6886_v57 = vpack.i.bf16 %v10290_v4, %v10287_v14  ;;  %v15036_v7 = vld [vmem:[#allocation42_spill] sm:$0xff]  ;;  %v1308_v13 = vrot.slane %v15042_v63, 2  ;;  %v15047_v63 = vld [vmem:[#allocation51_spill] sm:$0xff] }
 0x1f6   :  { %v10357_v6 = vsel %vm1234_vm5, %v1288_v30, %v1290_v44  ;;  %v1318_v31 = vrot.slane %v15047_v63, 2 }
 0x1f7   :  { %v10292_v25 = vpop.permute.xlu1 %6592  ;;  %v10301_v61 = vpop.permute.xlu0 %6587  ;;  %v10331_v24 = vsel %vm1234_vm5, %v1282_v23, %v1283_v12  ;;  %v15039_v12 = vld [vmem:[#allocation39_spill] sm:$0xff] }
 0x1f8   :  { %15026 = vst [vmem:[#allocation22_spill] sm:$0xff] %v10292_v25  ;;  %6867 = vrot.lane.b32.xlu1 %v6866_v52, %s8144_s22  ;;  %15028 = vst [vmem:[#allocation101_spill] sm:$0xff] %v10301_v61  ;;  %v1280_v25 = vrot.slane %v15030_v59, 2  ;;  %v6881_v52 = vpack.i.bf16 %v10304_v45, %v10295_v60  ;;  %v15032_v61 = vld [vmem:[#allocation31_spill] sm:$0xff]  ;;  %v1303_v23 = vrot.slane %v15039_v12, 2 }
 0x1f9   :  { %6862 = vrot.lane.b32.xlu0 %v6861_v62, %s8144_s22  ;;  %v1293_v18 = vrot.slane %v15032_v61, 2  ;;  %v10325_v62 = vsel %vm1234_vm5, %v1287_v29, %v1288_v30  ;;  %v15050_v30 = vld [vmem:[#allocation62_spill] sm:$0xff] }
 0x1fa   :  { %v10328_v58 = vsel %vm1234_vm5, %v1278_v32, %v1280_v25  ;;  %v6896_v29 = vpack.i.bf16 %v10325_v62, %v10322_v28 }
 0x1fb   :  { %v10319_v59 = vpop.permute.xlu1 %6602  ;;  %v10334_v61 = vpop.permute.xlu0 %6597  ;;  %v6891_v25 = vpack.i.bf16 %v10331_v24, %v10328_v58  ;;  %v10345_v32 = vsel %vm1234_vm5, %v1293_v18, %v1295_v19  ;;  %v10360_v19 = vsel %vm1234_vm5, %v1292_v11, %v1293_v18 }
 0x1fc   :  { %6877 = vrot.lane.b32.xlu1 %v6876_v41, %s8144_s22  ;;  %15033 = vst [vmem:[#allocation10_spill] sm:$0xff] %v10319_v59  ;;  %15034 = vst [vmem:[#allocation193_spill] sm:$0xff] %v10334_v61  ;;  %v1297_v41 = vrot.slane %v15035_v43, 2  ;;  %v1298_v59 = vrot.slane %v15036_v7, 2  ;;  %v15041_v43 = vld [vmem:[#allocation48_spill] sm:$0xff] }
 0x1fd   :  { %6872 = vrot.lane.b32.xlu0 %v6871_v38, %s8144_s22  ;;  %v15040_v38 = vld [vmem:[#allocation36_spill] sm:$0xff]  ;;  %v1307_v7 = vrot.slane %v15041_v43, 2 }
 0x1fe   :  { %v1305_v61 = vrot.slane %v15040_v38, 2  ;;  %v10354_v36 = vsel %vm1234_vm5, %v1297_v41, %v1298_v59  ;;  %v15045_v38 = vld [vmem:[#allocation40_spill] sm:$0xff] }
 0x1ff   :  { %v1302_v49 = vrot.slane %v15045_v38, 2  ;;  %v15046_v43 = vld [vmem:[#allocation52_spill] sm:$0xff]  ;;  %v6906_v18 = vpack.i.bf16 %v10354_v36, %v10345_v32  ;;  %v10384_v41 = vsel %vm1234_vm5, %v1307_v7, %v1308_v13 }
 0x200   :  { %6887 = vrot.lane.b32.xlu1 %v6886_v57, %s8144_s22  ;;  %v15043_v57 = vld [vmem:[#allocation9_spill] sm:$0xff]  ;;  %v1317_v2 = vrot.slane %v15046_v43, 2 }
 0x201   :  { %6882 = vrot.lane.b32.xlu0 %v6881_v52, %s8144_s22  ;;  %v1300_v3 = vrot.slane %v15043_v57, 2  ;;  %v15048_v52 = vld [vmem:[#allocation46_spill] sm:$0xff]  ;;  %v6901_v57 = vpack.i.bf16 %v10360_v19, %v10357_v6  ;;  %v10394_v63 = vsel %vm1234_vm5, %v1302_v49, %v1303_v23 }
 0x202   :  { %v10363_v12 = vpop.permute.xlu1 %6612  ;;  %v1310_v50 = vrot.slane %v15048_v52, 2  ;;  %v10381_v52 = vsel %vm1234_vm5, %v1303_v23, %v1305_v61  ;;  %v15059_v23 = vld [vmem:[#allocation66_spill] sm:$0xff] }
 0x203   :  { %15044 = vst [vmem:[#allocation33_spill] sm:$0xff] %v10363_v12  ;;  %v10370_v5 = vpop.permute.xlu0 %6607  ;;  %v15052_v12 = vld [vmem:[#allocation57_spill] sm:$0xff]  ;;  %v6916_v49 = vpack.i.bf16 %v10384_v41, %v10381_v52 }
 0x204   :  { %15049 = vst [vmem:[#allocation36_spill] sm:$0xff] %v10370_v5  ;;  %6897 = vrot.lane.b32.xlu1 %v6896_v29, %s8144_s22  ;;  %v15051_v5 = vld [vmem:[#allocation58_spill] sm:$0xff]  ;;  %v1325_v11 = vrot.slane %v15052_v12, 2  ;;  %v10391_v29 = vsel %vm1234_vm5, %v1298_v59, %v1300_v3  ;;  %v10400_v61 = vsel %vm1234_vm5, %v1308_v13, %v1310_v50  ;;  %v1320_v3 = vrot.slane %v15057_v48, 2  ;;  %v15060_v50 = vld [vmem:[#allocation61_spill] sm:$0xff] }
 0x205   :  { %6892 = vrot.lane.b32.xlu0 %v6891_v25, %s8144_s22  ;;  %v1323_v44 = vrot.slane %v15051_v5, 2  ;;  %v10397_v25 = vsel %vm1234_vm5, %v1317_v2, %v1318_v31  ;;  %v15055_v5 = vld [vmem:[#allocation56_spill] sm:$0xff]  ;;  %v15058_v2 = vld [vmem:[#allocation59_spill] sm:$0xff]  ;;  %v1333_v13 = vrot.slane %v15059_v23, 2  ;;  %v1335_v54 = vrot.slane %v15060_v50, 2 }
 0x206   :  { %v10388_v38 = vpop.permute.xlu1 %6622  ;;  %v1327_v12 = vrot.slane %v15055_v5, 2  ;;  %v1322_v59 = vrot.slane %v15058_v2, 2  ;;  %v6911_v7 = vpack.i.bf16 %v10394_v63, %v10391_v29  ;;  %v6921_v48 = vpack.i.bf16 %v10255_v21, %v10400_v61  ;;  %v15061_v2 = vld [vmem:[#allocation64_spill] sm:$0xff]  ;;  %v15062_v5 = vld [vmem:[#allocation63_spill] sm:$0xff] }
 0x207   :  { %15053 = vst [vmem:[#allocation9_spill] sm:$0xff] %v10388_v38  ;;  %v10403_v43 = vpop.permute.xlu0 %6617  ;;  %v1328_v38 = vrot.slane %v15056_v42, 2  ;;  %v1337_v23 = vrot.slane %v15061_v2, 2  ;;  %v1338_v50 = vrot.slane %v15062_v5, 2  ;;  %v10438_v21 = vsel %vm1234_vm5, %v1318_v31, %v1320_v3  ;;  %v15066_v31 = vld [vmem:[#allocation65_spill] sm:$0xff] }
 0x208   :  { %15054 = vst [vmem:[#allocation46_spill] sm:$0xff] %v10403_v43  ;;  %6907 = vrot.lane.b32.xlu1 %v6906_v18, %s8144_s22  ;;  %v6926_v43 = vpack.i.bf16 %v10397_v25, %v10252_v15  ;;  %v10422_v18 = vsel %vm1234_vm5, %v1323_v44, %v1325_v11  ;;  %v10442_v11 = vpack.i.bf16 %v10239_v27, %v10200_v16  ;;  %v1332_v3 = vrot.slane %v15066_v31, 2 }
 0x209   :  { %6902 = vrot.lane.b32.xlu0 %v6901_v57, %s8144_s22  ;;  %v10430_v57 = vpack.i.bf16 %v10197_v53, %v10203_v20  ;;  %v10435_v15 = vsel %vm1234_vm5, %v1327_v12, %v1328_v38  ;;  %v10446_v5 = vsel %vm1234_vm5, %v1322_v59, %v1323_v44  ;;  %v10449_v53 = vsel %vm1234_vm5, %v1333_v13, %v1335_v54  ;;  %v15065_v20 = vld [vmem:[#allocation50_spill] sm:$0xff] }
 0x20a   :  { %v10424_v42 = vpop.permute.xlu1 %6627  ;;  %15063 = vst [vmem:[#allocation62_spill] sm:$0xff] %v10446_v5  ;;  %15064 = vst [vmem:[#allocation57_spill] sm:$0xff] %v10449_v53  ;;  %v1330_v2 = vrot.slane %v15065_v20, 2  ;;  %v10454_v12 = vpack.i.bf16 %v10227_v46, %v10242_v37  ;;  %v10460_v27 = vpack.i.bf16 %v10279_v10, %v10236_v51  ;;  %v10465_v44 = vsel %vm1234_vm5, %v1337_v23, %v1338_v50  ;;  %v15068_v54 = vld [vmem:[#allocation70_spill] sm:$0xff]  ;;  %v15072_v23 = vld [vmem:[#allocation71_spill] sm:$0xff] }
 0x20b   :  { %v10432_v9 = vpop.permute.xlu0 %6632  ;;  %15067 = vst [vmem:[#allocation49_spill] sm:$0xff] %v10465_v44  ;;  %v10470_v59 = vpack.i.bf16 %v10265_v22, %v10284_v47  ;;  %v10476_v37 = vpack.i.bf16 %v10435_v15, %v10422_v18  ;;  %v10480_v51 = vpack.i.bf16 %v10446_v5, %v10438_v21  ;;  %v1347_v10 = vrot.slane %v14963_v17, 2  ;;  %v15071_v22 = vld [vmem:[#allocation67_spill] sm:$0xff]  ;;  %v15277_v5 = vld [vmem:[#allocation65_spill] sm:$0xff] }
 0x20c   :  { %6917 = vrot.lane.b32.xlu1 %v6916_v49, %s8144_s22  ;;  %v1343_v49 = vrot.slane %v15068_v54, 2  ;;  %v1348_v47 = vrot.slane %v15071_v22, 2  ;;  %v1342_v20 = vrot.slane %v15072_v23, 2  ;;  %v10492_v54 = vpack.i.bf16 %v10287_v14, %v10304_v45  ;;  %v15150_v23 = vld [vmem:[#allocation73_spill] sm:$0xff] }
 0x20d   :  { %6912 = vrot.lane.b32.xlu0 %v6911_v7, %s8144_s22  ;;  %15069 = vst [vmem:[#allocation61_spill] sm:$0xff] %v10476_v37  ;;  %15070 = vst [vmem:[#allocation50_spill] sm:$0xff] %v10480_v51  ;;  %v10485_v7 = vpack.i.bf16 %v10295_v60, %v10268_v1  ;;  %v10497_v31 = vpack.i.bf16 %v10465_v44, %v10449_v53  ;;  %v10500_v17 = vsel %vm1234_vm5, %v1328_v38, %v1330_v2 }
 0x20e   :  { %v10462_v16 = vpop.permute.xlu1 %6637  ;;  %v10504_v1 = vpack.i.bf16 %v10328_v58, %v10290_v4  ;;  %v15076_v14 = vrot.slane %v9983_v34, 2  ;;  %v15079_v2 = vrot.slane %v9914_v40, 2  ;;  %v15081_v58 = vld [vmem:[#allocation78_spill] sm:$0xff]  ;;  %v1358_v34 = vrot.slane %v14965_v8, 2 }
 0x20f   :  { %v10472_v46 = vpop.permute.xlu0 %6642  ;;  %15073 = vst [vmem:[#allocation194_spill] sm:$0xff] %v10497_v31  ;;  %v1353_v22 = vrot.slane %v15081_v58, 2  ;;  %v10540_v40 = vpack.i.bf16 %v10357_v6, %v10325_v62  ;;  %v1365_v6 = vrot.slane %v10073_v35, 2  ;;  %v15093_v35 = vrot.slane %v15050_v30, 2  ;;  %v15097_v30 = vld [vmem:[#allocation69_spill] sm:$0xff] }
 0x210   :  { %6927 = vrot.lane.b32.xlu1 %v6926_v43, %s8144_s22  ;;  %v10509_v43 = vsel %vm1234_vm5, %v1332_v3, %v1333_v13  ;;  %v10514_v45 = vsel %vm1234_vm5, %v1343_v49, %v15076_v14  ;;  %v10525_v4 = vsel %vm1234_vm5, %v1338_v50, %v15079_v2  ;;  %v1357_v13 = vrot.slane %v14975_v26, 2  ;;  %v15085_v50 = vld [vmem:[#allocation77_spill] sm:$0xff] }
 0x211   :  { %6922 = vrot.lane.b32.xlu0 %v6921_v48, %s8144_s22  ;;  %15075 = vst [vmem:[#allocation196_spill] sm:$0xff] %v10509_v43  ;;  %15077 = vst [vmem:[#allocation197_spill] sm:$0xff] %v10514_v45  ;;  %v10518_v48 = vpack.i.bf16 %v10322_v28, %v10331_v24  ;;  %v10533_v3 = vsel %vm1234_vm5, %v1347_v10, %v1348_v47  ;;  %v10536_v24 = vsel %vm1234_vm5, %v1342_v20, %v1343_v49 }
 0x212   :  { %v10506_v60 = vpop.permute.xlu1 %6647  ;;  %15080 = vst [vmem:[#allocation199_spill] sm:$0xff] %v10525_v4  ;;  %15082 = vst [vmem:[#allocation200_spill] sm:$0xff] %v10533_v3  ;;  %v10546_v28 = vpack.i.bf16 %v10509_v43, %v10500_v17  ;;  %v1352_v14 = vrot.slane %v15085_v50, 2  ;;  %v10551_v10 = vpack.i.bf16 %v10345_v32, %v10360_v19  ;;  %v10557_v49 = vpack.i.bf16 %v10391_v29, %v10354_v36 }
 0x213   :  { %15074 = vst [vmem:[#allocation195_spill] sm:$0xff] %v10506_v60  ;;  %v10520_v38 = vpop.permute.xlu0 %6652  ;;  %15083 = vst [vmem:[#allocation201_spill] sm:$0xff] %v10536_v24  ;;  %v10564_v20 = vpack.i.bf16 %v10533_v3, %v10514_v45  ;;  %v10568_v8 = vpack.i.bf16 %v10536_v24, %v10525_v4  ;;  %v15090_v32 = vrot.slane %v10017_v39, 2  ;;  %v10578_v36 = vsel %vm1234_vm5, %v1357_v13, %v1358_v34  ;;  %v8058_v3 = vld [vmem:[%s14236_s3] sm:$0xff]  }
 0x214   :  { %15078 = vst [vmem:[#allocation198_spill] sm:$0xff] %v10520_v38  ;;  %6937 = vrot.lane.b32.xlu1 %v10476_v37, %s8144_s22  ;;  %15084 = vst [vmem:[#allocation202_spill] sm:$0xff] %v10546_v28  ;;  %v10583_v29 = vsel %vm1234_vm5, %v1348_v47, %v15093_v35  ;;  %v10587_v50 = vpack.i.bf16 %v10381_v52, %v10394_v63  ;;  %v10592_v39 = vsel %vm1234_vm5, %v1352_v14, %v1353_v22  ;;  %v15099_v35 = vld [vmem:[#allocation83_spill] sm:$0xff] }
 0x215   :  { %6932 = vrot.lane.b32.xlu0 %v10480_v51, %s8144_s22  ;;  %15088 = vst [vmem:[#allocation205_spill] sm:$0xff] %v10564_v20  ;;  %15089 = vst [vmem:[#allocation206_spill] sm:$0xff] %v10568_v8  ;;  %v10573_v19 = vsel %vm1234_vm5, %v1353_v22, %v15090_v32  ;;  %v15096_v32 = vld [vmem:[#allocation82_spill] sm:$0xff]  ;;  %v1367_v13 = vrot.slane %v14990_v56, 2  ;;  %v1368_v58 = vrot.slane %v14986_v33, 2  ;;  %v1360_v45 = vrot.slane %v15097_v30, 2 }
 0x216   :  { %v10553_v2 = vpop.permute.xlu1 %6662  ;;  %15091 = vst [vmem:[#allocation207_spill] sm:$0xff] %v10573_v19  ;;  %15092 = vst [vmem:[#allocation208_spill] sm:$0xff] %v10578_v36  ;;  %v1363_v26 = vrot.slane %v15096_v32, 2  ;;  %v1362_v24 = vrot.slane %v15099_v35, 2  ;;  %v10605_v52 = vpack.i.bf16 %v10400_v61, %v10384_v41  ;;  %v1375_v22 = vrot.slane %v10107_v55, 2  ;;  %v15105_v61 = vld [vmem:[#allocation86_spill] sm:$0xff] }
 0x217   :  { %15086 = vst [vmem:[#allocation203_spill] sm:$0xff] %v10553_v2  ;;  %v10560_v62 = vpop.permute.xlu0 %6657  ;;  %15094 = vst [vmem:[#allocation209_spill] sm:$0xff] %v10583_v29  ;;  %v10612_v14 = vpack.i.bf16 %v10578_v36, %v10573_v19  ;;  %v10616_v30 = vpack.i.bf16 %v10592_v39, %v10583_v29  ;;  %v1373_v33 = vrot.slane %v9558_v0, 2  ;;  %v10625_v55 = vsel %vm1234_vm5, %v1367_v13, %v1368_v58  ;;  %v15106_v56 = vld [vmem:[#allocation85_spill] sm:$0xff]  ;;  %v15107_v19 = vld [vmem:[#allocation74_spill] sm:$0xff] }
 0x218   :  { %15087 = vst [vmem:[#allocation204_spill] sm:$0xff] %v10560_v62  ;;  %6947 = vrot.lane.b32.xlu1 %v10497_v31, %s8144_s22  ;;  %15095 = vst [vmem:[#allocation210_spill] sm:$0xff] %v10592_v39  ;;  %v10622_v41 = vsel %vm1234_vm5, %v1363_v26, %v1365_v6  ;;  %v1377_v35 = vrot.slane %v15105_v61, 2  ;;  %v1378_v32 = vrot.slane %v15106_v56, 2  ;;  %v1370_v36 = vrot.slane %v15107_v19, 2  ;;  %v15114_v19 = vld [vmem:[#allocation165_spill] sm:$0xff] }
 0x219   :  { %6942 = vrot.lane.b32.xlu0 %v10546_v28, %s8144_s22  ;;  %15101 = vst [vmem:[#allocation212_spill] sm:$0xff] %v10612_v14  ;;  %15102 = vst [vmem:[#allocation213_spill] sm:$0xff] %v10616_v30  ;;  %v10633_v39 = vsel %vm1234_vm5, %v1358_v34, %v1360_v45  ;;  %v10636_v0 = vsel %vm1234_vm5, %v1362_v24, %v1363_v26  ;;  %v10645_v13 = vpack.i.bf16 %v10625_v55, %v10622_v41  ;;  %v15121_v61 = vld [vmem:[#allocation92_spill] sm:$0xff] }
 0x21a   :  { %v10598_v47 = vpop.permute.xlu1 %6672  ;;  %15103 = vst [vmem:[#allocation214_spill] sm:$0xff] %v10622_v41  ;;  %15104 = vst [vmem:[#allocation215_spill] sm:$0xff] %v10625_v55  ;;  %v1380_v56 = vrot.slane %v15114_v19, 2  ;;  %v10652_v26 = vpack.i.bf16 %v10636_v0, %v10633_v39  ;;  %v10655_v45 = vsel %vm1234_vm5, %v1373_v33, %v1375_v22  ;;  %v10658_v34 = vsel %vm1234_vm5, %v1377_v35, %v1378_v32  ;;  %v15122_v55 = vld [vmem:[#allocation91_spill] sm:$0xff]  ;;  %v15274_v62 = vld [vmem:[#allocation64_spill] sm:$0xff] }
 0x21b   :  { %15098 = vst [vmem:[#allocation69_spill] sm:$0xff] %v10598_v47  ;;  %v10601_v63 = vpop.permute.xlu0 %6667  ;;  %15109 = vst [vmem:[#allocation216_spill] sm:$0xff] %v10633_v39  ;;  %v1382_v41 = vrot.slane %v15121_v61, 2  ;;  %v10676_v35 = vpack.i.bf16 %v10658_v34, %v10655_v45  ;;  %v15140_v39 = vld [vmem:[#allocation103_spill] sm:$0xff] }
 0x21c   :  { %15100 = vst [vmem:[#allocation211_spill] sm:$0xff] %v10601_v63  ;;  %6957 = vrot.lane.b32.xlu1 %v10564_v20, %s8144_s22  ;;  %15110 = vst [vmem:[#allocation217_spill] sm:$0xff] %v10636_v0  ;;  %v10691_v61 = vsel %vm1234_vm5, %v1378_v32, %v1380_v56  ;;  %v15131_v56 = vld [vmem:[#allocation100_spill] sm:$0xff]  ;;  %v15132_v32 = vld [vmem:[#allocation95_spill] sm:$0xff] }
 0x21d   :  { %6952 = vrot.lane.b32.xlu0 %v10568_v8, %s8144_s22  ;;  %v15111_v8 = vld [vmem:[#allocation87_spill] sm:$0xff]  ;;  %15113 = vst [vmem:[#allocation219_spill] sm:$0xff] %v10645_v13  ;;  %15115 = vst [vmem:[#allocation165_spill] sm:$0xff] %v10652_v26 }
 0x21e   :  { %v10630_v20 = vpop.permute.xlu1 %6682  ;;  %v1372_v6 = vrot.slane %v15111_v8, 2  ;;  %15116 = vst [vmem:[#allocation220_spill] sm:$0xff] %v10655_v45  ;;  %15117 = vst [vmem:[#allocation221_spill] sm:$0xff] %v10658_v34  ;;  %v10663_v8 = vsel %vm1234_vm5, %v1368_v58, %v1370_v36  ;;  %v15126_v58 = vld [vmem:[#allocation182_spill] sm:$0xff]  ;;  %v7001_v34 = vpack.i.bf16 %v15132_v32, %v15131_v56 }
 0x21f   :  { %15108 = vst [vmem:[#allocation74_spill] sm:$0xff] %v10630_v20  ;;  %v10639_v29 = vpop.permute.xlu0 %6677  ;;  %15119 = vst [vmem:[#allocation223_spill] sm:$0xff] %v10663_v8  ;;  %v1385_v36 = vrot.slane %v15126_v58, 2  ;;  %v15139_v56 = vld [vmem:[#allocation98_spill] sm:$0xff]  ;;  %v15245_v20 = vld [vmem:[#allocation15_spill] sm:$0xff] }
 0x220   :  { %15112 = vst [vmem:[#allocation218_spill] sm:$0xff] %v10639_v29  ;;  %6967 = vrot.lane.b32.xlu1 %v10612_v14, %s8144_s22  ;;  %v10666_v19 = vsel %vm1234_vm5, %v1372_v6, %v1373_v33  ;;  %15124 = vst [vmem:[#allocation226_spill] sm:$0xff] %v10676_v35  ;;  %v8057_v14 = vld [vmem:[%s14236_s3 + $0x8] sm:$0xff]  }
 0x221   :  { %6962 = vrot.lane.b32.xlu0 %v10616_v30, %s8144_s22  ;;  %15120 = vst [vmem:[#allocation224_spill] sm:$0xff] %v10666_v19  ;;  %v1383_v30 = vrot.slane %v15122_v55, 2  ;;  %v10682_v33 = vpack.i.bf16 %v10666_v19, %v10663_v8  ;;  %15128 = vst [vmem:[#allocation228_spill] sm:$0xff] %v10691_v61  ;;  %v15136_v8 = vld [vmem:[#allocation93_spill] sm:$0xff] }
 0x222   :  { %v10660_v24 = vpop.permute.xlu1 %6692 }
 0x223   :  { %15118 = vst [vmem:[#allocation222_spill] sm:$0xff] %v10660_v24  ;;  %v10670_v0 = vpop.permute.xlu0 %6687  ;;  %15125 = vst [vmem:[#allocation227_spill] sm:$0xff] %v10682_v33  ;;  %v10688_v6 = vsel %vm1234_vm5, %v1382_v41, %v1383_v30  ;;  %v10700_v45 = vsel %vm1234_vm5, %v1383_v30, %v1385_v36  ;;  %v15133_v36 = vld [vmem:[#allocation99_spill] sm:$0xff] }
 0x224   :  { %15123 = vst [vmem:[#allocation225_spill] sm:$0xff] %v10670_v0  ;;  %6977 = vrot.lane.b32.xlu1 %v10645_v13, %s8144_s22  ;;  %15127 = vst [vmem:[#allocation182_spill] sm:$0xff] %v10688_v6  ;;  %v10704_v58 = vpack.i.bf16 %v10688_v6, %v10691_v61  ;;  %v15134_v6 = vld [vmem:[#allocation106_spill] sm:$0xff]  ;;  %v8056_v0 = vld [vmem:[%s14236_s3 + $0x10] ss:$0 sps:$4 sm:$0x33]  }
 0x225   :  { %6972 = vrot.lane.b32.xlu0 %v10652_v26, %s8144_s22  ;;  %15129 = vst [vmem:[#allocation229_spill] sm:$0xff] %v10700_v45  ;;  %v7011_v61 = vpack.i.bf16 %v15134_v6, %v15133_v36  ;;  %v15138_v26 = vld [vmem:[#allocation97_spill] sm:$0xff]  ;;  %v15141_v6 = vld [vmem:[#allocation110_spill] sm:$0xff]  ;;  %6447 = vmatprep.subr.msk.bf16.mxu0 %vm3564_vm6, %v8056_v0  ;;  %s8148_s3 = smov 32  }
 0x226   :  { %v10685_v22 = vpop.permute.xlu1 %6707  ;;  %15130 = vst [vmem:[#allocation230_spill] sm:$0xff] %v10704_v58  ;;  %v7006_v32 = vpack.i.bf16 %v15139_v56, %v15138_v26  ;;  %v7021_v36 = vpack.i.bf16 %v15141_v6, %v15140_v39  ;;  %v3566_v26 = vsel %vm3564_vm6, %v8056_v0, 0  ;;  %6448 = vmatprep.subr.msk.bf16.mxu1 %vm3564_vm6, %v8056_v0  ;;  %v15145_v39 = vld [vmem:[#allocation113_spill] sm:$0xff]  ;;  %v15146_v6 = vld [vmem:[#allocation108_spill] sm:$0xff] }
 0x227   :  { %v10693_v55 = vpop.permute.xlu0 %6697  ;;  %6346 = vmatpush3.bf16.msra.mxu0 %v3566_v26  ;;  %6444 = vmatpush3.bf16.msra.mxu1 %v3566_v26  ;;  %v15149_v26 = vld [vmem:[#allocation151_spill] sm:$0xff] }
 0x228   :  { %6987 = vrot.lane.b32.xlu1 %v10676_v35, %s8144_s22  ;;  %v15135_v35 = vld [vmem:[#allocation94_spill] sm:$0xff]  ;;  %6347 = vmatprep.subr.bf16.mxu0 %v8057_v14  ;;  %v15151_v28 = vpack.i.bf16 %v15149_v26, %v15150_v23 }
 0x229   :  { %6982 = vrot.lane.b32.xlu0 %v10682_v33, %s8144_s22  ;;  %6442 = vmatprep.subr.bf16.mxu1 %v8057_v14 }
 0x22a   :  { %v10706_v41 = vpop.permute.xlu1 %6712 }
 0x22b   :  { %v10708_v19 = vpop.permute.xlu0 %6702  ;;  %6348 = vmatpush3.bf16.msra.mxu0 %v8057_v14  ;;  %6445 = vmatpush3.bf16.msra.mxu1 %v8057_v14 }
 0x22c   :  { %1714 = vrot.lane.b32.xlu1 %v10700_v45, %s8144_s22  ;;  %v15137_v45 = vpack.i.bf16 %v15135_v35, %v15136_v8  ;;  %v15142_v8 = vld [vmem:[#allocation107_spill] sm:$0xff]  ;;  %6349 = vmatprep.subr.bf16.mxu0 %v8058_v3 }
 0x22d   :  { %6992 = vrot.lane.b32.xlu0 %v10704_v58, %s8144_s22  ;;  %6443 = vmatprep.subr.bf16.mxu1 %v8058_v3 }
 0x22e   :  { %v10716_v33 = vpop.permute.xlu1 %6722 }
 0x22f   :  { %v10718_v30 = vpop.permute.xlu0 %6717  ;;  %6350 = vmatpush3.bf16.msra.mxu0 %v8058_v3  ;;  %6446 = vmatpush3.bf16.msra.mxu1 %v8058_v3 }
 0x230   :  { %7002 = vrot.lane.b32.xlu1 %v7001_v34, %s8145_s23 }
 0x231   :  { %6997 = vrot.lane.b32.xlu0 %v15137_v45, %s8145_s23  ;;  %v15143_v45 = vld [vmem:[#allocation102_spill] sm:$0xff] }
 0x232   :  { %v10729_v13 = vpop.permute.xlu1 %6732  ;;  %v7016_v35 = vpack.i.bf16 %v15143_v45, %v15142_v8  ;;  %v7026_v8 = vpack.i.bf16 %v15146_v6, %v15145_v39 }
 0x233   :  { %v10731_v58 = vpop.permute.xlu0 %6727 }
 0x234   :  { %7012 = vrot.lane.b32.xlu1 %v7011_v61, %s8145_s23  ;;  %v6729_v29 = vunpack.i.l.bf16 %v10731_v58 }
 0x235   :  { %7007 = vrot.lane.b32.xlu0 %v7006_v32, %s8145_s23 }
 0x236   :  { %v10742_v56 = vpop.permute.xlu1 %6742 }
 0x237   :  { %15144 = vst [vmem:[#allocation100_spill] sm:$0xff] %v10742_v56  ;;  %v10744_v24 = vpop.permute.xlu0 %6737 }
 0x238   :  { %7022 = vrot.lane.b32.xlu1 %v7021_v36, %s8145_s23 }
 0x239   :  { %7017 = vrot.lane.b32.xlu0 %v7016_v35, %s8145_s23 }
 0x23a   :  { %v10753_v45 = vpop.permute.xlu1 %6752 }
 0x23b   :  { %15147 = vst [vmem:[#allocation95_spill] sm:$0xff] %v10753_v45  ;;  %v10755_v0 = vpop.permute.xlu0 %6747  ;;  %v15207_v45 = vld [vmem:[#allocation111_spill] sm:$0xff] }
 0x23c   :  { %15148 = vst [vmem:[#allocation99_spill] sm:$0xff] %v10755_v0  ;;  %7032 = vrot.lane.b32.xlu1 %v15151_v28, %s8146_s30 }
 0x23d   :  { %7027 = vrot.lane.b32.xlu0 %v7026_v8, %s8145_s23 }
 0x23e   :  { %v10765_v39 = vpop.permute.xlu1 %6762 }
 0x23f   :  { %15152 = vst [vmem:[#allocation106_spill] sm:$0xff] %v10765_v39  ;;  %v10767_v6 = vpop.permute.xlu0 %6757 }
 0x240   :  { %15153 = vst [vmem:[#allocation94_spill] sm:$0xff] %v10767_v6  ;;  %7042 = vrot.lane.b32.xlu1 %v7001_v34, %s8147_s8  ;;  %v15189_v6 = vld [vmem:[#allocation121_spill] sm:$0xff] }
 0x241   :  { %7037 = vrot.lane.b32.xlu0 %v10430_v57, %s8146_s30 }
 0x242   :  { %v10772_v14 = vpop.permute.xlu1 %6772 }
 0x243   :  { %15154 = vst [vmem:[#allocation93_spill] sm:$0xff] %v10772_v14  ;;  %v10774_v23 = vpop.permute.xlu0 %6767 }
 0x244   :  { %15155 = vst [vmem:[#allocation97_spill] sm:$0xff] %v10774_v23  ;;  %7052 = vrot.lane.b32.xlu1 %v10430_v57, %s8148_s3 }
 0x245   :  { %7047 = vrot.lane.b32.xlu0 %v7006_v32, %s8147_s8 }
 0x246   :  { %v10779_v28 = vpop.permute.xlu1 %6782 }
 0x247   :  { %15156 = vst [vmem:[#allocation98_spill] sm:$0xff] %v10779_v28  ;;  %v10781_v26 = vpop.permute.xlu0 %6777 }
 0x248   :  { %15157 = vst [vmem:[#allocation103_spill] sm:$0xff] %v10781_v26  ;;  %7062 = vrot.lane.b32.xlu1 %v10442_v11, %s8146_s30 }
 0x249   :  { %7057 = vrot.lane.b32.xlu0 %v10442_v11, %s8148_s3 }
 0x24a   :  { %v10787_v3 = vpop.permute.xlu1 %6792 }
 0x24b   :  { %15158 = vst [vmem:[#allocation110_spill] sm:$0xff] %v10787_v3  ;;  %v10789_v34 = vpop.permute.xlu0 %6787 }
 0x24c   :  { %15159 = vst [vmem:[#allocation107_spill] sm:$0xff] %v10789_v34  ;;  %7072 = vrot.lane.b32.xlu1 %v7011_v61, %s8147_s8 }
 0x24d   :  { %7067 = vrot.lane.b32.xlu0 %v10454_v12, %s8146_s30 }
 0x24e   :  { %v10794_v57 = vpop.permute.xlu1 %6802 }
 0x24f   :  { %15160 = vst [vmem:[#allocation102_spill] sm:$0xff] %v10794_v57  ;;  %v10796_v32 = vpop.permute.xlu0 %6797 }
 0x250   :  { %15161 = vst [vmem:[#allocation113_spill] sm:$0xff] %v10796_v32  ;;  %7082 = vrot.lane.b32.xlu1 %v10454_v12, %s8148_s3 }
 0x251   :  { %7077 = vrot.lane.b32.xlu0 %v7016_v35, %s8147_s8 }
 0x252   :  { %v10801_v28 = vpop.permute.xlu1 %6812 }
 0x253   :  { %15162 = vst [vmem:[#allocation108_spill] sm:$0xff] %v10801_v28  ;;  %v10803_v11 = vpop.permute.xlu0 %6807  ;;  %v15168_v28 = vld [vmem:[#allocation109_spill] sm:$0xff] }
 0x254   :  { %15163 = vst [vmem:[#allocation151_spill] sm:$0xff] %v10803_v11  ;;  %7092 = vrot.lane.b32.xlu1 %v10460_v27, %s8146_s30  ;;  %v15169_v11 = vld [vmem:[#allocation37_spill] sm:$0xff] }
 0x255   :  { %7087 = vrot.lane.b32.xlu0 %v10460_v27, %s8148_s3  ;;  %v7121_v3 = vpack.i.bf16 %v15169_v11, %v15168_v28  ;;  %v15173_v28 = vld [vmem:[#allocation173_spill] sm:$0xff] }
 0x256   :  { %v10809_v61 = vpop.permute.xlu1 %6822  ;;  %v6550_v34 = vunpack.i.h.bf16 %v15173_v28 }
 0x257   :  { %15164 = vst [vmem:[#allocation73_spill] sm:$0xff] %v10809_v61  ;;  %v10811_v57 = vpop.permute.xlu0 %6817 }
 0x258   :  { %15165 = vst [vmem:[#allocation231_spill] sm:$0xff] %v10811_v57  ;;  %7102 = vrot.lane.b32.xlu1 %v7021_v36, %s8147_s8  ;;  %v6699_v36 = vunpack.i.l.bf16 %v10693_v55 }
 0x259   :  { %7097 = vrot.lane.b32.xlu0 %v10470_v59, %s8146_s30 }
 0x25a   :  { %v10816_v12 = vpop.permute.xlu1 %6832  ;;  %v2902_v11 = vsel %vm92_vm0, 0.0, %v6699_v36 }
 0x25b   :  { %15166 = vst [vmem:[#allocation232_spill] sm:$0xff] %v10816_v12  ;;  %v10818_v35 = vpop.permute.xlu0 %6827 }
 0x25c   :  { %15167 = vst [vmem:[#allocation233_spill] sm:$0xff] %v10818_v35  ;;  %7112 = vrot.lane.b32.xlu1 %v10470_v59, %s8148_s3 }
 0x25d   :  { %7107 = vrot.lane.b32.xlu0 %v7026_v8, %s8147_s8  ;;  %v6549_v8 = vunpack.i.l.bf16 %v15173_v28  ;;  %v15179_v28 = vld [vmem:[#allocation123_spill] sm:$0xff] }
 0x25e   :  { %v10825_v27 = vpop.permute.xlu1 %6842 }
 0x25f   :  { %15170 = vst [vmem:[#allocation109_spill] sm:$0xff] %v10825_v27  ;;  %v10827_v61 = vpop.permute.xlu0 %6837  ;;  %v15174_v27 = vld [vmem:[#allocation26_spill] sm:$0xff] }
 0x260   :  { %15171 = vst [vmem:[#allocation37_spill] sm:$0xff] %v10827_v61  ;;  %7122 = vrot.lane.b32.xlu1 %v7121_v3, %s8145_s23  ;;  %v15175_v61 = vld [vmem:[#allocation116_spill] sm:$0xff] }
 0x261   :  { %7117 = vrot.lane.b32.xlu0 %v10485_v7, %s8148_s3  ;;  %v7141_v57 = vpack.i.bf16 %v15175_v61, %v15174_v27 }
 0x262   :  { %v10833_v12 = vpop.permute.xlu1 %6847 }
 0x263   :  { %v6849_v59 = vunpack.i.l.bf16 %v10833_v12  ;;  %v10836_v35 = vpop.permute.xlu0 %1531 }
 0x264   :  { %15172 = vst [vmem:[#allocation234_spill] sm:$0xff] %v10836_v35  ;;  %7132 = vrot.lane.b32.xlu1 %v10492_v54, %s8146_s30 }
 0x265   :  { %v10845_v32 = vsel %vm2963_vm1, %v2902_v11, %v6849_v59  ;;  %7127 = vrot.lane.b32.xlu0 %v10485_v7, %s8146_s30  ;;  %v15178_v59 = vld [vmem:[#allocation117_spill] sm:$0xff] }
 0x266   :  { %v10850_v35 = vpop.permute.xlu1 %6857  ;;  %v10854_v26 = vsel %vm3025_vm7, %v10845_v32, %v6549_v8  ;;  %v10861_v61 = vsel %vm3025_vm7, %v10845_v32, %v6550_v34  ;;  %v7161_v8 = vpack.i.bf16 %v15179_v28, %v15178_v59  ;;  %v15184_v59 = vld [vmem:[#allocation120_spill] sm:$0xff] }
 0x267   :  { %15176 = vst [vmem:[#allocation173_spill] sm:$0xff] %v10854_v26  ;;  %v10856_v36 = vpop.permute.xlu0 %6852  ;;  %15177 = vst [vmem:[#allocation26_spill] sm:$0xff] %v10861_v61  ;;  %v15183_v61 = vld [vmem:[#allocation122_spill] sm:$0xff] }
 0x268   :  { %7142 = vrot.lane.b32.xlu1 %v7141_v57, %s8147_s8  ;;  %v7181_v28 = vpack.i.bf16 %v15184_v59, %v15183_v61  ;;  %v15190_v61 = vld [vmem:[#allocation126_spill] sm:$0xff] }
 0x269   :  { %7137 = vrot.lane.b32.xlu0 %v7121_v3, %s8147_s8  ;;  %v7201_v59 = vpack.i.bf16 %v15190_v61, %v15189_v6  ;;  %v15196_v6 = vld [vmem:[#allocation124_spill] sm:$0xff] }
 0x26a   :  { %v10864_v27 = vpop.permute.xlu1 %6867 }
 0x26b   :  { %v10866_v7 = vpop.permute.xlu0 %6862 }
 0x26c   :  { %7152 = vrot.lane.b32.xlu1 %v10504_v1, %s8148_s3 }
 0x26d   :  { %7147 = vrot.lane.b32.xlu0 %v10492_v54, %s8148_s3 }
 0x26e   :  { %v10874_v11 = vpop.permute.xlu1 %6877 }
 0x26f   :  { %15180 = vst [vmem:[#allocation116_spill] sm:$0xff] %v10874_v11  ;;  %v10876_v26 = vpop.permute.xlu0 %6872 }
 0x270   :  { %7162 = vrot.lane.b32.xlu1 %v7161_v8, %s8145_s23 }
 0x271   :  { %7157 = vrot.lane.b32.xlu0 %v7141_v57, %s8145_s23 }
 0x272   :  { %v10880_v3 = vpop.permute.xlu1 %6887 }
 0x273   :  { %15181 = vst [vmem:[#allocation117_spill] sm:$0xff] %v10880_v3  ;;  %v10882_v34 = vpop.permute.xlu0 %6882  ;;  %v15209_v3 = vld [vmem:[#allocation114_spill] sm:$0xff] }
 0x274   :  { %15182 = vst [vmem:[#allocation123_spill] sm:$0xff] %v10882_v34  ;;  %7172 = vrot.lane.b32.xlu1 %v10518_v48, %s8146_s30  ;;  %v15237_v34 = vld [vmem:[#allocation20_spill] sm:$0xff] }
 0x275   :  { %7167 = vrot.lane.b32.xlu0 %v10504_v1, %s8146_s30 }
 0x276   :  { %v10890_v54 = vpop.permute.xlu1 %6897 }
 0x277   :  { %15185 = vst [vmem:[#allocation122_spill] sm:$0xff] %v10890_v54  ;;  %v10892_v14 = vpop.permute.xlu0 %6892 }
 0x278   :  { %15186 = vst [vmem:[#allocation120_spill] sm:$0xff] %v10892_v14  ;;  %7182 = vrot.lane.b32.xlu1 %v7181_v28, %s8147_s8  ;;  %v15212_v14 = vld [vmem:[#allocation38_spill] sm:$0xff] }
 0x279   :  { %7177 = vrot.lane.b32.xlu0 %v7161_v8, %s8147_s8  ;;  %v1003_v4 = vsel %vm765_vm3, %v15212_v14, 0.0  ;;  %v15218_v14 = vld [vmem:[#allocation131_spill] sm:$0xff] }
 0x27a   :  { %v10896_v57 = vpop.permute.xlu1 %6907  ;;  %v1394_v0 = vrot.slane %v1003_v4, 1 }
 0x27b   :  { %15187 = vst [vmem:[#allocation235_spill] sm:$0xff] %v10896_v57  ;;  %v10898_v23 = vpop.permute.xlu0 %6902 }
 0x27c   :  { %15188 = vst [vmem:[#allocation236_spill] sm:$0xff] %v10898_v23  ;;  %7192 = vrot.lane.b32.xlu1 %v10540_v40, %s8148_s3  ;;  %v15195_v23 = vld [vmem:[#allocation127_spill] sm:$0xff] }
 0x27d   :  { %7187 = vrot.lane.b32.xlu0 %v10518_v48, %s8148_s3  ;;  %v7221_v61 = vpack.i.bf16 %v15196_v6, %v15195_v23  ;;  %v15202_v23 = vld [vmem:[#allocation132_spill] sm:$0xff] }
 0x27e   :  { %v10906_v1 = vpop.permute.xlu1 %6917 }
 0x27f   :  { %15191 = vst [vmem:[#allocation121_spill] sm:$0xff] %v10906_v1  ;;  %v10908_v39 = vpop.permute.xlu0 %6912 }
 0x280   :  { %15192 = vst [vmem:[#allocation126_spill] sm:$0xff] %v10908_v39  ;;  %7202 = vrot.lane.b32.xlu1 %v7201_v59, %s8145_s23 }
 0x281   :  { %7197 = vrot.lane.b32.xlu0 %v7181_v28, %s8145_s23 }
 0x282   :  { %v10912_v8 = vpop.permute.xlu1 %6927 }
 0x283   :  { %15193 = vst [vmem:[#allocation237_spill] sm:$0xff] %v10912_v8  ;;  %v10914_v57 = vpop.permute.xlu0 %6922 }
 0x284   :  { %15194 = vst [vmem:[#allocation238_spill] sm:$0xff] %v10914_v57  ;;  %7212 = vrot.lane.b32.xlu1 %v10551_v10, %s8146_s30  ;;  %v15201_v57 = vld [vmem:[#allocation125_spill] sm:$0xff] }
 0x285   :  { %7207 = vrot.lane.b32.xlu0 %v10540_v40, %s8146_s30  ;;  %v7241_v6 = vpack.i.bf16 %v15202_v23, %v15201_v57  ;;  %v15208_v23 = vld [vmem:[#allocation112_spill] sm:$0xff] }
 0x286   :  { %v10922_v48 = vpop.permute.xlu1 %6937  ;;  %v15275_v60 = vunpack.i.l.bf16 %v15208_v23 }
 0x287   :  { %15197 = vst [vmem:[#allocation127_spill] sm:$0xff] %v10922_v48  ;;  %v10924_v1 = vpop.permute.xlu0 %6932 }
 0x288   :  { %15198 = vst [vmem:[#allocation124_spill] sm:$0xff] %v10924_v1  ;;  %7222 = vrot.lane.b32.xlu1 %v7221_v61, %s8147_s8  ;;  %v15204_v1 = vld [vmem:[#allocation44_spill] sm:$0xff]  ;;  %v3026_v2 = vsel %vm3025_vm7, %v10845_v32, %v15275_v60 }
 0x289   :  { %7217 = vrot.lane.b32.xlu0 %v7201_v59, %s8147_s8  ;;  %v1391_v48 = vrot.slane %v15204_v1, 1 }
 0x28a   :  { %v10928_v28 = vpop.permute.xlu1 %6947 }
 0x28b   :  { %15199 = vst [vmem:[#allocation239_spill] sm:$0xff] %v10928_v28  ;;  %v10930_v8 = vpop.permute.xlu0 %6942  ;;  %v15206_v28 = vld [vmem:[#allocation43_spill] sm:$0xff] }
 0x28c   :  { %15200 = vst [vmem:[#allocation240_spill] sm:$0xff] %v10930_v8  ;;  %7232 = vrot.lane.b32.xlu1 %v10557_v49, %s8148_s3  ;;  %v1392_v54 = vrot.slane %v15206_v28, 1 }
 0x28d   :  { %7227 = vrot.lane.b32.xlu0 %v10551_v10, %s8148_s3  ;;  %v1404_v10 = vrot.slane %v1003_v4, 2 }
 0x28e   :  { %v10938_v40 = vpop.permute.xlu1 %6957  ;;  %v1393_v31 = vsel %vm1081_vm4, %v1391_v48, %v1392_v54  ;;  %v1395_v37 = vsel %vm1081_vm4, %v1392_v54, %v1394_v0  ;;  %v15231_v48 = vrot.slane %v15204_v1, 2 }
 0x28f   :  { %15203 = vst [vmem:[#allocation125_spill] sm:$0xff] %v10938_v40  ;;  %v10941_v39 = vpop.permute.xlu0 %6952  ;;  %v11015_v11 = vpack.i.bf16 %v1395_v37, %v1393_v31  ;;  %v6714_v37 = vunpack.i.l.bf16 %v10706_v41 }
 0x290   :  { %15205 = vst [vmem:[#allocation132_spill] sm:$0xff] %v10941_v39  ;;  %7242 = vrot.lane.b32.xlu1 %v7241_v6, %s8145_s23  ;;  %v15210_v39 = vld [vmem:[#allocation115_spill] sm:$0xff] }
 0x291   :  { %7237 = vrot.lane.b32.xlu0 %v7221_v61, %s8145_s23 }
 0x292   :  { %v10956_v43 = vpop.permute.xlu1 %6967 }
 0x293   :  { %15211 = vst [vmem:[#allocation44_spill] sm:$0xff] %v10956_v43  ;;  %v10964_v61 = vpop.permute.xlu0 %6962  ;;  %v15219_v43 = vld [vmem:[#allocation130_spill] sm:$0xff] }
 0x294   :  { %15215 = vst [vmem:[#allocation43_spill] sm:$0xff] %v10964_v61  ;;  %7252 = vrot.lane.b32.xlu1 %v10587_v50, %s8146_s30  ;;  %v7261_v44 = vpack.i.bf16 %v15219_v43, %v15218_v14  ;;  %v15270_v61 = vld [vmem:[#allocation135_spill] sm:$0xff] }
 0x295   :  { %7247 = vrot.lane.b32.xlu0 %v10557_v49, %s8146_s30 }
 0x296   :  { %v10981_v51 = vpop.permute.xlu1 %6977 }
 0x297   :  { %15223 = vst [vmem:[#allocation111_spill] sm:$0xff] %v10981_v51  ;;  %v10987_v49 = vpop.permute.xlu0 %6972  ;;  %v6710_v51 = vunpack.i.h.bf16 %v10685_v22 }
 0x298   :  { %15226 = vst [vmem:[#allocation112_spill] sm:$0xff] %v10987_v49  ;;  %7262 = vrot.lane.b32.xlu1 %v7261_v44, %s8147_s8 }
 0x299   :  { %7257 = vrot.lane.b32.xlu0 %v7241_v6, %s8147_s8  ;;  %v15230_v6 = vrot.slane %v15206_v28, 2  ;;  %v6700_v28 = vunpack.i.h.bf16 %v10693_v55  ;;  %v15235_v55 = vmov 0.0  }
 0x29a   :  { %v11002_v40 = vpop.permute.xlu1 %6987 }
 0x29b   :  { %15228 = vst [vmem:[#allocation114_spill] sm:$0xff] %v11002_v40  ;;  %v11008_v0 = vpop.permute.xlu0 %6982  ;;  %v1403_v4 = vsel %vm1234_vm5, %v15231_v48, %v15230_v6  ;;  %v15232_v54 = vmov %v15230_v6  ;;  %v6709_v6 = vunpack.i.l.bf16 %v10685_v22  ;;  %v15236_v22 = vld [vmem:[#allocation52_spill] sm:$0xff]  ;;  %v6724_v40 = vunpack.i.l.bf16 %v10716_v33 }
 0x29c   :  { %15229 = vst [vmem:[#allocation115_spill] sm:$0xff] %v11008_v0  ;;  %7272 = vrot.lane.b32.xlu1 %v10605_v52, %s8148_s3  ;;  %v1405_v53 = vsel %vm1234_vm5, %v15232_v54, %v1404_v10  ;;  %v7301_v31 = vpack.i.bf16 %v15236_v22, %v15235_v55  ;;  %v11054_v10 = vsel %vm92_vm0, %v15237_v34, %v6710_v51  ;;  %v6715_v54 = vunpack.i.h.bf16 %v10706_v41  ;;  %v15240_v34 = vld [vmem:[#allocation96_spill] sm:$0xff] }
 0x29d   :  { %7267 = vrot.lane.b32.xlu0 %v10587_v50, %s8148_s3  ;;  %v11045_v43 = vpack.i.bf16 %v1405_v53, %v1403_v4  ;;  %v6705_v53 = vunpack.i.h.bf16 %v10708_v19  ;;  %v15238_v50 = vld [vmem:[#allocation13_spill] sm:$0xff]  ;;  %v6704_v55 = vunpack.i.l.bf16 %v10708_v19  ;;  %v6725_v41 = vunpack.i.h.bf16 %v10716_v33  ;;  %v15243_v33 = vld [vmem:[#allocation19_spill] sm:$0xff] }
 0x29e   :  { %v11032_v49 = vpop.permute.xlu1 %1714  ;;  %v11063_v1 = vsel %vm92_vm0, %v15238_v50, %v6709_v6  ;;  %v6720_v22 = vunpack.i.h.bf16 %v10718_v30  ;;  %v6719_v50 = vunpack.i.l.bf16 %v10718_v30  ;;  %v6735_v6 = vunpack.i.h.bf16 %v10729_v13  ;;  %v15244_v30 = vld [vmem:[#allocation14_spill] sm:$0xff] }
 0x29f   :  { %15233 = vst [vmem:[#allocation38_spill] sm:$0xff] %v11032_v49  ;;  %v11038_v48 = vpop.permute.xlu0 %6992  ;;  %v6734_v19 = vunpack.i.l.bf16 %v10729_v13  ;;  %v11091_v57 = vsel %vm92_vm0, %v15243_v33, %v6714_v37  ;;  %v11095_v8 = vsel %vm92_vm0, %v15244_v30, %v6705_v53  ;;  %v2904_v14 = vsel %vm92_vm0, %v15245_v20, %v6704_v55  ;;  %v15247_v33 = vld [vmem:[#allocation21_spill] sm:$0xff]  ;;  %v15250_v30 = vld [vmem:[#allocation24_spill] sm:$0xff] }
 0x2a0   :  { %15234 = vst [vmem:[#allocation131_spill] sm:$0xff] %v11038_v48  ;;  %7282 = vrot.lane.b32.xlu1 %v11015_v11, %s8145_s23  ;;  %v15241_v48 = vld [vmem:[#allocation136_spill] sm:$0xff]  ;;  %v11109_v59 = vsel %vm92_vm0, %v15247_v33, %v6725_v41  ;;  %v15249_v53 = vld [vmem:[#allocation25_spill] sm:$0xff]  ;;  %v11117_v63 = vsel %vm92_vm0, %v15250_v30, %v6720_v22  ;;  %v15254_v41 = vld [vmem:[#allocation7_spill] sm:$0xff] }
 0x2a1   :  { %7277 = vrot.lane.b32.xlu0 %v7261_v44, %s8145_s23  ;;  %v15239_v44 = vld [vmem:[#allocation16_spill] sm:$0xff]  ;;  %v7311_v0 = vpack.i.bf16 %v15241_v48, %v15240_v34  ;;  %15248 = vst [vmem:[#allocation130_spill] sm:$0xff] %v11109_v59  ;;  %v15251_v20 = vld [vmem:[#allocation17_spill] sm:$0xff]  ;;  %v11130_v33 = vsel %vm92_vm0, %v15254_v41, %v6734_v19 }
 0x2a2   :  { %v11059_v4 = vpop.permute.xlu1 %7002  ;;  %v11067_v49 = vsel %vm92_vm0, %v15239_v44, %v6700_v28  ;;  %v6730_v28 = vunpack.i.h.bf16 %v10731_v58  ;;  %v15242_v44 = vld [vmem:[#allocation18_spill] sm:$0xff]  ;;  %v11113_v58 = vsel %vm92_vm0, %v15249_v53, %v6724_v40  ;;  %v11121_v55 = vsel %vm92_vm0, %v15251_v20, %v6719_v50  ;;  %15255 = vst [vmem:[#allocation13_spill] sm:$0xff] %v11130_v33  ;;  %v15256_v40 = vld [vmem:[#allocation11_spill] sm:$0xff]  ;;  %v15258_v22 = vld [vmem:[#allocation45_spill] sm:$0xff] }
 0x2a3   :  { %v11070_v51 = vpop.permute.xlu0 %6997  ;;  %v11087_v34 = vsel %vm92_vm0, %v15242_v44, %v6715_v54  ;;  %v15246_v44 = vld [vmem:[#allocation181_spill] sm:$0xff]  ;;  %v15259_v50 = vld [vmem:[#allocation60_spill] sm:$0xff]  ;;  %v7005_v60 = vunpack.i.h.bf16 %v11059_v4 }
 0x2a4   :  { %7292 = vrot.lane.b32.xlu1 %v11045_v43, %s8146_s30  ;;  %v7321_v37 = vpack.i.bf16 %v10397_v25, %v15246_v44  ;;  %v15252_v44 = vld [vmem:[#allocation6_spill] sm:$0xff]  ;;  %v11134_v53 = vsel %vm92_vm0, %v15256_v40, %v6730_v28  ;;  %v7331_v30 = vpack.i.bf16 %v15259_v50, %v15241_v48  ;;  %v15262_v41 = vld [vmem:[#allocation28_spill] sm:$0xff]  ;;  %v6854_v28 = vunpack.i.l.bf16 %v10856_v36 }
 0x2a5   :  { %7287 = vrot.lane.b32.xlu0 %v10605_v52, %s8146_s30  ;;  %v6745_v52 = vunpack.i.h.bf16 %v10742_v56  ;;  %v11126_v47 = vsel %vm92_vm0, %v15252_v44, %v6735_v6  ;;  %15257 = vst [vmem:[#allocation16_spill] sm:$0xff] %v11134_v53  ;;  %v15264_v48 = vld [vmem:[#allocation58_spill] sm:$0xff]  ;;  %v15265_v50 = vld [vmem:[#allocation56_spill] sm:$0xff]  ;;  %v6850_v6 = vunpack.i.h.bf16 %v10833_v12  ;;  %v6859_v44 = vunpack.i.l.bf16 %v10850_v35  ;;  %v15271_v56 = vld [vmem:[#allocation139_spill] sm:$0xff] }
 0x2a6   :  { %v11098_v13 = vpop.permute.xlu1 %7012  ;;  %15253 = vst [vmem:[#allocation20_spill] sm:$0xff] %v11126_v47  ;;  %v7000_v47 = vunpack.i.h.bf16 %v11070_v51  ;;  %v6999_v12 = vunpack.i.l.bf16 %v11070_v51  ;;  %v15278_v53 = vunpack.i.h.bf16 %v15208_v23  ;;  %v15279_v23 = vunpack.i.l.bf16 %v15207_v45 }
 0x2a7   :  { %v11103_v54 = vpop.permute.xlu0 %7007  ;;  %v11152_v40 = vsel %vm92_vm0, %v15262_v41, %v6745_v52  ;;  %v15268_v52 = vld [vmem:[#allocation140_spill] sm:$0xff]  ;;  %v15269_v41 = vld [vmem:[#allocation137_spill] sm:$0xff]  ;;  %v2965_v51 = vsel %vm2963_vm1, %v11067_v49, %v6850_v6 }
 0x2a8   :  { %7302 = vrot.lane.b32.xlu1 %v7301_v31, %s8142_s21  ;;  %v15260_v31 = vld [vmem:[#allocation23_spill] sm:$0xff]  ;;  %15263 = vst [vmem:[#allocation136_spill] sm:$0xff] %v11152_v40  ;;  %v3027_v49 = vsel %vm3025_vm7, %v10845_v32, %v15278_v53  ;;  %v3091_v6 = vsel %vm3090_vm8, %v3026_v2, %v6999_v12  ;;  %v3028_v32 = vsel %vm3025_vm7, %v2965_v51, %v15279_v23  ;;  %v15283_v51 = vld [vmem:[#allocation104_spill] sm:$0xff]  ;;  %v15285_v23 = vunpack.i.l.bf16 %v10424_v42 }
 0x2a9   :  { %7297 = vrot.lane.b32.xlu0 %v15258_v22, %s8142_s21  ;;  %v11142_v20 = vsel %vm92_vm0, %v15260_v31, %v6729_v29  ;;  %v15266_v29 = vld [vmem:[#allocation51_spill] sm:$0xff] }
 0x2aa   :  { %15261 = vst [vmem:[#allocation96_spill] sm:$0xff] %v11142_v20  ;;  %v11146_v19 = vpop.permute.xlu1 %7022  ;;  %v15267_v31 = vld [vmem:[#allocation59_spill] sm:$0xff]  ;;  %v2966_v20 = vsel %vm2963_vm1, %v2904_v14, %v6854_v28 }
 0x2ab   :  { %v11154_v22 = vpop.permute.xlu0 %7017 }
 0x2ac   :  { %7312 = vrot.lane.b32.xlu1 %v7311_v0, %s8147_s8 }
 0x2ad   :  { %7307 = vrot.lane.b32.xlu0 %v11015_v11, %s8147_s8  ;;  %v6860_v11 = vunpack.i.h.bf16 %v10850_v35 }
 0x2ae   :  { %v7033_v0 = vpop.permute.xlu1 %7032 }
 0x2af   :  { %v7035_v38 = vunpack.i.h.bf16 %v7033_v0  ;;  %v7034_v59 = vunpack.i.l.bf16 %v7033_v0  ;;  %v11177_v40 = vpop.permute.xlu0 %7027  ;;  %v2968_v0 = vsel %vm2963_vm1, %v11063_v1, %v6859_v44  ;;  %v3092_v1 = vsel %vm3090_vm8, %v3027_v49, %v7000_v47 }
 0x2b0   :  { %15272 = vst [vmem:[#allocation18_spill] sm:$0xff] %v11177_v40  ;;  %7322 = vrot.lane.b32.xlu1 %v7321_v37, %s8148_s3  ;;  %v6855_v40 = vunpack.i.h.bf16 %v10856_v36  ;;  %v7004_v37 = vunpack.i.l.bf16 %v11059_v4  ;;  %v2969_v14 = vsel %vm2963_vm1, %v11054_v10, %v6860_v11  ;;  %v6870_v47 = vunpack.i.h.bf16 %v10864_v27  ;;  %v15282_v11 = vld [vmem:[#allocation105_spill] sm:$0xff] }
 0x2b1   :  { %7317 = vrot.lane.b32.xlu0 %v11045_v43, %s8148_s3  ;;  %v3156_v53 = vsel %vm3155_vm9, %v3091_v6, %v7034_v59  ;;  %v3157_v43 = vsel %vm3155_vm9, %v3092_v1, %v7035_v38  ;;  %v15280_v10 = vunpack.i.h.bf16 %v15207_v45  ;;  %v15281_v59 = vunpack.i.h.bf16 %v15210_v39 }
 0x2b2   :  { %v7043_v36 = vpop.permute.xlu1 %7042  ;;  %v2967_v2 = vsel %vm2963_vm1, %v11095_v8, %v6855_v40  ;;  %v15284_v49 = vpack.i.bf16 %v15282_v11, %v15283_v51  ;;  %v6864_v6 = vunpack.i.l.bf16 %v10866_v7  ;;  %v3093_v8 = vsel %vm3090_vm8, %v3028_v32, %v7004_v37 }
 0x2b3   :  { %v7038_v44 = vpop.permute.xlu0 %7037  ;;  %v7045_v28 = vunpack.i.h.bf16 %v7043_v36  ;;  %v7044_v35 = vunpack.i.l.bf16 %v7043_v36  ;;  %v3029_v12 = vsel %vm3025_vm7, %v2966_v20, %v15280_v10  ;;  %v3031_v38 = vsel %vm3025_vm7, %v2968_v0, %v15281_v59 }
 0x2b4   :  { %v7040_v4 = vunpack.i.h.bf16 %v7038_v44  ;;  %v7039_v33 = vunpack.i.l.bf16 %v7038_v44  ;;  %7332 = vrot.lane.b32.xlu1 %v7331_v30, %s8145_s23  ;;  %v6869_v30 = vunpack.i.l.bf16 %v10864_v27  ;;  %v3094_v40 = vsel %vm3090_vm8, %v3029_v12, %v7005_v60 }
 0x2b5   :  { %7327 = vrot.lane.b32.xlu0 %v15284_v49, %s8145_s23  ;;  %v3221_v0 = vsel %vm3220_vm10, %v3156_v53, %v15285_v23  ;;  %v15286_v44 = vunpack.i.h.bf16 %v10424_v42  ;;  %v15287_v60 = vpack.i.bf16 %v10438_v21, %v10397_v25  ;;  %v15288_v53 = vld [vmem:[#allocation190_spill] sm:$0xff]  ;;  %v15289_v42 = vld [vmem:[#allocation191_spill] sm:$0xff]  ;;  %v7009_v21 = vunpack.i.l.bf16 %v11103_v54 }
 0x2b6   :  { %v7053_v45 = vpop.permute.xlu1 %7052  ;;  %v3158_v59 = vsel %vm3155_vm9, %v3093_v8, %v7039_v33  ;;  %v3159_v11 = vsel %vm3155_vm9, %v3094_v40, %v7040_v4  ;;  %v3286_v37 = vsel %vm3285_vm11, %v3221_v0, %v7044_v35  ;;  %v15290_v49 = vpack.i.bf16 %v15288_v53, %v15289_v42 }
 0x2b7   :  { %v7055_v1 = vunpack.i.h.bf16 %v7053_v45  ;;  %v7054_v20 = vunpack.i.l.bf16 %v7053_v45  ;;  %v7048_v36 = vpop.permute.xlu0 %7047  ;;  %v3222_v10 = vsel %vm3220_vm10, %v3157_v43, %v15286_v44  ;;  %v7010_v4 = vunpack.i.h.bf16 %v11103_v54 }
 0x2b8   :  { %7342 = vrot.lane.b32.xlu1 %v15287_v60, %s8146_s30  ;;  %v3287_v32 = vsel %vm3285_vm11, %v3222_v10, %v7045_v28  ;;  %v7050_v12 = vunpack.i.h.bf16 %v7048_v36  ;;  %v7049_v51 = vunpack.i.l.bf16 %v7048_v36  ;;  %v15291_v25 = vunpack.i.l.bf16 %v15210_v39 }
 0x2b9   :  { %7337 = vrot.lane.b32.xlu0 %v15290_v49, %s8146_s30  ;;  %v3351_v33 = vsel %vm3350_vm12, %v3286_v37, %v7054_v20  ;;  %v3352_v43 = vsel %vm3350_vm12, %v3287_v32, %v7055_v1  ;;  %v6865_v40 = vunpack.i.h.bf16 %v10866_v7  ;;  %v2970_v45 = vsel %vm2963_vm1, %v11091_v57, %v6864_v6 }
 0x2ba   :  { %v3030_v35 = vsel %vm3025_vm7, %v2967_v2, %v15291_v25  ;;  %v7063_v28 = vpop.permute.xlu1 %7062  ;;  %v3415_v8 = vpack.c.bf16 %v3352_v43, %v3351_v33  ;;  %v15292_v1 = vunpack.i.l.bf16 %v10432_v9  ;;  %v15293_v54 = vunpack.i.h.bf16 %v10432_v9 }
 0x2bb   :  { %v7065_v36 = vunpack.i.h.bf16 %v7063_v28  ;;  %v7064_v23 = vunpack.i.l.bf16 %v7063_v28  ;;  %v7058_v20 = vpop.permute.xlu0 %7057  ;;  %v15294_v7 = vpack.i.bf16 %v15265_v50, %v15264_v48  ;;  %v7015_v57 = vunpack.i.h.bf16 %v11098_v13 }
 0x2bc   :  { %v3223_v0 = vsel %vm3220_vm10, %v3158_v59, %v15292_v1  ;;  %v3224_v39 = vsel %vm3220_vm10, %v3159_v11, %v15293_v54  ;;  %v7060_v44 = vunpack.i.h.bf16 %v7058_v20  ;;  %v7059_v2 = vunpack.i.l.bf16 %v7058_v20  ;;  %6351 = vmatprep.mubr.msk.bf16.mxu0 %vm3467_vm13, %v3415_v8 }
 0x2bd   :  { %7352 = vrot.lane.b32.xlu1 %v15294_v7, %s8142_s21  ;;  %v7014_v6 = vunpack.i.l.bf16 %v11098_v13  ;;  %v3288_v10 = vsel %vm3285_vm11, %v3223_v0, %v7049_v51  ;;  %v3289_v59 = vsel %vm3285_vm11, %v3224_v39, %v7050_v12  ;;  %v15295_v9 = vpack.i.bf16 %v15267_v31, %v15266_v29  ;;  %v15302_v7 = vld [vmem:[#allocation61_spill] sm:$0xff] }
 0x2be   :  { %v3096_v11 = vsel %vm3090_vm8, %v3031_v38, %v7010_v4  ;;  %v3095_v60 = vsel %vm3090_vm8, %v3030_v35, %v7009_v21  ;;  %v3353_v37 = vsel %vm3350_vm12, %v3288_v10, %v7059_v2  ;;  %v3354_v32 = vsel %vm3350_vm12, %v3289_v59, %v7060_v44  ;;  %v7073_v53 = vpop.permute.xlu1 %7072  ;;  %v15297_v21 = vld [vmem:[#allocation145_spill] sm:$0xff]  ;;  %v15303_v59 = vld [vmem:[#allocation50_spill] sm:$0xff] }
 0x2bf   :  { %7347 = vrot.lane.b32.xlu0 %v15295_v9, %s8142_s21  ;;  %v15296_v13 = vunpack.i.l.bf16 %v15209_v3  ;;  %v3160_v12 = vsel %vm3155_vm9, %v3095_v60, %v7064_v23  ;;  %v3161_v42 = vsel %vm3155_vm9, %v3096_v11, %v7065_v36  ;;  %v7068_v49 = vpop.permute.xlu0 %7067  ;;  %v3416_v33 = vpack.c.bf16 %v3354_v32, %v3353_v37  ;;  %v15299_v23 = vld [vmem:[#allocation142_spill] sm:$0xff]  ;;  %v15304_v60 = vld [vmem:[#allocation119_spill] sm:$0xff] }
 0x2c0   :  { %v7075_v43 = vunpack.i.h.bf16 %v7073_v53  ;;  %v7074_v25 = vunpack.i.l.bf16 %v7073_v53  ;;  %v7070_v38 = vunpack.i.h.bf16 %v7068_v49  ;;  %v7069_v4 = vunpack.i.l.bf16 %v7068_v49 }
 0x2c1   :  { %v3032_v51 = vsel %vm3025_vm7, %v2969_v14, %v15296_v13  ;;  %7362 = vrot.lane.b32.xlu1 %v15297_v21, %s8147_s8  ;;  %v6739_v35 = vunpack.i.l.bf16 %v10744_v24  ;;  %v2972_v28 = vsel %vm2963_vm1, %v11121_v55, %v6869_v30  ;;  %v2973_v14 = vsel %vm2963_vm1, %v11117_v63, %v6870_v47  ;;  %6352 = vmatmul.mubr.msk.bf16.vlgmr.msra.gmra.mxu0 %vm3467_vm13, %v3416_v33 }
 0x2c2   :  { %v15298_v8 = vunpack.i.h.bf16 %v15209_v3  ;;  %v2971_v20 = vsel %vm2963_vm1, %v11087_v34, %v6865_v40  ;;  %v6874_v1 = vunpack.i.l.bf16 %v10876_v26  ;;  %v3097_v55 = vsel %vm3090_vm8, %v3032_v51, %v7014_v6  ;;  %v7083_v30 = vpop.permute.xlu1 %7082 }
 0x2c3   :  { %7357 = vrot.lane.b32.xlu0 %v15299_v23, %s8147_s8  ;;  %v15300_v63 = vunpack.i.l.bf16 %v10462_v16  ;;  %v15301_v47 = vunpack.i.h.bf16 %v10462_v16  ;;  %v7085_v0 = vunpack.i.h.bf16 %v7083_v30  ;;  %v7084_v54 = vunpack.i.l.bf16 %v7083_v30  ;;  %v7078_v39 = vpop.permute.xlu0 %7077 }
 0x2c4   :  { %v3033_v36 = vsel %vm3025_vm7, %v2970_v45, %v15298_v8  ;;  %v3162_v44 = vsel %vm3155_vm9, %v3097_v55, %v7069_v4  ;;  %v7080_v6 = vunpack.i.h.bf16 %v7078_v39  ;;  %v7079_v10 = vunpack.i.l.bf16 %v7078_v39 }
 0x2c5   :  { %v3098_v27 = vsel %vm3090_vm8, %v3033_v36, %v7015_v57  ;;  %v3225_v3 = vsel %vm3220_vm10, %v3160_v12, %v15300_v63  ;;  %v3226_v45 = vsel %vm3220_vm10, %v3161_v42, %v15301_v47  ;;  %7372 = vrot.lane.b32.xlu1 %v15302_v7, %s8148_s3  ;;  %v7020_v9 = vunpack.i.h.bf16 %v11154_v22 }
 0x2c6   :  { %v3290_v34 = vsel %vm3285_vm11, %v3225_v3, %v7074_v25  ;;  %v3291_v40 = vsel %vm3285_vm11, %v3226_v45, %v7075_v43  ;;  %v3163_v2 = vsel %vm3155_vm9, %v3098_v27, %v7070_v38  ;;  %v7019_v11 = vunpack.i.l.bf16 %v11154_v22  ;;  %v7093_v53 = vpop.permute.xlu1 %7092 }
 0x2c7   :  { %v3355_v57 = vsel %vm3350_vm12, %v3290_v34, %v7084_v54  ;;  %v3356_v16 = vsel %vm3350_vm12, %v3291_v40, %v7085_v0  ;;  %7367 = vrot.lane.b32.xlu0 %v15303_v59, %s8148_s3  ;;  %v15305_v37 = vunpack.i.h.bf16 %v15304_v60  ;;  %v2974_v51 = vsel %vm2963_vm1, %v11113_v58, %v6874_v1  ;;  %v7088_v43 = vpop.permute.xlu0 %7087  ;;  %v15312_v54 = vld [vmem:[#allocation116_spill] sm:$0xff]  ;;  %v15313_v40 = vld [vmem:[#allocation118_spill] sm:$0xff] }
 0x2c8   :  { %v3417_v13 = vpack.c.bf16 %v3356_v16, %v3355_v57  ;;  %v15306_v12 = vunpack.i.l.bf16 %v15304_v60  ;;  %v7095_v49 = vunpack.i.h.bf16 %v7093_v53  ;;  %v7094_v33 = vunpack.i.l.bf16 %v7093_v53  ;;  %v15316_v16 = vld [vmem:[#allocation62_spill] sm:$0xff] }
 0x2c9   :  { %v3035_v32 = vsel %vm3025_vm7, %v2972_v28, %v15305_v37  ;;  %v15307_v25 = vunpack.i.l.bf16 %v10472_v46  ;;  %v15308_v38 = vunpack.i.h.bf16 %v10472_v46  ;;  %v7090_v21 = vunpack.i.h.bf16 %v7088_v43 }
 0x2ca   :  { %v3034_v42 = vsel %vm3025_vm7, %v2971_v20, %v15306_v12  ;;  %v7089_v28 = vunpack.i.l.bf16 %v7088_v43  ;;  %v15309_v58 = vpack.i.bf16 %v15269_v41, %v15268_v52  ;;  %6355 = vmatprep.mubr.msk.bf16.mxu0 %vm3467_vm13, %v3417_v13  ;;  %v7025_v8 = vunpack.i.h.bf16 %v11146_v19  ;;  %v7103_v27 = vpop.permute.xlu1 %7102 }
 0x2cb   :  { %v3227_v22 = vsel %vm3220_vm10, %v3162_v44, %v15307_v25  ;;  %v3228_v4 = vsel %vm3220_vm10, %v3163_v2, %v15308_v38  ;;  %v7024_v36 = vunpack.i.l.bf16 %v11146_v19  ;;  %v15310_v46 = vpack.i.bf16 %v15271_v56, %v15270_v61  ;;  %v7098_v63 = vpop.permute.xlu0 %7097 }
 0x2cc   :  { %7382 = vrot.lane.b32.xlu1 %v15309_v58, %s8145_s23  ;;  %v3292_v23 = vsel %vm3285_vm11, %v3227_v22, %v7079_v10  ;;  %v3293_v20 = vsel %vm3285_vm11, %v3228_v4, %v7080_v6  ;;  %v3099_v1 = vsel %vm3090_vm8, %v3034_v42, %v7019_v11  ;;  %v3100_v52 = vsel %vm3090_vm8, %v3035_v32, %v7020_v9  ;;  %v15319_v11 = vld [vmem:[#allocation195_spill] sm:$0xff] }
 0x2cd   :  { %7377 = vrot.lane.b32.xlu0 %v15310_v46, %s8145_s23  ;;  %v3357_v41 = vsel %vm3350_vm12, %v3292_v23, %v7089_v28  ;;  %v3358_v55 = vsel %vm3350_vm12, %v3293_v20, %v7090_v21  ;;  %v3164_v19 = vsel %vm3155_vm9, %v3099_v1, %v7094_v33  ;;  %v3165_v30 = vsel %vm3155_vm9, %v3100_v52, %v7095_v49  ;;  %v15322_v33 = vld [vmem:[#allocation66_spill] sm:$0xff]  ;;  %v15324_v21 = vld [vmem:[#allocation55_spill] sm:$0xff]  ;;  %v15328_v46 = vld [vmem:[#allocation96_spill] sm:$0xff] }
 0x2ce   :  { %v3418_v3 = vpack.c.bf16 %v3358_v55, %v3357_v41  ;;  %v7105_v47 = vunpack.i.h.bf16 %v7103_v27  ;;  %v7104_v45 = vunpack.i.l.bf16 %v7103_v27  ;;  %v7100_v0 = vunpack.i.h.bf16 %v7098_v63  ;;  %v15327_v23 = vld [vmem:[#allocation146_spill] sm:$0xff]  ;;  %v15329_v52 = vld [vmem:[#allocation16_spill] sm:$0xff] }
 0x2cf   :  { %v7099_v56 = vunpack.i.l.bf16 %v7098_v63  ;;  %v15311_v61 = vpack.i.bf16 %v10500_v17, %v10435_v15  ;;  %v6880_v39 = vunpack.i.h.bf16 %v15312_v54  ;;  %v6879_v34 = vunpack.i.l.bf16 %v15312_v54  ;;  %v15318_v15 = vld [vmem:[#allocation123_spill] sm:$0xff]  ;;  %v15330_v55 = vld [vmem:[#allocation130_spill] sm:$0xff] }
 0x2d0   :  { %v15314_v44 = vunpack.i.l.bf16 %v15313_v40  ;;  %v15315_v7 = vunpack.i.h.bf16 %v15313_v40  ;;  %v15317_v6 = vpack.i.bf16 %v10422_v18, %v15316_v16  ;;  %6356 = vmatmul.mubr.msk.bf16.gmra.mxu0 %vm3467_vm13, %v3418_v3  ;;  %v6875_v17 = vunpack.i.h.bf16 %v10876_v26  ;;  %v15332_v63 = vld [vmem:[#allocation147_spill] sm:$0xff] }
 0x2d1   :  { %7392 = vrot.lane.b32.xlu1 %v15311_v61, %s8146_s30  ;;  %v6884_v10 = vunpack.i.l.bf16 %v15318_v15  ;;  %v15320_v60 = vunpack.i.l.bf16 %v15319_v11  ;;  %v15321_v32 = vunpack.i.h.bf16 %v15319_v11  ;;  %v15323_v43 = vpack.i.bf16 %v15274_v62, %v15322_v33  ;;  %v15336_v40 = vld [vmem:[#allocation155_spill] sm:$0xff] }
 0x2d2   :  { %v3036_v2 = vsel %vm3025_vm7, %v2973_v14, %v15314_v44  ;;  %v3037_v57 = vsel %vm3025_vm7, %v2974_v51, %v15315_v7  ;;  %7387 = vrot.lane.b32.xlu0 %v15317_v6, %s8146_s30  ;;  %v7113_v14 = vpop.permute.xlu1 %7112  ;;  %v7108_v51 = vpop.permute.xlu0 %7107  ;;  %v15325_v28 = vpack.i.bf16 %v15277_v5, %v15324_v21  ;;  %v2976_v1 = vsel %vm2963_vm1, %v15328_v46, %v6879_v34  ;;  %v15339_v6 = vld [vmem:[#allocation143_spill] sm:$0xff]  ;;  %v15350_v46 = vld [vmem:[#allocation70_spill] sm:$0xff] }
 0x2d3   :  { %v3101_v59 = vsel %vm3090_vm8, %v3036_v2, %v7024_v36  ;;  %v3102_v9 = vsel %vm3090_vm8, %v3037_v57, %v7025_v8  ;;  %v3229_v37 = vsel %vm3220_vm10, %v3164_v19, %v15320_v60  ;;  %v3230_v18 = vsel %vm3220_vm10, %v3165_v30, %v15321_v32  ;;  %v15326_v36 = vld [vmem:[#allocation148_spill] sm:$0xff]  ;;  %v15331_v30 = vld [vmem:[#allocation138_spill] sm:$0xff] }
 0x2d4   :  { %v7115_v53 = vunpack.i.h.bf16 %v7113_v14  ;;  %v7114_v13 = vunpack.i.l.bf16 %v7113_v14  ;;  %v3294_v26 = vsel %vm3285_vm11, %v3229_v37, %v7104_v45  ;;  %v3295_v12 = vsel %vm3285_vm11, %v3230_v18, %v7105_v47  ;;  %v15333_v47 = vld [vmem:[#allocation198_spill] sm:$0xff] }
 0x2d5   :  { %v3166_v42 = vsel %vm3155_vm9, %v3101_v59, %v7099_v56  ;;  %v3167_v49 = vsel %vm3155_vm9, %v3102_v9, %v7100_v0  ;;  %7402 = vrot.lane.b32.xlu1 %v15323_v43, %s8142_s21  ;;  %v7110_v38 = vunpack.i.h.bf16 %v7108_v51  ;;  %v7109_v4 = vunpack.i.l.bf16 %v7108_v51  ;;  %v15338_v2 = vld [vmem:[#allocation18_spill] sm:$0xff]  ;;  %v15344_v43 = vld [vmem:[#allocation57_spill] sm:$0xff] }
 0x2d6   :  { %v3359_v25 = vsel %vm3350_vm12, %v3294_v26, %v7114_v13  ;;  %v3360_v22 = vsel %vm3350_vm12, %v3295_v12, %v7115_v53  ;;  %7397 = vrot.lane.b32.xlu0 %v15325_v28, %s8142_s21  ;;  %v7123_v58 = vpop.permute.xlu1 %7122  ;;  %v7431_v20 = vpack.i.bf16 %v15327_v23, %v15326_v36  ;;  %v2977_v41 = vsel %vm2963_vm1, %v15329_v52, %v6880_v39  ;;  %v7118_v19 = vpop.permute.xlu0 %7117  ;;  %v15337_v39 = vld [vmem:[#allocation13_spill] sm:$0xff]  ;;  %v15340_v51 = vld [vmem:[#allocation194_spill] sm:$0xff]  ;;  %v15342_v12 = vld [vmem:[#allocation199_spill] sm:$0xff] }
 0x2d7   :  { %v3419_v8 = vpack.c.bf16 %v3360_v22, %v3359_v25  ;;  %v2975_v27 = vsel %vm2963_vm1, %v15330_v55, %v6875_v17  ;;  %v7426_v3 = vpack.i.bf16 %v15332_v63, %v15331_v30  ;;  %v15334_v45 = vunpack.i.l.bf16 %v15333_v47  ;;  %v15341_v26 = vld [vmem:[#allocation49_spill] sm:$0xff]  ;;  %v15345_v22 = vld [vmem:[#allocation99_spill] sm:$0xff]  ;;  %v15349_v23 = vld [vmem:[#allocation202_spill] sm:$0xff] }
 0x2d8   :  { %v15335_v56 = vunpack.i.h.bf16 %v15333_v47  ;;  %v7120_v54 = vunpack.i.h.bf16 %v7118_v19  ;;  %v7119_v34 = vunpack.i.l.bf16 %v7118_v19  ;;  %v2978_v44 = vsel %vm2963_vm1, %v15337_v39, %v6884_v10  ;;  %v15351_v52 = vld [vmem:[#allocation68_spill] sm:$0xff]  ;;  %v15352_v19 = vld [vmem:[#allocation129_spill] sm:$0xff] }
 0x2d9   :  { %v3231_v0 = vsel %vm3220_vm10, %v3166_v42, %v15334_v45  ;;  %7412 = vrot.lane.b32.xlu1 %v15336_v40, %s8147_s8  ;;  %6359 = vmatprep.mubr.msk.bf16.mxu0 %vm3467_vm13, %v3419_v8  ;;  %v7030_v7 = vunpack.i.h.bf16 %v15338_v2  ;;  %v7125_v17 = vunpack.i.h.bf16 %v7123_v58  ;;  %v7124_v59 = vunpack.i.l.bf16 %v7123_v58 }
 0x2da   :  { %v3232_v61 = vsel %vm3220_vm10, %v3167_v49, %v15335_v56  ;;  %v3296_v57 = vsel %vm3285_vm11, %v3231_v0, %v7109_v4  ;;  %7407 = vrot.lane.b32.xlu0 %v15339_v6, %s8147_s8  ;;  %v7133_v11 = vpop.permute.xlu1 %7132  ;;  %v7029_v60 = vunpack.i.l.bf16 %v15338_v2  ;;  %v7128_v32 = vpop.permute.xlu0 %7127  ;;  %v7441_v42 = vpack.i.bf16 %v15342_v12, %v15341_v26  ;;  %v15343_v49 = vld [vmem:[#allocation196_spill] sm:$0xff] }
 0x2db   :  { %v3297_v16 = vsel %vm3285_vm11, %v3232_v61, %v7110_v38  ;;  %v3361_v9 = vsel %vm3350_vm12, %v3296_v57, %v7119_v34  ;;  %v7135_v37 = vunpack.i.h.bf16 %v7133_v11  ;;  %v7134_v10 = vunpack.i.l.bf16 %v7133_v11  ;;  %v15346_v4 = vld [vmem:[#allocation128_spill] sm:$0xff]  ;;  %v15355_v57 = vld [vmem:[#allocation117_spill] sm:$0xff] }
 0x2dc   :  { %v3362_v14 = vsel %vm3350_vm12, %v3297_v16, %v7120_v54  ;;  %v7130_v53 = vunpack.i.h.bf16 %v7128_v32  ;;  %v7129_v13 = vunpack.i.l.bf16 %v7128_v32  ;;  %v7436_v25 = vpack.i.bf16 %v15344_v43, %v15343_v49 }
 0x2dd   :  { %v3420_v18 = vpack.c.bf16 %v3362_v14, %v3361_v9  ;;  %7422 = vrot.lane.b32.xlu1 %v15340_v51, %s8148_s3  ;;  %v6750_v38 = vunpack.i.h.bf16 %v15345_v22  ;;  %v15347_v28 = vunpack.i.l.bf16 %v15346_v4  ;;  %v15348_v8 = vunpack.i.h.bf16 %v15346_v4 }
 0x2de   :  { %7417 = vrot.lane.b32.xlu0 %v15349_v23, %s8148_s3  ;;  %v7451_v55 = vpack.i.bf16 %v15351_v52, %v15350_v46  ;;  %v15353_v30 = vunpack.i.l.bf16 %v15352_v19  ;;  %v15354_v47 = vunpack.i.h.bf16 %v15352_v19  ;;  %v7143_v56 = vpop.permute.xlu1 %7142  ;;  %v7138_v39 = vpop.permute.xlu0 %7137  ;;  %v6890_v16 = vunpack.i.h.bf16 %v15355_v57 }
 0x2df   :  { %v3040_v58 = vsel %vm3025_vm7, %v2977_v41, %v15347_v28  ;;  %v3041_v36 = vsel %vm3025_vm7, %v2978_v44, %v15348_v8  ;;  %6360 = vmatmul.mubr.msk.bf16.gmra.mxu0 %vm3467_vm13, %v3420_v18  ;;  %v7145_v2 = vunpack.i.h.bf16 %v7143_v56  ;;  %v7140_v6 = vunpack.i.h.bf16 %v7138_v39 }
 0x2e0   :  { %v3038_v63 = vsel %vm3025_vm7, %v2975_v27, %v15353_v30  ;;  %v3039_v41 = vsel %vm3025_vm7, %v2976_v1, %v15354_v47  ;;  %v3105_v45 = vsel %vm3090_vm8, %v3040_v58, %v7124_v59  ;;  %v3106_v0 = vsel %vm3090_vm8, %v3041_v36, %v7125_v17  ;;  %v15357_v59 = vld [vmem:[#allocation71_spill] sm:$0xff]  ;;  %v15364_v30 = vld [vmem:[#allocation120_spill] sm:$0xff] }
 0x2e1   :  { %v3103_v61 = vsel %vm3090_vm8, %v3038_v63, %v7029_v60  ;;  %v3104_v54 = vsel %vm3090_vm8, %v3039_v41, %v7030_v7  ;;  %v3170_v34 = vsel %vm3155_vm9, %v3105_v45, %v7134_v10  ;;  %v3171_v40 = vsel %vm3155_vm9, %v3106_v0, %v7135_v37  ;;  %7432 = vrot.lane.b32.xlu1 %v7431_v20, %s8145_s23  ;;  %v15356_v7 = vld [vmem:[#allocation63_spill] sm:$0xff] }
 0x2e2   :  { %v3168_v27 = vsel %vm3155_vm9, %v3103_v61, %v7129_v13  ;;  %v3169_v44 = vsel %vm3155_vm9, %v3104_v54, %v7130_v53  ;;  %v7144_v1 = vunpack.i.l.bf16 %v7143_v56  ;;  %v7139_v17 = vunpack.i.l.bf16 %v7138_v39  ;;  %7427 = vrot.lane.b32.xlu0 %v7426_v3, %s8145_s23  ;;  %v15358_v60 = vld [vmem:[#allocation203_spill] sm:$0xff]  ;;  %v7153_v18 = vpop.permute.xlu1 %7152  ;;  %v15361_v53 = vld [vmem:[#allocation204_spill] sm:$0xff]  ;;  %v15367_v61 = vld [vmem:[#allocation30_spill] sm:$0xff] }
 0x2e3   :  { %v7446_v9 = vpack.i.bf16 %v15357_v59, %v15356_v7  ;;  %v6889_v14 = vunpack.i.l.bf16 %v15355_v57  ;;  %v6885_v11 = vunpack.i.h.bf16 %v15318_v15  ;;  %v15359_v37 = vunpack.i.l.bf16 %v15358_v60  ;;  %v7148_v15 = vpop.permute.xlu0 %7147  ;;  %v15365_v56 = vld [vmem:[#allocation100_spill] sm:$0xff] }
 0x2e4   :  { %v15360_v32 = vunpack.i.h.bf16 %v15358_v60  ;;  %v15362_v13 = vunpack.i.l.bf16 %v15361_v53  ;;  %v15363_v51 = vunpack.i.h.bf16 %v15361_v53  ;;  %v7155_v12 = vunpack.i.h.bf16 %v7153_v18 }
 0x2e5   :  { %v3235_v10 = vsel %vm3220_vm10, %v3170_v34, %v15359_v37  ;;  %v7154_v49 = vunpack.i.l.bf16 %v7153_v18  ;;  %v7150_v28 = vunpack.i.h.bf16 %v7148_v15  ;;  %v7149_v58 = vunpack.i.l.bf16 %v7148_v15  ;;  %7442 = vrot.lane.b32.xlu1 %v7441_v42, %s8146_s30 }
 0x2e6   :  { %v3236_v20 = vsel %vm3220_vm10, %v3171_v40, %v15360_v32  ;;  %v3233_v3 = vsel %vm3220_vm10, %v3168_v27, %v15362_v13  ;;  %v3234_v26 = vsel %vm3220_vm10, %v3169_v44, %v15363_v51  ;;  %v3300_v43 = vsel %vm3285_vm11, %v3235_v10, %v7144_v1  ;;  %7437 = vrot.lane.b32.xlu0 %v7436_v25, %s8146_s30  ;;  %v7163_v45 = vpop.permute.xlu1 %7162  ;;  %v15369_v40 = vld [vmem:[#allocation29_spill] sm:$0xff]  ;;  %v15370_v25 = vld [vmem:[#allocation8_spill] sm:$0xff]  ;;  %v15371_v1 = vld [vmem:[#allocation95_spill] sm:$0xff] }
 0x2e7   :  { %v3301_v4 = vsel %vm3285_vm11, %v3236_v20, %v7145_v2  ;;  %v3298_v8 = vsel %vm3285_vm11, %v3233_v3, %v7139_v17  ;;  %v3299_v36 = vsel %vm3285_vm11, %v3234_v26, %v7140_v6  ;;  %v3365_v23 = vsel %vm3350_vm12, %v3300_v43, %v7154_v49  ;;  %v7158_v44 = vpop.permute.xlu0 %7157  ;;  %v15372_v6 = vld [vmem:[#allocation35_spill] sm:$0xff]  ;;  %v15375_v26 = vld [vmem:[#allocation157_spill] sm:$0xff] }
 0x2e8   :  { %v3366_v19 = vsel %vm3350_vm12, %v3301_v4, %v7155_v12  ;;  %v6894_v63 = vunpack.i.l.bf16 %v15364_v30  ;;  %v3363_v47 = vsel %vm3350_vm12, %v3298_v8, %v7149_v58  ;;  %v3364_v41 = vsel %vm3350_vm12, %v3299_v36, %v7150_v28  ;;  %v15376_v12 = vld [vmem:[#allocation153_spill] sm:$0xff]  ;;  %v15380_v58 = vld [vmem:[#allocation152_spill] sm:$0xff] }
 0x2e9   :  { %v3422_v0 = vpack.c.bf16 %v3366_v19, %v3365_v23  ;;  %v15366_v42 = vunpack.i.l.bf16 %v15365_v56  ;;  %v15368_v34 = vunpack.i.h.bf16 %v10744_v24  ;;  %v2918_v27 = vsel %vm92_vm0, %v15370_v25, %v6739_v35  ;;  %7452 = vrot.lane.b32.xlu1 %v7451_v55, %s8142_s21  ;;  %v15373_v24 = vld [vmem:[#allocation20_spill] sm:$0xff]  ;;  %v15377_v49 = vld [vmem:[#allocation133_spill] sm:$0xff] }
 0x2ea   :  { %v3421_v2 = vpack.c.bf16 %v3364_v41, %v3363_v47  ;;  %v6754_v57 = vunpack.i.l.bf16 %v15371_v1  ;;  %v11503_v17 = vsel %vm92_vm0, %v15372_v6, %v6750_v38  ;;  %v6749_v60 = vunpack.i.l.bf16 %v15345_v22  ;;  %7447 = vrot.lane.b32.xlu0 %v7446_v9, %s8142_s21  ;;  %v7173_v55 = vpop.permute.xlu1 %7172  ;;  %v15374_v9 = vld [vmem:[#allocation162_spill] sm:$0xff]  ;;  %v15381_v8 = vld [vmem:[#allocation72_spill] sm:$0xff]  ;;  %v15407_v22 = vld [vmem:[#allocation67_spill] sm:$0xff] }
 0x2eb   :  { %v2920_v54 = vsel %vm92_vm0, %v15367_v61, %v15366_v42  ;;  %v2919_v39 = vsel %vm92_vm0, %v15369_v40, %v15368_v34  ;;  %v2980_v37 = vsel %vm2963_vm1, %v2918_v27, %v6889_v14  ;;  %v2979_v35 = vsel %vm2963_vm1, %v15373_v24, %v6885_v11  ;;  %v7168_v3 = vpop.permute.xlu0 %7167  ;;  %v15382_v36 = vld [vmem:[#allocation156_spill] sm:$0xff] }
 0x2ec   :  { %v2981_v10 = vsel %vm2963_vm1, %v2919_v39, %v6890_v16  ;;  %6363 = vmatprep.mubr.msk.bf16.mxu0 %vm3467_vm13, %v3421_v2  ;;  %v2982_v32 = vsel %vm2963_vm1, %v2920_v54, %v6894_v63  ;;  %v7165_v20 = vunpack.i.h.bf16 %v7163_v45  ;;  %v7164_v38 = vunpack.i.l.bf16 %v7163_v45  ;;  %v15383_v19 = vld [vmem:[#allocation200_spill] sm:$0xff]  ;;  %v15384_v63 = vld [vmem:[#allocation209_spill] sm:$0xff] }
 0x2ed   :  { %6364 = vmatmul.mubr.msk.bf16.gmra.mxu0 %vm3467_vm13, %v3422_v0  ;;  %v7160_v18 = vunpack.i.h.bf16 %v7158_v44  ;;  %v7159_v53 = vunpack.i.l.bf16 %v7158_v44  ;;  %v7175_v13 = vunpack.i.h.bf16 %v7173_v55  ;;  %v7174_v14 = vunpack.i.l.bf16 %v7173_v55  ;;  %7462 = vrot.lane.b32.xlu1 %v15374_v9, %s8147_s8  ;;  %v15385_v0 = vld [vmem:[#allocation134_spill] sm:$0xff] }
 0x2ee   :  { %v7170_v16 = vunpack.i.h.bf16 %v7168_v3  ;;  %v7169_v51 = vunpack.i.l.bf16 %v7168_v3  ;;  %v7481_v11 = vpack.i.bf16 %v15376_v12, %v15375_v26  ;;  %v15378_v15 = vunpack.i.l.bf16 %v15377_v49  ;;  %7457 = vrot.lane.b32.xlu0 %v15380_v58, %s8147_s8  ;;  %v7183_v34 = vpop.permute.xlu1 %7182  ;;  %v15390_v55 = vld [vmem:[#allocation206_spill] sm:$0xff] }
 0x2ef   :  { %v15379_v4 = vunpack.i.h.bf16 %v15377_v49  ;;  %v7476_v23 = vpack.i.bf16 %v15382_v36, %v15381_v8  ;;  %v7491_v47 = vpack.i.bf16 %v15384_v63, %v15383_v19  ;;  %v15386_v56 = vunpack.i.l.bf16 %v15385_v0  ;;  %v7178_v44 = vpop.permute.xlu0 %7177 }
 0x2f0   :  { %v3044_v43 = vsel %vm3025_vm7, %v2981_v10, %v15378_v15  ;;  %v15387_v61 = vunpack.i.h.bf16 %v15385_v0  ;;  %v7185_v10 = vunpack.i.h.bf16 %v7183_v34  ;;  %v7184_v24 = vunpack.i.l.bf16 %v7183_v34  ;;  %v15396_v15 = vld [vmem:[#allocation211_spill] sm:$0xff] }
 0x2f1   :  { %v3045_v28 = vsel %vm3025_vm7, %v2982_v32, %v15379_v4  ;;  %v3109_v41 = vsel %vm3090_vm8, %v3044_v43, %v7164_v38  ;;  %v3042_v42 = vsel %vm3025_vm7, %v2979_v35, %v15386_v56  ;;  %v15388_v35 = vld [vmem:[#allocation205_spill] sm:$0xff]  ;;  %v7179_v38 = vunpack.i.l.bf16 %v7178_v44 }
 0x2f2   :  { %v3110_v45 = vsel %vm3090_vm8, %v3045_v28, %v7165_v20  ;;  %v3043_v54 = vsel %vm3025_vm7, %v2980_v37, %v15387_v61  ;;  %v3107_v40 = vsel %vm3090_vm8, %v3042_v42, %v7159_v53  ;;  %v3174_v25 = vsel %vm3155_vm9, %v3109_v41, %v7174_v14  ;;  %7472 = vrot.lane.b32.xlu1 %v15388_v35, %s8148_s3  ;;  %v15389_v37 = vld [vmem:[#allocation122_spill] sm:$0xff]  ;;  %v15392_v53 = vld [vmem:[#allocation197_spill] sm:$0xff]  ;;  %v7193_v49 = vpop.permute.xlu1 %7192 }
 0x2f3   :  { %v3108_v39 = vsel %vm3090_vm8, %v3043_v54, %v7160_v18  ;;  %v3175_v27 = vsel %vm3155_vm9, %v3110_v45, %v7175_v13  ;;  %v3172_v2 = vsel %vm3155_vm9, %v3107_v40, %v7169_v51  ;;  %v6900_v32 = vunpack.i.h.bf16 %v15389_v37  ;;  %7467 = vrot.lane.b32.xlu0 %v15390_v55, %s8148_s3  ;;  %v15391_v18 = vld [vmem:[#allocation201_spill] sm:$0xff]  ;;  %v15399_v54 = vld [vmem:[#allocation236_spill] sm:$0xff] }
 0x2f4   :  { %v3173_v6 = vsel %vm3155_vm9, %v3108_v39, %v7170_v16  ;;  %v7180_v20 = vunpack.i.h.bf16 %v7178_v44  ;;  %v7486_v13 = vpack.i.bf16 %v15392_v53, %v15391_v18  ;;  %v6899_v14 = vunpack.i.l.bf16 %v15389_v37  ;;  %v15393_v16 = vld [vmem:[#allocation69_spill] sm:$0xff]  ;;  %v15400_v44 = vld [vmem:[#allocation34_spill] sm:$0xff]  ;;  %v15405_v53 = vld [vmem:[#allocation76_spill] sm:$0xff] }
 0x2f5   :  { %v6895_v3 = vunpack.i.h.bf16 %v15364_v30  ;;  %v15394_v51 = vunpack.i.l.bf16 %v15393_v16  ;;  %v15395_v26 = vunpack.i.h.bf16 %v15393_v16  ;;  %v15397_v43 = vunpack.i.l.bf16 %v15396_v15  ;;  %v7188_v30 = vpop.permute.xlu0 %7187  ;;  %v15402_v37 = vld [vmem:[#allocation106_spill] sm:$0xff] }
 0x2f6   :  { %v15398_v28 = vunpack.i.h.bf16 %v15396_v15  ;;  %v7195_v8 = vunpack.i.h.bf16 %v7193_v49  ;;  %v7194_v36 = vunpack.i.l.bf16 %v7193_v49  ;;  %v7190_v41 = vunpack.i.h.bf16 %v7188_v30  ;;  %7482 = vrot.lane.b32.xlu1 %v7481_v11, %s8145_s23  ;;  %v15404_v18 = vld [vmem:[#allocation78_spill] sm:$0xff]  ;;  %v15409_v49 = vld [vmem:[#allocation141_spill] sm:$0xff] }
 0x2f7   :  { %v3239_v9 = vsel %vm3220_vm10, %v3174_v25, %v15394_v51  ;;  %v3240_v12 = vsel %vm3220_vm10, %v3175_v27, %v15395_v26  ;;  %v3237_v4 = vsel %vm3220_vm10, %v3172_v2, %v15397_v43  ;;  %v7189_v45 = vunpack.i.l.bf16 %v7188_v30  ;;  %7477 = vrot.lane.b32.xlu0 %v7476_v23, %s8145_s23  ;;  %v7203_v25 = vpop.permute.xlu1 %7202 }
 0x2f8   :  { %v3238_v58 = vsel %vm3220_vm10, %v3173_v6, %v15398_v28  ;;  %v3304_v19 = vsel %vm3285_vm11, %v3239_v9, %v7184_v24  ;;  %v3305_v63 = vsel %vm3285_vm11, %v3240_v12, %v7185_v10  ;;  %v3302_v0 = vsel %vm3285_vm11, %v3237_v4, %v7179_v38  ;;  %v15401_v24 = vld [vmem:[#allocation27_spill] sm:$0xff]  ;;  %v15403_v38 = vld [vmem:[#allocation94_spill] sm:$0xff] }
 0x2f9   :  { %v3303_v56 = vsel %vm3285_vm11, %v3238_v58, %v7180_v20  ;;  %v3369_v42 = vsel %vm3350_vm12, %v3304_v19, %v7194_v36  ;;  %v3370_v61 = vsel %vm3350_vm12, %v3305_v63, %v7195_v8  ;;  %v6904_v34 = vunpack.i.l.bf16 %v15399_v54  ;;  %v7198_v10 = vpop.permute.xlu0 %7197  ;;  %v15411_v8 = vld [vmem:[#allocation144_spill] sm:$0xff] }
 0x2fa   :  { %v3367_v40 = vsel %vm3350_vm12, %v3302_v0, %v7189_v45  ;;  %v3368_v39 = vsel %vm3350_vm12, %v3303_v56, %v7190_v41  ;;  %v3424_v27 = vpack.c.bf16 %v3370_v61, %v3369_v42  ;;  %v6755_v11 = vunpack.i.h.bf16 %v15371_v1  ;;  %7492 = vrot.lane.b32.xlu1 %v7491_v47, %s8146_s30  ;;  %v15413_v41 = vld [vmem:[#allocation235_spill] sm:$0xff] }
 0x2fb   :  { %v2924_v2 = vsel %vm92_vm0, %v15400_v44, %v6754_v57  ;;  %v2985_v6 = vsel %vm2963_vm1, %v11503_v17, %v6900_v32  ;;  %v3423_v23 = vpack.c.bf16 %v3368_v39, %v3367_v40  ;;  %v2922_v35 = vsel %vm92_vm0, %v15401_v24, %v6749_v60  ;;  %v15406_v32 = vld [vmem:[#allocation136_spill] sm:$0xff]  ;;  %7487 = vrot.lane.b32.xlu0 %v7486_v13, %s8146_s30  ;;  %v15408_v60 = vld [vmem:[#allocation77_spill] sm:$0xff] }
 0x2fc   :  { %v6764_v20 = vunpack.i.l.bf16 %v15402_v37  ;;  %v6760_v55 = vunpack.i.h.bf16 %v15403_v38  ;;  %v7501_v16 = vpack.i.bf16 %v15405_v53, %v15404_v18  ;;  %v6759_v57 = vunpack.i.l.bf16 %v15403_v38  ;;  %v15440_v38 = vld [vmem:[#allocation207_spill] sm:$0xff] }
 0x2fd   :  { %v2984_v17 = vsel %vm2963_vm1, %v2922_v35, %v6899_v14  ;;  %v2983_v51 = vsel %vm2963_vm1, %v15406_v32, %v6895_v3  ;;  %6367 = vmatprep.mubr.msk.bf16.mxu0 %vm3467_vm13, %v3423_v23  ;;  %v7496_v9 = vpack.i.bf16 %v15408_v60, %v15407_v22  ;;  %v2986_v26 = vsel %vm2963_vm1, %v2924_v2, %v6904_v34  ;;  %v7213_v14 = vpop.permute.xlu1 %7212  ;;  %v7208_v58 = vpop.permute.xlu0 %7207 }
 0x2fe   :  { %v7205_v47 = vunpack.i.h.bf16 %v7203_v25  ;;  %v7204_v12 = vunpack.i.l.bf16 %v7203_v25  ;;  %v15410_v15 = vunpack.i.l.bf16 %v15409_v49  ;;  %6368 = vmatmul.mubr.msk.bf16.gmra.mxu0 %vm3467_vm13, %v3424_v27  ;;  %v7200_v4 = vunpack.i.h.bf16 %v7198_v10  ;;  %7502 = vrot.lane.b32.xlu1 %v7501_v16, %s8142_s21 }
 0x2ff   :  { %v7199_v3 = vunpack.i.l.bf16 %v7198_v10  ;;  %v7215_v28 = vunpack.i.h.bf16 %v7213_v14  ;;  %v7214_v13 = vunpack.i.l.bf16 %v7213_v14  ;;  %v15412_v36 = vunpack.i.h.bf16 %v15411_v8  ;;  %7497 = vrot.lane.b32.xlu0 %v7496_v9, %s8142_s21 }
 0x300   :  { %v3048_v43 = vsel %vm3025_vm7, %v2985_v6, %v15410_v15  ;;  %v7210_v19 = vunpack.i.h.bf16 %v7208_v58  ;;  %v7209_v63 = vunpack.i.l.bf16 %v7208_v58  ;;  %v6910_v45 = vunpack.i.h.bf16 %v15413_v41  ;;  %v15424_v58 = vld [vmem:[#allocation163_spill] sm:$0xff] }
 0x301   :  { %v3047_v30 = vsel %vm3025_vm7, %v2984_v17, %v15412_v36  ;;  %v6909_v0 = vunpack.i.l.bf16 %v15413_v41  ;;  %v15414_v56 = vunpack.i.h.bf16 %v15409_v49  ;;  %v3113_v61 = vsel %vm3090_vm8, %v3048_v43, %v7204_v12  ;;  %v7223_v25 = vpop.permute.xlu1 %7222  ;;  %v7218_v10 = vpop.permute.xlu0 %7217  ;;  %v15416_v17 = vld [vmem:[#allocation167_spill] sm:$0xff] }
 0x302   :  { %v15415_v40 = vunpack.i.l.bf16 %v15411_v8  ;;  %v3112_v44 = vsel %vm3090_vm8, %v3047_v30, %v7200_v4  ;;  %v3178_v2 = vsel %vm3155_vm9, %v3113_v61, %v7214_v13  ;;  %v7225_v35 = vunpack.i.h.bf16 %v7223_v25  ;;  %7512 = vrot.lane.b32.xlu1 %v15416_v17, %s8147_s8  ;;  %v15421_v4 = vld [vmem:[#allocation164_spill] sm:$0xff]  ;;  %v15423_v13 = vld [vmem:[#allocation154_spill] sm:$0xff] }
 0x303   :  { %v3049_v42 = vsel %vm3025_vm7, %v2986_v26, %v15414_v56  ;;  %v3177_v24 = vsel %vm3155_vm9, %v3112_v44, %v7210_v19  ;;  %v7224_v16 = vunpack.i.l.bf16 %v7223_v25  ;;  %v6905_v32 = vunpack.i.h.bf16 %v15399_v54  ;;  %v15417_v26 = vld [vmem:[#allocation158_spill] sm:$0xff]  ;;  %v15428_v25 = vld [vmem:[#allocation212_spill] sm:$0xff] }
 0x304   :  { %v3114_v34 = vsel %vm3090_vm8, %v3049_v42, %v7205_v47  ;;  %v3046_v39 = vsel %vm3025_vm7, %v2983_v51, %v15415_v40  ;;  %v7220_v51 = vunpack.i.h.bf16 %v7218_v10  ;;  %v7219_v9 = vunpack.i.l.bf16 %v7218_v10  ;;  %7507 = vrot.lane.b32.xlu0 %v15417_v26, %s8147_s8  ;;  %v15418_v47 = vld [vmem:[#allocation74_spill] sm:$0xff]  ;;  %v15429_v10 = vld [vmem:[#allocation213_spill] sm:$0xff] }
 0x305   :  { %v3111_v27 = vsel %vm3090_vm8, %v3046_v39, %v7199_v3  ;;  %v3179_v6 = vsel %vm3155_vm9, %v3114_v34, %v7215_v28  ;;  %v15419_v12 = vunpack.i.l.bf16 %v15418_v47  ;;  %v15420_v15 = vunpack.i.h.bf16 %v15418_v47  ;;  %v7233_v14 = vpop.permute.xlu1 %7232  ;;  %v15422_v3 = vld [vmem:[#allocation159_spill] sm:$0xff]  ;;  %v15425_v8 = vld [vmem:[#allocation218_spill] sm:$0xff]  ;;  %v7228_v42 = vpop.permute.xlu0 %7227 }
 0x306   :  { %v3176_v23 = vsel %vm3155_vm9, %v3111_v27, %v7209_v63  ;;  %v7531_v28 = vpack.i.bf16 %v15422_v3, %v15421_v4  ;;  %v7526_v54 = vpack.i.bf16 %v15424_v58, %v15423_v13  ;;  %v15426_v36 = vunpack.i.l.bf16 %v15425_v8  ;;  %7522 = vrot.lane.b32.xlu1 %v15428_v25, %s8148_s3  ;;  %v15431_v47 = vld [vmem:[#allocation222_spill] sm:$0xff]  ;;  %v15434_v3 = vld [vmem:[#allocation41_spill] sm:$0xff]  ;;  %v15435_v58 = vld [vmem:[#allocation31_spill] sm:$0xff] }
 0x307   :  { %v3243_v49 = vsel %vm3220_vm10, %v3178_v2, %v15419_v12  ;;  %v3244_v43 = vsel %vm3220_vm10, %v3179_v6, %v15420_v15  ;;  %v15427_v19 = vunpack.i.h.bf16 %v15425_v8  ;;  %v7235_v41 = vunpack.i.h.bf16 %v7233_v14  ;;  %v15437_v8 = vld [vmem:[#allocation216_spill] sm:$0xff] }
 0x308   :  { %v3241_v30 = vsel %vm3220_vm10, %v3176_v23, %v15426_v36  ;;  %v7234_v56 = vunpack.i.l.bf16 %v7233_v14  ;;  %v3308_v61 = vsel %vm3285_vm11, %v3243_v49, %v7224_v16  ;;  %v3309_v34 = vsel %vm3285_vm11, %v3244_v43, %v7225_v35  ;;  %7517 = vrot.lane.b32.xlu0 %v15429_v10, %s8148_s3  ;;  %v15430_v23 = vld [vmem:[#allocation126_spill] sm:$0xff] }
 0x309   :  { %v3242_v63 = vsel %vm3220_vm10, %v3177_v24, %v15427_v19  ;;  %v7230_v40 = vunpack.i.h.bf16 %v7228_v42  ;;  %v7229_v39 = vunpack.i.l.bf16 %v7228_v42  ;;  %v3306_v27 = vsel %vm3285_vm11, %v3241_v30, %v7219_v9  ;;  %v7243_v17 = vpop.permute.xlu1 %7242  ;;  %v7238_v15 = vpop.permute.xlu0 %7237  ;;  %v15433_v14 = vld [vmem:[#allocation42_spill] sm:$0xff]  ;;  %v15438_v30 = vld [vmem:[#allocation225_spill] sm:$0xff] }
 0x30a   :  { %v3307_v44 = vsel %vm3285_vm11, %v3242_v63, %v7220_v51  ;;  %v3373_v2 = vsel %vm3350_vm12, %v3308_v61, %v7234_v56  ;;  %v3374_v6 = vsel %vm3350_vm12, %v3309_v34, %v7235_v41  ;;  %v6914_v24 = vunpack.i.l.bf16 %v15430_v23  ;;  %v15432_v51 = vld [vmem:[#allocation32_spill] sm:$0xff]  ;;  %7532 = vrot.lane.b32.xlu1 %v7531_v28, %s8145_s23 }
 0x30b   :  { %v3371_v35 = vsel %vm3350_vm12, %v3306_v27, %v7229_v39  ;;  %v3372_v16 = vsel %vm3350_vm12, %v3307_v44, %v7230_v40  ;;  %v3426_v26 = vpack.c.bf16 %v3374_v6, %v3373_v2  ;;  %v6695_v12 = vunpack.i.h.bf16 %v15431_v47  ;;  %v15441_v44 = vld [vmem:[#allocation82_spill] sm:$0xff]  ;;  %v15443_v6 = vld [vmem:[#allocation149_spill] sm:$0xff] }
 0x30c   :  { %v6694_v9 = vunpack.i.l.bf16 %v15431_v47  ;;  %v2925_v49 = vsel %vm92_vm0, %v15432_v51, %v6755_v11  ;;  %v3425_v43 = vpack.c.bf16 %v3372_v16, %v3371_v35  ;;  %v2928_v4 = vsel %vm92_vm0, %v15433_v14, %v6764_v20  ;;  %v15436_v11 = vld [vmem:[#allocation208_spill] sm:$0xff]  ;;  %7527 = vrot.lane.b32.xlu0 %v7526_v54, %s8145_s23  ;;  %v15448_v51 = vld [vmem:[#allocation75_spill] sm:$0xff] }
 0x30d   :  { %v2927_v13 = vsel %vm92_vm0, %v15434_v3, %v6760_v55  ;;  %v2926_v1 = vsel %vm92_vm0, %v15435_v58, %v6759_v57  ;;  %v7541_v36 = vpack.i.bf16 %v15437_v8, %v15436_v11  ;;  %v6690_v19 = vunpack.i.h.bf16 %v15438_v30  ;;  %v15439_v55 = vld [vmem:[#allocation210_spill] sm:$0xff]  ;;  %v7253_v61 = vpop.permute.xlu1 %7252  ;;  %v7248_v39 = vpop.permute.xlu0 %7247 }
 0x30e   :  { %v2988_v63 = vsel %vm2963_vm1, %v2926_v1, %v6909_v0  ;;  %v2989_v20 = vsel %vm2963_vm1, %v2927_v13, %v6910_v45  ;;  %6371 = vmatprep.mubr.msk.bf16.mxu0 %vm3467_vm13, %v3425_v43  ;;  %v7536_v41 = vpack.i.bf16 %v15440_v38, %v15439_v55  ;;  %v2987_v57 = vsel %vm2963_vm1, %v2925_v49, %v6905_v32  ;;  %v15442_v32 = vld [vmem:[#allocation80_spill] sm:$0xff]  ;;  %v15449_v49 = vld [vmem:[#allocation83_spill] sm:$0xff] }
 0x30f   :  { %v2990_v28 = vsel %vm2963_vm1, %v2928_v4, %v6914_v24  ;;  %v7245_v56 = vunpack.i.h.bf16 %v7243_v17  ;;  %v7244_v42 = vunpack.i.l.bf16 %v7243_v17  ;;  %6372 = vmatmul.mubr.msk.bf16.gmra.mxu0 %vm3467_vm13, %v3426_v26  ;;  %v7240_v34 = vunpack.i.h.bf16 %v7238_v15  ;;  %7542 = vrot.lane.b32.xlu1 %v7541_v36, %s8146_s30  ;;  %v15446_v17 = vld [vmem:[#allocation150_spill] sm:$0xff] }
 0x310   :  { %v7239_v0 = vunpack.i.l.bf16 %v7238_v15  ;;  %v7255_v40 = vunpack.i.h.bf16 %v7253_v61  ;;  %v7254_v45 = vunpack.i.l.bf16 %v7253_v61  ;;  %v6689_v54 = vunpack.i.l.bf16 %v15438_v30  ;;  %7537 = vrot.lane.b32.xlu0 %v7536_v41, %s8146_s30 }
 0x311   :  { %v7250_v25 = vunpack.i.h.bf16 %v7248_v39  ;;  %v7249_v27 = vunpack.i.l.bf16 %v7248_v39  ;;  %v7551_v2 = vpack.i.bf16 %v15442_v32, %v15441_v44  ;;  %v15444_v10 = vunpack.i.l.bf16 %v15443_v6  ;;  %v7263_v13 = vpop.permute.xlu1 %7262  ;;  %v7258_v36 = vpop.permute.xlu0 %7257 }
 0x312   :  { %v15445_v35 = vunpack.i.h.bf16 %v15443_v6  ;;  %v15447_v26 = vunpack.i.h.bf16 %v15446_v17  ;;  %v7546_v15 = vpack.i.bf16 %v15449_v49, %v15448_v51  ;;  %v15450_v4 = vunpack.i.l.bf16 %v15446_v17  ;;  %v15452_v6 = vld [vmem:[#allocation166_spill] sm:$0xff] }
 0x313   :  { %v3052_v24 = vsel %vm3025_vm7, %v2989_v20, %v15444_v10  ;;  %v7265_v20 = vunpack.i.h.bf16 %v7263_v13  ;;  %v7264_v55 = vunpack.i.l.bf16 %v7263_v13  ;;  %7552 = vrot.lane.b32.xlu1 %v7551_v2, %s8142_s21  ;;  %v6765_v38 = vunpack.i.h.bf16 %v15402_v37  ;;  %v15451_v2 = vld [vmem:[#allocation175_spill] sm:$0xff]  ;;  %v15453_v10 = vld [vmem:[#allocation97_spill] sm:$0xff] }
 0x314   :  { %v3053_v16 = vsel %vm3025_vm7, %v2990_v28, %v15445_v35  ;;  %v3051_v47 = vsel %vm3025_vm7, %v2988_v63, %v15447_v26  ;;  %v3117_v43 = vsel %vm3090_vm8, %v3052_v24, %v7244_v42  ;;  %v3050_v3 = vsel %vm3025_vm7, %v2987_v57, %v15450_v4  ;;  %7547 = vrot.lane.b32.xlu0 %v7546_v15, %s8142_s21 }
 0x315   :  { %v3118_v14 = vsel %vm3090_vm8, %v3053_v16, %v7245_v56  ;;  %v3115_v58 = vsel %vm3090_vm8, %v3050_v3, %v7239_v0  ;;  %v3116_v1 = vsel %vm3090_vm8, %v3051_v47, %v7240_v34  ;;  %v3182_v11 = vsel %vm3155_vm9, %v3117_v43, %v7254_v45  ;;  %v7273_v42 = vpop.permute.xlu1 %7272  ;;  %v7268_v45 = vpop.permute.xlu0 %7267  ;;  %v15454_v47 = vld [vmem:[#allocation93_spill] sm:$0xff] }
 0x316   :  { %v3183_v8 = vsel %vm3155_vm9, %v3118_v14, %v7255_v40  ;;  %v3180_v30 = vsel %vm3155_vm9, %v3115_v58, %v7249_v27  ;;  %v3181_v63 = vsel %vm3155_vm9, %v3116_v1, %v7250_v25  ;;  %v7260_v41 = vunpack.i.h.bf16 %v7258_v36  ;;  %v15455_v14 = vld [vmem:[#allocation121_spill] sm:$0xff] }
 0x317   :  { %v7259_v57 = vunpack.i.l.bf16 %v7258_v36  ;;  %v3247_v28 = vsel %vm3220_vm10, %v3182_v11, %v6694_v9  ;;  %v3248_v56 = vsel %vm3220_vm10, %v3183_v8, %v6695_v12  ;;  %v3245_v61 = vsel %vm3220_vm10, %v3180_v30, %v6689_v54  ;;  %7562 = vrot.lane.b32.xlu1 %v15451_v2, %s8147_s8  ;;  %v15456_v11 = vld [vmem:[#allocation238_spill] sm:$0xff]  ;;  %v15457_v36 = vld [vmem:[#allocation219_spill] sm:$0xff]  ;;  %v15458_v30 = vld [vmem:[#allocation172_spill] sm:$0xff] }
 0x318   :  { %v3246_v34 = vsel %vm3220_vm10, %v3181_v63, %v6690_v19  ;;  %v7275_v0 = vunpack.i.h.bf16 %v7273_v42  ;;  %v7274_v40 = vunpack.i.l.bf16 %v7273_v42  ;;  %v3312_v39 = vsel %vm3285_vm11, %v3247_v28, %v7264_v55  ;;  %7557 = vrot.lane.b32.xlu0 %v15452_v6, %s8147_s8  ;;  %v15459_v63 = vld [vmem:[#allocation168_spill] sm:$0xff]  ;;  %v15460_v55 = vld [vmem:[#allocation165_spill] sm:$0xff]  ;;  %v15469_v6 = vld [vmem:[#allocation223_spill] sm:$0xff] }
 0x319   :  { %v3313_v37 = vsel %vm3285_vm11, %v3248_v56, %v7265_v20  ;;  %v7270_v25 = vunpack.i.h.bf16 %v7268_v45  ;;  %v7269_v27 = vunpack.i.l.bf16 %v7268_v45  ;;  %v3310_v9 = vsel %vm3285_vm11, %v3245_v61, %v7259_v57  ;;  %v7283_v17 = vpop.permute.xlu1 %7282  ;;  %v7278_v3 = vpop.permute.xlu0 %7277  ;;  %v15462_v57 = vld [vmem:[#allocation171_spill] sm:$0xff]  ;;  %v15463_v56 = vld [vmem:[#allocation161_spill] sm:$0xff]  ;;  %v15464_v61 = vld [vmem:[#allocation48_spill] sm:$0xff] }
 0x31a   :  { %v3311_v12 = vsel %vm3285_vm11, %v3246_v34, %v7260_v41  ;;  %v3377_v54 = vsel %vm3350_vm12, %v3312_v39, %v7274_v40  ;;  %v3378_v19 = vsel %vm3350_vm12, %v3313_v37, %v7275_v0  ;;  %v6770_v24 = vunpack.i.h.bf16 %v15453_v10  ;;  %v15461_v41 = vld [vmem:[#allocation160_spill] sm:$0xff]  ;;  %v15466_v45 = vld [vmem:[#allocation47_spill] sm:$0xff] }
 0x31b   :  { %v3375_v35 = vsel %vm3350_vm12, %v3310_v9, %v7269_v27  ;;  %v3376_v16 = vsel %vm3350_vm12, %v3311_v12, %v7270_v25  ;;  %v3428_v26 = vpack.c.bf16 %v3378_v19, %v3377_v54  ;;  %v6774_v15 = vunpack.i.l.bf16 %v15454_v47  ;;  %7572 = vrot.lane.b32.xlu1 %v15457_v36, %s8148_s3  ;;  %v15465_v0 = vld [vmem:[#allocation40_spill] sm:$0xff]  ;;  %v15467_v37 = vld [vmem:[#allocation39_spill] sm:$0xff] }
 0x31c   :  { %v6769_v43 = vunpack.i.l.bf16 %v15453_v10  ;;  %v6920_v4 = vunpack.i.h.bf16 %v15455_v14  ;;  %v3427_v13 = vpack.c.bf16 %v3376_v16, %v3375_v35  ;;  %v6919_v58 = vunpack.i.l.bf16 %v15455_v14  ;;  %7567 = vrot.lane.b32.xlu0 %v15460_v55, %s8148_s3  ;;  %v15468_v19 = vld [vmem:[#allocation215_spill] sm:$0xff]  ;;  %v15473_v36 = vld [vmem:[#allocation88_spill] sm:$0xff] }
 0x31d   :  { %v6915_v1 = vunpack.i.h.bf16 %v15430_v23  ;;  %v6924_v8 = vunpack.i.l.bf16 %v15456_v11  ;;  %v7581_v20 = vpack.i.bf16 %v15459_v63, %v15458_v30  ;;  %v7576_v28 = vpack.i.bf16 %v15462_v57, %v15461_v41  ;;  %v7293_v34 = vpop.permute.xlu1 %7292  ;;  %v7288_v2 = vpop.permute.xlu0 %7287  ;;  %v15474_v30 = vld [vmem:[#allocation86_spill] sm:$0xff]  ;;  %v15475_v57 = vld [vmem:[#allocation79_spill] sm:$0xff] }
 0x31e   :  { %6375 = vmatprep.mubr.msk.bf16.mxu0 %vm3467_vm13, %v3427_v13  ;;  %v6544_v42 = vunpack.i.l.bf16 %v15463_v56  ;;  %v2931_v23 = vsel %vm92_vm0, %v15464_v61, %v6770_v24  ;;  %v2929_v40 = vsel %vm92_vm0, %v15465_v0, %v6765_v38  ;;  %v2932_v39 = vsel %vm92_vm0, %v15466_v45, %v6774_v15  ;;  %v15470_v24 = vld [vmem:[#allocation81_spill] sm:$0xff]  ;;  %v15472_v15 = vld [vmem:[#allocation214_spill] sm:$0xff] }
 0x31f   :  { %6376 = vmatmul.mubr.msk.bf16.gmra.mxu0 %vm3467_vm13, %v3428_v26  ;;  %v2930_v25 = vsel %vm92_vm0, %v15467_v37, %v6769_v43  ;;  %v2993_v27 = vsel %vm2963_vm1, %v2931_v23, %v6920_v4  ;;  %v2991_v12 = vsel %vm2963_vm1, %v2929_v40, %v6915_v1  ;;  %v2994_v54 = vsel %vm2963_vm1, %v2932_v39, %v6924_v8  ;;  %v15471_v26 = vld [vmem:[#allocation217_spill] sm:$0xff] }
 0x320   :  { %v2992_v9 = vsel %vm2963_vm1, %v2930_v25, %v6919_v58  ;;  %7582 = vrot.lane.b32.xlu1 %v7581_v20, %s8145_s23  ;;  %v7591_v38 = vpack.i.bf16 %v15469_v6, %v15468_v19  ;;  %v6545_v10 = vunpack.i.h.bf16 %v15463_v56  ;;  %v6540_v35 = vunpack.i.h.bf16 %v15470_v24  ;;  %7577 = vrot.lane.b32.xlu0 %v7576_v28, %s8145_s23  ;;  %v15476_v28 = vld [vmem:[#allocation87_spill] sm:$0xff] }
 0x321   :  { %v6539_v16 = vunpack.i.l.bf16 %v15470_v24  ;;  %v7586_v43 = vpack.i.bf16 %v15472_v15, %v15471_v26  ;;  %v3056_v14 = vsel %vm3025_vm7, %v2993_v27, %v6544_v42  ;;  %v11778_v4 = vpop.permute.xlu1 %7302  ;;  %v7298_v8 = vpop.permute.xlu0 %7297  ;;  %v7601_v63 = vpack.i.bf16 %v15474_v30, %v15473_v36 }
 0x322   :  { %v3057_v13 = vsel %vm3025_vm7, %v2994_v54, %v6545_v10  ;;  %v3055_v1 = vsel %vm3025_vm7, %v2992_v9, %v6540_v35  ;;  %v7285_v20 = vunpack.i.h.bf16 %v7283_v17  ;;  %v7284_v55 = vunpack.i.l.bf16 %v7283_v17 }
 0x323   :  { %v3054_v58 = vsel %vm3025_vm7, %v2991_v12, %v6539_v16  ;;  %v7279_v41 = vunpack.i.l.bf16 %v7278_v3  ;;  %v7596_v56 = vpack.i.bf16 %v15476_v28, %v15475_v57  ;;  %v7280_v42 = vunpack.i.h.bf16 %v7278_v3 }
 0x324   :  { %7592 = vrot.lane.b32.xlu1 %v7591_v38, %s8146_s30  ;;  %v7294_v61 = vunpack.i.l.bf16 %v7293_v34  ;;  %7587 = vrot.lane.b32.xlu0 %v7586_v43, %s8146_s30  ;;  %v7295_v23 = vunpack.i.h.bf16 %v7293_v34  ;;  %v7290_v0 = vunpack.i.h.bf16 %v7288_v2  ;;  %v7289_v40 = vunpack.i.l.bf16 %v7288_v2 }
 0x325   :  { %v11790_v45 = vunpack.i.l.bf16 %v11778_v4  ;;  %v11792_v39 = vpop.permute.xlu1 %7312  ;;  %v7300_v37 = vunpack.i.h.bf16 %v7298_v8  ;;  %v7299_v17 = vunpack.i.l.bf16 %v7298_v8  ;;  %v7308_v25 = vpop.permute.xlu0 %7307  ;;  %v3121_v27 = vsel %vm3090_vm8, %v3056_v14, %v7284_v55 }
 0x326   :  { %v3122_v9 = vsel %vm3090_vm8, %v3057_v13, %v7285_v20  ;;  %v3119_v3 = vsel %vm3090_vm8, %v3054_v58, %v7279_v41  ;;  %v11798_v12 = vunpack.i.l.bf16 %v11792_v39  ;;  %v3120_v34 = vsel %vm3090_vm8, %v3055_v1, %v7280_v42  ;;  %v15480_v1 = vld [vmem:[#allocation185_spill] sm:$0xff]  ;;  %v15481_v41 = vld [vmem:[#allocation174_spill] sm:$0xff] }
 0x327   :  { %15477 = vst [vmem:[#allocation19_spill] sm:$0xff] %v11790_v45  ;;  %v3186_v2 = vsel %vm3155_vm9, %v3121_v27, %v7294_v61  ;;  %v7310_v54 = vunpack.i.h.bf16 %v7308_v25  ;;  %v7309_v19 = vunpack.i.l.bf16 %v7308_v25  ;;  %v3187_v6 = vsel %vm3155_vm9, %v3122_v9, %v7295_v23  ;;  %v15482_v61 = vld [vmem:[#allocation103_spill] sm:$0xff]  ;;  %v15483_v27 = vld [vmem:[#allocation237_spill] sm:$0xff] }
 0x328   :  { %15478 = vst [vmem:[#allocation14_spill] sm:$0xff] %v11798_v12  ;;  %7602 = vrot.lane.b32.xlu1 %v7601_v63, %s8142_s21  ;;  %7597 = vrot.lane.b32.xlu0 %v7596_v56, %s8142_s21  ;;  %v3184_v38 = vsel %vm3155_vm9, %v3119_v3, %v7289_v40  ;;  %v3185_v10 = vsel %vm3155_vm9, %v3120_v34, %v7290_v0  ;;  %v6779_v23 = vunpack.i.l.bf16 %v15482_v61  ;;  %v6775_v25 = vunpack.i.h.bf16 %v15454_v47 }
 0x329   :  { %v3251_v24 = vsel %vm3220_vm10, %v3186_v2, %v11790_v45  ;;  %v11809_v35 = vpop.permute.xlu1 %7322  ;;  %v3252_v16 = vsel %vm3220_vm10, %v3187_v6, %v11790_v45  ;;  %v3249_v26 = vsel %vm3220_vm10, %v3184_v38, %v7299_v17  ;;  %v3250_v15 = vsel %vm3220_vm10, %v3185_v10, %v7300_v37  ;;  %v7318_v14 = vpop.permute.xlu0 %7317  ;;  %v15486_v6 = vld [vmem:[#allocation176_spill] sm:$0xff]  ;;  %v15487_v10 = vld [vmem:[#allocation227_spill] sm:$0xff] }
 0x32a   :  { %v11816_v43 = vunpack.i.l.bf16 %v11809_v35  ;;  %v7320_v13 = vunpack.i.h.bf16 %v7318_v14  ;;  %v7319_v58 = vunpack.i.l.bf16 %v7318_v14  ;;  %v3316_v8 = vsel %vm3285_vm11, %v3251_v24, %v11798_v12  ;;  %v15488_v24 = vld [vmem:[#allocation169_spill] sm:$0xff]  ;;  %v15491_v14 = vld [vmem:[#allocation90_spill] sm:$0xff] }
 0x32b   :  { %v3317_v63 = vsel %vm3285_vm11, %v3252_v16, %v11798_v12  ;;  %v3314_v20 = vsel %vm3285_vm11, %v3249_v26, %v7309_v19  ;;  %v3315_v55 = vsel %vm3285_vm11, %v3250_v15, %v7310_v54  ;;  %v6929_v9 = vunpack.i.l.bf16 %v15483_v27  ;;  %v15484_v54 = vld [vmem:[#allocation226_spill] sm:$0xff]  ;;  %v15489_v16 = vld [vmem:[#allocation179_spill] sm:$0xff] }
 0x32c   :  { %15479 = vst [vmem:[#allocation15_spill] sm:$0xff] %v11816_v43  ;;  %7612 = vrot.lane.b32.xlu1 %v15480_v1, %s8147_s8  ;;  %7607 = vrot.lane.b32.xlu0 %v15481_v41, %s8147_s8  ;;  %v3381_v56 = vsel %vm3350_vm12, %v3316_v8, %v11816_v43  ;;  %v3382_v42 = vsel %vm3350_vm12, %v3317_v63, %v11816_v43  ;;  %v6925_v2 = vunpack.i.h.bf16 %v15456_v11  ;;  %v15485_v19 = vld [vmem:[#allocation178_spill] sm:$0xff]  ;;  %v15493_v8 = vld [vmem:[#allocation53_spill] sm:$0xff] }
 0x32d   :  { %v3379_v0 = vsel %vm3350_vm12, %v3314_v20, %v7319_v58  ;;  %v3380_v40 = vsel %vm3350_vm12, %v3315_v55, %v7320_v13  ;;  %v11835_v37 = vpop.permute.xlu1 %7332  ;;  %v3430_v17 = vpack.c.bf16 %v3382_v42, %v3381_v56  ;;  %v7328_v3 = vpop.permute.xlu0 %7327  ;;  %v7631_v38 = vpack.i.bf16 %v15486_v6, %v15485_v19  ;;  %v15490_v26 = vld [vmem:[#allocation54_spill] sm:$0xff]  ;;  %v15494_v42 = vld [vmem:[#allocation221_spill] sm:$0xff]  ;;  %v15499_v6 = vld [vmem:[#allocation220_spill] sm:$0xff] }
 0x32e   :  { %v3429_v34 = vpack.c.bf16 %v3380_v40, %v3379_v0  ;;  %v7626_v47 = vpack.i.bf16 %v15489_v16, %v15488_v24  ;;  %v2934_v15 = vsel %vm92_vm0, %v15490_v26, %v6779_v23  ;;  %v1396_v13 = vrot.slane %v15491_v14, 1  ;;  %v15492_v58 = vld [vmem:[#allocation170_spill] sm:$0xff]  ;;  %v15495_v23 = vld [vmem:[#allocation228_spill] sm:$0xff] }
 0x32f   :  { %v6555_v1 = vunpack.i.h.bf16 %v15492_v58  ;;  %v2933_v63 = vsel %vm92_vm0, %v15493_v8, %v6775_v25  ;;  %v2996_v20 = vsel %vm2963_vm1, %v2934_v15, %v6929_v9  ;;  %v7329_v56 = vunpack.i.l.bf16 %v7328_v3  ;;  %v15496_v40 = vld [vmem:[#allocation84_spill] sm:$0xff]  ;;  %v15500_v8 = vld [vmem:[#allocation91_spill] sm:$0xff] }
 0x330   :  { %7622 = vrot.lane.b32.xlu1 %v15484_v54, %s8148_s3  ;;  %7617 = vrot.lane.b32.xlu0 %v15487_v10, %s8148_s3  ;;  %v2995_v41 = vsel %vm2963_vm1, %v2933_v63, %v6925_v2  ;;  %v7641_v0 = vpack.i.bf16 %v15495_v23, %v15494_v42  ;;  %v6554_v19 = vunpack.i.l.bf16 %v15492_v58  ;;  %v15498_v9 = vld [vmem:[#allocation224_spill] sm:$0xff]  ;;  %v7651_v58 = vpack.i.bf16 %v15491_v14, %v15500_v8  ;;  %v15501_v63 = vld [vmem:[#allocation85_spill] sm:$0xff] }
 0x331   :  { %6379 = vmatprep.mubr.msk.bf16.mxu0 %vm3467_vm13, %v3429_v34  ;;  %v7343_v11 = vpop.permute.xlu1 %7342  ;;  %v7338_v55 = vpop.permute.xlu0 %7337  ;;  %v15497_v34 = vld [vmem:[#allocation89_spill] sm:$0xff]  ;;  %v7636_v2 = vpack.i.bf16 %v15499_v6, %v15498_v9  ;;  %v3061_v24 = vsel %vm3025_vm7, %v2996_v20, %v6555_v1  ;;  %v15502_v42 = vld [vmem:[#allocation92_spill] sm:$0xff]  ;;  %v7335_v1 = vunpack.i.h.bf16 %v11835_v37  ;;  %v7330_v20 = vunpack.i.h.bf16 %v7328_v3 }
 0x332   :  { %6380 = vmatmul.mubr.msk.bf16.gmra.mxu0 %vm3467_vm13, %v3430_v17  ;;  %v11863_v17 = vsel %vm765_vm3, %v15496_v40, 0.0  ;;  %v1397_v54 = vrot.slane %v15497_v34, 1  ;;  %v7339_v25 = vunpack.i.l.bf16 %v7338_v55  ;;  %v3060_v26 = vsel %vm3025_vm7, %v2995_v41, %v6554_v19  ;;  %v15503_v9 = vld [vmem:[#allocation173_spill] sm:$0xff] }
 0x333   :  { %v1399_v23 = vrot.slane %v11863_v17, 1  ;;  %v7334_v40 = vunpack.i.l.bf16 %v11835_v37  ;;  %v3123_v6 = vsel %vm3090_vm8, %v15503_v9, %v7329_v56  ;;  %v7305_v10 = vunpack.i.h.bf16 %v11778_v4 }
 0x334   :  { %7632 = vrot.lane.b32.xlu1 %v7631_v38, %s8145_s23  ;;  %7627 = vrot.lane.b32.xlu0 %v7626_v47, %s8145_s23  ;;  %v7646_v47 = vpack.i.bf16 %v15502_v42, %v15501_v63  ;;  %v3188_v41 = vsel %vm3155_vm9, %v3123_v6, %v7339_v25  ;;  %v1398_v19 = vsel %vm1081_vm4, %v1396_v13, %v1397_v54  ;;  %v7345_v38 = vunpack.i.h.bf16 %v7343_v11 }
 0x335   :  { %v11873_v16 = vpop.permute.xlu1 %7352  ;;  %v7348_v15 = vpop.permute.xlu0 %7347  ;;  %v7344_v43 = vunpack.i.l.bf16 %v7343_v11  ;;  %v7340_v12 = vunpack.i.h.bf16 %v7338_v55  ;;  %v7315_v56 = vunpack.i.h.bf16 %v11792_v39  ;;  %v1400_v3 = vsel %vm1081_vm4, %v1397_v54, %v1399_v23  ;;  %v15504_v55 = vld [vmem:[#allocation26_spill] sm:$0xff] }
 0x336   :  { %v7349_v9 = vunpack.i.l.bf16 %v7348_v15  ;;  %v3125_v25 = vsel %vm3090_vm8, %v3060_v26, %v7334_v40  ;;  %v7350_v13 = vunpack.i.h.bf16 %v7348_v15  ;;  %v3126_v11 = vsel %vm3090_vm8, %v3061_v24, %v7335_v1 }
 0x337   :  { %v3124_v39 = vsel %vm3090_vm8, %v15504_v55, %v7330_v20  ;;  %v7325_v54 = vunpack.i.h.bf16 %v11809_v35  ;;  %v3190_v26 = vsel %vm3155_vm9, %v3125_v25, %v7344_v43  ;;  %v15507_v25 = vld [vmem:[#allocation98_spill] sm:$0xff]  ;;  %vm5983_vm4 = vcmask 621568  }
 0x338   :  { %7642 = vrot.lane.b32.xlu1 %v7641_v0, %s8146_s30  ;;  %7637 = vrot.lane.b32.xlu0 %v7636_v2, %s8146_s30  ;;  %v7354_v0 = vunpack.i.l.bf16 %v11873_v16  ;;  %v3253_v2 = vsel %vm3220_vm10, %v3188_v41, %v7305_v10  ;;  %v3191_v10 = vsel %vm3155_vm9, %v3126_v11, %v7345_v38  ;;  %v3189_v15 = vsel %vm3155_vm9, %v3124_v39, %v7340_v12  ;;  %v15505_v38 = vld [vmem:[#allocation187_spill] sm:$0xff] }
 0x339   :  { %v11890_v45 = vpop.permute.xlu1 %7362  ;;  %v7358_v37 = vpop.permute.xlu0 %7357  ;;  %v3254_v24 = vsel %vm3220_vm10, %v3189_v15, %v7349_v9  ;;  %v3318_v20 = vsel %vm3285_vm11, %v3253_v2, %v7315_v56  ;;  %v1409_v56 = vrot.slane %v11863_v17, 2  ;;  %v6785_v2 = vunpack.i.h.bf16 %v15507_v25  ;;  %v15508_v39 = vld [vmem:[#allocation107_spill] sm:$0xff] }
 0x33a   :  { %v7364_v4 = vunpack.i.l.bf16 %v11890_v45  ;;  %v7360_v6 = vunpack.i.h.bf16 %v7358_v37  ;;  %v7359_v30 = vunpack.i.l.bf16 %v7358_v37  ;;  %v15506_v37 = vld [vmem:[#allocation184_spill] sm:$0xff]  ;;  %v3383_v55 = vsel %vm3350_vm12, %v3318_v20, %v7325_v54 }
 0x33b   :  { %v6784_v54 = vunpack.i.l.bf16 %v15507_v25  ;;  %v15518_v25 = vld [vmem:[#allocation183_spill] sm:$0xff] }
 0x33c   :  { %7652 = vrot.lane.b32.xlu1 %v7651_v58, %s8142_s21  ;;  %7647 = vrot.lane.b32.xlu0 %v7646_v47, %s8142_s21  ;;  %v3256_v58 = vsel %vm3220_vm10, %v3191_v10, %v7354_v0  ;;  %v3255_v47 = vsel %vm3220_vm10, %v3190_v26, %v7350_v13  ;;  %v3319_v12 = vsel %vm3285_vm11, %v3254_v24, %v7359_v30  ;;  %v6780_v30 = vunpack.i.h.bf16 %v15482_v61  ;;  %v15512_v61 = vld [vmem:[#allocation124_spill] sm:$0xff] }
 0x33d   :  { %v11907_v23 = vpop.permute.xlu1 %7372  ;;  %v7368_v1 = vpop.permute.xlu0 %7367  ;;  %v3321_v35 = vsel %vm3285_vm11, %v3256_v58, %v7364_v4  ;;  %v3320_v0 = vsel %vm3285_vm11, %v3255_v47, %v7360_v6  ;;  %v6789_v6 = vunpack.i.l.bf16 %v15508_v39  ;;  %v15509_v58 = vld [vmem:[#allocation177_spill] sm:$0xff]  ;;  %v6930_v24 = vunpack.i.h.bf16 %v15483_v27 }
 0x33e   :  { %v7374_v40 = vunpack.i.l.bf16 %v11907_v23  ;;  %v7370_v43 = vunpack.i.h.bf16 %v7368_v1  ;;  %v7369_v41 = vunpack.i.l.bf16 %v7368_v1  ;;  %v7666_v17 = vpack.i.bf16 %v15505_v38, %v15509_v58  ;;  %v15511_v47 = vld [vmem:[#allocation229_spill] sm:$0xff] }
 0x33f   :  { %v6935_v20 = vunpack.i.h.bf16 %v15512_v61 }
 0x340   :  { %2652 = vrot.lane.b32.xlu1 %v15505_v38, %s8147_s8  ;;  %v3386_v9 = vsel %vm3350_vm12, %v3321_v35, %v7374_v40  ;;  %7657 = vrot.lane.b32.xlu0 %v15506_v37, %s8147_s8  ;;  %v3384_v13 = vsel %vm3350_vm12, %v3319_v12, %v7369_v41  ;;  %v3385_v4 = vsel %vm3350_vm12, %v3320_v0, %v7370_v43  ;;  %v15510_v40 = vld [vmem:[#allocation127_spill] sm:$0xff]  ;;  %v15513_v43 = vld [vmem:[#allocation230_spill] sm:$0xff]  ;;  %v15514_v41 = vrot.slane %v15497_v34, 2 }
 0x341   :  { %v11926_v11 = vpop.permute.xlu1 %7382  ;;  %v11931_v26 = vpop.permute.xlu0 %7377  ;;  %v3431_v10 = vpack.c.bf16 %v3384_v13, %v3383_v55  ;;  %v3432_v15 = vpack.c.bf16 %v3386_v9, %v3385_v4  ;;  %v6939_v1 = vunpack.i.l.bf16 %v15510_v40  ;;  %v7671_v35 = vpack.i.bf16 %v1400_v3, %v1398_v19  ;;  %v15517_v19 = vld [vmem:[#allocation180_spill] sm:$0xff] }
 0x342   :  { %v15515_v38 = vrot.slane %v15491_v14, 2  ;;  %v15516_v12 = vmov %v15514_v41  ;;  %v6565_v3 = vunpack.i.h.bf16 %v15517_v19  ;;  %v6934_v9 = vunpack.i.l.bf16 %v15512_v61  ;;  %v15519_v55 = vld [vmem:[#allocation52_spill] sm:$0xff] }
 0x343   :  { %6383 = vmatprep.mubr.msk.bf16.mxu0 %vm3467_vm13, %v3431_v10  ;;  %v1410_v0 = vsel %vm1234_vm5, %v15516_v12, %v1409_v56  ;;  %v6559_v13 = vunpack.i.l.bf16 %v15518_v25  ;;  %v2937_v4 = vsel %vm92_vm0, %v15267_v31, %v6785_v2  ;;  %v2935_v14 = vsel %vm92_vm0, %v15519_v55, %v6780_v30 }
 0x344   :  { %2835 = vrot.lane.b32.xlu1 %v15511_v47, %s8148_s3  ;;  %7662 = vrot.lane.b32.xlu0 %v15513_v43, %s8148_s3  ;;  %v1408_v27 = vsel %vm1234_vm5, %v15515_v38, %v15514_v41  ;;  %v2938_v10 = vsel %vm92_vm0, %v15264_v48, %v6789_v6  ;;  %v2997_v56 = vsel %vm2963_vm1, %v2935_v14, %v6930_v24  ;;  %v7379_v61 = vunpack.i.l.bf16 %v11931_v26  ;;  %v15520_v41 = vld [vmem:[#allocation182_spill] sm:$0xff] }
 0x345   :  { %6384 = vmatmul.mubr.msk.bf16.gmra.mxu0 %vm3467_vm13, %v3432_v15  ;;  %v7393_v37 = vpop.permute.xlu1 %7392  ;;  %v7388_v58 = vpop.permute.xlu0 %7387  ;;  %v3000_v43 = vsel %vm2963_vm1, %v2938_v10, %v6939_v1  ;;  %v7681_v15 = vpack.i.bf16 %v1410_v0, %v1408_v27  ;;  %v7676_v38 = vpack.i.bf16 %v15511_v47, %v15520_v41  ;;  %v2936_v31 = vsel %vm92_vm0, %v15266_v29, %v6784_v54 }
 0x346   :  { %v2999_v2 = vsel %vm2963_vm1, %v2937_v4, %v6935_v20  ;;  %v7389_v30 = vunpack.i.l.bf16 %v7388_v58  ;;  %v6564_v48 = vunpack.i.l.bf16 %v15517_v19  ;;  %v2998_v6 = vsel %vm2963_vm1, %v2936_v31, %v6934_v9 }
 0x347   :  { %v6560_v1 = vunpack.i.h.bf16 %v15518_v25  ;;  %v3065_v27 = vsel %vm3025_vm7, %v3000_v43, %v6565_v3  ;;  %v3062_v47 = vsel %vm3025_vm7, %v2997_v56, %v6559_v13  ;;  %v7384_v29 = vunpack.i.l.bf16 %v11926_v11 }
 0x348   :  { %7672 = vrot.lane.b32.xlu1 %v7671_v35, %s8145_s23  ;;  %7667 = vrot.lane.b32.xlu0 %v7666_v17, %s8145_s23  ;;  %v3064_v54 = vsel %vm3025_vm7, %v2999_v2, %v6564_v48  ;;  %v3127_v20 = vsel %vm3090_vm8, %v3062_v47, %v7379_v61  ;;  %v7385_v17 = vunpack.i.h.bf16 %v11926_v11  ;;  %v7380_v0 = vunpack.i.h.bf16 %v11931_v26 }
 0x349   :  { %v11974_v24 = vpop.permute.xlu1 %7402  ;;  %v7398_v12 = vpop.permute.xlu0 %7397  ;;  %v3063_v19 = vsel %vm3025_vm7, %v2998_v6, %v6560_v1  ;;  %v3192_v9 = vsel %vm3155_vm9, %v3127_v20, %v7389_v30  ;;  %v7355_v3 = vunpack.i.h.bf16 %v11873_v16  ;;  %v7395_v25 = vunpack.i.h.bf16 %v7393_v37 }
 0x34a   :  { %v7394_v13 = vunpack.i.l.bf16 %v7393_v37  ;;  %v7390_v4 = vunpack.i.h.bf16 %v7388_v58  ;;  %v7365_v14 = vunpack.i.h.bf16 %v11890_v45  ;;  %v7404_v10 = vunpack.i.l.bf16 %v11974_v24 }
 0x34b   :  { %v7399_v11 = vunpack.i.l.bf16 %v7398_v12  ;;  %v3129_v26 = vsel %vm3090_vm8, %v3064_v54, %v7384_v29  ;;  %v3257_v43 = vsel %vm3220_vm10, %v3192_v9, %v7355_v3  ;;  %v7400_v61 = vunpack.i.h.bf16 %v7398_v12 }
 0x34c   :  { %7682 = vrot.lane.b32.xlu1 %v7681_v15, %s8146_s30  ;;  %7677 = vrot.lane.b32.xlu0 %v7676_v38, %s8146_s30  ;;  %v3130_v16 = vsel %vm3090_vm8, %v3065_v27, %v7385_v17  ;;  %v3128_v37 = vsel %vm3090_vm8, %v3063_v19, %v7380_v0  ;;  %v7375_v45 = vunpack.i.h.bf16 %v11907_v23  ;;  %v3194_v31 = vsel %vm3155_vm9, %v3129_v26, %v7394_v13  ;;  %v15522_v26 = vld [vmem:[#allocation110_spill] sm:$0xff] }
 0x34d   :  { %v11989_v55 = vpop.permute.xlu1 %7412  ;;  %v7408_v56 = vpop.permute.xlu0 %7407  ;;  %v3195_v2 = vsel %vm3155_vm9, %v3130_v16, %v7395_v25  ;;  %v3193_v30 = vsel %vm3155_vm9, %v3128_v37, %v7390_v4  ;;  %v3322_v47 = vsel %vm3285_vm11, %v3257_v43, %v7365_v14  ;;  %v6790_v25 = vunpack.i.h.bf16 %v15508_v39 }
 0x34e   :  { %v7414_v41 = vunpack.i.l.bf16 %v11989_v55  ;;  %v7410_v58 = vunpack.i.h.bf16 %v7408_v56  ;;  %v7409_v38 = vunpack.i.l.bf16 %v7408_v56  ;;  %v3258_v6 = vsel %vm3220_vm10, %v3193_v30, %v7399_v11  ;;  %v15525_v30 = vld [vmem:[#allocation188_spill] sm:$0xff] }
 0x34f   :  { %v3387_v3 = vsel %vm3350_vm12, %v3322_v47, %v7375_v45  ;;  %v6940_v56 = vunpack.i.h.bf16 %v15510_v40  ;;  %v6795_v43 = vunpack.i.h.bf16 %v15522_v26  ;;  %v6794_v39 = vunpack.i.l.bf16 %v15522_v26  ;;  %v15526_v47 = vld [vmem:[#allocation186_spill] sm:$0xff] }
 0x350   :  { %7687 = vrot.lane.b32.xlu1 %v7671_v35, %s8147_s8  ;;  %2473 = vrot.lane.b32.xlu0 %v15497_v34, %s8142_s21  ;;  %v3260_v35 = vsel %vm3220_vm10, %v3195_v2, %v7404_v10  ;;  %v3259_v34 = vsel %vm3220_vm10, %v3194_v31, %v7400_v61  ;;  %v3323_v54 = vsel %vm3285_vm11, %v3258_v6, %v7409_v38  ;;  %v15521_v10 = vld [vmem:[#allocation113_spill] sm:$0xff]  ;;  %v15523_v61 = vld [vmem:[#allocation239_spill] sm:$0xff] }
 0x351   :  { %v12005_v48 = vpop.permute.xlu1 %7422  ;;  %v7418_v27 = vpop.permute.xlu0 %7417  ;;  %v3325_v23 = vsel %vm3285_vm11, %v3260_v35, %v7414_v41  ;;  %v3324_v20 = vsel %vm3285_vm11, %v3259_v34, %v7410_v58  ;;  %v6799_v11 = vunpack.i.l.bf16 %v15521_v10  ;;  %v15524_v41 = vld [vmem:[#allocation240_spill] sm:$0xff]  ;;  %v2939_v58 = vsel %vm92_vm0, %v15265_v50, %v6790_v25 }
 0x352   :  { %v7424_v1 = vunpack.i.l.bf16 %v12005_v48  ;;  %v7420_v12 = vunpack.i.h.bf16 %v7418_v27  ;;  %v7419_v29 = vunpack.i.l.bf16 %v7418_v27  ;;  %v6945_v16 = vunpack.i.h.bf16 %v15524_v41 }
 0x353   :  { %v2942_v40 = vsel %vm92_vm0, %v15322_v33, %v6799_v11  ;;  %v3001_v45 = vsel %vm2963_vm1, %v2939_v58, %v6940_v56  ;;  %v6944_v31 = vunpack.i.l.bf16 %v15524_v41  ;;  %v6569_v35 = vunpack.i.l.bf16 %v15525_v30 }
 0x354   :  { %v3390_v17 = vsel %vm3350_vm12, %v3325_v23, %v7424_v1  ;;  %7692 = vrot.lane.b32.xlu0 %v7681_v15, %s8148_s3  ;;  %v3388_v0 = vsel %vm3350_vm12, %v3323_v54, %v7419_v29  ;;  %v3389_v19 = vsel %vm3350_vm12, %v3324_v20, %v7420_v12  ;;  %v6949_v15 = vunpack.i.l.bf16 %v15523_v61 }
 0x355   :  { %v7433_v9 = vpop.permute.xlu1 %7432  ;;  %v7428_v13 = vpop.permute.xlu0 %7427  ;;  %v3433_v4 = vpack.c.bf16 %v3388_v0, %v3387_v3  ;;  %v3434_v14 = vpack.c.bf16 %v3390_v17, %v3389_v19  ;;  %v2941_v6 = vsel %vm92_vm0, %v15277_v5, %v6795_v43  ;;  %v6575_v34 = vunpack.i.h.bf16 %v15526_v47 }
 0x356   :  { %v7429_v2 = vunpack.i.l.bf16 %v7428_v13  ;;  %v3004_v1 = vsel %vm2963_vm1, %v2942_v40, %v6949_v15  ;;  %v3003_v50 = vsel %vm2963_vm1, %v2941_v6, %v6945_v16  ;;  %v6574_v33 = vunpack.i.l.bf16 %v15526_v47 }
 0x357   :  { %6387 = vmatprep.mubr.msk.bf16.mxu0 %vm3467_vm13, %v3433_v4  ;;  %v6570_v12 = vunpack.i.h.bf16 %v15525_v30  ;;  %v2940_v29 = vsel %vm92_vm0, %v15324_v21, %v6794_v39  ;;  %v3066_v54 = vsel %vm3025_vm7, %v3001_v45, %v6569_v35  ;;  %v7434_v17 = vunpack.i.l.bf16 %v7433_v9 }
 0x358   :  { %6388 = vmatmul.mubr.msk.bf16.gmra.mxu0 %vm3467_vm13, %v3434_v14  ;;  %v3002_v5 = vsel %vm2963_vm1, %v2940_v29, %v6944_v31  ;;  %v3069_v0 = vsel %vm3025_vm7, %v3004_v1, %v6575_v34  ;;  %v3131_v19 = vsel %vm3090_vm8, %v3066_v54, %v7429_v2  ;;  %v7435_v3 = vunpack.i.h.bf16 %v7433_v9 }
 0x359   :  { %v7443_v37 = vpop.permute.xlu1 %7442  ;;  %v7438_v38 = vpop.permute.xlu0 %7437  ;;  %v3068_v25 = vsel %vm3025_vm7, %v3003_v50, %v6574_v33  ;;  %v7430_v4 = vunpack.i.h.bf16 %v7428_v13  ;;  %v7405_v11 = vunpack.i.h.bf16 %v11974_v24  ;;  %v7415_v15 = vunpack.i.h.bf16 %v11989_v55 }
 0x35a   :  { %v7439_v27 = vunpack.i.l.bf16 %v7438_v38  ;;  %v7445_v56 = vunpack.i.h.bf16 %v7443_v37  ;;  %v7444_v21 = vunpack.i.l.bf16 %v7443_v37  ;;  %v7440_v26 = vunpack.i.h.bf16 %v7438_v38 }
 0x35b   :  { %v3067_v41 = vsel %vm3025_vm7, %v3002_v5, %v6570_v12  ;;  %v3133_v58 = vsel %vm3090_vm8, %v3068_v25, %v7434_v17  ;;  %v3134_v37 = vsel %vm3090_vm8, %v3069_v0, %v7435_v3  ;;  %v7425_v55 = vunpack.i.h.bf16 %v12005_v48 }
 0x35c   :  { %v3196_v14 = vsel %vm3155_vm9, %v3131_v19, %v7439_v27  ;;  %v3132_v38 = vsel %vm3090_vm8, %v3067_v41, %v7430_v4  ;;  %v3198_v2 = vsel %vm3155_vm9, %v3133_v58, %v7444_v21  ;;  %v3199_v30 = vsel %vm3155_vm9, %v3134_v37, %v7445_v56  ;;  %v15527_v56 = vld [vmem:[#allocation151_spill] sm:$0xff] }
 0x35d   :  { %v12041_v23 = vpop.permute.xlu1 %7452  ;;  %v7448_v20 = vpop.permute.xlu0 %7447  ;;  %v3261_v24 = vsel %vm3220_vm10, %v3196_v14, %v7405_v11  ;;  %v3197_v35 = vsel %vm3155_vm9, %v3132_v38, %v7440_v26  ;;  %v6800_v25 = vunpack.i.h.bf16 %v15521_v10  ;;  %v6809_v21 = vunpack.i.l.bf16 %v15527_v56 }
 0x35e   :  { %v7454_v16 = vunpack.i.l.bf16 %v12041_v23  ;;  %v7450_v39 = vunpack.i.h.bf16 %v7448_v20  ;;  %v7449_v13 = vunpack.i.l.bf16 %v7448_v20  ;;  %v3326_v50 = vsel %vm3285_vm11, %v3261_v24, %v7415_v15  ;;  %v15528_v15 = vld [vmem:[#allocation102_spill] sm:$0xff] }
 0x35f   :  { %v3391_v19 = vsel %vm3350_vm12, %v3326_v50, %v7425_v55  ;;  %v6950_v26 = vunpack.i.h.bf16 %v15523_v61  ;;  %v6805_v41 = vunpack.i.h.bf16 %v15528_v15  ;;  %v6804_v10 = vunpack.i.l.bf16 %v15528_v15 }
 0x360   :  { %v3264_v1 = vsel %vm3220_vm10, %v3199_v30, %v7454_v16  ;;  %v3263_v27 = vsel %vm3220_vm10, %v3198_v2, %v7450_v39  ;;  %v3262_v29 = vsel %vm3220_vm10, %v3197_v35, %v7449_v13  ;;  %v15529_v16 = vld [vmem:[#allocation125_spill] sm:$0xff]  ;;  %v2946_v61 = vsel %vm92_vm0, %v15350_v46, %v6809_v21 }
 0x361   :  { %v12054_v43 = vpop.permute.xlu1 %7462  ;;  %v7458_v9 = vpop.permute.xlu0 %7457  ;;  %v6959_v39 = vunpack.i.l.bf16 %v15529_v16  ;;  %v2945_v2 = vsel %vm92_vm0, %v15357_v59, %v6805_v41  ;;  %v2944_v50 = vsel %vm92_vm0, %v15356_v7, %v6804_v10 }
 0x362   :  { %v7464_v40 = vunpack.i.l.bf16 %v12054_v43  ;;  %v7460_v45 = vunpack.i.h.bf16 %v7458_v9  ;;  %v7459_v31 = vunpack.i.l.bf16 %v7458_v9  ;;  %v15530_v9 = vld [vmem:[#allocation132_spill] sm:$0xff]  ;;  %v7465_v21 = vunpack.i.h.bf16 %v12054_v43 }
 0x363   :  { %v6955_v58 = vunpack.i.h.bf16 %v15530_v9  ;;  %v6954_v38 = vunpack.i.l.bf16 %v15530_v9  ;;  %v3008_v30 = vsel %vm2963_vm1, %v2946_v61, %v6959_v39 }
 0x364   :  { %v3329_v33 = vsel %vm3285_vm11, %v3264_v1, %v7464_v40  ;;  %v3328_v54 = vsel %vm3285_vm11, %v3263_v27, %v7460_v45  ;;  %v3327_v5 = vsel %vm3285_vm11, %v3262_v29, %v7459_v31  ;;  %v2943_v40 = vsel %vm92_vm0, %v15274_v62, %v6800_v25  ;;  %v15531_v31 = vld [vmem:[#allocation192_spill] sm:$0xff]  ;;  %v15532_v1 = vld [vmem:[#allocation189_spill] sm:$0xff] }
 0x365   :  { %v12068_v6 = vpop.permute.xlu1 %7472  ;;  %v7468_v34 = vpop.permute.xlu0 %7467  ;;  %v3005_v37 = vsel %vm2963_vm1, %v2943_v40, %v6950_v26  ;;  %v6579_v55 = vunpack.i.l.bf16 %v15531_v31  ;;  %v6585_v27 = vunpack.i.h.bf16 %v15532_v1  ;;  %v3007_v62 = vsel %vm2963_vm1, %v2945_v2, %v6955_v58 }
 0x366   :  { %v7474_v47 = vunpack.i.l.bf16 %v12068_v6  ;;  %v7470_v48 = vunpack.i.h.bf16 %v7468_v34  ;;  %v7469_v12 = vunpack.i.l.bf16 %v7468_v34  ;;  %v6584_v46 = vunpack.i.l.bf16 %v15532_v1 }
 0x367   :  { %v6580_v34 = vunpack.i.h.bf16 %v15531_v31  ;;  %v3006_v59 = vsel %vm2963_vm1, %v2944_v50, %v6954_v38  ;;  %v3073_v29 = vsel %vm3025_vm7, %v3008_v30, %v6585_v27  ;;  %v7475_v43 = vunpack.i.h.bf16 %v12068_v6 }
 0x368   :  { %v3394_v20 = vsel %vm3350_vm12, %v3329_v33, %v7474_v47  ;;  %v3393_v17 = vsel %vm3350_vm12, %v3328_v54, %v7470_v48  ;;  %v3392_v3 = vsel %vm3350_vm12, %v3327_v5, %v7469_v12  ;;  %v3070_v33 = vsel %vm3025_vm7, %v3005_v37, %v6579_v55 }
 0x369   :  { %v7483_v0 = vpop.permute.xlu1 %7482  ;;  %v7478_v4 = vpop.permute.xlu0 %7477  ;;  %v3435_v14 = vpack.c.bf16 %v3392_v3, %v3391_v19  ;;  %v3436_v11 = vpack.c.bf16 %v3394_v20, %v3393_v17  ;;  %v3072_v5 = vsel %vm3025_vm7, %v3007_v62, %v6584_v46  ;;  %v7455_v3 = vunpack.i.h.bf16 %v12041_v23 }
 0x36a   :  { %v7479_v45 = vunpack.i.l.bf16 %v7478_v4  ;;  %v7484_v12 = vunpack.i.l.bf16 %v7483_v0  ;;  %v7485_v20 = vunpack.i.h.bf16 %v7483_v0  ;;  %v7480_v17 = vunpack.i.h.bf16 %v7478_v4 }
 0x36b   :  { %6391 = vmatprep.mubr.msk.bf16.mxu1 %vm3467_vm13, %v3435_v14  ;;  %v3071_v26 = vsel %vm3025_vm7, %v3006_v59, %v6580_v34 }
 0x36c   :  { %6392 = vmatmul.mubr.msk.bf16.vlgmr.msra.gmra.mxu1 %vm3467_vm13, %v3436_v11  ;;  %v3135_v54 = vsel %vm3090_vm8, %v3070_v33, %v7479_v45  ;;  %v3137_v39 = vsel %vm3090_vm8, %v3072_v5, %v7484_v12  ;;  %v3138_v58 = vsel %vm3090_vm8, %v3073_v29, %v7485_v20  ;;  %v6810_v12 = vunpack.i.h.bf16 %v15527_v56  ;;  %v15533_v5 = vld [vmem:[#allocation231_spill] sm:$0xff] }
 0x36d   :  { %v7493_v13 = vpop.permute.xlu1 %7492  ;;  %v7488_v24 = vpop.permute.xlu0 %7487 }
 0x36e   :  { %v7489_v35 = vunpack.i.l.bf16 %v7488_v24  ;;  %v7495_v25 = vunpack.i.h.bf16 %v7493_v13  ;;  %v7494_v7 = vunpack.i.l.bf16 %v7493_v13  ;;  %v7490_v14 = vunpack.i.h.bf16 %v7488_v24 }
 0x36f   :  { %v3136_v13 = vsel %vm3090_vm8, %v3071_v26, %v7480_v17  ;;  %v6819_v17 = vunpack.i.l.bf16 %v15533_v5 }
 0x370   :  { %v3200_v19 = vsel %vm3155_vm9, %v3135_v54, %v7489_v35  ;;  %v3202_v24 = vsel %vm3155_vm9, %v3137_v39, %v7494_v7  ;;  %v3203_v61 = vsel %vm3155_vm9, %v3138_v58, %v7495_v25  ;;  %v3201_v37 = vsel %vm3155_vm9, %v3136_v13, %v7490_v14  ;;  %v15535_v7 = vld [vmem:[#allocation44_spill] sm:$0xff] }
 0x371   :  { %v12103_v47 = vpop.permute.xlu1 %7502  ;;  %v7498_v48 = vpop.permute.xlu0 %7497  ;;  %v3265_v4 = vsel %vm3220_vm10, %v3200_v19, %v7455_v3  ;;  %v6960_v19 = vunpack.i.h.bf16 %v15529_v16  ;;  %v15534_v3 = vld [vmem:[#allocation108_spill] sm:$0xff]  ;;  %v6969_v14 = vunpack.i.l.bf16 %v15535_v7  ;;  %v2950_v16 = vsel %vm92_vm0, %v15404_v18, %v6819_v17 }
 0x372   :  { %v7504_v15 = vunpack.i.l.bf16 %v12103_v47  ;;  %v7499_v41 = vunpack.i.l.bf16 %v7498_v48  ;;  %v7500_v9 = vunpack.i.h.bf16 %v7498_v48  ;;  %v3330_v30 = vsel %vm3285_vm11, %v3265_v4, %v7465_v21  ;;  %v15536_v21 = vld [vmem:[#allocation43_spill] sm:$0xff] }
 0x373   :  { %v3395_v59 = vsel %vm3350_vm12, %v3330_v30, %v7475_v43  ;;  %v6815_v25 = vunpack.i.h.bf16 %v15534_v3  ;;  %v6965_v26 = vunpack.i.h.bf16 %v15536_v21  ;;  %v6814_v56 = vunpack.i.l.bf16 %v15534_v3  ;;  %v15538_v43 = vld [vmem:[#allocation22_spill] sm:$0xff] }
 0x374   :  { %v3268_v45 = vsel %vm3220_vm10, %v3203_v61, %v7504_v15  ;;  %v3266_v31 = vsel %vm3220_vm10, %v3201_v37, %v7499_v41  ;;  %v3267_v35 = vsel %vm3220_vm10, %v3202_v24, %v7500_v9  ;;  %v2947_v41 = vsel %vm92_vm0, %v15351_v52, %v6810_v12 }
 0x375   :  { %v12116_v11 = vpop.permute.xlu1 %7512  ;;  %v3009_v39 = vsel %vm2963_vm1, %v2947_v41, %v6960_v19  ;;  %v6964_v4 = vunpack.i.l.bf16 %v15536_v21  ;;  %v2949_v13 = vsel %vm92_vm0, %v15408_v60, %v6815_v25  ;;  %v6595_v24 = vunpack.i.h.bf16 %v15538_v43 }
 0x376   :  { %v7508_v0 = vpop.permute.xlu0 %7507  ;;  %v7514_v23 = vunpack.i.l.bf16 %v12116_v11  ;;  %v3011_v52 = vsel %vm2963_vm1, %v2949_v13, %v6965_v26  ;;  %v6594_v18 = vunpack.i.l.bf16 %v15538_v43 }
 0x377   :  { %v7510_v10 = vunpack.i.h.bf16 %v7508_v0  ;;  %v7509_v40 = vunpack.i.l.bf16 %v7508_v0 }
 0x378   :  { %v3333_v6 = vsel %vm3285_vm11, %v3268_v45, %v7514_v23  ;;  %v15537_v23 = vld [vmem:[#allocation101_spill] sm:$0xff]  ;;  %v2948_v45 = vsel %vm92_vm0, %v15407_v22, %v6814_v56 }
 0x379   :  { %v12130_v38 = vpop.permute.xlu1 %7522  ;;  %v3331_v62 = vsel %vm3285_vm11, %v3266_v31, %v7509_v40  ;;  %v3332_v46 = vsel %vm3285_vm11, %v3267_v35, %v7510_v10  ;;  %v6589_v58 = vunpack.i.l.bf16 %v15537_v23  ;;  %v3012_v10 = vsel %vm2963_vm1, %v2950_v16, %v6969_v14 }
 0x37a   :  { %v7524_v55 = vunpack.i.l.bf16 %v12130_v38  ;;  %v7518_v2 = vpop.permute.xlu0 %7517  ;;  %v6590_v37 = vunpack.i.h.bf16 %v15537_v23  ;;  %v3010_v60 = vsel %vm2963_vm1, %v2948_v45, %v6964_v4  ;;  %v3077_v30 = vsel %vm3025_vm7, %v3012_v10, %v6595_v24 }
 0x37b   :  { %v7520_v1 = vunpack.i.h.bf16 %v7518_v2  ;;  %v7519_v27 = vunpack.i.l.bf16 %v7518_v2  ;;  %v3074_v31 = vsel %vm3025_vm7, %v3009_v39, %v6589_v58  ;;  %v6820_v45 = vunpack.i.h.bf16 %v15533_v5 }
 0x37c   :  { %v3398_v34 = vsel %vm3350_vm12, %v3333_v6, %v7524_v55  ;;  %v3075_v12 = vsel %vm3025_vm7, %v3010_v60, %v6590_v37  ;;  %v15539_v60 = vld [vmem:[#allocation233_spill] sm:$0xff] }
 0x37d   :  { %v3396_v50 = vsel %vm3350_vm12, %v3331_v62, %v7519_v27  ;;  %v3397_v33 = vsel %vm3350_vm12, %v3332_v46, %v7520_v1  ;;  %v7533_v48 = vpop.permute.xlu1 %7532  ;;  %v3076_v1 = vsel %vm3025_vm7, %v3011_v52, %v6594_v18  ;;  %v7505_v46 = vunpack.i.h.bf16 %v12103_v47 }
 0x37e   :  { %v7528_v29 = vpop.permute.xlu0 %7527  ;;  %v3437_v54 = vpack.c.bf16 %v3396_v50, %v3395_v59  ;;  %v3438_v20 = vpack.c.bf16 %v3398_v34, %v3397_v33  ;;  %v7534_v2 = vunpack.i.l.bf16 %v7533_v48  ;;  %v7535_v6 = vunpack.i.h.bf16 %v7533_v48 }
 0x37f   :  { %v7529_v9 = vunpack.i.l.bf16 %v7528_v29  ;;  %v7530_v27 = vunpack.i.h.bf16 %v7528_v29  ;;  %v7515_v59 = vunpack.i.h.bf16 %v12116_v11  ;;  %v7525_v11 = vunpack.i.h.bf16 %v12130_v38 }
 0x380   :  { %6395 = vmatprep.mubr.msk.bf16.mxu1 %vm3467_vm13, %v3437_v54  ;;  %v3141_v17 = vsel %vm3090_vm8, %v3076_v1, %v7534_v2  ;;  %v3142_v3 = vsel %vm3090_vm8, %v3077_v30, %v7535_v6  ;;  %v6829_v2 = vunpack.i.l.bf16 %v15539_v60  ;;  %v6970_v30 = vunpack.i.h.bf16 %v15535_v7  ;;  %v15540_v6 = vld [vmem:[#allocation73_spill] sm:$0xff] }
 0x381   :  { %6396 = vmatmul.mubr.msk.bf16.gmra.mxu1 %vm3467_vm13, %v3438_v20  ;;  %v7543_v15 = vpop.permute.xlu1 %7542  ;;  %v3139_v35 = vsel %vm3090_vm8, %v3074_v31, %v7529_v9  ;;  %v3140_v25 = vsel %vm3090_vm8, %v3075_v12, %v7530_v27  ;;  %v6825_v1 = vunpack.i.h.bf16 %v15540_v6  ;;  %v15541_v27 = vld [vmem:[#allocation111_spill] sm:$0xff]  ;;  %v6824_v5 = vunpack.i.l.bf16 %v15540_v6 }
 0x382   :  { %v7538_v0 = vpop.permute.xlu0 %7537  ;;  %v7545_v34 = vunpack.i.h.bf16 %v7543_v15  ;;  %v7544_v22 = vunpack.i.l.bf16 %v7543_v15  ;;  %v2954_v7 = vsel %vm92_vm0, %v15441_v44, %v6829_v2 }
 0x383   :  { %v7539_v40 = vunpack.i.l.bf16 %v7538_v0  ;;  %v7540_v50 = vunpack.i.h.bf16 %v7538_v0 }
 0x384   :  { %v3206_v26 = vsel %vm3155_vm9, %v3141_v17, %v7544_v22  ;;  %v3207_v15 = vsel %vm3155_vm9, %v3142_v3, %v7545_v34  ;;  %v15544_v3 = vld [vmem:[#allocation10_spill] sm:$0xff] }
 0x385   :  { %v12165_v61 = vpop.permute.xlu1 %7552  ;;  %v3204_v62 = vsel %vm3155_vm9, %v3139_v35, %v7539_v40  ;;  %v3205_v56 = vsel %vm3155_vm9, %v3140_v25, %v7540_v50  ;;  %v2951_v50 = vsel %vm92_vm0, %v15405_v53, %v6820_v45  ;;  %v6605_v25 = vunpack.i.h.bf16 %v15544_v3 }
 0x386   :  { %v7548_v55 = vpop.permute.xlu0 %7547  ;;  %v7554_v54 = vunpack.i.l.bf16 %v12165_v61  ;;  %v3269_v29 = vsel %vm3220_vm10, %v3204_v62, %v7505_v46  ;;  %v6979_v62 = vunpack.i.l.bf16 %v15541_v27  ;;  %v15542_v46 = vld [vmem:[#allocation112_spill] sm:$0xff]  ;;  %v3013_v12 = vsel %vm2963_vm1, %v2951_v50, %v6970_v30 }
 0x387   :  { %v7549_v20 = vunpack.i.l.bf16 %v7548_v55  ;;  %v7550_v19 = vunpack.i.h.bf16 %v7548_v55  ;;  %v3334_v9 = vsel %vm3285_vm11, %v3269_v29, %v7515_v59  ;;  %v6975_v34 = vunpack.i.h.bf16 %v15542_v46 }
 0x388   :  { %v3272_v0 = vsel %vm3220_vm10, %v3207_v15, %v7554_v54  ;;  %v3399_v37 = vsel %vm3350_vm12, %v3334_v9, %v7525_v11  ;;  %v6974_v54 = vunpack.i.l.bf16 %v15542_v46  ;;  %v2953_v29 = vsel %vm92_vm0, %v15449_v49, %v6825_v1 }
 0x389   :  { %v12178_v33 = vpop.permute.xlu1 %7562  ;;  %v3270_v16 = vsel %vm3220_vm10, %v3205_v56, %v7549_v20  ;;  %v3271_v23 = vsel %vm3220_vm10, %v3206_v26, %v7550_v19  ;;  %v3016_v19 = vsel %vm2963_vm1, %v2954_v7, %v6979_v62  ;;  %v3015_v53 = vsel %vm2963_vm1, %v2953_v29, %v6975_v34 }
 0x38a   :  { %v7558_v48 = vpop.permute.xlu0 %7557  ;;  %v7564_v47 = vunpack.i.l.bf16 %v12178_v33  ;;  %v6604_v44 = vunpack.i.l.bf16 %v15544_v3  ;;  %v2952_v11 = vsel %vm92_vm0, %v15448_v51, %v6824_v5 }
 0x38b   :  { %v7560_v14 = vunpack.i.h.bf16 %v7558_v48  ;;  %v7559_v21 = vunpack.i.l.bf16 %v7558_v48  ;;  %v15543_v48 = vld [vmem:[#allocation193_spill] sm:$0xff]  ;;  %v3014_v49 = vsel %vm2963_vm1, %v2952_v11, %v6974_v54  ;;  %v6980_v11 = vunpack.i.h.bf16 %v15541_v27 }
 0x38c   :  { %v3337_v38 = vsel %vm3285_vm11, %v3272_v0, %v7564_v47  ;;  %v6599_v17 = vunpack.i.l.bf16 %v15543_v48  ;;  %v3081_v0 = vsel %vm3025_vm7, %v3016_v19, %v6605_v25  ;;  %v6830_v25 = vunpack.i.h.bf16 %v15539_v60 }
 0x38d   :  { %v12192_v41 = vpop.permute.xlu1 %7572  ;;  %v3335_v10 = vsel %vm3285_vm11, %v3270_v16, %v7559_v21  ;;  %v3336_v40 = vsel %vm3285_vm11, %v3271_v23, %v7560_v14  ;;  %v6600_v21 = vunpack.i.h.bf16 %v15543_v48 }
 0x38e   :  { %v7574_v39 = vunpack.i.l.bf16 %v12192_v41  ;;  %v7568_v4 = vpop.permute.xlu0 %7567  ;;  %v3078_v26 = vsel %vm3025_vm7, %v3013_v12, %v6599_v17  ;;  %v2955_v27 = vsel %vm92_vm0, %v15442_v32, %v6830_v25 }
 0x38f   :  { %v7570_v58 = vunpack.i.h.bf16 %v7568_v4  ;;  %v7569_v13 = vunpack.i.l.bf16 %v7568_v4  ;;  %v3080_v4 = vsel %vm3025_vm7, %v3015_v53, %v6604_v44 }
 0x390   :  { %v3402_v43 = vsel %vm3350_vm12, %v3337_v38, %v7574_v39  ;;  %v7555_v38 = vunpack.i.h.bf16 %v12165_v61 }
 0x391   :  { %v3400_v24 = vsel %vm3350_vm12, %v3335_v10, %v7569_v13  ;;  %v3401_v52 = vsel %vm3350_vm12, %v3336_v40, %v7570_v58  ;;  %v7565_v40 = vunpack.i.h.bf16 %v12178_v33  ;;  %v7575_v33 = vunpack.i.h.bf16 %v12192_v41 }
 0x392   :  { %v7583_v18 = vpop.permute.xlu1 %7582  ;;  %v7578_v31 = vpop.permute.xlu0 %7577  ;;  %v3439_v55 = vpack.c.bf16 %v3400_v24, %v3399_v37  ;;  %v3440_v35 = vpack.c.bf16 %v3402_v43, %v3401_v52  ;;  %v3079_v43 = vsel %vm3025_vm7, %v3014_v49, %v6600_v21  ;;  %v15546_v49 = vld [vmem:[#allocation232_spill] sm:$0xff] }
 0x393   :  { %v7579_v20 = vunpack.i.l.bf16 %v7578_v31  ;;  %v7584_v56 = vunpack.i.l.bf16 %v7583_v18  ;;  %v7585_v39 = vunpack.i.h.bf16 %v7583_v18  ;;  %v7580_v9 = vunpack.i.h.bf16 %v7578_v31 }
 0x394   :  { %6399 = vmatprep.mubr.msk.bf16.mxu1 %vm3467_vm13, %v3439_v55 }
 0x395   :  { %6400 = vmatmul.mubr.msk.bf16.gmra.mxu1 %vm3467_vm13, %v3440_v35  ;;  %v3143_v16 = vsel %vm3090_vm8, %v3078_v26, %v7579_v20  ;;  %v3145_v37 = vsel %vm3090_vm8, %v3080_v4, %v7584_v56  ;;  %v3146_v55 = vsel %vm3090_vm8, %v3081_v0, %v7585_v39  ;;  %v3144_v2 = vsel %vm3090_vm8, %v3079_v43, %v7580_v9  ;;  %v15545_v26 = vld [vmem:[#allocation37_spill] sm:$0xff] }
 0x396   :  { %v7593_v22 = vpop.permute.xlu1 %7592  ;;  %v7588_v59 = vpop.permute.xlu0 %7587  ;;  %v6835_v56 = vunpack.i.h.bf16 %v15546_v49  ;;  %v6834_v0 = vunpack.i.l.bf16 %v15546_v49  ;;  %v15548_v9 = vld [vmem:[#allocation33_spill] sm:$0xff]  ;;  %v15553_v49 = vld [vmem:[#allocation131_spill] sm:$0xff] }
 0x397   :  { %v7589_v47 = vunpack.i.l.bf16 %v7588_v59  ;;  %v7595_v58 = vunpack.i.h.bf16 %v7593_v22  ;;  %v7594_v51 = vunpack.i.l.bf16 %v7593_v22  ;;  %v7590_v13 = vunpack.i.h.bf16 %v7588_v59 }
 0x398   :  { %v6615_v60 = vunpack.i.h.bf16 %v15548_v9  ;;  %v2956_v32 = vsel %vm92_vm0, %v15475_v57, %v6834_v0 }
 0x399   :  { %v3208_v23 = vsel %vm3155_vm9, %v3143_v16, %v7589_v47  ;;  %v3210_v6 = vsel %vm3155_vm9, %v3145_v37, %v7594_v51  ;;  %v3211_v1 = vsel %vm3155_vm9, %v3146_v55, %v7595_v58  ;;  %v3209_v62 = vsel %vm3155_vm9, %v3144_v2, %v7590_v13  ;;  %v15547_v16 = vld [vmem:[#allocation114_spill] sm:$0xff]  ;;  %v15549_v51 = vld [vmem:[#allocation115_spill] sm:$0xff] }
 0x39a   :  { %v12227_v14 = vpop.permute.xlu1 %7602  ;;  %v7598_v15 = vpop.permute.xlu0 %7597  ;;  %v3273_v45 = vsel %vm3220_vm10, %v3208_v23, %v7555_v38  ;;  %v6989_v39 = vunpack.i.l.bf16 %v15547_v16  ;;  %v6614_v23 = vunpack.i.l.bf16 %v15548_v9  ;;  %v3017_v58 = vsel %vm2963_vm1, %v2955_v27, %v6980_v11 }
 0x39b   :  { %v7604_v24 = vunpack.i.l.bf16 %v12227_v14  ;;  %v7599_v52 = vunpack.i.l.bf16 %v7598_v15  ;;  %v7600_v31 = vunpack.i.h.bf16 %v7598_v15  ;;  %v3338_v59 = vsel %vm3285_vm11, %v3273_v45, %v7565_v40 }
 0x39c   :  { %v3403_v29 = vsel %vm3350_vm12, %v3338_v59, %v7575_v33  ;;  %v6839_v15 = vunpack.i.l.bf16 %v15545_v26  ;;  %v6985_v13 = vunpack.i.h.bf16 %v15549_v51  ;;  %v6984_v40 = vunpack.i.l.bf16 %v15549_v51 }
 0x39d   :  { %v3276_v34 = vsel %vm3220_vm10, %v3211_v1, %v7604_v24  ;;  %v3274_v22 = vsel %vm3220_vm10, %v3209_v62, %v7599_v52  ;;  %v3275_v7 = vsel %vm3220_vm10, %v3210_v6, %v7600_v31  ;;  %v15550_v24 = vld [vmem:[#allocation36_spill] sm:$0xff]  ;;  %v2957_v31 = vsel %vm92_vm0, %v15476_v28, %v6835_v56  ;;  %v15552_v6 = vld [vmem:[#allocation234_spill] sm:$0xff] }
 0x39e   :  { %v12240_v10 = vpop.permute.xlu1 %7612  ;;  %v7608_v18 = vpop.permute.xlu0 %7607  ;;  %v6610_v52 = vunpack.i.h.bf16 %v15550_v24  ;;  %v2958_v37 = vsel %vm92_vm0, %v15473_v36, %v6839_v15  ;;  %v6840_v33 = vunpack.i.h.bf16 %v15545_v26  ;;  %v2962_v36 = vsel %vm92_vm0, %v15500_v8, %v15552_v6 }
 0x39f   :  { %v7614_v61 = vunpack.i.l.bf16 %v12240_v10  ;;  %v7610_v30 = vunpack.i.h.bf16 %v7608_v18  ;;  %v7609_v35 = vunpack.i.l.bf16 %v7608_v18  ;;  %v6609_v18 = vunpack.i.l.bf16 %v15550_v24 }
 0x3a0   :  { %v3020_v2 = vsel %vm2963_vm1, %v2958_v37, %v6989_v39  ;;  %v3019_v62 = vsel %vm2963_vm1, %v2957_v31, %v6985_v13  ;;  %v3018_v57 = vsel %vm2963_vm1, %v2956_v32, %v6984_v40  ;;  %v7605_v8 = vunpack.i.h.bf16 %v12227_v14 }
 0x3a1   :  { %v3341_v41 = vsel %vm3285_vm11, %v3276_v34, %v7614_v61  ;;  %v3339_v20 = vsel %vm3285_vm11, %v3274_v22, %v7609_v35  ;;  %v3340_v48 = vsel %vm3285_vm11, %v3275_v7, %v7610_v30  ;;  %v15551_v61 = vld [vmem:[#allocation109_spill] sm:$0xff]  ;;  %v3082_v1 = vsel %vm3025_vm7, %v3017_v58, %v6609_v18 }
 0x3a2   :  { %v12254_v46 = vpop.permute.xlu1 %7622  ;;  %v7618_v50 = vpop.permute.xlu0 %7617  ;;  %v6845_v55 = vunpack.i.h.bf16 %v15551_v61  ;;  %v6844_v35 = vunpack.i.l.bf16 %v15551_v61  ;;  %v7615_v14 = vunpack.i.h.bf16 %v12240_v10  ;;  %v6995_v56 = vunpack.i.h.bf16 %v15553_v49 }
 0x3a3   :  { %v7624_v5 = vunpack.i.l.bf16 %v12254_v46  ;;  %v7620_v12 = vunpack.i.h.bf16 %v7618_v50  ;;  %v7619_v54 = vunpack.i.l.bf16 %v7618_v50  ;;  %v3085_v50 = vsel %vm3025_vm7, %v3020_v2, %v6615_v60  ;;  %v15554_v2 = vld [vmem:[#allocation38_spill] sm:$0xff] }
 0x3a4   :  { %v7625_v9 = vunpack.i.h.bf16 %v12254_v46  ;;  %v6994_v40 = vunpack.i.l.bf16 %v15553_v49  ;;  %v2961_v32 = vsel %vm92_vm0, %v15502_v42, %v6845_v55  ;;  %v3024_v6 = vsel %vm2963_vm1, %v2962_v36, %v15554_v2  ;;  %v15556_v42 = vld [vmem:[#allocation86_spill] sm:$0xff] }
 0x3a5   :  { %v3406_v17 = vsel %vm3350_vm12, %v3341_v41, %v7624_v5  ;;  %v3404_v19 = vsel %vm3350_vm12, %v3339_v20, %v7619_v54  ;;  %v3405_v47 = vsel %vm3350_vm12, %v3340_v48, %v7620_v12  ;;  %v6990_v5 = vunpack.i.h.bf16 %v15547_v16  ;;  %v15557_v36 = vld [vmem:[#allocation46_spill] sm:$0xff] }
 0x3a6   :  { %v12268_v3 = vpop.permute.xlu1 %7632  ;;  %v3441_v53 = vpack.c.bf16 %v3404_v19, %v3403_v29  ;;  %v3442_v44 = vpack.c.bf16 %v3406_v17, %v3405_v47  ;;  %v7628_v21 = vpop.permute.xlu0 %7627  ;;  %v3084_v48 = vsel %vm3025_vm7, %v3019_v62, %v6614_v23  ;;  %v3083_v17 = vsel %vm3025_vm7, %v3018_v57, %v6610_v52  ;;  %v15555_v57 = vld [vmem:[#allocation9_spill] sm:$0xff] }
 0x3a7   :  { %v7629_v43 = vunpack.i.l.bf16 %v7628_v21  ;;  %v7635_v34 = vunpack.i.h.bf16 %v12268_v3  ;;  %v7634_v41 = vunpack.i.l.bf16 %v12268_v3  ;;  %v7630_v12 = vunpack.i.h.bf16 %v7628_v21 }
 0x3a8   :  { %6403 = vmatprep.mubr.msk.bf16.mxu1 %vm3467_vm13, %v3441_v53  ;;  %v2959_v55 = vsel %vm92_vm0, %v15556_v42, %v6840_v33 }
 0x3a9   :  { %6404 = vmatmul.mubr.msk.bf16.gmra.mxu1 %vm3467_vm13, %v3442_v44  ;;  %v3147_v22 = vsel %vm3090_vm8, %v3082_v1, %v7629_v43  ;;  %v3150_v25 = vsel %vm3090_vm8, %v3085_v50, %v7635_v34  ;;  %v3149_v0 = vsel %vm3090_vm8, %v3084_v48, %v7634_v41  ;;  %v3148_v16 = vsel %vm3090_vm8, %v3083_v17, %v7630_v12 }
 0x3aa   :  { %v7643_v4 = vpop.permute.xlu1 %7642  ;;  %v7638_v38 = vpop.permute.xlu0 %7637  ;;  %v6625_v34 = vunpack.i.h.bf16 %v15555_v57  ;;  %v6620_v41 = vunpack.i.h.bf16 %v15557_v36  ;;  %v3021_v12 = vsel %vm2963_vm1, %v2959_v55, %v6990_v5  ;;  %v6619_v5 = vunpack.i.l.bf16 %v15557_v36 }
 0x3ab   :  { %v7639_v45 = vunpack.i.l.bf16 %v7638_v38  ;;  %v7645_v59 = vunpack.i.h.bf16 %v7643_v4  ;;  %v7644_v29 = vunpack.i.l.bf16 %v7643_v4  ;;  %v7640_v19 = vunpack.i.h.bf16 %v7638_v38 }
 0x3ad   :  { %v3212_v7 = vsel %vm3155_vm9, %v3147_v22, %v7639_v45  ;;  %v3215_v3 = vsel %vm3155_vm9, %v3150_v25, %v7645_v59  ;;  %v3214_v60 = vsel %vm3155_vm9, %v3149_v0, %v7644_v29  ;;  %v3213_v23 = vsel %vm3155_vm9, %v3148_v16, %v7640_v19 }
 0x3ae   :  { %v12295_v30 = vpop.permute.xlu1 %7652  ;;  %v7648_v28 = vpop.permute.xlu0 %7647  ;;  %v3277_v53 = vsel %vm3220_vm10, %v3212_v7, %v7605_v8  ;;  %v3023_v22 = vsel %vm2963_vm1, %v2961_v32, %v6995_v56  ;;  %v6624_v7 = vunpack.i.l.bf16 %v15555_v57  ;;  %v2960_v8 = vsel %vm92_vm0, %v15501_v63, %v6844_v35 }
 0x3af   :  { %v7654_v54 = vunpack.i.l.bf16 %v12295_v30  ;;  %v7650_v44 = vunpack.i.h.bf16 %v7648_v28  ;;  %v7649_v11 = vunpack.i.l.bf16 %v7648_v28  ;;  %v3342_v27 = vsel %vm3285_vm11, %v3277_v53, %v7615_v14 }
 0x3b0   :  { %v3407_v18 = vsel %vm3350_vm12, %v3342_v27, %v7625_v9  ;;  %v3088_v63 = vsel %vm3025_vm7, %v3023_v22, %v6624_v7  ;;  %v7655_v27 = vunpack.i.h.bf16 %v12295_v30  ;;  %vm5885_vm0 = vcmask 457728  }
 0x3b1   :  { %v3280_v39 = vsel %vm3220_vm10, %v3215_v3, %v7654_v54  ;;  %v3278_v38 = vsel %vm3220_vm10, %v3213_v23, %v7649_v11  ;;  %v3279_v58 = vsel %vm3220_vm10, %v3214_v60, %v7650_v44  ;;  %v3089_v54 = vsel %vm3025_vm7, %v3024_v6, %v6625_v34  ;;  %v12364_v11 = vpop.f32.mrf.mxu0 }
 0x3b2   :  { %v2653_v20 = vpop.permute.xlu1 %2652  ;;  %v7658_v47 = vpop.permute.xlu0 %7657  ;;  %v3860_v36 = vsel %vm2963_vm1, %v12364_v11, 0.0 }
 0x3b3   :  { %v7660_v21 = vunpack.i.h.bf16 %v7658_v47  ;;  %v7659_v15 = vunpack.i.l.bf16 %v7658_v47  ;;  %v3345_v43 = vsel %vm3285_vm11, %v3280_v39, %v2653_v20  ;;  %v3022_v20 = vsel %vm2963_vm1, %v2960_v8, %v6994_v40 }
 0x3b4   :  { %v3087_v3 = vsel %vm3025_vm7, %v3022_v20, %v6620_v41 }
 0x3b5   :  { %v3343_v24 = vsel %vm3285_vm11, %v3278_v38, %v7659_v15  ;;  %v3344_v46 = vsel %vm3285_vm11, %v3279_v58, %v7660_v21  ;;  %v3086_v21 = vsel %vm3025_vm7, %v3021_v12, %v6619_v5  ;;  %v15558_v15 = vld [vmem:[#allocation19_spill] sm:$0xff]  ;;  %v15559_v58 = vld [vmem:[#allocation14_spill] sm:$0xff] }
 0x3b6   :  { %v2836_v4 = vpop.permute.xlu1 %2835  ;;  %v7663_v10 = vpop.permute.xlu0 %7662 }
 0x3b7   :  { %v7665_v51 = vunpack.i.h.bf16 %v7663_v10  ;;  %v7664_v13 = vunpack.i.l.bf16 %v7663_v10  ;;  %v3410_v52 = vsel %vm3350_vm12, %v3345_v43, %v2836_v4  ;;  %v12376_v10 = vpop.f32.mrf.mxu0 }
 0x3b8   :  { %v3857_v8 = vsel %vm2963_vm1, %v12376_v10, 0.0 }
 0x3b9   :  { %v3408_v37 = vsel %vm3350_vm12, %v3343_v24, %v7664_v13  ;;  %v3409_v45 = vsel %vm3350_vm12, %v3344_v46, %v7665_v51 }
 0x3ba   :  { %v7673_v31 = vpop.permute.xlu1 %7672  ;;  %v3443_v1 = vpack.c.bf16 %v3408_v37, %v3407_v18  ;;  %v3444_v28 = vpack.c.bf16 %v3410_v52, %v3409_v45  ;;  %v7668_v62 = vpop.permute.xlu0 %7667  ;;  %v15560_v37 = vld [vmem:[#allocation15_spill] sm:$0xff] }
 0x3bb   :  { %v7675_v50 = vunpack.i.h.bf16 %v7673_v31  ;;  %v7674_v59 = vunpack.i.l.bf16 %v7673_v31  ;;  %v7670_v35 = vunpack.i.h.bf16 %v7668_v62  ;;  %v7669_v19 = vunpack.i.l.bf16 %v7668_v62  ;;  %v12391_v31 = vpop.f32.mrf.mxu0 }
 0x3bc   :  { %6407 = vmatprep.mubr.msk.bf16.mxu1 %vm3467_vm13, %v3443_v1  ;;  %v3862_v20 = vsel %vm2963_vm1, %v12391_v31, 0.0 }
 0x3bd   :  { %6408 = vmatmul.mubr.msk.bf16.gmra.mxu1 %vm3467_vm13, %v3444_v28  ;;  %v3153_v33 = vsel %vm3090_vm8, %v3088_v63, %v7674_v59  ;;  %v3154_v29 = vsel %vm3090_vm8, %v3089_v54, %v7675_v50  ;;  %v3152_v16 = vsel %vm3090_vm8, %v3087_v3, %v7670_v35  ;;  %v3151_v39 = vsel %vm3090_vm8, %v3086_v21, %v7669_v19  ;;  %v12396_v28 = vpop.f32.mrf.mxu0 }
 0x3be   :  { %v7683_v61 = vpop.permute.xlu1 %7682  ;;  %v7678_v17 = vpop.permute.xlu0 %7677  ;;  %v3858_v7 = vsel %vm2963_vm1, %v12396_v28, 0.0 }
 0x3bf   :  { %v7685_v26 = vunpack.i.h.bf16 %v7683_v61  ;;  %v7684_v48 = vunpack.i.l.bf16 %v7683_v61  ;;  %v7680_v47 = vunpack.i.h.bf16 %v7678_v17  ;;  %v7679_v44 = vunpack.i.l.bf16 %v7678_v17  ;;  %v12399_v62 = vpop.f32.mrf.mxu0 }
 0x3c0   :  { %v3859_v42 = vadd.f32 %v3858_v7, %v3857_v8 }
 0x3c1   :  { %v3218_v25 = vsel %vm3155_vm9, %v3153_v33, %v7684_v48  ;;  %v3219_v53 = vsel %vm3155_vm9, %v3154_v29, %v7685_v26  ;;  %v3217_v4 = vsel %vm3155_vm9, %v3152_v16, %v7680_v47  ;;  %v3216_v9 = vsel %vm3155_vm9, %v3151_v39, %v7679_v44  ;;  %v12401_v57 = vpop.f32.mrf.mxu0 }
 0x3c2   :  { %v7688_v14 = vpop.permute.xlu1 %7687  ;;  %v3283_v49 = vsel %vm3220_vm10, %v3218_v25, %v15558_v15  ;;  %v3284_v56 = vsel %vm3220_vm10, %v3219_v53, %v15558_v15  ;;  %v2474_v0 = vpop.permute.xlu0 %2473  ;;  %v3281_v43 = vsel %vm3220_vm10, %v3216_v9, %v7655_v27  ;;  %15561 = vst [vmem:[#allocation181_spill] sm:$0xff] %v12401_v57  ;;  %v3861_v41 = vadd.f32 %v3860_v36, %v3859_v42 }
 0x3c3   :  { %v7690_v60 = vunpack.i.h.bf16 %v7688_v14  ;;  %v7689_v23 = vunpack.i.l.bf16 %v7688_v14  ;;  %v3282_v38 = vsel %vm3220_vm10, %v3217_v4, %v2474_v0  ;;  %v3348_v51 = vsel %vm3285_vm11, %v3283_v49, %v15559_v58  ;;  %v12403_v34 = vpop.f32.mrf.mxu0 }
 0x3c4   :  { %v3349_v13 = vsel %vm3285_vm11, %v3284_v56, %v15559_v58  ;;  %v3413_v30 = vsel %vm3350_vm12, %v3348_v51, %v15560_v37  ;;  %v3864_v61 = vsel %vm2963_vm1, %v12401_v57, 0.0  ;;  %v3863_v63 = vadd.f32 %v3862_v20, %v3861_v41 }
 0x3c5   :  { %v3346_v52 = vsel %vm3285_vm11, %v3281_v43, %v7689_v23  ;;  %v3347_v18 = vsel %vm3285_vm11, %v3282_v38, %v7690_v60  ;;  %v3414_v45 = vsel %vm3350_vm12, %v3349_v13, %v15560_v37  ;;  %v12405_v22 = vpop.f32.mrf.mxu0  ;;  %v3868_v29 = vsel %vm2963_vm1, %v12399_v62, 0.0 }
 0x3c6   :  { %v7693_v40 = vpop.permute.xlu0 %7692  ;;  %v3446_v1 = vpack.c.bf16 %v3414_v45, %v3413_v30  ;;  %15562 = vst [vmem:[#allocation21_spill] sm:$0xff] %v12405_v22  ;;  %v3866_v35 = vsel %vm2963_vm1, %v12405_v22, 0.0  ;;  %v3865_v26 = vadd.f32 %v3864_v61, %v3863_v63  ;;  %v3870_v5 = vsel %vm2963_vm1, %v12403_v34, 0.0 }
 0x3c7   :  { %v7695_v24 = vunpack.i.h.bf16 %v7693_v40  ;;  %v7694_v46 = vunpack.i.l.bf16 %v7693_v40  ;;  %v12407_v50 = vpop.f32.mrf.mxu0 }
 0x3c8   :  { %v3867_v17 = vadd.f32 %v3866_v35, %v3865_v26  ;;  %v3876_v49 = vsel %vm2963_vm1, %v12407_v50, 0.0 }
 0x3c9   :  { %v3411_v32 = vsel %vm3350_vm12, %v3346_v52, %v7694_v46  ;;  %v3412_v2 = vsel %vm3350_vm12, %v3347_v18, %v7695_v24  ;;  %v12409_v59 = vpop.f32.mrf.mxu0 }
 0x3ca   :  { %v3445_v6 = vpack.c.bf16 %v3412_v2, %v3411_v32  ;;  %v3869_v19 = vadd.f32 %v3868_v29, %v3867_v17  ;;  %v3872_v25 = vsel %vm2963_vm1, %v12409_v59, 0.0 }
 0x3cb   :  { %v12415_v55 = vpop.f32.mrf.mxu0 }
 0x3cc   :  { %6411 = vmatprep.mubr.msk.bf16.mxu1 %vm3467_vm13, %v3445_v6  ;;  %v3871_v53 = vadd.f32 %v3870_v5, %v3869_v19  ;;  %v3878_v16 = vsel %vm2963_vm1, %v12415_v55, 0.0 }
 0x3cd   :  { %6412 = vmatmul.mubr.msk.bf16.gmra.mxu1 %vm3467_vm13, %v3446_v1  ;;  %v12419_v12 = vpop.f32.mrf.mxu0 }
 0x3ce   :  { %v3874_v14 = vsel %vm2963_vm1, %v12419_v12, 0.0  ;;  %v3873_v3 = vadd.f32 %v3872_v25, %v3871_v53 }
 0x3cf   :  { %v12421_v54 = vpop.f32.mrf.mxu0 }
 0x3d0   :  { %v3875_v21 = vadd.f32 %v3874_v14, %v3873_v3  ;;  %v3884_v51 = vsel %vm2963_vm1, %v12421_v54, 0.0 }
 0x3d1   :  { %v12429_v48 = vpop.f32.mrf.mxu0 }
 0x3d2   :  { %v3877_v56 = vadd.f32 %v3876_v49, %v3875_v21  ;;  %v3880_v39 = vsel %vm2963_vm1, %v12429_v48, 0.0 }
 0x3d3   :  { %v12431_v33 = vpop.f32.mrf.mxu0 }
 0x3d4   :  { %v3879_v4 = vadd.f32 %v3878_v16, %v3877_v56  ;;  %v3886_v43 = vsel %vm2963_vm1, %v12431_v33, 0.0 }
 0x3d5   :  { %v12435_v47 = vpop.f32.mrf.mxu0 }
 0x3d6   :  { %v3882_v60 = vsel %vm2963_vm1, %v12435_v47, 0.0  ;;  %v3881_v23 = vadd.f32 %v3880_v39, %v3879_v4 }
 0x3d7   :  { %v12441_v44 = vpop.f32.mrf.mxu0 }
 0x3d8   :  { %v3883_v38 = vadd.f32 %v3882_v60, %v3881_v23  ;;  %v3892_v32 = vsel %vm2963_vm1, %v12441_v44, 0.0 }
 0x3d9   :  { %v12445_v15 = vpop.f32.mrf.mxu0 }
 0x3da   :  { %v3885_v13 = vadd.f32 %v3884_v51, %v3883_v38  ;;  %v3888_v24 = vsel %vm2963_vm1, %v12445_v15, 0.0 }
 0x3db   :  { %v12449_v0 = vpop.f32.mrf.mxu0 }
 0x3dc   :  { %v3887_v46 = vadd.f32 %v3886_v43, %v3885_v13  ;;  %v3894_v1 = vsel %vm2963_vm1, %v12449_v0, 0.0 }
 0x3dd   :  { %v12455_v9 = vpop.f32.mrf.mxu0 }
 0x3de   :  { %v3890_v52 = vsel %vm2963_vm1, %v12455_v9, 0.0  ;;  %v3889_v18 = vadd.f32 %v3888_v24, %v3887_v46 }
 0x3df   :  { %v12459_v27 = vpop.f32.mrf.mxu0 }
 0x3e0   :  { %v3891_v30 = vadd.f32 %v3890_v52, %v3889_v18  ;;  %v3900_v35 = vsel %vm2963_vm1, %v12459_v27, 0.0 }
 0x3e1   :  { %v12461_v58 = vpop.f32.mrf.mxu0 }
 0x3e2   :  { %v3893_v2 = vadd.f32 %v3892_v32, %v3891_v30  ;;  %v3896_v7 = vsel %vm2963_vm1, %v12461_v58, 0.0 }
 0x3e3   :  { %v12465_v40 = vpop.f32.mrf.mxu0 }
 0x3e4   :  { %v3895_v8 = vadd.f32 %v3894_v1, %v3893_v2  ;;  %v3902_v29 = vsel %vm2963_vm1, %v12465_v40, 0.0 }
 0x3e5   :  { %v12473_v37 = vpop.f32.mrf.mxu0 }
 0x3e6   :  { %v3898_v36 = vsel %vm2963_vm1, %v12473_v37, 0.0  ;;  %v3897_v41 = vadd.f32 %v3896_v7, %v3895_v8 }
 0x3e7   :  { %v12475_v45 = vpop.f32.mrf.mxu0 }
 0x3e8   :  { %v3899_v20 = vadd.f32 %v3898_v36, %v3897_v41  ;;  %v3908_v49 = vsel %vm2963_vm1, %v12475_v45, 0.0 }
 0x3e9   :  { %v12479_v6 = vpop.f32.mrf.mxu0 }
 0x3ea   :  { %v3901_v26 = vadd.f32 %v3900_v35, %v3899_v20  ;;  %v3904_v19 = vsel %vm2963_vm1, %v12479_v6, 0.0 }
 0x3eb   :  { %v12485_v42 = vpop.f32.mrf.mxu0 }
 0x3ec   :  { %v3903_v5 = vadd.f32 %v3902_v29, %v3901_v26  ;;  %v3910_v39 = vsel %vm2963_vm1, %v12485_v42, 0.0 }
 0x3ed   :  { %v12489_v61 = vpop.f32.mrf.mxu0 }
 0x3ee   :  { %v3906_v25 = vsel %vm2963_vm1, %v12489_v61, 0.0  ;;  %v3905_v53 = vadd.f32 %v3904_v19, %v3903_v5 }
 0x3f0   :  { %v3907_v3 = vadd.f32 %v3906_v25, %v3905_v53 }
 0x3f2   :  { %v12491_v63 = vpop.f32.mrf.mxu0  ;;  %v3909_v56 = vadd.f32 %v3908_v49, %v3907_v3 }
 0x3f3   :  { %v3916_v24 = vsel %vm2963_vm1, %v12491_v63, 0.0 }
 0x3f4   :  { %v12495_v17 = vpop.f32.mrf.mxu0  ;;  %v3911_v60 = vadd.f32 %v3910_v39, %v3909_v56 }
 0x3f5   :  { %v3912_v4 = vsel %vm2963_vm1, %v12495_v17, 0.0 }
 0x3f6   :  { %v12503_v14 = vpop.f32.mrf.mxu0  ;;  %v3913_v51 = vadd.f32 %v3912_v4, %v3911_v60 }
 0x3f7   :  { %15563 = vst [vmem:[#allocation25_spill] sm:$0xff] %v12503_v14  ;;  %v3918_v30 = vsel %vm2963_vm1, %v12503_v14, 0.0 }
 0x3f8   :  { %v12505_v21 = vpop.f32.mrf.mxu0 }
 0x3f9   :  { %v3914_v38 = vsel %vm2963_vm1, %v12505_v21, 0.0 }
 0x3fa   :  { %v3915_v13 = vadd.f32 %v3914_v38, %v3913_v51 }
 0x3fc   :  { %v3917_v46 = vadd.f32 %v3916_v24, %v3915_v13 }
 0x3fe   :  { %v3919_v2 = vadd.f32 %v3918_v30, %v3917_v46 }
 0x405   :  { %v12509_v16 = vpop.f32.mrf.mxu0 }
 0x406   :  { %v3924_v35 = vsel %vm2963_vm1, %v12509_v16, 0.0 }
 0x407   :  { %v12515_v23 = vpop.f32.mrf.mxu0 }
 0x408   :  { %v3920_v32 = vsel %vm2963_vm1, %v12515_v23, 0.0 }
 0x409   :  { %v12519_v43 = vpop.f32.mrf.mxu0  ;;  %v3921_v7 = vadd.f32 %v3920_v32, %v3919_v2 }
 0x40a   :  { %v3926_v5 = vsel %vm2963_vm1, %v12519_v43, 0.0 }
 0x40b   :  { %v12523_v52 = vpop.f32.mrf.mxu0 }
 0x40c   :  { %v3922_v1 = vsel %vm2963_vm1, %v12523_v52, 0.0 }
 0x40d   :  { %v3923_v36 = vadd.f32 %v3922_v1, %v3921_v7 }
 0x40f   :  { %v3925_v26 = vadd.f32 %v3924_v35, %v3923_v36 }
 0x411   :  { %v3927_v53 = vadd.f32 %v3926_v5, %v3925_v26 }
 0x418   :  { %v12525_v18 = vpop.f32.mrf.mxu0 }
 0x419   :  { %v3932_v38 = vsel %vm2963_vm1, %v12525_v18, 0.0 }
 0x41a   :  { %v12533_v8 = vpop.f32.mrf.mxu0 }
 0x41b   :  { %v3928_v25 = vsel %vm2963_vm1, %v12533_v8, 0.0 }
 0x41c   :  { %v12537_v20 = vpop.f32.mrf.mxu0  ;;  %v3929_v56 = vadd.f32 %v3928_v25, %v3927_v53 }
 0x41d   :  { %v3934_v24 = vsel %vm2963_vm1, %v12537_v20, 0.0 }
 0x41e   :  { %v12543_v19 = vpop.f32.mrf.mxu0 }
 0x41f   :  { %v3930_v49 = vsel %vm2963_vm1, %v12543_v19, 0.0 }
 0x420   :  { %v3931_v39 = vadd.f32 %v3930_v49, %v3929_v56 }
 0x422   :  { %v3933_v51 = vadd.f32 %v3932_v38, %v3931_v39 }
 0x424   :  { %v3935_v30 = vadd.f32 %v3934_v24, %v3933_v51 }
 0x42c   :  { %v12535_v41 = vpop.f32.mrf.mxu1 }
 0x42d   :  { %15564 = vst [vmem:[#allocation24_spill] sm:$0xff] %v12535_v41  ;;  %v3940_v35 = vsel %vm2963_vm1, %v12535_v41, 0.0 }
 0x42e   :  { %v12541_v29 = vpop.f32.mrf.mxu1 }
 0x42f   :  { %v3936_v46 = vsel %vm2963_vm1, %v12541_v29, 0.0 }
 0x430   :  { %v12549_v3 = vpop.f32.mrf.mxu1  ;;  %v3937_v2 = vadd.f32 %v3936_v46, %v3935_v30 }
 0x431   :  { %15565 = vst [vmem:[#allocation17_spill] sm:$0xff] %v12549_v3  ;;  %v3942_v25 = vsel %vm2963_vm1, %v12549_v3, 0.0 }
 0x432   :  { %v12553_v4 = vpop.f32.mrf.mxu1 }
 0x433   :  { %v3938_v32 = vsel %vm2963_vm1, %v12553_v4, 0.0 }
 0x434   :  { %v3939_v7 = vadd.f32 %v3938_v32, %v3937_v2 }
 0x436   :  { %v3941_v26 = vadd.f32 %v3940_v35, %v3939_v7 }
 0x438   :  { %v3943_v49 = vadd.f32 %v3942_v25, %v3941_v26 }
 0x441   :  { %v12555_v60 = vpop.f32.mrf.mxu1 }
 0x442   :  { %15566 = vst [vmem:[#allocation6_spill] sm:$0xff] %v12555_v60  ;;  %v3948_v46 = vsel %vm2963_vm1, %v12555_v60, 0.0 }
 0x443   :  { %v12559_v13 = vpop.f32.mrf.mxu1 }
 0x444   :  { %15567 = vst [vmem:[#allocation7_spill] sm:$0xff] %v12559_v13  ;;  %v3944_v53 = vsel %vm2963_vm1, %v12559_v13, 0.0 }
 0x445   :  { %v12567_v1 = vpop.f32.mrf.mxu1  ;;  %v3945_v38 = vadd.f32 %v3944_v53, %v3943_v49 }
 0x446   :  { %15568 = vst [vmem:[#allocation11_spill] sm:$0xff] %v12567_v1  ;;  %v3950_v7 = vsel %vm2963_vm1, %v12567_v1, 0.0 }
 0x447   :  { %v12569_v36 = vpop.f32.mrf.mxu1 }
 0x448   :  { %15569 = vst [vmem:[#allocation45_spill] sm:$0xff] %v12569_v36  ;;  %v3946_v39 = vsel %vm2963_vm1, %v12569_v36, 0.0 }
 0x449   :  { %v3947_v51 = vadd.f32 %v3946_v39, %v3945_v38 }
 0x44b   :  { %v3949_v30 = vadd.f32 %v3948_v46, %v3947_v51 }
 0x44d   :  { %v3951_v26 = vadd.f32 %v3950_v7, %v3949_v30 }
 0x455   :  { %v12573_v5 = vpop.f32.mrf.mxu1 }
 0x456   :  { %15570 = vst [vmem:[#allocation60_spill] sm:$0xff] %v12573_v5  ;;  %v3956_v51 = vsel %vm2963_vm1, %v12573_v5, 0.0 }
 0x457   :  { %v12579_v56 = vpop.f32.mrf.mxu1 }
 0x458   :  { %15571 = vst [vmem:[#allocation23_spill] sm:$0xff] %v12579_v56  ;;  %v3952_v35 = vsel %vm2963_vm1, %v12579_v56, 0.0 }
 0x459   :  { %v12583_v24 = vpop.f32.mrf.mxu1  ;;  %v3953_v53 = vadd.f32 %v3952_v35, %v3951_v26 }
 0x45a   :  { %15572 = vst [vmem:[#allocation28_spill] sm:$0xff] %v12583_v24  ;;  %v3958_v1 = vsel %vm2963_vm1, %v12583_v24, 0.0 }
 0x45b   :  { %v12587_v32 = vpop.f32.mrf.mxu1 }
 0x45c   :  { %15573 = vst [vmem:[#allocation58_spill] sm:$0xff] %v12587_v32  ;;  %v3954_v25 = vsel %vm2963_vm1, %v12587_v32, 0.0 }
 0x45d   :  { %v3955_v39 = vadd.f32 %v3954_v25, %v3953_v53 }
 0x45f   :  { %v3957_v46 = vadd.f32 %v3956_v51, %v3955_v39 }
 0x461   :  { %v3959_v7 = vadd.f32 %v3958_v1, %v3957_v46 }
 0x469   :  { %v12589_v2 = vpop.f32.mrf.mxu1 }
 0x46a   :  { %15574 = vst [vmem:[#allocation56_spill] sm:$0xff] %v12589_v2  ;;  %v3964_v39 = vsel %vm2963_vm1, %v12589_v2, 0.0 }
 0x46b   :  { %v12597_v49 = vpop.f32.mrf.mxu1 }
 0x46c   :  { %15575 = vst [vmem:[#allocation51_spill] sm:$0xff] %v12597_v49  ;;  %v3960_v30 = vsel %vm2963_vm1, %v12597_v49, 0.0 }
 0x46d   :  { %v12599_v38 = vpop.f32.mrf.mxu1  ;;  %v3961_v26 = vadd.f32 %v3960_v30, %v3959_v7 }
 0x46e   :  { %15576 = vst [vmem:[#allocation59_spill] sm:$0xff] %v12599_v38  ;;  %v3966_v1 = vsel %vm2963_vm1, %v12599_v38, 0.0 }
 0x46f   :  { %v12603_v60 = vpop.f32.mrf.mxu1 }
 0x470   :  { %15577 = vst [vmem:[#allocation140_spill] sm:$0xff] %v12603_v60  ;;  %v3962_v35 = vsel %vm2963_vm1, %v12603_v60, 0.0 }
 0x471   :  { %v3963_v53 = vadd.f32 %v3962_v35, %v3961_v26 }
 0x473   :  { %v3965_v51 = vadd.f32 %v3964_v39, %v3963_v53 }
 0x475   :  { %v3967_v49 = vadd.f32 %v3966_v1, %v3965_v51 }
 0x47d   :  { %v12609_v32 = vpop.f32.mrf.mxu1 }
 0x47e   :  { %15578 = vst [vmem:[#allocation137_spill] sm:$0xff] %v12609_v32  ;;  %v3972_v53 = vsel %vm2963_vm1, %v12609_v32, 0.0 }
 0x47f   :  { %v12613_v25 = vpop.f32.mrf.mxu1 }
 0x480   :  { %15579 = vst [vmem:[#allocation135_spill] sm:$0xff] %v12613_v25  ;;  %v3968_v46 = vsel %vm2963_vm1, %v12613_v25, 0.0 }
 0x481   :  { %v12615_v5 = vpop.f32.mrf.mxu1  ;;  %v3969_v7 = vadd.f32 %v3968_v46, %v3967_v49 }
 0x482   :  { %15580 = vst [vmem:[#allocation139_spill] sm:$0xff] %v12615_v5  ;;  %v3974_v51 = vsel %vm2963_vm1, %v12615_v5, 0.0 }
 0x483   :  { %v12619_v24 = vpop.f32.mrf.mxu1 }
 0x484   :  { %15581 = vst [vmem:[#allocation64_spill] sm:$0xff] %v12619_v24  ;;  %v3970_v30 = vsel %vm2963_vm1, %v12619_v24, 0.0 }
 0x485   :  { %v3971_v35 = vadd.f32 %v3970_v30, %v3969_v7 }
 0x487   :  { %v3973_v39 = vadd.f32 %v3972_v53, %v3971_v35 }
 0x489   :  { %v3975_v49 = vadd.f32 %v3974_v51, %v3973_v39 }
 0x48d   :  { %v12627_v26 = vpop.f32.mrf.mxu1 }
 0x48e   :  { %v3980_v32 = vsel %vm2963_vm1, %v12627_v26, 0.0 }
 0x48f   :  { %v12629_v60 = vpop.f32.mrf.mxu1 }
 0x490   :  { %15582 = vst [vmem:[#allocation65_spill] sm:$0xff] %v12629_v60  ;;  %v3976_v1 = vsel %vm2963_vm1, %v12629_v60, 0.0 }
 0x491   :  { %v12633_v2 = vpop.f32.mrf.mxu1  ;;  %v3977_v30 = vadd.f32 %v3976_v1, %v3975_v49 }
 0x492   :  { %v3982_v53 = vsel %vm2963_vm1, %v12633_v2, 0.0 }
 0x493   :  { %v12635_v38 = vpop.f32.mrf.mxu1 }
 0x494   :  { %v3978_v46 = vsel %vm2963_vm1, %v12635_v38, 0.0 }
 0x495   :  { %v3979_v7 = vadd.f32 %v3978_v46, %v3977_v30 }
 0x497   :  { %v3981_v35 = vadd.f32 %v3980_v32, %v3979_v7 }
 0x499   :  { %v3983_v24 = vadd.f32 %v3982_v53, %v3981_v35 }
 0x49b   :  { %v3984_v25 = vrot.slane %v3983_v24, 4 }
 0x49d   :  { %v3985_v56 = vadd.f32 %v3984_v25, %v3983_v24 }
 0x49f   :  { %v3986_v5 = vrot.slane %v3985_v56, 2 }
 0x4a1   :  { %v3987_v36 = vadd.f32 %v3986_v5, %v3985_v56 }
 0x4a3   :  { %v3988_v13 = vrot.slane %v3987_v36, 1 }
 0x4a5   :  { %v3989_v60 = vadd.f32 %v3988_v13, %v3987_v36 }
 0x4a7   :  { %v12647_v39 = vmul.f32 0.001953125, %v3989_v60 }
 0x4a9   :  { %v3991_v51 = vsub.f32 %v12376_v10, %v12647_v39  ;;  %v3992_v1 = vsub.f32 %v12396_v28, %v12647_v39  ;;  %v3993_v32 = vsub.f32 %v12364_v11, %v12647_v39  ;;  %v3994_v49 = vsub.f32 %v12391_v31, %v12647_v39 }
 0x4aa   :  { %v3995_v5 = vsub.f32 %v12401_v57, %v12647_v39  ;;  %v3996_v60 = vsub.f32 %v12405_v22, %v12647_v39  ;;  %v3997_v7 = vsub.f32 %v12399_v62, %v12647_v39 }
 0x4ab   :  { %v4055_v46 = vmul.f32 %v3991_v51, %v3991_v51  ;;  %v4056_v24 = vmul.f32 %v3992_v1, %v3992_v1  ;;  %v4057_v13 = vmul.f32 %v3993_v32, %v3993_v32  ;;  %v4058_v36 = vmul.f32 %v3994_v49, %v3994_v49 }
 0x4ac   :  { %v4059_v35 = vmul.f32 %v3995_v5, %v3995_v5  ;;  %v3998_v1 = vsub.f32 %v12403_v34, %v12647_v39  ;;  %v4060_v32 = vmul.f32 %v3996_v60, %v3996_v60  ;;  %v3999_v49 = vsub.f32 %v12409_v59, %v12647_v39 }
 0x4ad   :  { %v4119_v56 = vsel %vm2963_vm1, %v4055_v46, 0.0  ;;  %v4120_v25 = vsel %vm2963_vm1, %v4056_v24, 0.0  ;;  %v4122_v53 = vsel %vm2963_vm1, %v4057_v13, 0.0  ;;  %v4124_v57 = vsel %vm2963_vm1, %v4058_v36, 0.0 }
 0x4ae   :  { %v4121_v30 = vadd.f32 %v4120_v25, %v4119_v56  ;;  %v4061_v46 = vmul.f32 %v3997_v7, %v3997_v7  ;;  %v4126_v24 = vsel %vm2963_vm1, %v4059_v35, 0.0  ;;  %v4000_v5 = vsub.f32 %v12419_v12, %v12647_v39 }
 0x4af   :  { %v4062_v25 = vmul.f32 %v3998_v1, %v3998_v1  ;;  %v4128_v13 = vsel %vm2963_vm1, %v4060_v32, 0.0  ;;  %v4001_v60 = vsub.f32 %v12407_v50, %v12647_v39  ;;  %v4002_v7 = vsub.f32 %v12415_v55, %v12647_v39 }
 0x4b0   :  { %v4123_v51 = vadd.f32 %v4122_v53, %v4121_v30  ;;  %v4063_v53 = vmul.f32 %v3999_v49, %v3999_v49  ;;  %v4003_v1 = vsub.f32 %v12429_v48, %v12647_v39  ;;  %v4004_v49 = vsub.f32 %v12435_v47, %v12647_v39 }
 0x4b2   :  { %v4125_v22 = vadd.f32 %v4124_v57, %v4123_v51  ;;  %v4130_v57 = vsel %vm2963_vm1, %v4061_v46, 0.0  ;;  %v4064_v51 = vmul.f32 %v4000_v5, %v4000_v5  ;;  %v4134_v32 = vsel %vm2963_vm1, %v4063_v53, 0.0 }
 0x4b3   :  { %v4005_v5 = vsub.f32 %v12421_v54, %v12647_v39 }
 0x4b4   :  { %v4127_v56 = vadd.f32 %v4126_v24, %v4125_v22  ;;  %v4132_v22 = vsel %vm2963_vm1, %v4062_v25, 0.0  ;;  %v4065_v24 = vmul.f32 %v4001_v60, %v4001_v60  ;;  %v4136_v46 = vsel %vm2963_vm1, %v4064_v51, 0.0 }
 0x4b5   :  { %v4006_v60 = vsub.f32 %v12431_v33, %v12647_v39 }
 0x4b6   :  { %v4129_v30 = vadd.f32 %v4128_v13, %v4127_v56  ;;  %v4066_v13 = vmul.f32 %v4002_v7, %v4002_v7  ;;  %v4138_v25 = vsel %vm2963_vm1, %v4065_v24, 0.0  ;;  %v4007_v7 = vsub.f32 %v12445_v15, %v12647_v39 }
 0x4b8   :  { %v4131_v36 = vadd.f32 %v4130_v57, %v4129_v30  ;;  %v4067_v57 = vmul.f32 %v4003_v1, %v4003_v1  ;;  %v4140_v53 = vsel %vm2963_vm1, %v4066_v13, 0.0  ;;  %v4008_v1 = vsub.f32 %v12455_v9, %v12647_v39 }
 0x4ba   :  { %v4133_v35 = vadd.f32 %v4132_v22, %v4131_v36  ;;  %v4068_v22 = vmul.f32 %v4004_v49, %v4004_v49  ;;  %v4142_v51 = vsel %vm2963_vm1, %v4067_v57, 0.0  ;;  %v4009_v49 = vsub.f32 %v12441_v44, %v12647_v39 }
 0x4bc   :  { %v4135_v56 = vadd.f32 %v4134_v32, %v4133_v35  ;;  %v4069_v32 = vmul.f32 %v4005_v5, %v4005_v5  ;;  %v4144_v24 = vsel %vm2963_vm1, %v4068_v22, 0.0  ;;  %v4010_v5 = vsub.f32 %v12449_v0, %v12647_v39 }
 0x4be   :  { %v4137_v30 = vadd.f32 %v4136_v46, %v4135_v56  ;;  %v4070_v46 = vmul.f32 %v4006_v60, %v4006_v60  ;;  %v4146_v13 = vsel %vm2963_vm1, %v4069_v32, 0.0  ;;  %v4011_v60 = vsub.f32 %v12461_v58, %v12647_v39 }
 0x4c0   :  { %v4139_v36 = vadd.f32 %v4138_v25, %v4137_v30  ;;  %v4071_v25 = vmul.f32 %v4007_v7, %v4007_v7  ;;  %v4148_v57 = vsel %vm2963_vm1, %v4070_v46, 0.0  ;;  %v4012_v7 = vsub.f32 %v12473_v37, %v12647_v39 }
 0x4c2   :  { %v4141_v35 = vadd.f32 %v4140_v53, %v4139_v36  ;;  %v4072_v53 = vmul.f32 %v4008_v1, %v4008_v1  ;;  %v4150_v22 = vsel %vm2963_vm1, %v4071_v25, 0.0  ;;  %v4013_v1 = vsub.f32 %v12459_v27, %v12647_v39 }
 0x4c4   :  { %v4143_v56 = vadd.f32 %v4142_v51, %v4141_v35  ;;  %v4073_v51 = vmul.f32 %v4009_v49, %v4009_v49  ;;  %v4152_v32 = vsel %vm2963_vm1, %v4072_v53, 0.0  ;;  %v4014_v49 = vsub.f32 %v12465_v40, %v12647_v39 }
 0x4c6   :  { %v4145_v30 = vadd.f32 %v4144_v24, %v4143_v56  ;;  %v4074_v24 = vmul.f32 %v4010_v5, %v4010_v5  ;;  %v4154_v46 = vsel %vm2963_vm1, %v4073_v51, 0.0  ;;  %v4015_v5 = vsub.f32 %v12479_v6, %v12647_v39 }
 0x4c8   :  { %v4147_v36 = vadd.f32 %v4146_v13, %v4145_v30  ;;  %v4075_v13 = vmul.f32 %v4011_v60, %v4011_v60  ;;  %v4156_v25 = vsel %vm2963_vm1, %v4074_v24, 0.0  ;;  %v4016_v60 = vsub.f32 %v12489_v61, %v12647_v39 }
 0x4ca   :  { %v4149_v35 = vadd.f32 %v4148_v57, %v4147_v36  ;;  %v4076_v57 = vmul.f32 %v4012_v7, %v4012_v7  ;;  %v4158_v53 = vsel %vm2963_vm1, %v4075_v13, 0.0  ;;  %v4017_v7 = vsub.f32 %v12475_v45, %v12647_v39 }
 0x4cc   :  { %v4151_v56 = vadd.f32 %v4150_v22, %v4149_v35  ;;  %v4077_v22 = vmul.f32 %v4013_v1, %v4013_v1  ;;  %v4160_v51 = vsel %vm2963_vm1, %v4076_v57, 0.0  ;;  %v4018_v1 = vsub.f32 %v12485_v42, %v12647_v39 }
 0x4ce   :  { %v4153_v30 = vadd.f32 %v4152_v32, %v4151_v56  ;;  %v4078_v32 = vmul.f32 %v4014_v49, %v4014_v49  ;;  %v4162_v24 = vsel %vm2963_vm1, %v4077_v22, 0.0  ;;  %v4019_v49 = vsub.f32 %v12495_v17, %v12647_v39 }
 0x4d0   :  { %v4155_v36 = vadd.f32 %v4154_v46, %v4153_v30  ;;  %v4079_v46 = vmul.f32 %v4015_v5, %v4015_v5  ;;  %v4164_v13 = vsel %vm2963_vm1, %v4078_v32, 0.0  ;;  %v4020_v5 = vsub.f32 %v12505_v21, %v12647_v39 }
 0x4d2   :  { %v4157_v35 = vadd.f32 %v4156_v25, %v4155_v36  ;;  %v4080_v25 = vmul.f32 %v4016_v60, %v4016_v60  ;;  %v4166_v57 = vsel %vm2963_vm1, %v4079_v46, 0.0  ;;  %v4021_v60 = vsub.f32 %v12491_v63, %v12647_v39  ;;  %v6271_v46 = vld [vmem:[%s14233_s0 + $0x60] ss:$2 sm:$0xff] }
 0x4d4   :  { %v4159_v56 = vadd.f32 %v4158_v53, %v4157_v35  ;;  %v4081_v53 = vmul.f32 %v4017_v7, %v4017_v7  ;;  %v4168_v22 = vsel %vm2963_vm1, %v4080_v25, 0.0  ;;  %v6270_v7 = vld [vmem:[%s14233_s0 + $0x40] ss:$2 sm:$0xff]  ;;  %v4084_v25 = vmul.f32 %v4020_v5, %v4020_v5 }
 0x4d6   :  { %v4161_v30 = vadd.f32 %v4160_v51, %v4159_v56  ;;  %v4082_v51 = vmul.f32 %v4018_v1, %v4018_v1  ;;  %v4170_v32 = vsel %vm2963_vm1, %v4081_v53, 0.0  ;;  %v4022_v1 = vsub.f32 %v12503_v14, %v12647_v39 }
 0x4d7   :  { %v4085_v53 = vmul.f32 %v4021_v60, %v4021_v60  ;;  %v4176_v5 = vsel %vm2963_vm1, %v4084_v25, 0.0 }
 0x4d8   :  { %v4163_v36 = vadd.f32 %v4162_v24, %v4161_v30  ;;  %v4083_v24 = vmul.f32 %v4019_v49, %v4019_v49  ;;  %v4023_v49 = vsub.f32 %v12515_v23, %v12647_v39 }
 0x4da   :  { %v4165_v35 = vadd.f32 %v4164_v13, %v4163_v36  ;;  %v4172_v13 = vsel %vm2963_vm1, %v4082_v51, 0.0  ;;  %v4025_v51 = vsub.f32 %v12509_v16, %v12647_v39 }
 0x4dc   :  { %v4167_v56 = vadd.f32 %v4166_v57, %v4165_v35  ;;  %v7701_v35 = vpack.i.bf16 %v6271_v46, %v6270_v7  ;;  %v4178_v7 = vsel %vm2963_vm1, %v4085_v53, 0.0 }
 0x4de   :  { %v4169_v30 = vadd.f32 %v4168_v22, %v4167_v56  ;;  %v4174_v56 = vsel %vm2963_vm1, %v4083_v24, 0.0  ;;  %7702 = vrot.lane.b32.xlu1 %v7701_v35, %s8149_s13  ;;  %v4026_v24 = vsub.f32 %v12519_v43, %v12647_v39 }
 0x4e0   :  { %v4171_v36 = vadd.f32 %v4170_v32, %v4169_v30  ;;  %v4024_v30 = vsub.f32 %v12523_v52, %v12647_v39  ;;  %v4086_v32 = vmul.f32 %v4022_v1, %v4022_v1  ;;  %v4027_v1 = vsub.f32 %v12533_v8, %v12647_v39 }
 0x4e2   :  { %v4173_v57 = vadd.f32 %v4172_v13, %v4171_v36  ;;  %v4087_v36 = vmul.f32 %v4023_v49, %v4023_v49  ;;  %v4088_v46 = vmul.f32 %v4024_v30, %v4024_v30  ;;  %v4180_v13 = vsel %vm2963_vm1, %v4086_v32, 0.0 }
 0x4e3   :  { %v4028_v49 = vsub.f32 %v12543_v19, %v12647_v39  ;;  %v4029_v30 = vsub.f32 %v12525_v18, %v12647_v39 }
 0x4e4   :  { %v4175_v22 = vadd.f32 %v4174_v56, %v4173_v57  ;;  %v4089_v57 = vmul.f32 %v4025_v51, %v4025_v51  ;;  %v4182_v25 = vsel %vm2963_vm1, %v4087_v36, 0.0  ;;  %v5180_v51 = vld [vmem:[%s14233_s0] ss:$2 sm:$0xff] }
 0x4e5   :  { %v6269_v36 = vld [vmem:[%s14233_s0 + $0x20] ss:$2 sm:$0xff] }
 0x4e6   :  { %v4177_v14 = vadd.f32 %v4176_v5, %v4175_v22  ;;  %v4090_v22 = vmul.f32 %v4026_v24, %v4026_v24  ;;  %v4091_v5 = vmul.f32 %v4027_v1, %v4027_v1  ;;  %v4186_v32 = vsel %vm2963_vm1, %v4089_v57, 0.0 }
 0x4e7   :  { %v4092_v24 = vmul.f32 %v4028_v49, %v4028_v49  ;;  %v4031_v1 = vsub.f32 %v12541_v29, %v12647_v39  ;;  %v4093_v57 = vmul.f32 %v4029_v30, %v4029_v30  ;;  %v4034_v30 = vsub.f32 %v12549_v3, %v12647_v39 }
 0x4e8   :  { %v4179_v60 = vadd.f32 %v4178_v7, %v4177_v14  ;;  %v4184_v14 = vsel %vm2963_vm1, %v4088_v46, 0.0  ;;  %v4188_v46 = vsel %vm2963_vm1, %v4090_v22, 0.0  ;;  %v4033_v22 = vsub.f32 %v12535_v41, %v12647_v39 }
 0x4e9   :  { %v4098_v41 = vmul.f32 %v4034_v30, %v4034_v30  ;;  %v15586_v30 = vld [vmem:[#allocation11_spill] sm:$0xff] }
 0x4ea   :  { %v4181_v35 = vadd.f32 %v4180_v13, %v4179_v60  ;;  %v4030_v60 = vsub.f32 %v12537_v20, %v12647_v39  ;;  %v7696_v13 = vpack.i.bf16 %v6269_v36, %v5180_v51  ;;  %v4194_v51 = vsel %vm2963_vm1, %v4093_v57, 0.0 }
 0x4ec   :  { %v4183_v56 = vadd.f32 %v4182_v25, %v4181_v35  ;;  %v4190_v25 = vsel %vm2963_vm1, %v4091_v5, 0.0  ;;  %7697 = vrot.lane.b32.xlu0 %v7696_v13, %s8149_s13 }
 0x4ee   :  { %v4185_v53 = vadd.f32 %v4184_v14, %v4183_v56  ;;  %v4032_v14 = vsub.f32 %v12553_v4, %v12647_v39 }
 0x4f0   :  { %v4187_v7 = vadd.f32 %v4186_v32, %v4185_v53  ;;  %v4094_v53 = vmul.f32 %v4030_v60, %v4030_v60  ;;  %v4192_v32 = vsel %vm2963_vm1, %v4092_v24, 0.0  ;;  %v4096_v5 = vmul.f32 %v4032_v14, %v4032_v14 }
 0x4f2   :  { %v4189_v35 = vadd.f32 %v4188_v46, %v4187_v7  ;;  %v4095_v7 = vmul.f32 %v4031_v1, %v4031_v1  ;;  %v4196_v46 = vsel %vm2963_vm1, %v4094_v53, 0.0  ;;  %v4200_v57 = vsel %vm2963_vm1, %v4096_v5, 0.0 }
 0x4f3   :  { %v4038_v5 = vsub.f32 %v15586_v30, %v12647_v39 }
 0x4f4   :  { %v4191_v56 = vadd.f32 %v4190_v25, %v4189_v35  ;;  %v15583_v35 = vld [vmem:[#allocation7_spill] sm:$0xff]  ;;  %v4097_v25 = vmul.f32 %v4033_v22, %v4033_v22  ;;  %v4198_v24 = vsel %vm2963_vm1, %v4095_v7, 0.0 }
 0x4f5   :  { %v4035_v60 = vsub.f32 %v15583_v35, %v12647_v39  ;;  %v6274_v22 = vld [vmem:[%s14233_s0 + $0xc0] ss:$2 sm:$0xff] }
 0x4f6   :  { %v4193_v49 = vadd.f32 %v4192_v32, %v4191_v56  ;;  %v15584_v32 = vld [vmem:[#allocation45_spill] sm:$0xff]  ;;  %v4202_v53 = vsel %vm2963_vm1, %v4097_v25, 0.0  ;;  %v6275_v7 = vld [vmem:[%s14233_s0 + $0xe0] ss:$2 sm:$0xff] }
 0x4f7   :  { %v4036_v1 = vsub.f32 %v15584_v32, %v12647_v39  ;;  %v4099_v3 = vmul.f32 %v4035_v60, %v4035_v60  ;;  %v15587_v60 = vld [vmem:[#allocation23_spill] sm:$0xff]  ;;  %v15588_v35 = vld [vmem:[#allocation58_spill] sm:$0xff] }
 0x4f8   :  { %v4195_v36 = vadd.f32 %v4194_v51, %v4193_v49  ;;  %v15585_v51 = vld [vmem:[#allocation6_spill] sm:$0xff]  ;;  %v4039_v25 = vsub.f32 %v15587_v60, %v12647_v39  ;;  %v15590_v60 = vld [vmem:[#allocation28_spill] sm:$0xff] }
 0x4f9   :  { %v4037_v14 = vsub.f32 %v15585_v51, %v12647_v39  ;;  %v4206_v51 = vsel %vm2963_vm1, %v4099_v3, 0.0 }
 0x4fa   :  { %v4197_v13 = vadd.f32 %v4196_v46, %v4195_v36  ;;  %v7711_v46 = vpack.i.bf16 %v6275_v7, %v6274_v22 }
 0x4fc   :  { %v4199_v56 = vadd.f32 %v4198_v24, %v4197_v13  ;;  %v4100_v13 = vmul.f32 %v4036_v1, %v4036_v1  ;;  %v4204_v24 = vsel %vm2963_vm1, %v4098_v41, 0.0  ;;  %7712 = vrot.lane.b32.xlu1 %v7711_v46, %s8149_s13  ;;  %v15589_v1 = vld [vmem:[#allocation60_spill] sm:$0xff] }
 0x4fd   :  { %v4041_v41 = vsub.f32 %v15589_v1, %v12647_v39 }
 0x4fe   :  { %v4201_v49 = vadd.f32 %v4200_v57, %v4199_v56  ;;  %v4101_v57 = vmul.f32 %v4037_v14, %v4037_v14  ;;  %v4208_v22 = vsel %vm2963_vm1, %v4100_v13, 0.0  ;;  %v4042_v14 = vsub.f32 %v15590_v60, %v12647_v39 }
 0x500   :  { %v4203_v36 = vadd.f32 %v4202_v53, %v4201_v49  ;;  %v4040_v49 = vsub.f32 %v15588_v35, %v12647_v39  ;;  %v4102_v53 = vmul.f32 %v4038_v5, %v4038_v5  ;;  %v4210_v46 = vsel %vm2963_vm1, %v4101_v57, 0.0 }
 0x501   :  { %v4105_v35 = vmul.f32 %v4041_v41, %v4041_v41  ;;  %v4106_v1 = vmul.f32 %v4042_v14, %v4042_v14  ;;  %v6272_v41 = vld [vmem:[%s14233_s0 + $0x80] ss:$2 sm:$0xff] }
 0x502   :  { %v4205_v56 = vadd.f32 %v4204_v24, %v4203_v36  ;;  %v4103_v36 = vmul.f32 %v4039_v25, %v4039_v25  ;;  %v4104_v30 = vmul.f32 %v4040_v49, %v4040_v49  ;;  %v4212_v3 = vsel %vm2963_vm1, %v4102_v53, 0.0  ;;  %v15594_v14 = vld [vmem:[#allocation59_spill] sm:$0xff] }
 0x503   :  { %v4218_v53 = vsel %vm2963_vm1, %v4105_v35, 0.0  ;;  %v15595_v35 = vld [vmem:[#allocation135_spill] sm:$0xff] }
 0x504   :  { %v4207_v32 = vadd.f32 %v4206_v51, %v4205_v56  ;;  %v15591_v56 = vld [vmem:[#allocation51_spill] sm:$0xff]  ;;  %v4216_v57 = vsel %vm2963_vm1, %v4104_v30, 0.0  ;;  %v4046_v30 = vsub.f32 %v15594_v14, %v12647_v39 }
 0x505   :  { %v4043_v5 = vsub.f32 %v15591_v56, %v12647_v39  ;;  %v15596_v56 = vld [vmem:[#allocation64_spill] sm:$0xff] }
 0x506   :  { %v4209_v7 = vadd.f32 %v4208_v22, %v4207_v32  ;;  %v4214_v32 = vsel %vm2963_vm1, %v4103_v36, 0.0  ;;  %v15592_v22 = vld [vmem:[#allocation140_spill] sm:$0xff]  ;;  %v6273_v36 = vld [vmem:[%s14233_s0 + $0xa0] ss:$2 sm:$0xff] }
 0x507   :  { %v4044_v25 = vsub.f32 %v15592_v22, %v12647_v39  ;;  %v4107_v60 = vmul.f32 %v4043_v5, %v4043_v5  ;;  %v4047_v5 = vsub.f32 %v15595_v35, %v12647_v39  ;;  %v15598_v35 = vld [vmem:[#allocation139_spill] sm:$0xff] }
 0x508   :  { %v4211_v24 = vadd.f32 %v4210_v46, %v4209_v7  ;;  %v15593_v46 = vld [vmem:[#allocation56_spill] sm:$0xff] }
 0x509   :  { %v4045_v49 = vsub.f32 %v15593_v46, %v12647_v39  ;;  %v4222_v46 = vsel %vm2963_vm1, %v4107_v60, 0.0 }
 0x50a   :  { %v4213_v51 = vadd.f32 %v4212_v3, %v4211_v24  ;;  %v7706_v3 = vpack.i.bf16 %v6273_v36, %v6272_v41 }
 0x50c   :  { %v4215_v13 = vadd.f32 %v4214_v32, %v4213_v51  ;;  %v4108_v51 = vmul.f32 %v4044_v25, %v4044_v25  ;;  %v4220_v32 = vsel %vm2963_vm1, %v4106_v1, 0.0  ;;  %7707 = vrot.lane.b32.xlu0 %v7706_v3, %s8149_s13  ;;  %v15597_v25 = vld [vmem:[#allocation137_spill] sm:$0xff] }
 0x50d   :  { %v4049_v1 = vsub.f32 %v15597_v25, %v12647_v39 }
 0x50e   :  { %v4217_v7 = vadd.f32 %v4216_v57, %v4215_v13  ;;  %v4109_v57 = vmul.f32 %v4045_v49, %v4045_v49  ;;  %v4224_v41 = vsel %vm2963_vm1, %v4108_v51, 0.0  ;;  %v4050_v49 = vsub.f32 %v15598_v35, %v12647_v39 }
 0x510   :  { %v4219_v24 = vadd.f32 %v4218_v53, %v4217_v7  ;;  %v4048_v7 = vsub.f32 %v15596_v56, %v12647_v39  ;;  %v4110_v53 = vmul.f32 %v4046_v30, %v4046_v30  ;;  %v4226_v3 = vsel %vm2963_vm1, %v4109_v57, 0.0 }
 0x511   :  { %v4113_v56 = vmul.f32 %v4049_v1, %v4049_v1  ;;  %v4054_v1 = vsub.f32 %v12633_v2, %v12647_v39 }
 0x512   :  { %v4221_v13 = vadd.f32 %v4220_v32, %v4219_v24  ;;  %v4111_v24 = vmul.f32 %v4047_v5, %v4047_v5  ;;  %v4112_v14 = vmul.f32 %v4048_v7, %v4048_v7  ;;  %v4228_v60 = vsel %vm2963_vm1, %v4110_v53, 0.0 }
 0x513   :  { %v4052_v5 = vsub.f32 %v12635_v38, %v12647_v39  ;;  %v4053_v7 = vsub.f32 %v12627_v26, %v12647_v39  ;;  %v4234_v53 = vsel %vm2963_vm1, %v4113_v56, 0.0  ;;  %v6278_v56 = vld [vmem:[%s14233_s0 + $0x140] ss:$2 sm:$0xff] }
 0x514   :  { %v4223_v22 = vadd.f32 %v4222_v46, %v4221_v13  ;;  %v15599_v13 = vld [vmem:[#allocation65_spill] sm:$0xff]  ;;  %v4232_v57 = vsel %vm2963_vm1, %v4112_v14, 0.0  ;;  %v4118_v14 = vmul.f32 %v4054_v1, %v4054_v1 }
 0x515   :  { %v4051_v30 = vsub.f32 %v15599_v13, %v12647_v39 }
 0x516   :  { %v4225_v36 = vadd.f32 %v4224_v41, %v4223_v22  ;;  %v4230_v22 = vsel %vm2963_vm1, %v4111_v24, 0.0  ;;  %v4114_v41 = vmul.f32 %v4050_v49, %v4050_v49 }
 0x518   :  { %v4227_v32 = vadd.f32 %v4226_v3, %v4225_v36  ;;  %v4115_v3 = vmul.f32 %v4051_v30, %v4051_v30  ;;  %v4236_v24 = vsel %vm2963_vm1, %v4114_v41, 0.0  ;;  %v6279_v30 = vld [vmem:[%s14233_s0 + $0x160] ss:$2 sm:$0xff] }
 0x519   :  { %v7721_v41 = vpack.i.bf16 %v6279_v30, %v6278_v56 }
 0x51a   :  { %v4229_v46 = vadd.f32 %v4228_v60, %v4227_v32  ;;  %v4116_v60 = vmul.f32 %v4052_v5, %v4052_v5  ;;  %v4238_v49 = vsel %vm2963_vm1, %v4115_v3, 0.0 }
 0x51b   :  { %7722 = vrot.lane.b32.xlu1 %v7721_v41, %s8149_s13 }
 0x51c   :  { %v4231_v51 = vadd.f32 %v4230_v22, %v4229_v46  ;;  %v4117_v22 = vmul.f32 %v4053_v7, %v4053_v7  ;;  %v6277_v7 = vld [vmem:[%s14233_s0 + $0x120] ss:$2 sm:$0xff] }
 0x51e   :  { %v4233_v36 = vadd.f32 %v4232_v57, %v4231_v51  ;;  %v4240_v51 = vsel %vm2963_vm1, %v4116_v60, 0.0  ;;  %v4242_v5 = vsel %vm2963_vm1, %v4117_v22, 0.0 }
 0x520   :  { %v4235_v32 = vadd.f32 %v4234_v53, %v4233_v36  ;;  %v6276_v36 = vld [vmem:[%s14233_s0 + $0x100] ss:$2 sm:$0xff]  ;;  %v4244_v53 = vsel %vm2963_vm1, %v4118_v14, 0.0 }
 0x521   :  { %v7716_v3 = vpack.i.bf16 %v6277_v7, %v6276_v36  ;;  %v15600_v36 = vld [vmem:[#allocation12_spill] sm:$0xff] }
 0x522   :  { %v4237_v46 = vadd.f32 %v4236_v24, %v4235_v32 }
 0x523   :  { %7717 = vrot.lane.b32.xlu0 %v7716_v3, %s8149_s13 }
 0x524   :  { %v4239_v35 = vadd.f32 %v4238_v49, %v4237_v46 }
 0x526   :  { %v4241_v57 = vadd.f32 %v4240_v51, %v4239_v35 }
 0x528   :  { %v4243_v35 = vadd.f32 %v4242_v5, %v4241_v57  ;;  %v4253_v57 = vld [vmem:[%s14237_s4] sm:$0x1]  ;;  %s8150_s4 = smov 40  }
 0x529   :  { %v4257_v5 = vld [vmem:[%s14238_s5] sm:$0x1]  ;;  %s8151_s5 = smov 48  }
 0x52a   :  { %v4245_v32 = vadd.f32 %v4244_v53, %v4243_v35 }
 0x52c   :  { %v4246_v1 = vrot.slane %v4245_v32, 4 }
 0x52e   :  { %v4247_v60 = vadd.f32 %v4246_v1, %v4245_v32 }
 0x530   :  { %v4248_v24 = vrot.slane %v4247_v60, 2 }
 0x532   :  { %v4249_v46 = vadd.f32 %v4248_v24, %v4247_v60 }
 0x534   :  { %v4250_v22 = vrot.slane %v4249_v46, 1 }
 0x536   :  { %v4251_v49 = vadd.f32 %v4250_v22, %v4249_v46 }
 0x538   :  { %v4252_v51 = vmul.f32 0.001953125, %v4251_v49 }
 0x53a   :  { %v4254_v56 = vadd.f32 1e-05, %v4252_v51 }
 0x53c   :  { %8066 = vrsqrt.f32 %v4254_v56 }
 0x549   :  { %v8067_v30 = vpop.eup %8066 }
 0x54a   :  { %v4256_v14 = vmul.f32 %v8067_v30, %v4253_v57 }
 0x54c   :  { %v4258_v41 = vmul.f32 %v4256_v14, %v12647_v39  ;;  %v12891_v7 = vrot.slane %v4256_v14, %v15600_v36 }
 0x54e   :  { %v4259_v35 = vsub.f32 %v4257_v5, %v4258_v41  ;;  %v4326_v3 = vmul.f32 %v12891_v7, %v15599_v13  ;;  %v4327_v53 = vmul.f32 %v12891_v7, %v12635_v38  ;;  %v12899_v32 = vmul.f32 %v12891_v7, %v12376_v10  ;;  %v15601_v13 = vld [vmem:[#allocation181_spill] sm:$0xff] }
 0x54f   :  { %v12903_v1 = vmul.f32 %v12891_v7, %v12396_v28  ;;  %v12907_v39 = vmul.f32 %v12364_v11, %v12891_v7  ;;  %v12911_v60 = vmul.f32 %v12391_v31, %v12891_v7  ;;  %v12915_v24 = vmul.f32 %v12891_v7, %v15601_v13  ;;  %v15602_v10 = vld [vmem:[#allocation21_spill] sm:$0xff] }
 0x550   :  { %v12918_v38 = vrot.slane %v4259_v35, %v15600_v36  ;;  %v12922_v46 = vmul.f32 %v12891_v7, %v15602_v10  ;;  %v12926_v28 = vmul.f32 %v12399_v62, %v12891_v7  ;;  %v12930_v11 = vmul.f32 %v12403_v34, %v12891_v7  ;;  %v15603_v36 = vld [vmem:[#allocation25_spill] sm:$0xff]  ;;  %v15606_v10 = vld [vmem:[#allocation7_spill] sm:$0xff] }
 0x551   :  { %v12934_v31 = vmul.f32 %v12891_v7, %v12409_v59  ;;  %v12938_v22 = vmul.f32 %v12891_v7, %v12419_v12  ;;  %v12942_v49 = vmul.f32 %v12407_v50, %v12891_v7  ;;  %v12946_v62 = vmul.f32 %v12415_v55, %v12891_v7  ;;  %v15605_v13 = vld [vmem:[#allocation17_spill] sm:$0xff] }
 0x552   :  { %v4396_v51 = vadd.f32 %v12918_v38, %v4326_v3  ;;  %v4397_v34 = vadd.f32 %v12918_v38, %v4327_v53  ;;  %v12952_v59 = vmul.f32 %v12891_v7, %v12429_v48  ;;  %v12956_v12 = vmul.f32 %v12891_v7, %v12435_v47  ;;  %v15604_v53 = vld [vmem:[#allocation24_spill] sm:$0xff] }
 0x553   :  { %v12960_v50 = vmul.f32 %v12421_v54, %v12891_v7  ;;  %v12964_v55 = vmul.f32 %v12431_v33, %v12891_v7  ;;  %v12968_v56 = vmul.f32 %v12891_v7, %v12445_v15  ;;  %v12972_v48 = vmul.f32 %v12891_v7, %v12455_v9 }
 0x554   :  { %v4460_v57 = vmax.f32 %v4396_v51, 0.0  ;;  %v4461_v30 = vmax.f32 %v4397_v34, 0.0  ;;  %v12976_v47 = vmul.f32 %v12441_v44, %v12891_v7  ;;  %v12980_v54 = vmul.f32 %v12449_v0, %v12891_v7  ;;  %v15607_v51 = vld [vmem:[#allocation45_spill] sm:$0xff]  ;;  %v15608_v34 = vld [vmem:[#allocation6_spill] sm:$0xff] }
 0x555   :  { %v12984_v33 = vmul.f32 %v12891_v7, %v12461_v58  ;;  %v12988_v15 = vmul.f32 %v12891_v7, %v12473_v37  ;;  %v12992_v9 = vmul.f32 %v12459_v27, %v12891_v7  ;;  %v12996_v44 = vmul.f32 %v12465_v40, %v12891_v7 }
 0x556   :  { %v4618_v14 = vrot.slane %v4460_v57, 7  ;;  %v4619_v5 = vrot.slane %v4461_v30, 7  ;;  %v13000_v0 = vmul.f32 %v12891_v7, %v12479_v6  ;;  %v13004_v58 = vmul.f32 %v12891_v7, %v12489_v61  ;;  %v15609_v57 = vld [vmem:[#allocation11_spill] sm:$0xff] }
 0x557   :  { %v13008_v37 = vmul.f32 %v12475_v45, %v12891_v7  ;;  %v13012_v27 = vmul.f32 %v12485_v42, %v12891_v7  ;;  %v13016_v40 = vmul.f32 %v12891_v7, %v12495_v17  ;;  %v13020_v6 = vmul.f32 %v12891_v7, %v12505_v21 }
 0x558   :  { %v4620_v41 = vsel %vm765_vm3, %v4618_v14, %v4619_v5  ;;  %v4782_v61 = vsel %vm765_vm3, %v4619_v5, 0.0  ;;  %v13026_v45 = vmul.f32 %v12491_v63, %v12891_v7  ;;  %v13030_v42 = vmul.f32 %v15603_v36, %v12891_v7  ;;  %v15611_v5 = vld [vmem:[#allocation23_spill] sm:$0xff] }
 0x559   :  { %4885 = vst.msk [vmem:[#allocation2 + $0x320] sm:$0xff] %vm2963_vm1, %v4620_v41  ;;  %v13036_v17 = vmul.f32 %v12891_v7, %v12515_v23  ;;  %v13040_v21 = vmul.f32 %v12891_v7, %v12523_v52  ;;  %v13044_v63 = vmul.f32 %v12509_v16, %v12891_v7  ;;  %v13048_v35 = vmul.f32 %v12519_v43, %v12891_v7 }
 0x55a   :  { %4886 = vst.msk [vmem:[#allocation2 + $0x328] sm:$0x3] %vm4786_vm2, %v4782_v61  ;;  %v13052_v3 = vmul.f32 %v12891_v7, %v12533_v8  ;;  %v13056_v23 = vmul.f32 %v12891_v7, %v12543_v19  ;;  %v13060_v52 = vmul.f32 %v12525_v18, %v12891_v7  ;;  %v13064_v16 = vmul.f32 %v12537_v20, %v12891_v7  ;;  %v15613_v61 = vld [vmem:[#allocation58_spill] sm:$0xff] }
 0x55b   :  { %v13068_v43 = vmul.f32 %v12891_v7, %v12541_v29  ;;  %v13072_v8 = vmul.f32 %v12891_v7, %v12553_v4  ;;  %v13076_v19 = vmul.f32 %v15604_v53, %v12891_v7  ;;  %v13080_v18 = vmul.f32 %v15605_v13, %v12891_v7  ;;  %v15615_v53 = vld [vmem:[#allocation60_spill] sm:$0xff] }
 0x55c   :  { %v13084_v20 = vmul.f32 %v12891_v7, %v15606_v10  ;;  %v13088_v29 = vmul.f32 %v12891_v7, %v15607_v51  ;;  %v13092_v4 = vmul.f32 %v15608_v34, %v12891_v7  ;;  %v13096_v30 = vmul.f32 %v15609_v57, %v12891_v7  ;;  %v15617_v10 = vld [vmem:[#allocation28_spill] sm:$0xff]  ;;  %v15619_v34 = vld [vmem:[#allocation51_spill] sm:$0xff] }
 0x55d   :  { %v13100_v41 = vmul.f32 %v12891_v7, %v15611_v5  ;;  %v13104_v36 = vmul.f32 %v12891_v7, %v15613_v61  ;;  %v13108_v13 = vmul.f32 %v15615_v53, %v12891_v7  ;;  %v13112_v51 = vmul.f32 %v15617_v10, %v12891_v7 }
 0x55e   :  { %15610 = vst [vmem:[#allocation105_spill] sm:$0xff] %v13096_v30  ;;  %v13116_v57 = vmul.f32 %v12891_v7, %v15619_v34  ;;  %v15620_v30 = vld [vmem:[#allocation140_spill] sm:$0xff] }
 0x55f   :  { %15612 = vst [vmem:[#allocation104_spill] sm:$0xff] %v13100_v41  ;;  %15614 = vst [vmem:[#allocation190_spill] sm:$0xff] %v13104_v36  ;;  %v13120_v5 = vmul.f32 %v12891_v7, %v15620_v30  ;;  %v15622_v41 = vld [vmem:[#allocation56_spill] sm:$0xff]  ;;  %v15623_v36 = vld [vmem:[#allocation59_spill] sm:$0xff]  ;;  %v13140_v30 = vmul.f32 %v15597_v25, %v12891_v7  ;;  %v13161_v25 = vadd.f32 %v12918_v38, %v12903_v1 }
 0x560   :  { %15616 = vst [vmem:[#allocation191_spill] sm:$0xff] %v13108_v13  ;;  %15618 = vst [vmem:[#allocation145_spill] sm:$0xff] %v13112_v51  ;;  %v13124_v61 = vmul.f32 %v15622_v41, %v12891_v7  ;;  %v13128_v53 = vmul.f32 %v15623_v36, %v12891_v7  ;;  %v15624_v13 = vld [vmem:[#allocation135_spill] sm:$0xff]  ;;  %v15626_v51 = vld [vmem:[#allocation64_spill] sm:$0xff]  ;;  %v13148_v36 = vmul.f32 %v12627_v26, %v12891_v7 }
 0x561   :  { %15621 = vst [vmem:[#allocation142_spill] sm:$0xff] %v13120_v5  ;;  %v13132_v10 = vmul.f32 %v12891_v7, %v15624_v13  ;;  %v13136_v34 = vmul.f32 %v12891_v7, %v15626_v51  ;;  %v15627_v5 = vld [vmem:[#allocation139_spill] sm:$0xff]  ;;  %v13152_v13 = vmul.f32 %v12633_v2, %v12891_v7  ;;  %v13157_v51 = vadd.f32 %v12918_v38, %v12899_v32 }
 0x562   :  { %v13144_v41 = vmul.f32 %v15627_v5, %v12891_v7  ;;  %v13165_v5 = vadd.f32 %v12918_v38, %v12907_v39  ;;  %v13169_v26 = vadd.f32 %v12918_v38, %v12911_v60  ;;  %v13173_v2 = vadd.f32 %v12918_v38, %v12915_v24 }
 0x563   :  { %15625 = vst [vmem:[#allocation61_spill] sm:$0xff] %v13132_v10  ;;  %v4750_v10 = vsel %vm765_vm3, 0.0, %v4618_v14  ;;  %v13178_v7 = vadd.f32 %v12918_v38, %v12922_v46  ;;  %v13182_v32 = vadd.f32 %v12918_v38, %v12926_v28  ;;  %v13186_v1 = vadd.f32 %v12918_v38, %v12930_v11 }
 0x564   :  { %4884 = vst.msk [vmem:[#allocation2 + $0x318] sm:$0xff] %vm2963_vm1, %v4750_v10  ;;  %v13190_v39 = vadd.f32 %v12918_v38, %v12934_v31  ;;  %v13194_v60 = vadd.f32 %v12918_v38, %v12938_v22  ;;  %v13198_v24 = vadd.f32 %v12918_v38, %v12942_v49  ;;  %v13202_v46 = vadd.f32 %v12918_v38, %v12946_v62 }
 0x565   :  { %v13206_v28 = vadd.f32 %v12918_v38, %v12952_v59  ;;  %v13210_v11 = vadd.f32 %v12918_v38, %v12956_v12  ;;  %v13214_v31 = vadd.f32 %v12918_v38, %v12960_v50  ;;  %v13218_v22 = vadd.f32 %v12918_v38, %v12964_v55 }
 0x566   :  { %v13222_v49 = vadd.f32 %v12918_v38, %v12968_v56  ;;  %v13226_v62 = vadd.f32 %v12918_v38, %v12972_v48  ;;  %v13230_v59 = vadd.f32 %v12918_v38, %v12976_v47  ;;  %v13234_v12 = vadd.f32 %v12918_v38, %v12980_v54  ;;  %v15633_v10 = vld [vmem:[#allocation190_spill] sm:$0xff] }
 0x567   :  { %v13238_v50 = vadd.f32 %v12918_v38, %v12984_v33  ;;  %v13242_v55 = vadd.f32 %v12918_v38, %v12988_v15  ;;  %v13246_v56 = vadd.f32 %v12918_v38, %v12992_v9  ;;  %v13250_v48 = vadd.f32 %v12918_v38, %v12996_v44 }
 0x568   :  { %v13254_v47 = vadd.f32 %v12918_v38, %v13000_v0  ;;  %v13258_v54 = vadd.f32 %v12918_v38, %v13004_v58  ;;  %v13262_v33 = vadd.f32 %v12918_v38, %v13008_v37  ;;  %v13266_v15 = vadd.f32 %v12918_v38, %v13012_v27 }
 0x569   :  { %v13270_v9 = vadd.f32 %v12918_v38, %v13016_v40  ;;  %v13274_v44 = vadd.f32 %v12918_v38, %v13020_v6  ;;  %v13278_v14 = vadd.f32 %v12918_v38, %v13026_v45  ;;  %v13282_v0 = vadd.f32 %v12918_v38, %v13030_v42 }
 0x56a   :  { %v13286_v58 = vadd.f32 %v12918_v38, %v13036_v17  ;;  %v13290_v37 = vadd.f32 %v12918_v38, %v13040_v21  ;;  %v13294_v27 = vadd.f32 %v12918_v38, %v13044_v63  ;;  %v13298_v40 = vadd.f32 %v12918_v38, %v13048_v35 }
 0x56b   :  { %v13302_v6 = vadd.f32 %v12918_v38, %v13052_v3  ;;  %v13306_v45 = vadd.f32 %v12918_v38, %v13056_v23  ;;  %v13310_v42 = vadd.f32 %v12918_v38, %v13060_v52  ;;  %v13314_v17 = vadd.f32 %v12918_v38, %v13064_v16 }
 0x56c   :  { %v13318_v21 = vadd.f32 %v12918_v38, %v13068_v43  ;;  %v13322_v63 = vadd.f32 %v12918_v38, %v13072_v8  ;;  %v13326_v35 = vadd.f32 %v12918_v38, %v13076_v19  ;;  %v13330_v3 = vadd.f32 %v12918_v38, %v13080_v18  ;;  %v15630_v43 = vld [vmem:[#allocation105_spill] sm:$0xff]  ;;  %v15632_v19 = vld [vmem:[#allocation104_spill] sm:$0xff] }
 0x56d   :  { %v13334_v23 = vadd.f32 %v12918_v38, %v13084_v20  ;;  %v13338_v52 = vadd.f32 %v12918_v38, %v13088_v29  ;;  %v13342_v16 = vadd.f32 %v12918_v38, %v13092_v4  ;;  %v13346_v8 = vadd.f32 %v12918_v38, %v15630_v43 }
 0x56e   :  { %v13350_v18 = vadd.f32 %v12918_v38, %v15632_v19  ;;  %v13354_v20 = vadd.f32 %v12918_v38, %v15633_v10  ;;  %v13366_v43 = vadd.f32 %v12918_v38, %v13116_v57  ;;  %v13374_v10 = vadd.f32 %v12918_v38, %v13124_v61 }
 0x56f   :  { %15628 = vst [vmem:[#allocation50_spill] sm:$0xff] %v13334_v23  ;;  %15629 = vst [vmem:[#allocation119_spill] sm:$0xff] %v13338_v52  ;;  %v15634_v23 = vld [vmem:[#allocation191_spill] sm:$0xff]  ;;  %v15636_v52 = vld [vmem:[#allocation145_spill] sm:$0xff]  ;;  %v13386_v57 = vadd.f32 %v12918_v38, %v13136_v34  ;;  %v13394_v61 = vadd.f32 %v12918_v38, %v13144_v41  ;;  %v4401_v34 = vmax.f32 %v13161_v25, 0.0  ;;  %v4405_v41 = vmax.f32 %v13178_v7, 0.0 }
 0x570   :  { %15631 = vst [vmem:[#allocation116_spill] sm:$0xff] %v13346_v8  ;;  %v13358_v29 = vadd.f32 %v12918_v38, %v15634_v23  ;;  %v13362_v4 = vadd.f32 %v12918_v38, %v15636_v52  ;;  %v15637_v8 = vld [vmem:[#allocation142_spill] sm:$0xff]  ;;  %15638 = vst [vmem:[#allocation62_spill] sm:$0xff] %v13374_v10  ;;  %v13378_v23 = vadd.f32 %v12918_v38, %v13128_v53  ;;  %v4412_v25 = vmax.f32 %v13206_v28, 0.0 }
 0x571   :  { %v13370_v19 = vadd.f32 %v12918_v38, %v15637_v8  ;;  %15642 = vst [vmem:[#allocation66_spill] sm:$0xff] %v13386_v57  ;;  %v13390_v8 = vadd.f32 %v12918_v38, %v13140_v30  ;;  %15644 = vst [vmem:[#allocation148_spill] sm:$0xff] %v13394_v61  ;;  %v13398_v53 = vadd.f32 %v12918_v38, %v13148_v36  ;;  %v4402_v57 = vmax.f32 %v13165_v5, 0.0 }
 0x572   :  { %15635 = vst [vmem:[#allocation118_spill] sm:$0xff] %v13358_v29  ;;  %15639 = vst [vmem:[#allocation123_spill] sm:$0xff] %v13378_v23  ;;  %v15640_v29 = vld [vmem:[#allocation61_spill] sm:$0xff]  ;;  %v4403_v30 = vmax.f32 %v13169_v26, 0.0  ;;  %v4406_v61 = vmax.f32 %v13182_v32, 0.0  ;;  %v4407_v36 = vmax.f32 %v13186_v1, 0.0 }
 0x573   :  { %v13382_v52 = vadd.f32 %v12918_v38, %v15640_v29  ;;  %15643 = vst [vmem:[#allocation55_spill] sm:$0xff] %v13390_v8  ;;  %15645 = vst [vmem:[#allocation146_spill] sm:$0xff] %v13398_v53  ;;  %v13402_v29 = vadd.f32 %v12918_v38, %v13152_v13  ;;  %v4404_v8 = vmax.f32 %v13173_v2, 0.0  ;;  %v4408_v53 = vmax.f32 %v13190_v39, 0.0 }
 0x574   :  { %v4409_v38 = vmax.f32 %v13194_v60, 0.0  ;;  %v4410_v13 = vmax.f32 %v13198_v24, 0.0  ;;  %v4413_v5 = vmax.f32 %v13210_v11, 0.0  ;;  %v4414_v26 = vmax.f32 %v13214_v31, 0.0 }
 0x575   :  { %15641 = vst [vmem:[#allocation195_spill] sm:$0xff] %v13382_v52  ;;  %15646 = vst [vmem:[#allocation96_spill] sm:$0xff] %v13402_v29  ;;  %v4400_v52 = vmax.f32 %v13157_v51, 0.0  ;;  %v4411_v51 = vmax.f32 %v13202_v46, 0.0  ;;  %v4415_v2 = vmax.f32 %v13218_v22, 0.0  ;;  %v4416_v7 = vmax.f32 %v13222_v49, 0.0 }
 0x576   :  { %v4417_v32 = vmax.f32 %v13226_v62, 0.0  ;;  %v4418_v1 = vmax.f32 %v13230_v59, 0.0  ;;  %v4419_v39 = vmax.f32 %v13234_v12, 0.0  ;;  %v4420_v60 = vmax.f32 %v13238_v50, 0.0  ;;  %v15648_v29 = vld [vmem:[#allocation119_spill] sm:$0xff] }
 0x577   :  { %v4421_v24 = vmax.f32 %v13242_v55, 0.0  ;;  %v4422_v46 = vmax.f32 %v13246_v56, 0.0  ;;  %v4423_v28 = vmax.f32 %v13250_v48, 0.0  ;;  %v4424_v11 = vmax.f32 %v13254_v47, 0.0  ;;  %v15649_v23 = vld [vmem:[#allocation116_spill] sm:$0xff] }
 0x578   :  { %v4425_v31 = vmax.f32 %v13258_v54, 0.0  ;;  %v4426_v22 = vmax.f32 %v13262_v33, 0.0  ;;  %v4427_v49 = vmax.f32 %v13266_v15, 0.0  ;;  %v4428_v62 = vmax.f32 %v13270_v9, 0.0 }
 0x579   :  { %v4429_v59 = vmax.f32 %v13274_v44, 0.0  ;;  %v4430_v12 = vmax.f32 %v13278_v14, 0.0  ;;  %v4431_v50 = vmax.f32 %v13282_v0, 0.0  ;;  %v4432_v55 = vmax.f32 %v13286_v58, 0.0  ;;  %v15650_v10 = vld [vmem:[#allocation118_spill] sm:$0xff] }
 0x57a   :  { %v4433_v56 = vmax.f32 %v13290_v37, 0.0  ;;  %v4434_v48 = vmax.f32 %v13294_v27, 0.0  ;;  %v4435_v47 = vmax.f32 %v13298_v40, 0.0  ;;  %v4436_v54 = vmax.f32 %v13302_v6, 0.0  ;;  %v15647_v37 = vld [vmem:[#allocation50_spill] sm:$0xff] }
 0x57b   :  { %v4437_v33 = vmax.f32 %v13306_v45, 0.0  ;;  %v4438_v15 = vmax.f32 %v13310_v42, 0.0  ;;  %v4439_v9 = vmax.f32 %v13314_v17, 0.0  ;;  %v4440_v44 = vmax.f32 %v13318_v21, 0.0 }
 0x57c   :  { %v4441_v14 = vmax.f32 %v13322_v63, 0.0  ;;  %v4442_v0 = vmax.f32 %v13326_v35, 0.0  ;;  %v4443_v58 = vmax.f32 %v13330_v3, 0.0  ;;  %v4444_v27 = vmax.f32 %v15647_v37, 0.0  ;;  %v15651_v37 = vld [vmem:[#allocation62_spill] sm:$0xff] }
 0x57d   :  { %v4445_v40 = vmax.f32 %v15648_v29, 0.0  ;;  %v4446_v6 = vmax.f32 %v13342_v16, 0.0  ;;  %v4447_v45 = vmax.f32 %v15649_v23, 0.0  ;;  %v4448_v42 = vmax.f32 %v13350_v18, 0.0  ;;  %v15652_v16 = vld [vmem:[#allocation123_spill] sm:$0xff] }
 0x57e   :  { %v4449_v17 = vmax.f32 %v13354_v20, 0.0  ;;  %v4450_v21 = vmax.f32 %v15650_v10, 0.0  ;;  %v4451_v63 = vmax.f32 %v13362_v4, 0.0  ;;  %v4452_v35 = vmax.f32 %v13366_v43, 0.0  ;;  %v15653_v18 = vld [vmem:[#allocation195_spill] sm:$0xff]  ;;  %v15654_v10 = vld [vmem:[#allocation66_spill] sm:$0xff] }
 0x57f   :  { %v4453_v3 = vmax.f32 %v13370_v19, 0.0  ;;  %v4454_v29 = vmax.f32 %v15651_v37, 0.0  ;;  %v4455_v23 = vmax.f32 %v15652_v16, 0.0  ;;  %v4456_v20 = vmax.f32 %v15653_v18, 0.0  ;;  %v15655_v43 = vld [vmem:[#allocation55_spill] sm:$0xff]  ;;  %v15656_v37 = vld [vmem:[#allocation148_spill] sm:$0xff] }
 0x580   :  { %v4457_v4 = vmax.f32 %v15654_v10, 0.0  ;;  %v4458_v19 = vmax.f32 %v15655_v43, 0.0  ;;  %v4459_v16 = vmax.f32 %v15656_v37, 0.0  ;;  %v15657_v18 = vld [vmem:[#allocation146_spill] sm:$0xff]  ;;  %v15658_v43 = vld [vmem:[#allocation96_spill] sm:$0xff] }
 0x581   :  { %v4462_v10 = vmax.f32 %v15657_v18, 0.0  ;;  %v4463_v37 = vmax.f32 %v15658_v43, 0.0  ;;  %v13466_v18 = vrot.slane %v4400_v52, 7  ;;  %v13468_v43 = vrot.slane %v4401_v34, 7 }
 0x582   :  { %v13470_v52 = vrot.slane %v4402_v57, 7  ;;  %v13474_v34 = vrot.slane %v4404_v8, 7  ;;  %v13478_v57 = vrot.slane %v4406_v61, 7  ;;  %v13486_v8 = vrot.slane %v4410_v13, 7 }
 0x583   :  { %15659 = vst [vmem:[#allocation16_spill] sm:$0xff] %v13466_v18  ;;  %15660 = vst [vmem:[#allocation130_spill] sm:$0xff] %v13468_v43  ;;  %v13472_v18 = vrot.slane %v4403_v30, 7  ;;  %v13476_v43 = vrot.slane %v4405_v41, 7  ;;  %v13482_v30 = vrot.slane %v4408_v53, 7  ;;  %v13490_v41 = vrot.slane %v4412_v25, 7 }
 0x584   :  { %15661 = vst [vmem:[#allocation138_spill] sm:$0xff] %v13470_v52  ;;  %15663 = vst [vmem:[#allocation198_spill] sm:$0xff] %v13474_v34  ;;  %v13480_v52 = vrot.slane %v4407_v36, 7  ;;  %v13488_v34 = vrot.slane %v4411_v51, 7  ;;  %v13494_v61 = vrot.slane %v4414_v26, 7  ;;  %v13498_v36 = vrot.slane %v4416_v7, 7 }
 0x585   :  { %15662 = vst [vmem:[#allocation147_spill] sm:$0xff] %v13472_v18  ;;  %15664 = vst [vmem:[#allocation155_spill] sm:$0xff] %v13476_v43  ;;  %v13484_v18 = vrot.slane %v4409_v38, 7  ;;  %v13492_v43 = vrot.slane %v4413_v5, 7  ;;  %v13502_v53 = vrot.slane %v4418_v1, 7  ;;  %v13504_v38 = vrot.slane %v4419_v39, 7 }
 0x586   :  { %15665 = vst [vmem:[#allocation13_spill] sm:$0xff] %v13478_v57  ;;  %15666 = vst [vmem:[#allocation18_spill] sm:$0xff] %v13480_v52  ;;  %v13496_v57 = vrot.slane %v4415_v2, 7  ;;  %v13500_v52 = vrot.slane %v4417_v32, 7  ;;  %v13506_v13 = vrot.slane %v4420_v60, 7  ;;  %v13508_v51 = vrot.slane %v4421_v24, 7 }
 0x587   :  { %15667 = vst [vmem:[#allocation143_spill] sm:$0xff] %v13484_v18  ;;  %15668 = vst [vmem:[#allocation194_spill] sm:$0xff] %v13488_v34  ;;  %v13510_v25 = vrot.slane %v4422_v46, 7  ;;  %v13512_v5 = vrot.slane %v4423_v28, 7  ;;  %v13514_v26 = vrot.slane %v4424_v11, 7  ;;  %v13516_v2 = vrot.slane %v4425_v31, 7 }
 0x588   :  { %15669 = vst [vmem:[#allocation49_spill] sm:$0xff] %v13508_v51  ;;  %v13518_v7 = vrot.slane %v4426_v22, 7  ;;  %v13520_v32 = vrot.slane %v4427_v49, 7  ;;  %v13522_v1 = vrot.slane %v4428_v62, 7  ;;  %v13524_v39 = vrot.slane %v4429_v59, 7 }
 0x589   :  { %v13526_v60 = vrot.slane %v4430_v12, 7  ;;  %v13528_v24 = vrot.slane %v4431_v50, 7  ;;  %v13530_v46 = vrot.slane %v4432_v55, 7  ;;  %v13532_v28 = vrot.slane %v4433_v56, 7 }
 0x58a   :  { %v13534_v11 = vrot.slane %v4434_v48, 7  ;;  %v13536_v31 = vrot.slane %v4435_v47, 7  ;;  %v13538_v22 = vrot.slane %v4436_v54, 7  ;;  %v13540_v49 = vrot.slane %v4437_v33, 7 }
 0x58b   :  { %v13542_v62 = vrot.slane %v4438_v15, 7  ;;  %v13544_v59 = vrot.slane %v4439_v9, 7  ;;  %v13546_v12 = vrot.slane %v4440_v44, 7  ;;  %v13548_v50 = vrot.slane %v4441_v14, 7 }
 0x58c   :  { %v13550_v55 = vrot.slane %v4442_v0, 7  ;;  %v13552_v56 = vrot.slane %v4443_v58, 7  ;;  %v13554_v48 = vrot.slane %v4444_v27, 7  ;;  %v13556_v47 = vrot.slane %v4445_v40, 7 }
 0x58d   :  { %v13558_v54 = vrot.slane %v4446_v6, 7  ;;  %v13560_v33 = vrot.slane %v4447_v45, 7  ;;  %v13562_v15 = vrot.slane %v4448_v42, 7  ;;  %v13564_v9 = vrot.slane %v4449_v17, 7 }
 0x58e   :  { %v13566_v44 = vrot.slane %v4450_v21, 7  ;;  %v13568_v14 = vrot.slane %v4451_v63, 7  ;;  %v13570_v0 = vrot.slane %v4452_v35, 7  ;;  %v13572_v58 = vrot.slane %v4453_v3, 7  ;;  %v15679_v35 = vld [vmem:[#allocation130_spill] sm:$0xff] }
 0x58f   :  { %15670 = vst [vmem:[#allocation199_spill] sm:$0xff] %v13560_v33  ;;  %15671 = vst [vmem:[#allocation196_spill] sm:$0xff] %v13564_v9  ;;  %v13574_v27 = vrot.slane %v4454_v29, 7  ;;  %v13576_v40 = vrot.slane %v4455_v23, 7  ;;  %v13578_v6 = vrot.slane %v4456_v20, 7  ;;  %v13580_v45 = vrot.slane %v4457_v4, 7 }
 0x590   :  { %15672 = vst [vmem:[#allocation57_spill] sm:$0xff] %v13568_v14  ;;  %15673 = vst [vmem:[#allocation99_spill] sm:$0xff] %v13570_v0  ;;  %v13582_v42 = vrot.slane %v4458_v19, 7  ;;  %v13584_v17 = vrot.slane %v4459_v16, 7  ;;  %v13586_v21 = vrot.slane %v4462_v10, 7  ;;  %v13588_v63 = vrot.slane %v4463_v37, 7 }
 0x591   :  { %15674 = vst [vmem:[#allocation128_spill] sm:$0xff] %v13572_v58  ;;  %15675 = vst [vmem:[#allocation202_spill] sm:$0xff] %v13574_v27  ;;  %v15680_v0 = vld [vmem:[#allocation16_spill] sm:$0xff]  ;;  %v15681_v29 = vld [vmem:[#allocation147_spill] sm:$0xff]  ;;  %v4542_v10 = vsel %vm765_vm3, %v13482_v30, %v13484_v18  ;;  %v4545_v37 = vsel %vm765_vm3, %v13486_v8, %v13488_v34  ;;  %v4554_v18 = vsel %vm765_vm3, %v13498_v36, %v13500_v52 }
 0x592   :  { %15676 = vst [vmem:[#allocation70_spill] sm:$0xff] %v13578_v6  ;;  %15677 = vst [vmem:[#allocation68_spill] sm:$0xff] %v13582_v42  ;;  %v4530_v3 = vsel %vm765_vm3, %v15680_v0, %v15679_v35  ;;  %v15682_v27 = vld [vmem:[#allocation138_spill] sm:$0xff]  ;;  %v15683_v20 = vld [vmem:[#allocation155_spill] sm:$0xff]  ;;  %v4557_v34 = vsel %vm765_vm3, %v13502_v53, %v13504_v38 }
 0x593   :  { %15678 = vst [vmem:[#allocation129_spill] sm:$0xff] %v13588_v63  ;;  %v4533_v23 = vsel %vm765_vm3, %v15682_v27, %v15681_v29  ;;  %v15684_v6 = vld [vmem:[#allocation198_spill] sm:$0xff]  ;;  %v15686_v42 = vld [vmem:[#allocation13_spill] sm:$0xff]  ;;  %v4548_v29 = vsel %vm765_vm3, %v13490_v41, %v13492_v43  ;;  %4789 = vst.msk [vmem:[#allocation2 + $0x20] sm:$0xff] %vm2963_vm1, %v4530_v3  ;;  %v4560_v3 = vsel %vm765_vm3, %v13506_v13, %v13508_v51 }
 0x594   :  { %v4536_v4 = vsel %vm765_vm3, %v15684_v6, %v15683_v20  ;;  %v15685_v19 = vld [vmem:[#allocation18_spill] sm:$0xff]  ;;  %4792 = vst.msk [vmem:[#allocation2 + $0x38] sm:$0xff] %vm2963_vm1, %v4533_v23  ;;  %4801 = vst.msk [vmem:[#allocation2 + $0x80] sm:$0xff] %vm2963_vm1, %v4542_v10  ;;  %v4563_v23 = vsel %vm765_vm3, %v13510_v25, %v13512_v5  ;;  %v4569_v51 = vsel %vm765_vm3, %v13518_v7, %v13520_v32 }
 0x595   :  { %v4539_v16 = vsel %vm765_vm3, %v15686_v42, %v15685_v19  ;;  %4795 = vst.msk [vmem:[#allocation2 + $0x50] sm:$0xff] %vm2963_vm1, %v4536_v4  ;;  %v4551_v19 = vsel %vm765_vm3, %v13494_v61, %v13496_v57  ;;  %4804 = vst.msk [vmem:[#allocation2 + $0x98] sm:$0xff] %vm2963_vm1, %v4545_v37  ;;  %v4566_v4 = vsel %vm765_vm3, %v13514_v26, %v13516_v2 }
 0x596   :  { %4798 = vst.msk [vmem:[#allocation2 + $0x68] sm:$0xff] %vm2963_vm1, %v4539_v16  ;;  %4807 = vst.msk [vmem:[#allocation2 + $0xb0] sm:$0xff] %vm2963_vm1, %v4548_v29  ;;  %v4572_v16 = vsel %vm765_vm3, %v13522_v1, %v13524_v39  ;;  %v4575_v29 = vsel %vm765_vm3, %v13526_v60, %v13528_v24  ;;  %v4578_v10 = vsel %vm765_vm3, %v13530_v46, %v13532_v28 }
 0x597   :  { %4810 = vst.msk [vmem:[#allocation2 + $0xc8] sm:$0xff] %vm2963_vm1, %v4551_v19  ;;  %4813 = vst.msk [vmem:[#allocation2 + $0xe0] sm:$0xff] %vm2963_vm1, %v4554_v18  ;;  %v4581_v37 = vsel %vm765_vm3, %v13534_v11, %v13536_v31  ;;  %v4584_v18 = vsel %vm765_vm3, %v13538_v22, %v13540_v49  ;;  %v4590_v19 = vsel %vm765_vm3, %v13546_v12, %v13548_v50 }
 0x598   :  { %4816 = vst.msk [vmem:[#allocation2 + $0xf8] sm:$0xff] %vm2963_vm1, %v4557_v34  ;;  %4819 = vst.msk [vmem:[#allocation2 + $0x110] sm:$0xff] %vm2963_vm1, %v4560_v3  ;;  %v4587_v34 = vsel %vm765_vm3, %v13542_v62, %v13544_v59  ;;  %v4593_v3 = vsel %vm765_vm3, %v13550_v55, %v13552_v56 }
 0x599   :  { %4822 = vst.msk [vmem:[#allocation2 + $0x128] sm:$0xff] %vm2963_vm1, %v4563_v23  ;;  %4825 = vst.msk [vmem:[#allocation2 + $0x140] sm:$0xff] %vm2963_vm1, %v4566_v4  ;;  %v4596_v23 = vsel %vm765_vm3, %v13554_v48, %v13556_v47  ;;  %v4602_v4 = vsel %vm765_vm3, %v13562_v15, %v13564_v9  ;;  %v15689_v9 = vld [vmem:[#allocation70_spill] sm:$0xff] }
 0x59a   :  { %4828 = vst.msk [vmem:[#allocation2 + $0x158] sm:$0xff] %vm2963_vm1, %v4569_v51  ;;  %4831 = vst.msk [vmem:[#allocation2 + $0x170] sm:$0xff] %vm2963_vm1, %v4572_v16  ;;  %v4599_v51 = vsel %vm765_vm3, %v13558_v54, %v13560_v33  ;;  %v4605_v16 = vsel %vm765_vm3, %v13566_v44, %v13568_v14  ;;  %v4614_v14 = vsel %vm765_vm3, %v15689_v9, %v13580_v45  ;;  %v15690_v33 = vld [vmem:[#allocation68_spill] sm:$0xff] }
 0x59b   :  { %4834 = vst.msk [vmem:[#allocation2 + $0x188] sm:$0xff] %vm2963_vm1, %v4575_v29  ;;  %4843 = vst.msk [vmem:[#allocation2 + $0x1d0] sm:$0xff] %vm2963_vm1, %v4578_v10  ;;  %v15687_v29 = vld [vmem:[#allocation99_spill] sm:$0xff] }
 0x59c   :  { %4846 = vst.msk [vmem:[#allocation2 + $0x1e8] sm:$0xff] %vm2963_vm1, %v4581_v37  ;;  %4849 = vst.msk [vmem:[#allocation2 + $0x200] sm:$0xff] %vm2963_vm1, %v4584_v18  ;;  %v4608_v10 = vsel %vm765_vm3, %v15687_v29, %v13572_v58  ;;  %v15688_v37 = vld [vmem:[#allocation202_spill] sm:$0xff]  ;;  %v4617_v58 = vsel %vm765_vm3, %v15690_v33, %v13584_v17 }
 0x59d   :  { %4852 = vst.msk [vmem:[#allocation2 + $0x218] sm:$0xff] %vm2963_vm1, %v4587_v34  ;;  %4855 = vst.msk [vmem:[#allocation2 + $0x230] sm:$0xff] %vm2963_vm1, %v4590_v19  ;;  %v4611_v18 = vsel %vm765_vm3, %v15688_v37, %v13576_v40  ;;  %v4623_v34 = vsel %vm765_vm3, %v13586_v21, %v13588_v63  ;;  %v4720_v19 = vsel %vm765_vm3, 0.0, %v15680_v0  ;;  %v4723_v63 = vsel %vm765_vm3, 0.0, %v15686_v42 }
 0x59e   :  { %4858 = vst.msk [vmem:[#allocation2 + $0x248] sm:$0xff] %vm2963_vm1, %v4593_v3  ;;  %4861 = vst.msk [vmem:[#allocation2 + $0x260] sm:$0xff] %vm2963_vm1, %v4596_v23  ;;  %v4721_v3 = vsel %vm765_vm3, 0.0, %v15682_v27  ;;  %v4722_v23 = vsel %vm765_vm3, 0.0, %v15684_v6  ;;  %v4724_v0 = vsel %vm765_vm3, 0.0, %v13482_v30  ;;  %v4725_v27 = vsel %vm765_vm3, 0.0, %v13486_v8 }
 0x59f   :  { %4864 = vst.msk [vmem:[#allocation2 + $0x278] sm:$0xff] %vm2963_vm1, %v4599_v51  ;;  %4867 = vst.msk [vmem:[#allocation2 + $0x290] sm:$0xff] %vm2963_vm1, %v4602_v4  ;;  %v4726_v6 = vsel %vm765_vm3, 0.0, %v13490_v41  ;;  %v4727_v42 = vsel %vm765_vm3, 0.0, %v13494_v61  ;;  %v4728_v30 = vsel %vm765_vm3, 0.0, %v13498_v36  ;;  %v4729_v8 = vsel %vm765_vm3, 0.0, %v13502_v53 }
 0x5a0   :  { %4870 = vst.msk [vmem:[#allocation2 + $0x2a8] sm:$0xff] %vm2963_vm1, %v4605_v16  ;;  %4873 = vst.msk [vmem:[#allocation2 + $0x2c0] sm:$0xff] %vm2963_vm1, %v4608_v10  ;;  %v4730_v41 = vsel %vm765_vm3, 0.0, %v13506_v13  ;;  %v4731_v61 = vsel %vm765_vm3, 0.0, %v13510_v25  ;;  %v4732_v36 = vsel %vm765_vm3, 0.0, %v13514_v26  ;;  %v4733_v53 = vsel %vm765_vm3, 0.0, %v13518_v7 }
 0x5a1   :  { %4876 = vst.msk [vmem:[#allocation2 + $0x2d8] sm:$0xff] %vm2963_vm1, %v4611_v18  ;;  %4879 = vst.msk [vmem:[#allocation2 + $0x2f0] sm:$0xff] %vm2963_vm1, %v4614_v14  ;;  %v4734_v13 = vsel %vm765_vm3, 0.0, %v13522_v1  ;;  %v4735_v25 = vsel %vm765_vm3, 0.0, %v13526_v60  ;;  %v4736_v26 = vsel %vm765_vm3, 0.0, %v13530_v46  ;;  %v4737_v7 = vsel %vm765_vm3, 0.0, %v13534_v11 }
 0x5a2   :  { %4882 = vst.msk [vmem:[#allocation2 + $0x308] sm:$0xff] %vm2963_vm1, %v4617_v58  ;;  %4888 = vst.msk [vmem:[#allocation2 + $0x338] sm:$0xff] %vm2963_vm1, %v4623_v34  ;;  %v4738_v1 = vsel %vm765_vm3, 0.0, %v13538_v22  ;;  %v4739_v60 = vsel %vm765_vm3, 0.0, %v13542_v62  ;;  %v4740_v46 = vsel %vm765_vm3, 0.0, %v13546_v12  ;;  %v4741_v11 = vsel %vm765_vm3, 0.0, %v13550_v55 }
 0x5a3   :  { %4788 = vst.msk [vmem:[#allocation2 + $0x18] sm:$0xff] %vm2963_vm1, %v4720_v19  ;;  %4791 = vst.msk [vmem:[#allocation2 + $0x30] sm:$0xff] %vm2963_vm1, %v4721_v3  ;;  %v4742_v22 = vsel %vm765_vm3, 0.0, %v13554_v48  ;;  %v4743_v62 = vsel %vm765_vm3, 0.0, %v13558_v54  ;;  %v4744_v12 = vsel %vm765_vm3, 0.0, %v13562_v15  ;;  %v4745_v55 = vsel %vm765_vm3, 0.0, %v13566_v44 }
 0x5a4   :  { %4794 = vst.msk [vmem:[#allocation2 + $0x48] sm:$0xff] %vm2963_vm1, %v4722_v23  ;;  %4797 = vst.msk [vmem:[#allocation2 + $0x60] sm:$0xff] %vm2963_vm1, %v4723_v63  ;;  %v4746_v48 = vsel %vm765_vm3, 0.0, %v15687_v29  ;;  %v4747_v54 = vsel %vm765_vm3, 0.0, %v15688_v37  ;;  %v4748_v15 = vsel %vm765_vm3, 0.0, %v15689_v9  ;;  %v4749_v44 = vsel %vm765_vm3, 0.0, %v15690_v33 }
 0x5a5   :  { %4800 = vst.msk [vmem:[#allocation2 + $0x78] sm:$0xff] %vm2963_vm1, %v4724_v0  ;;  %4803 = vst.msk [vmem:[#allocation2 + $0x90] sm:$0xff] %vm2963_vm1, %v4725_v27  ;;  %v4751_v14 = vsel %vm765_vm3, 0.0, %v13586_v21  ;;  %v4752_v58 = vsel %vm765_vm3, %v15679_v35, 0.0  ;;  %v15691_v63 = vld [vmem:[#allocation147_spill] sm:$0xff]  ;;  %v4754_v33 = vsel %vm765_vm3, %v15683_v20, 0.0 }
 0x5a6   :  { %4806 = vst.msk [vmem:[#allocation2 + $0xa8] sm:$0xff] %vm2963_vm1, %v4726_v6  ;;  %4809 = vst.msk [vmem:[#allocation2 + $0xc0] sm:$0xff] %vm2963_vm1, %v4727_v42  ;;  %v4753_v9 = vsel %vm765_vm3, %v15691_v63, 0.0  ;;  %v15692_v51 = vld [vmem:[#allocation18_spill] sm:$0xff]  ;;  %v15693_v4 = vld [vmem:[#allocation143_spill] sm:$0xff]  ;;  %v4758_v20 = vsel %vm765_vm3, %v13492_v43, 0.0 }
 0x5a7   :  { %4812 = vst.msk [vmem:[#allocation2 + $0xd8] sm:$0xff] %vm2963_vm1, %v4728_v30  ;;  %4815 = vst.msk [vmem:[#allocation2 + $0xf0] sm:$0xff] %vm2963_vm1, %v4729_v8  ;;  %v4755_v21 = vsel %vm765_vm3, %v15692_v51, 0.0  ;;  %v4756_v35 = vsel %vm765_vm3, %v15693_v4, 0.0  ;;  %v15694_v16 = vld [vmem:[#allocation194_spill] sm:$0xff]  ;;  %v4759_v10 = vsel %vm765_vm3, %v13496_v57, 0.0 }
 0x5a8   :  { %4818 = vst.msk [vmem:[#allocation2 + $0x108] sm:$0xff] %vm2963_vm1, %v4730_v41  ;;  %4821 = vst.msk [vmem:[#allocation2 + $0x120] sm:$0xff] %vm2963_vm1, %v4731_v61  ;;  %v4757_v29 = vsel %vm765_vm3, %v15694_v16, 0.0  ;;  %v4760_v37 = vsel %vm765_vm3, %v13500_v52, 0.0  ;;  %v4761_v18 = vsel %vm765_vm3, %v13504_v38, 0.0  ;;  %v15695_v34 = vld [vmem:[#allocation49_spill] sm:$0xff] }
 0x5a9   :  { %4824 = vst.msk [vmem:[#allocation2 + $0x138] sm:$0xff] %vm2963_vm1, %v4732_v36  ;;  %4827 = vst.msk [vmem:[#allocation2 + $0x150] sm:$0xff] %vm2963_vm1, %v4733_v53  ;;  %v4762_v43 = vsel %vm765_vm3, %v15695_v34, 0.0  ;;  %v4763_v57 = vsel %vm765_vm3, %v13512_v5, 0.0  ;;  %v4764_v52 = vsel %vm765_vm3, %v13516_v2, 0.0  ;;  %v4765_v38 = vsel %vm765_vm3, %v13520_v32, 0.0 }
 0x5aa   :  { %4830 = vst.msk [vmem:[#allocation2 + $0x168] sm:$0xff] %vm2963_vm1, %v4734_v13  ;;  %4833 = vst.msk [vmem:[#allocation2 + $0x180] sm:$0xff] %vm2963_vm1, %v4735_v25  ;;  %v4925_v3 = vld [vmem:[#allocation2 + $0x1] ss:$2 sm:$0xff]  ;;  %v4766_v23 = vsel %vm765_vm3, %v13524_v39, 0.0  ;;  %v4767_v5 = vsel %vm765_vm3, %v13528_v24, 0.0 }
 0x5ab   :  { %4842 = vst.msk [vmem:[#allocation2 + $0x1c8] sm:$0xff] %vm2963_vm1, %v4736_v26  ;;  %4845 = vst.msk [vmem:[#allocation2 + $0x1e0] sm:$0xff] %vm2963_vm1, %v4737_v7  ;;  %v4929_v19 = vld [vmem:[#allocation2 + $0x61] ss:$2 sm:$0xff]  ;;  %v4768_v2 = vsel %vm765_vm3, %v13532_v28, 0.0  ;;  %v4769_v32 = vsel %vm765_vm3, %v13536_v31, 0.0 }
 0x5ac   :  { %4848 = vst.msk [vmem:[#allocation2 + $0x1f8] sm:$0xff] %vm2963_vm1, %v4738_v1  ;;  %4851 = vst.msk [vmem:[#allocation2 + $0x210] sm:$0xff] %vm2963_vm1, %v4739_v60  ;;  %v4931_v0 = vld [vmem:[#allocation2 + $0x91] ss:$2 sm:$0xff]  ;;  %v4770_v39 = vsel %vm765_vm3, %v13540_v49, 0.0  ;;  %v4771_v24 = vsel %vm765_vm3, %v13544_v59, 0.0 }
 0x5ad   :  { %4854 = vst.msk [vmem:[#allocation2 + $0x228] sm:$0xff] %vm2963_vm1, %v4740_v46  ;;  %4857 = vst.msk [vmem:[#allocation2 + $0x240] sm:$0xff] %vm2963_vm1, %v4741_v11  ;;  %v4772_v28 = vsel %vm765_vm3, %v13548_v50, 0.0  ;;  %v4927_v27 = vld [vmem:[#allocation2 + $0x31] ss:$2 sm:$0xff]  ;;  %v4773_v31 = vsel %vm765_vm3, %v13552_v56, 0.0 }
 0x5ae   :  { %4860 = vst.msk [vmem:[#allocation2 + $0x258] sm:$0xff] %vm2963_vm1, %v4742_v22  ;;  %4863 = vst.msk [vmem:[#allocation2 + $0x270] sm:$0xff] %vm2963_vm1, %v4743_v62  ;;  %v4774_v49 = vsel %vm765_vm3, %v13556_v47, 0.0  ;;  %v15696_v6 = vld [vmem:[#allocation199_spill] sm:$0xff]  ;;  %v15697_v42 = vld [vmem:[#allocation196_spill] sm:$0xff]  ;;  %v4779_v41 = vsel %vm765_vm3, %v13576_v40, 0.0  ;;  %v7731_v40 = vpack.i.bf16 %v4931_v0, %v4929_v19 }
 0x5af   :  { %4866 = vst.msk [vmem:[#allocation2 + $0x288] sm:$0xff] %vm2963_vm1, %v4744_v12  ;;  %4869 = vst.msk [vmem:[#allocation2 + $0x2a0] sm:$0xff] %vm2963_vm1, %v4745_v55  ;;  %v4775_v59 = vsel %vm765_vm3, %v15696_v6, 0.0  ;;  %v4776_v50 = vsel %vm765_vm3, %v15697_v42, 0.0  ;;  %v15698_v30 = vld [vmem:[#allocation57_spill] sm:$0xff]  ;;  %v15699_v8 = vld [vmem:[#allocation128_spill] sm:$0xff] }
 0x5b0   :  { %4872 = vst.msk [vmem:[#allocation2 + $0x2b8] sm:$0xff] %vm2963_vm1, %v4746_v48  ;;  %4875 = vst.msk [vmem:[#allocation2 + $0x2d0] sm:$0xff] %vm2963_vm1, %v4747_v54  ;;  %v4777_v56 = vsel %vm765_vm3, %v15698_v30, 0.0  ;;  %v4778_v47 = vsel %vm765_vm3, %v15699_v8, 0.0  ;;  %v4780_v61 = vsel %vm765_vm3, %v13580_v45, 0.0  ;;  %v4781_v36 = vsel %vm765_vm3, %v13584_v17, 0.0  ;;  %7732 = vrot.lane.b32.xlu0 %v7731_v40, %s8144_s22 }
 0x5b1   :  { %4790 = vst.msk [vmem:[#allocation2 + $0x28] sm:$0x3] %vm4786_vm2, %v4752_v58  ;;  %4793 = vst.msk [vmem:[#allocation2 + $0x40] sm:$0x3] %vm4786_vm2, %v4753_v9  ;;  %v15700_v53 = vld [vmem:[#allocation129_spill] sm:$0xff]  ;;  %v7726_v45 = vpack.i.bf16 %v4927_v27, %v4925_v3 }
 0x5b2   :  { %4878 = vst.msk [vmem:[#allocation2 + $0x2e8] sm:$0xff] %vm2963_vm1, %v4748_v15  ;;  %4881 = vst.msk [vmem:[#allocation2 + $0x300] sm:$0xff] %vm2963_vm1, %v4749_v44  ;;  %v4783_v13 = vsel %vm765_vm3, %v15700_v53, 0.0  ;;  %v4957_v26 = vld [vmem:[#allocation2 + $0x2] ss:$2 sm:$0xff]  ;;  %vm5919_vm3 = vcmask 588800  }
 0x5b3   :  { %4887 = vst.msk [vmem:[#allocation2 + $0x330] sm:$0xff] %vm2963_vm1, %v4751_v14  ;;  %7727 = vrot.lane.b32.xlu1 %v7726_v45, %s8144_s22  ;;  %v4993_v46 = vld [vmem:[#allocation2 + $0x78] ss:$2 sm:$0xff]  ;;  %v4995_v11 = vld [vmem:[#allocation2 + $0xa8] ss:$2 sm:$0xff] }
 0x5b4   :  { %4796 = vst.msk [vmem:[#allocation2 + $0x58] sm:$0x3] %vm4786_vm2, %v4754_v33  ;;  %4799 = vst.msk [vmem:[#allocation2 + $0x70] sm:$0x3] %vm4786_vm2, %v4755_v21  ;;  %v4989_v22 = vld [vmem:[#allocation2 + $0x18] ss:$2 sm:$0xff]  ;;  %v7751_v12 = vpack.i.bf16 %v4995_v11, %v4993_v46 }
 0x5b5   :  { %4802 = vst.msk [vmem:[#allocation2 + $0x88] sm:$0x3] %vm4786_vm2, %v4756_v35  ;;  %4805 = vst.msk [vmem:[#allocation2 + $0xa0] sm:$0x3] %vm4786_vm2, %v4757_v29  ;;  %v4991_v62 = vld [vmem:[#allocation2 + $0x48] ss:$2 sm:$0xff] }
 0x5b6   :  { %4808 = vst.msk [vmem:[#allocation2 + $0xb8] sm:$0x3] %vm4786_vm2, %v4758_v20  ;;  %4811 = vst.msk [vmem:[#allocation2 + $0xd0] sm:$0x3] %vm4786_vm2, %v4759_v10  ;;  %v7746_v55 = vpack.i.bf16 %v4991_v62, %v4989_v22  ;;  %v5025_v48 = vld [vmem:[#allocation2 + $0x79] ss:$2 sm:$0xff] }
 0x5b7   :  { %4814 = vst.msk [vmem:[#allocation2 + $0xe8] sm:$0x3] %vm4786_vm2, %v4760_v37  ;;  %4817 = vst.msk [vmem:[#allocation2 + $0x100] sm:$0x3] %vm4786_vm2, %v4761_v18  ;;  %v5027_v54 = vld [vmem:[#allocation2 + $0xa9] ss:$2 sm:$0xff] }
 0x5b8   :  { %4820 = vst.msk [vmem:[#allocation2 + $0x118] sm:$0x3] %vm4786_vm2, %v4762_v43  ;;  %4823 = vst.msk [vmem:[#allocation2 + $0x130] sm:$0x3] %vm4786_vm2, %v4763_v57  ;;  %v4959_v17 = vld [vmem:[#allocation2 + $0x32] ss:$2 sm:$0xff]  ;;  %v7761_v14 = vpack.i.bf16 %v5027_v54, %v5025_v48 }
 0x5b9   :  { %4826 = vst.msk [vmem:[#allocation2 + $0x148] sm:$0x3] %vm4786_vm2, %v4764_v52  ;;  %4829 = vst.msk [vmem:[#allocation2 + $0x160] sm:$0x3] %vm4786_vm2, %v4765_v38  ;;  %v7736_v60 = vpack.i.bf16 %v4959_v17, %v4957_v26  ;;  %v5021_v15 = vld [vmem:[#allocation2 + $0x19] ss:$2 sm:$0xff] }
 0x5ba   :  { %4832 = vst.msk [vmem:[#allocation2 + $0x178] sm:$0x3] %vm4786_vm2, %v4766_v23  ;;  %4835 = vst.msk [vmem:[#allocation2 + $0x190] sm:$0x3] %vm4786_vm2, %v4767_v5  ;;  %v5023_v44 = vld [vmem:[#allocation2 + $0x49] ss:$2 sm:$0xff] }
 0x5bb   :  { %4844 = vst.msk [vmem:[#allocation2 + $0x1d8] sm:$0x3] %vm4786_vm2, %v4768_v2  ;;  %4847 = vst.msk [vmem:[#allocation2 + $0x1f0] sm:$0x3] %vm4786_vm2, %v4769_v32  ;;  %v4961_v25 = vld [vmem:[#allocation2 + $0x62] ss:$2 sm:$0xff]  ;;  %7737 = vrot.lane.b32.xlu1 %v7736_v60, %s8145_s23  ;;  %v7756_v58 = vpack.i.bf16 %v5023_v44, %v5021_v15 }
 0x5bc   :  { %4850 = vst.msk [vmem:[#allocation2 + $0x208] sm:$0x3] %vm4786_vm2, %v4770_v39  ;;  %4853 = vst.msk [vmem:[#allocation2 + $0x220] sm:$0x3] %vm4786_vm2, %v4771_v24  ;;  %v4963_v7 = vld [vmem:[#allocation2 + $0x92] ss:$2 sm:$0xff] }
 0x5bd   :  { %4856 = vst.msk [vmem:[#allocation2 + $0x238] sm:$0x3] %vm4786_vm2, %v4772_v28  ;;  %4859 = vst.msk [vmem:[#allocation2 + $0x250] sm:$0x3] %vm4786_vm2, %v4773_v31  ;;  %v7741_v1 = vpack.i.bf16 %v4963_v7, %v4961_v25  ;;  %v5057_v63 = vld [vmem:[#allocation2 + $0x7a] ss:$2 sm:$0xff] }
 0x5be   :  { %4862 = vst.msk [vmem:[#allocation2 + $0x268] sm:$0x3] %vm4786_vm2, %v4774_v49  ;;  %4865 = vst.msk [vmem:[#allocation2 + $0x280] sm:$0x3] %vm4786_vm2, %v4775_v59  ;;  %v5059_v9 = vld [vmem:[#allocation2 + $0xaa] ss:$2 sm:$0xff] }
 0x5bf   :  { %4868 = vst.msk [vmem:[#allocation2 + $0x298] sm:$0x3] %vm4786_vm2, %v4776_v50  ;;  %4871 = vst.msk [vmem:[#allocation2 + $0x2b0] sm:$0x3] %vm4786_vm2, %v4777_v56  ;;  %7742 = vrot.lane.b32.xlu0 %v7741_v1, %s8145_s23  ;;  %7747 = vrot.lane.b32.xlu1 %v7746_v55, %s8142_s21  ;;  %v5053_v33 = vld [vmem:[#allocation2 + $0x1a] ss:$2 sm:$0xff]  ;;  %v7771_v21 = vpack.i.bf16 %v5059_v9, %v5057_v63 }
 0x5c0   :  { %4874 = vst.msk [vmem:[#allocation2 + $0x2c8] sm:$0x3] %vm4786_vm2, %v4778_v47  ;;  %4877 = vst.msk [vmem:[#allocation2 + $0x2e0] sm:$0x3] %vm4786_vm2, %v4779_v41  ;;  %v5055_v51 = vld [vmem:[#allocation2 + $0x4a] ss:$2 sm:$0xff] }
 0x5c1   :  { %4880 = vst.msk [vmem:[#allocation2 + $0x2f8] sm:$0x3] %vm4786_vm2, %v4780_v61  ;;  %4883 = vst.msk [vmem:[#allocation2 + $0x310] sm:$0x3] %vm4786_vm2, %v4781_v36  ;;  %v7766_v4 = vpack.i.bf16 %v5055_v51, %v5053_v33  ;;  %v5089_v35 = vld [vmem:[#allocation2 + $0x90] ss:$2 sm:$0xff] }
 0x5c2   :  { %4889 = vst.msk [vmem:[#allocation2 + $0x340] sm:$0x3] %vm4786_vm2, %v4783_v13  ;;  %v5091_v16 = vld [vmem:[#allocation2 + $0xc0] ss:$2 sm:$0xff]  ;;  %v5085_v29 = vld [vmem:[#allocation2 + $0x30] ss:$2 sm:$0xff] }
 0x5c3   :  { %7752 = vrot.lane.b32.xlu0 %v7751_v12, %s8142_s21  ;;  %7757 = vrot.lane.b32.xlu1 %v7756_v58, %s8148_s3  ;;  %v5087_v20 = vld [vmem:[#allocation2 + $0x60] ss:$2 sm:$0xff]  ;;  %v7781_v10 = vpack.i.bf16 %v5091_v16, %v5089_v35  ;;  %v5121_v18 = vld [vmem:[#allocation2 + $0x91] ss:$2 sm:$0xff]  ;;  %v5123_v34 = vld [vmem:[#allocation2 + $0xc1] ss:$2 sm:$0xff] }
 0x5c4   :  { %v7776_v37 = vpack.i.bf16 %v5087_v20, %v5085_v29  ;;  %v5117_v43 = vld [vmem:[#allocation2 + $0x31] ss:$2 sm:$0xff]  ;;  %v5119_v57 = vld [vmem:[#allocation2 + $0x61] ss:$2 sm:$0xff]  ;;  %v7791_v52 = vpack.i.bf16 %v5123_v34, %v5121_v18  ;;  %v5149_v23 = vld [vmem:[#allocation2 + $0x32] ss:$2 sm:$0xff] }
 0x5c5   :  { %v7786_v19 = vpack.i.bf16 %v5119_v57, %v5117_v43  ;;  %v4933_v3 = vld [vmem:[#allocation2 + $0xc1] ss:$2 sm:$0xff]  ;;  %v4935_v38 = vld [vmem:[#allocation2 + $0xf1] ss:$2 sm:$0xff]  ;;  %v5151_v5 = vld [vmem:[#allocation2 + $0x62] ss:$2 sm:$0xff] }
 0x5c6   :  { %v7801_v2 = vpack.i.bf16 %v4935_v38, %v4933_v3  ;;  %v7796_v0 = vpack.i.bf16 %v5151_v5, %v5149_v23  ;;  %v4965_v32 = vld [vmem:[#allocation2 + $0xc2] ss:$2 sm:$0xff]  ;;  %v4967_v39 = vld [vmem:[#allocation2 + $0xf2] ss:$2 sm:$0xff]  ;;  %v4937_v59 = vld [vmem:[#allocation2 + $0x121] ss:$2 sm:$0xff] }
 0x5c7   :  { %7762 = vrot.lane.b32.xlu0 %v7761_v14, %s8148_s3  ;;  %7767 = vrot.lane.b32.xlu1 %v7766_v4, %s8150_s4  ;;  %v5153_v24 = vld [vmem:[#allocation2 + $0x92] ss:$2 sm:$0xff]  ;;  %v5155_v28 = vld [vmem:[#allocation2 + $0xc2] ss:$2 sm:$0xff]  ;;  %v7816_v27 = vpack.i.bf16 %v4967_v39, %v4965_v32  ;;  %v4939_v42 = vld [vmem:[#allocation2 + $0x151] ss:$2 sm:$0xff] }
 0x5c8   :  { %v7806_v31 = vpack.i.bf16 %v5155_v28, %v5153_v24  ;;  %v4969_v49 = vld [vmem:[#allocation2 + $0x122] ss:$2 sm:$0xff]  ;;  %v4971_v6 = vld [vmem:[#allocation2 + $0x152] ss:$2 sm:$0xff]  ;;  %v7811_v30 = vpack.i.bf16 %v4939_v42, %v4937_v59  ;;  %v5033_v53 = vld [vmem:[#allocation2 + $0x139] ss:$2 sm:$0xff] }
 0x5c9   :  { %v7821_v50 = vpack.i.bf16 %v4971_v6, %v4969_v49  ;;  %v5001_v56 = vld [vmem:[#allocation2 + $0x138] ss:$2 sm:$0xff]  ;;  %v5003_v8 = vld [vmem:[#allocation2 + $0x168] ss:$2 sm:$0xff]  ;;  %v5035_v13 = vld [vmem:[#allocation2 + $0x169] ss:$2 sm:$0xff] }
 0x5ca   :  { %v4997_v47 = vld [vmem:[#allocation2 + $0xd8] ss:$2 sm:$0xff]  ;;  %v4999_v41 = vld [vmem:[#allocation2 + $0x108] ss:$2 sm:$0xff]  ;;  %v7831_v61 = vpack.i.bf16 %v5003_v8, %v5001_v56  ;;  %v5029_v40 = vld [vmem:[#allocation2 + $0xd9] ss:$2 sm:$0xff]  ;;  %v7841_v7 = vpack.i.bf16 %v5035_v13, %v5033_v53 }
 0x5cb   :  { %7772 = vrot.lane.b32.xlu0 %v7771_v21, %s8150_s4  ;;  %7777 = vrot.lane.b32.xlu1 %v7776_v37, %s8151_s5  ;;  %v7826_v36 = vpack.i.bf16 %v4999_v41, %v4997_v47  ;;  %v5031_v45 = vld [vmem:[#allocation2 + $0x109] ss:$2 sm:$0xff]  ;;  %v8059_v25 = vld [vmem:[%s14239_s6 + $0x20] sm:$0x3f]   ;;  %v8060_v26 = vld [vmem:[%s14239_s6 + $0x18] sm:$0xff]   ;;  %vm5902_vm2 = vcmask 523264  }
 0x5cc   :  { %6449 = vmatprep.subr.msk.bf16.mxu1 %vm1234_vm5, %v8059_v25  ;;  %v6009_v17 = vsel %vm1234_vm5, %v8059_v25, 0  ;;  %v7836_v1 = vpack.i.bf16 %v5031_v45, %v5029_v40  ;;  %v5065_v60 = vld [vmem:[#allocation2 + $0x13a] ss:$2 sm:$0xff]  ;;  %v5067_v46 = vld [vmem:[#allocation2 + $0x16a] ss:$2 sm:$0xff] }
 0x5cd   :  { %6416 = vmatpush3.bf16.msra.mxu1 %v6009_v17  ;;  %v5061_v11 = vld [vmem:[#allocation2 + $0xda] ss:$2 sm:$0xff]  ;;  %v5063_v22 = vld [vmem:[#allocation2 + $0x10a] ss:$2 sm:$0xff]  ;;  %v7851_v12 = vpack.i.bf16 %v5067_v46, %v5065_v60  ;;  %v5129_v9 = vld [vmem:[#allocation2 + $0x151] ss:$2 sm:$0xff] }
 0x5ce   :  { %6417 = vmatprep.subr.bf16.mxu1 %v8060_v26  ;;  %v8061_v62 = vld [vmem:[%s14239_s6 + $0x10] sm:$0xff]   ;;  %v7846_v55 = vpack.i.bf16 %v5063_v22, %v5061_v11  ;;  %v5099_v54 = vld [vmem:[#allocation2 + $0x180] ss:$2 sm:$0xff]  ;;  %v5131_v33 = vld [vmem:[#allocation2 + $0x181] ss:$2 sm:$0xff] }
 0x5cf   :  { %7782 = vrot.lane.b32.xlu0 %v7781_v10, %s8151_s5  ;;  %7787 = vrot.lane.b32.xlu1 %v7786_v19, %s8152_s17  ;;  %v5097_v48 = vld [vmem:[#allocation2 + $0x150] ss:$2 sm:$0xff]  ;;  %v5095_v44 = vld [vmem:[#allocation2 + $0x120] ss:$2 sm:$0xff]  ;;  %v5125_v51 = vld [vmem:[#allocation2 + $0xf1] ss:$2 sm:$0xff]  ;;  %v7871_v35 = vpack.i.bf16 %v5131_v33, %v5129_v9 }
 0x5d0   :  { %v5093_v15 = vld [vmem:[#allocation2 + $0xf0] ss:$2 sm:$0xff]  ;;  %v8062_v14 = vld [vmem:[%s14239_s6 + $0x8] sm:$0xff]   ;;  %v7861_v58 = vpack.i.bf16 %v5099_v54, %v5097_v48  ;;  %v8063_v4 = vld [vmem:[%s14239_s6] sm:$0xff]  }
 0x5d1   :  { %6418 = vmatpush3.bf16.msra.mxu1 %v8060_v26  ;;  %v7856_v63 = vpack.i.bf16 %v5095_v44, %v5093_v15  ;;  %v5127_v21 = vld [vmem:[#allocation2 + $0x121] ss:$2 sm:$0xff]  ;;  %v4941_v29 = vld [vmem:[#allocation2 + $0x1b1] ss:$2 sm:$0xff]  ;;  %v5157_v10 = vld [vmem:[#allocation2 + $0xf2] ss:$2 sm:$0xff] }
 0x5d2   :  { %6419 = vmatprep.subr.bf16.mxu1 %v8061_v62  ;;  %v7866_v16 = vpack.i.bf16 %v5127_v21, %v5125_v51  ;;  %v4943_v20 = vld [vmem:[#allocation2 + $0x1e1] ss:$2 sm:$0xff]  ;;  %v5159_v37 = vld [vmem:[#allocation2 + $0x122] ss:$2 sm:$0xff]  ;;  %v4973_v43 = vld [vmem:[#allocation2 + $0x1b2] ss:$2 sm:$0xff] }
 0x5d3   :  { %7792 = vrot.lane.b32.xlu0 %v7791_v52, %s8152_s17  ;;  %7797 = vrot.lane.b32.xlu1 %v7796_v0, %s8153_s2  ;;  %v7881_v18 = vpack.i.bf16 %v4943_v20, %v4941_v29  ;;  %v7876_v34 = vpack.i.bf16 %v5159_v37, %v5157_v10  ;;  %v4975_v57 = vld [vmem:[#allocation2 + $0x1e2] ss:$2 sm:$0xff]  ;;  %v5161_v52 = vld [vmem:[#allocation2 + $0x152] ss:$2 sm:$0xff]  ;;  %v4947_v0 = vld [vmem:[#allocation2 + $0x241] ss:$2 sm:$0xff]  ;;  %v13967_v29 = vpop.permute.xlu1 %7702  ;;  %v13969_v20 = vpop.permute.xlu0 %7697 }
 0x5d4   :  { %v5163_v19 = vld [vmem:[#allocation2 + $0x182] ss:$2 sm:$0xff]  ;;  %v7896_v3 = vpack.i.bf16 %v4975_v57, %v4973_v43  ;;  %v4977_v23 = vld [vmem:[#allocation2 + $0x212] ss:$2 sm:$0xff]  ;;  %v5041_v59 = vld [vmem:[#allocation2 + $0x229] ss:$2 sm:$0xff] }
 0x5d5   :  { %6420 = vmatpush3.bf16.msra.mxu1 %v8061_v62  ;;  %v7886_v38 = vpack.i.bf16 %v5163_v19, %v5161_v52  ;;  %v4979_v5 = vld [vmem:[#allocation2 + $0x242] ss:$2 sm:$0xff]  ;;  %v5043_v42 = vld [vmem:[#allocation2 + $0x259] ss:$2 sm:$0xff]  ;;  %v5167_v54 = vld [vmem:[#allocation2 + $0x212] ss:$2 sm:$0xff] }
 0x5d6   :  { %6421 = vmatprep.subr.bf16.mxu1 %v8062_v14  ;;  %v7901_v32 = vpack.i.bf16 %v4979_v5, %v4977_v23  ;;  %v5009_v24 = vld [vmem:[#allocation2 + $0x228] ss:$2 sm:$0xff]  ;;  %v5011_v28 = vld [vmem:[#allocation2 + $0x258] ss:$2 sm:$0xff]  ;;  %v7921_v56 = vpack.i.bf16 %v5043_v42, %v5041_v59  ;;  %v5139_v60 = vld [vmem:[#allocation2 + $0x271] ss:$2 sm:$0xff] }
 0x5d7   :  { %7802 = vrot.lane.b32.xlu0 %v7801_v2, %s8144_s22  ;;  %7807 = vrot.lane.b32.xlu1 %v7806_v31, %s8153_s2  ;;  %v4945_v2 = vld [vmem:[#allocation2 + $0x211] ss:$2 sm:$0xff]  ;;  %v5007_v31 = vld [vmem:[#allocation2 + $0x1f8] ss:$2 sm:$0xff]  ;;  %v7911_v49 = vpack.i.bf16 %v5011_v28, %v5009_v24  ;;  %v5133_v46 = vld [vmem:[#allocation2 + $0x1e1] ss:$2 sm:$0xff] }
 0x5d8   :  { %v7891_v39 = vpack.i.bf16 %v4947_v0, %v4945_v2  ;;  %v5073_v47 = vld [vmem:[#allocation2 + $0x22a] ss:$2 sm:$0xff]  ;;  %v5075_v41 = vld [vmem:[#allocation2 + $0x25a] ss:$2 sm:$0xff]  ;;  %v5135_v11 = vld [vmem:[#allocation2 + $0x211] ss:$2 sm:$0xff] }
 0x5d9   :  { %6422 = vmatpush3.bf16.msra.mxu1 %v8062_v14  ;;  %v7931_v53 = vpack.i.bf16 %v5075_v41, %v5073_v47  ;;  %v5105_v40 = vld [vmem:[#allocation2 + $0x240] ss:$2 sm:$0xff]  ;;  %v5107_v45 = vld [vmem:[#allocation2 + $0x270] ss:$2 sm:$0xff]  ;;  %v7946_v62 = vpack.i.bf16 %v5135_v11, %v5133_v46  ;;  %v5051_v23 = vld [vmem:[#allocation2 + $0x319] ss:$2 sm:$0xff] }
 0x5da   :  { %6423 = vmatprep.subr.bf16.mxu1 %v8063_v4  ;;  %v5101_v25 = vld [vmem:[#allocation2 + $0x1e0] ss:$2 sm:$0xff]  ;;  %v5103_v26 = vld [vmem:[#allocation2 + $0x210] ss:$2 sm:$0xff]  ;;  %v7941_v17 = vpack.i.bf16 %v5107_v45, %v5105_v40  ;;  %v5049_v5 = vld [vmem:[#allocation2 + $0x2e9] ss:$2 sm:$0xff] }
 0x5db   :  { %7817 = vrot.lane.b32.xlu0 %v7816_v27, %s8145_s23  ;;  %7812 = vrot.lane.b32.xlu1 %v7811_v30, %s8144_s22  ;;  %v5005_v27 = vld [vmem:[#allocation2 + $0x1c8] ss:$2 sm:$0xff]  ;;  %v5039_v30 = vld [vmem:[#allocation2 + $0x1f9] ss:$2 sm:$0xff]  ;;  %v5015_v57 = vld [vmem:[#allocation2 + $0x2b8] ss:$2 sm:$0xff] }
 0x5dc   :  { %v7906_v6 = vpack.i.bf16 %v5007_v31, %v5005_v27  ;;  %v5165_v48 = vld [vmem:[#allocation2 + $0x1e2] ss:$2 sm:$0xff]  ;;  %v4981_v14 = vld [vmem:[#allocation2 + $0x272] ss:$2 sm:$0xff]  ;;  %v5045_v2 = vld [vmem:[#allocation2 + $0x289] ss:$2 sm:$0xff] }
 0x5dd   :  { %6424 = vmatpush3.bf16.msra.mxu1 %v8063_v4  ;;  %v7956_v44 = vpack.i.bf16 %v5167_v54, %v5165_v48  ;;  %v5171_v9 = vld [vmem:[#allocation2 + $0x272] ss:$2 sm:$0xff]  ;;  %v4987_v4 = vld [vmem:[#allocation2 + $0x302] ss:$2 sm:$0xff]  ;;  %v5047_v0 = vld [vmem:[#allocation2 + $0x2b9] ss:$2 sm:$0xff] }
 0x5de   :  { %v4985_v21 = vld [vmem:[#allocation2 + $0x2d2] ss:$2 sm:$0xff]  ;;  %v5141_v40 = vld [vmem:[#allocation2 + $0x2a1] ss:$2 sm:$0xff]  ;;  %v5143_v45 = vld [vmem:[#allocation2 + $0x2d1] ss:$2 sm:$0xff] }
 0x5df   :  { %7822 = vrot.lane.b32.xlu0 %v7821_v50, %s8145_s23  ;;  %7827 = vrot.lane.b32.xlu1 %v7826_v36, %s8142_s21  ;;  %v5037_v50 = vld [vmem:[#allocation2 + $0x1c9] ss:$2 sm:$0xff]  ;;  %v5071_v36 = vld [vmem:[#allocation2 + $0x1fa] ss:$2 sm:$0xff]  ;;  %v7981_v10 = vpack.i.bf16 %v4987_v4, %v4985_v21  ;;  %v5081_v28 = vld [vmem:[#allocation2 + $0x2ea] ss:$2 sm:$0xff]  ;;  %v7700_v4 = vunpack.i.h.bf16 %v13969_v20 }
 0x5e0   :  { %v7916_v8 = vpack.i.bf16 %v5039_v30, %v5037_v50  ;;  %v5013_v43 = vld [vmem:[#allocation2 + $0x288] ss:$2 sm:$0xff] }
 0x5e1   :  { %v7986_v19 = vpack.i.bf16 %v5015_v57, %v5013_v43  ;;  %v5083_v24 = vld [vmem:[#allocation2 + $0x31a] ss:$2 sm:$0xff]  ;;  %v5077_v27 = vld [vmem:[#allocation2 + $0x28a] ss:$2 sm:$0xff] }
 0x5e2   :  { %v5079_v31 = vld [vmem:[#allocation2 + $0x2ba] ss:$2 sm:$0xff]  ;;  %v8011_v59 = vpack.i.bf16 %v5083_v24, %v5081_v28 }
 0x5e3   :  { %7832 = vrot.lane.b32.xlu0 %v7831_v61, %s8142_s21  ;;  %7837 = vrot.lane.b32.xlu1 %v7836_v1, %s8148_s3  ;;  %v5069_v61 = vld [vmem:[#allocation2 + $0x1ca] ss:$2 sm:$0xff]  ;;  %v5137_v1 = vld [vmem:[#allocation2 + $0x241] ss:$2 sm:$0xff]  ;;  %v8006_v42 = vpack.i.bf16 %v5079_v31, %v5077_v27 }
 0x5e4   :  { %v7926_v13 = vpack.i.bf16 %v5071_v36, %v5069_v61  ;;  %v7951_v22 = vpack.i.bf16 %v5139_v60, %v5137_v1  ;;  %v5113_v50 = vld [vmem:[#allocation2 + $0x300] ss:$2 sm:$0xff]  ;;  %v5115_v30 = vld [vmem:[#allocation2 + $0x330] ss:$2 sm:$0xff] }
 0x5e5   :  { %v8021_v61 = vpack.i.bf16 %v5115_v30, %v5113_v50  ;;  %v5177_v1 = vld [vmem:[#allocation2 + $0x302] ss:$2 sm:$0xff]  ;;  %v5179_v60 = vld [vmem:[#allocation2 + $0x332] ss:$2 sm:$0xff] }
 0x5e6   :  { %v5173_v46 = vld [vmem:[#allocation2 + $0x2a2] ss:$2 sm:$0xff]  ;;  %v5175_v11 = vld [vmem:[#allocation2 + $0x2d2] ss:$2 sm:$0xff] }
 0x5e7   :  { %7842 = vrot.lane.b32.xlu0 %v7841_v7, %s8148_s3  ;;  %7847 = vrot.lane.b32.xlu1 %v7846_v55, %s8150_s4  ;;  %v7936_v7 = vpack.i.bf16 %v5103_v26, %v5101_v25  ;;  %v4951_v55 = vld [vmem:[#allocation2 + $0x2a1] ss:$2 sm:$0xff]  ;;  %v4893_v57 = vld [vmem:[#allocation2] ss:$2 sm:$0xff]  ;;  %v4895_v27 = vld [vmem:[#allocation2 + $0x30] ss:$2 sm:$0xff] }
 0x5eb   :  { %7852 = vrot.lane.b32.xlu0 %v7851_v12, %s8150_s4  ;;  %7857 = vrot.lane.b32.xlu1 %v7856_v63, %s8151_s5  ;;  %v4949_v12 = vld [vmem:[#allocation2 + $0x271] ss:$2 sm:$0xff]  ;;  %v5169_v63 = vld [vmem:[#allocation2 + $0x242] ss:$2 sm:$0xff] }
 0x5ec   :  { %v7961_v15 = vpack.i.bf16 %v4951_v55, %v4949_v12  ;;  %v7966_v51 = vpack.i.bf16 %v5171_v9, %v5169_v63  ;;  %v6280_v12 = vld [vmem:[%s14233_s0 + $0x180] ss:$2 sm:$0xff] }
 0x5ed   :  { %v6281_v55 = vld [vmem:[%s14233_s0 + $0x1a0] ss:$2 sm:$0xff] }
 0x5ef   :  { %7862 = vrot.lane.b32.xlu0 %v7861_v58, %s8151_s5  ;;  %7867 = vrot.lane.b32.xlu1 %v7866_v16, %s8152_s17  ;;  %v4983_v58 = vld [vmem:[#allocation2 + $0x2a2] ss:$2 sm:$0xff]  ;;  %v4955_v16 = vld [vmem:[#allocation2 + $0x301] ss:$2 sm:$0xff] }
 0x5f0   :  { %v7976_v33 = vpack.i.bf16 %v4983_v58, %v4981_v14  ;;  %v8046_v58 = vpack.i.bf16 %v6281_v55, %v6280_v12 }
 0x5f3   :  { %7872 = vrot.lane.b32.xlu0 %v7871_v35, %s8152_s17  ;;  %7877 = vrot.lane.b32.xlu1 %v7876_v34, %s8153_s2  ;;  %v4953_v35 = vld [vmem:[#allocation2 + $0x2d1] ss:$2 sm:$0xff]  ;;  %v5017_v34 = vld [vmem:[#allocation2 + $0x2e8] ss:$2 sm:$0xff] }
 0x5f4   :  { %v7971_v37 = vpack.i.bf16 %v4955_v16, %v4953_v35  ;;  %v7699_v35 = vunpack.i.l.bf16 %v13969_v20 }
 0x5f7   :  { %7882 = vrot.lane.b32.xlu0 %v7881_v18, %s8144_s22  ;;  %7887 = vrot.lane.b32.xlu1 %v7886_v38, %s8153_s2  ;;  %v5019_v18 = vld [vmem:[#allocation2 + $0x318] ss:$2 sm:$0xff]  ;;  %v13975_v38 = vpop.permute.xlu0 %7707 }
 0x5f8   :  { %v7991_v52 = vpack.i.bf16 %v5019_v18, %v5017_v34 }
 0x5fb   :  { %7897 = vrot.lane.b32.xlu0 %v7896_v3, %s8145_s23  ;;  %7892 = vrot.lane.b32.xlu1 %v7891_v39, %s8144_s22  ;;  %v13973_v3 = vpop.permute.xlu1 %7712  ;;  %v7996_v39 = vpack.i.bf16 %v5047_v0, %v5045_v2 }
 0x5ff   :  { %7902 = vrot.lane.b32.xlu0 %v7901_v32, %s8145_s23  ;;  %7907 = vrot.lane.b32.xlu1 %v7906_v6, %s8142_s21  ;;  %v8001_v32 = vpack.i.bf16 %v5051_v23, %v5049_v5  ;;  %v13983_v6 = vpop.permute.xlu0 %7717  ;;  %v4899_v23 = vld [vmem:[#allocation2 + $0x90] ss:$2 sm:$0xff]  ;;  %v4897_v5 = vld [vmem:[#allocation2 + $0x60] ss:$2 sm:$0xff] }
 0x603   :  { %7912 = vrot.lane.b32.xlu0 %v7911_v49, %s8142_s21  ;;  %7917 = vrot.lane.b32.xlu1 %v7916_v8, %s8148_s3  ;;  %v13981_v49 = vpop.permute.xlu1 %7722  ;;  %v5111_v8 = vld [vmem:[#allocation2 + $0x2d0] ss:$2 sm:$0xff] }
 0x607   :  { %7922 = vrot.lane.b32.xlu0 %v7921_v56, %s8148_s3  ;;  %7927 = vrot.lane.b32.xlu1 %v7926_v13, %s8150_s4  ;;  %v5109_v56 = vld [vmem:[#allocation2 + $0x2a0] ss:$2 sm:$0xff]  ;;  %v5147_v13 = vld [vmem:[#allocation2 + $0x331] ss:$2 sm:$0xff] }
 0x608   :  { %v8016_v36 = vpack.i.bf16 %v5111_v8, %v5109_v56 }
 0x60b   :  { %7932 = vrot.lane.b32.xlu0 %v7931_v53, %s8150_s4  ;;  %7937 = vrot.lane.b32.xlu1 %v7936_v7, %s8151_s5  ;;  %v5145_v53 = vld [vmem:[#allocation2 + $0x301] ss:$2 sm:$0xff]  ;;  %v8026_v7 = vpack.i.bf16 %v5143_v45, %v5141_v40 }
 0x60f   :  { %7942 = vrot.lane.b32.xlu0 %v7941_v17, %s8151_s5  ;;  %7947 = vrot.lane.b32.xlu1 %v7946_v62, %s8152_s17  ;;  %v8031_v17 = vpack.i.bf16 %v5147_v13, %v5145_v53  ;;  %v6283_v62 = vld [vmem:[%s14233_s0 + $0x1e0] ss:$2 sm:$0xff] }
 0x613   :  { %7952 = vrot.lane.b32.xlu0 %v7951_v22, %s8152_s17  ;;  %7957 = vrot.lane.b32.xlu1 %v7956_v44, %s8153_s2  ;;  %v6282_v22 = vld [vmem:[%s14233_s0 + $0x1c0] ss:$2 sm:$0xff]  ;;  %v8036_v44 = vpack.i.bf16 %v5175_v11, %v5173_v46  ;;  %s8154_s0 = smov [#allocation3]  }
 0x614   :  { %v8051_v14 = vpack.i.bf16 %v6283_v62, %v6282_v22 }
 0x617   :  { %7962 = vrot.lane.b32.xlu0 %v7961_v15, %s8144_s22  ;;  %7967 = vrot.lane.b32.xlu1 %v7966_v51, %s8153_s2  ;;  %v8041_v15 = vpack.i.bf16 %v5179_v60, %v5177_v1 }
 0x61b   :  { %7977 = vrot.lane.b32.xlu0 %v7976_v33, %s8145_s23  ;;  %7972 = vrot.lane.b32.xlu1 %v7971_v37, %s8144_s22  ;;  %v7705_v33 = vunpack.i.h.bf16 %v13967_v29 }
 0x61f   :  { %7982 = vrot.lane.b32.xlu0 %v7981_v10, %s8145_s23  ;;  %7987 = vrot.lane.b32.xlu1 %v7986_v19, %s8142_s21 }
 0x622   :  { %v13987_v47 = vpop.permute.xlu0 %7732 }
 0x623   :  { %7992 = vrot.lane.b32.xlu0 %v7991_v52, %s8142_s21  ;;  %7997 = vrot.lane.b32.xlu1 %v7996_v39, %s8148_s3  ;;  %v7735_v16 = vunpack.i.h.bf16 %v13987_v47  ;;  %v7734_v10 = vunpack.i.l.bf16 %v13987_v47 }
 0x625   :  { %v13989_v41 = vpop.permute.xlu1 %7727  ;;  %v5790_v24 = vsel %vm2963_vm1, %v4899_v23, %v7735_v16  ;;  %v5789_v28 = vsel %vm2963_vm1, %v4897_v5, %v7734_v10 }
 0x626   :  { %v7730_v37 = vunpack.i.h.bf16 %v13989_v41  ;;  %v7729_v18 = vunpack.i.l.bf16 %v13989_v41 }
 0x627   :  { %8002 = vrot.lane.b32.xlu0 %v8001_v32, %s8148_s3  ;;  %8007 = vrot.lane.b32.xlu1 %v8006_v42, %s8150_s4 }
 0x628   :  { %v5787_v42 = vsel %vm2963_vm1, %v4893_v57, %v7729_v18  ;;  %v5788_v50 = vsel %vm2963_vm1, %v4895_v27, %v7730_v37 }
 0x62b   :  { %8012 = vrot.lane.b32.xlu0 %v8011_v59, %s8150_s4  ;;  %8017 = vrot.lane.b32.xlu1 %v8016_v36, %s8151_s5 }
 0x62d   :  { %v7738_v26 = vpop.permute.xlu1 %7737 }
 0x62e   :  { %v7740_v52 = vunpack.i.h.bf16 %v7738_v26  ;;  %v7739_v19 = vunpack.i.l.bf16 %v7738_v26 }
 0x62f   :  { %8022 = vrot.lane.b32.xlu0 %v8021_v61, %s8151_s5  ;;  %8027 = vrot.lane.b32.xlu1 %v8026_v7, %s8152_s17 }
 0x630   :  { %v5803_v8 = vsel %vm3090_vm8, %v5787_v42, %v7739_v19  ;;  %v5804_v47 = vsel %vm3090_vm8, %v5788_v50, %v7740_v52 }
 0x631   :  { %v7743_v25 = vpop.permute.xlu0 %7742  ;;  %v7748_v54 = vpop.permute.xlu1 %7747 }
 0x632   :  { %v7745_v34 = vunpack.i.h.bf16 %v7743_v25  ;;  %v7744_v43 = vunpack.i.l.bf16 %v7743_v25  ;;  %v7750_v31 = vunpack.i.h.bf16 %v7748_v54  ;;  %v7749_v59 = vunpack.i.l.bf16 %v7748_v54 }
 0x633   :  { %8032 = vrot.lane.b32.xlu0 %v8031_v17, %s8152_s17  ;;  %8037 = vrot.lane.b32.xlu1 %v8036_v44, %s8153_s2 }
 0x634   :  { %v5805_v30 = vsel %vm3090_vm8, %v5789_v28, %v7744_v43  ;;  %v5806_v56 = vsel %vm3090_vm8, %v5790_v24, %v7745_v34  ;;  %v5820_v26 = vsel %vm3220_vm10, %v5804_v47, %v7750_v31  ;;  %v5819_v17 = vsel %vm3220_vm10, %v5803_v8, %v7749_v59 }
 0x635   :  { %v7753_v48 = vpop.permute.xlu0 %7752  ;;  %v7758_v9 = vpop.permute.xlu1 %7757  ;;  %v7704_v59 = vunpack.i.l.bf16 %v13967_v29 }
 0x636   :  { %v7755_v2 = vunpack.i.h.bf16 %v7753_v48  ;;  %v7754_v0 = vunpack.i.l.bf16 %v7753_v48  ;;  %v7760_v41 = vunpack.i.h.bf16 %v7758_v9  ;;  %v7759_v61 = vunpack.i.l.bf16 %v7758_v9 }
 0x637   :  { %8042 = vrot.lane.b32.xlu0 %v8041_v15, %s8153_s2  ;;  %8047 = vrot.lane.b32.xlu1 %v8046_v58, %s8149_s13 }
 0x638   :  { %v5821_v36 = vsel %vm3220_vm10, %v5805_v30, %v7754_v0  ;;  %v5822_v53 = vsel %vm3220_vm10, %v5806_v56, %v7755_v2  ;;  %v5835_v62 = vsel %vm3350_vm12, %v5819_v17, %v7759_v61  ;;  %v5836_v12 = vsel %vm3350_vm12, %v5820_v26, %v7760_v41 }
 0x639   :  { %v14009_v63 = vpop.permute.xlu0 %7762  ;;  %v7768_v21 = vpop.permute.xlu1 %7767 }
 0x63a   :  { %v7770_v13 = vunpack.i.h.bf16 %v7768_v21  ;;  %v7769_v40 = vunpack.i.l.bf16 %v7768_v21  ;;  %v7765_v60 = vunpack.i.h.bf16 %v14009_v63  ;;  %v7764_v46 = vunpack.i.l.bf16 %v14009_v63 }
 0x63b   :  { %8052 = vrot.lane.b32.xlu0 %v8051_v14, %s8149_s13  ;;  %s6129_s13 = sshll.u32 %s8154_s0, 4  ;;  %s6130_s13 = int_to_ptr.vmem [resolvable:$true] %s6129_s13 }
 0x63c   :  { %v5852_v54 = vsel %vm5851_vm14, %v5835_v62, %v7769_v40  ;;  %v5853_v15 = vsel %vm5851_vm14, %v5836_v12, %v7770_v13  ;;  %v5837_v43 = vsel %vm3350_vm12, %v5821_v36, %v7764_v46  ;;  %v5838_v57 = vsel %vm3350_vm12, %v5822_v53, %v7765_v60  ;;  %v4901_v62 = vld [vmem:[#allocation2 + $0xc0] ss:$2 sm:$0xff]  ;;  %v4903_v12 = vld [vmem:[#allocation2 + $0xf0] ss:$2 sm:$0xff]  ;;  %s8118_s11 = scalar_lea.vmem %s6130_s13, 2048  ;;  %p8123_p1 = scmp.lt.s32.totalorder %s6130_s13, %s6130_s13 }
 0x63d   :  { %v14014_v51 = vpop.permute.xlu0 %7772  ;;  %v7778_v39 = vpop.permute.xlu1 %7777  ;;  %p8119_p0 = scmp.ne.s32.totalorder %s6130_s13, %s8118_s11  ;;  %p8124_p2 = scmp.lt.s32.totalorder %s8118_s11, %s8118_s11 }
 0x63e   :  { %v7780_v7 = vunpack.i.h.bf16 %v7778_v39  ;;  %v7779_v1 = vunpack.i.l.bf16 %v7778_v39  ;;  %v7775_v55 = vunpack.i.h.bf16 %v14014_v51  ;;  %v7774_v48 = vunpack.i.l.bf16 %v14014_v51 }
 0x63f   :  { %p8125_p3 = por %p8124_p2, %p8123_p1 }
 0x640   :  { %v5869_v9 = vsel %vm5868_vm15, %v5852_v54, %v7779_v1  ;;  %v5870_v21 = vsel %vm5868_vm15, %v5853_v15, %v7780_v7  ;;  %v5854_v23 = vsel %vm5851_vm14, %v5837_v43, %v7774_v48  ;;  %v5855_v5 = vsel %vm5851_vm14, %v5838_v57, %v7775_v55 }
 0x641   :  { %v14022_v32 = vpop.permute.xlu0 %7782  ;;  %v7788_v25 = vpop.permute.xlu1 %7787  ;;  %v7715_v1 = vunpack.i.h.bf16 %v13973_v3  ;;  %p8126_p4 = pnand %p8125_p3, %p8119_p0 }
 0x642   :  { %v7790_v11 = vunpack.i.h.bf16 %v7788_v25  ;;  %v7789_v22 = vunpack.i.l.bf16 %v7788_v25  ;;  %v7785_v44 = vunpack.i.h.bf16 %v14022_v32  ;;  %v7784_v14 = vunpack.i.l.bf16 %v14022_v32 }
 0x644   :  { %v5886_v51 = vsel %vm5885_vm0, %v5869_v9, %v7789_v22  ;;  %v5887_v34 = vsel %vm5885_vm0, %v5870_v21, %v7790_v11  ;;  %v5871_v24 = vsel %vm5868_vm15, %v5854_v23, %v7784_v14  ;;  %v5872_v28 = vsel %vm5868_vm15, %v5855_v5, %v7785_v44  ;;  %v4905_v11 = vld [vmem:[#allocation2 + $0x120] ss:$2 sm:$0xff]  ;;  %v4907_v22 = vld [vmem:[#allocation2 + $0x150] ss:$2 sm:$0xff] }
 0x645   :  { %v7793_v45 = vpop.permute.xlu0 %7792  ;;  %v7798_v63 = vpop.permute.xlu1 %7797 }
 0x646   :  { %v7800_v16 = vunpack.i.h.bf16 %v7798_v63  ;;  %v7799_v10 = vunpack.i.l.bf16 %v7798_v63  ;;  %v7795_v37 = vunpack.i.h.bf16 %v7793_v45  ;;  %v7794_v18 = vunpack.i.l.bf16 %v7793_v45 }
 0x648   :  { %v5903_v52 = vsel %vm5902_vm2, %v5886_v51, %v7799_v10  ;;  %v5904_v19 = vsel %vm5902_vm2, %v5887_v34, %v7800_v16  ;;  %v5888_v42 = vsel %vm5885_vm0, %v5871_v24, %v7794_v18  ;;  %v5889_v50 = vsel %vm5885_vm0, %v5872_v28, %v7795_v37 }
 0x649   :  { %v14046_v58 = vpop.permute.xlu0 %7802  ;;  %v7808_v0 = vpop.permute.xlu1 %7807  ;;  %v5920_v32 = vsel %vm5919_vm3, %v5903_v52, %v7699_v35  ;;  %v5921_v39 = vsel %vm5919_vm3, %v5904_v19, %v7700_v4  ;;  %v7710_v16 = vunpack.i.h.bf16 %v13975_v38  ;;  %v7709_v10 = vunpack.i.l.bf16 %v13975_v38 }
 0x64a   :  { %v7810_v27 = vunpack.i.h.bf16 %v7808_v0  ;;  %v7809_v31 = vunpack.i.l.bf16 %v7808_v0  ;;  %v5936_v30 = vpack.c.bf16 %v5921_v39, %v5920_v32  ;;  %v7804_v26 = vunpack.i.l.bf16 %v14046_v58 }
 0x64c   :  { %v5906_v56 = vsel %vm5902_vm2, %v5889_v50, %v7810_v27  ;;  %v5905_v35 = vsel %vm5902_vm2, %v5888_v42, %v7809_v31  ;;  %6425 = vmatprep.mubr.msk.bf16.mxu1 %vm5983_vm4, %v5936_v30  ;;  %v5791_v63 = vsel %vm2963_vm1, %v4901_v62, %v7804_v26 }
 0x64d   :  { %v7818_v2 = vpop.permute.xlu0 %7817  ;;  %v5923_v20 = vsel %vm5919_vm3, %v5906_v56, %v7705_v33  ;;  %v5922_v4 = vsel %vm5919_vm3, %v5905_v35, %v7704_v59  ;;  %v7813_v47 = vpop.permute.xlu1 %7812  ;;  %v7805_v33 = vunpack.i.h.bf16 %v14046_v58 }
 0x64e   :  { %v5937_v41 = vpack.c.bf16 %v5923_v20, %v5922_v4  ;;  %v7815_v40 = vunpack.i.h.bf16 %v7813_v47  ;;  %v7814_v45 = vunpack.i.l.bf16 %v7813_v47  ;;  %v7820_v17 = vunpack.i.h.bf16 %v7818_v2 }
 0x64f   :  { %v7819_v7 = vunpack.i.l.bf16 %v7818_v2  ;;  %v5792_v58 = vsel %vm2963_vm1, %v4903_v12, %v7805_v33 }
 0x650   :  { %6426 = vmatmul.mubr.msk.bf16.vlgmr.msra.gmra.mxu1 %vm5983_vm4, %v5937_v41  ;;  %v5794_v55 = vsel %vm2963_vm1, %v4907_v22, %v7815_v40  ;;  %v5793_v48 = vsel %vm2963_vm1, %v4905_v11, %v7814_v45  ;;  %v5808_v18 = vsel %vm3090_vm8, %v5792_v58, %v7820_v17 }
 0x651   :  { %v7823_v8 = vpop.permute.xlu0 %7822  ;;  %v7828_v36 = vpop.permute.xlu1 %7827  ;;  %v5807_v37 = vsel %vm3090_vm8, %v5791_v63, %v7819_v7 }
 0x652   :  { %v7825_v60 = vunpack.i.h.bf16 %v7823_v8  ;;  %v7824_v46 = vunpack.i.l.bf16 %v7823_v8  ;;  %v7830_v9 = vunpack.i.h.bf16 %v7828_v36  ;;  %v7829_v21 = vunpack.i.l.bf16 %v7828_v36 }
 0x654   :  { %v5809_v51 = vsel %vm3090_vm8, %v5793_v48, %v7824_v46  ;;  %v5810_v34 = vsel %vm3090_vm8, %v5794_v55, %v7825_v60  ;;  %v5824_v38 = vsel %vm3220_vm10, %v5808_v18, %v7830_v9  ;;  %v5823_v32 = vsel %vm3220_vm10, %v5807_v37, %v7829_v21 }
 0x655   :  { %v7833_v61 = vpop.permute.xlu0 %7832  ;;  %v7838_v13 = vpop.permute.xlu1 %7837 }
 0x656   :  { %v7835_v54 = vunpack.i.h.bf16 %v7833_v61  ;;  %v7834_v15 = vunpack.i.l.bf16 %v7833_v61  ;;  %v7840_v43 = vunpack.i.h.bf16 %v7838_v13  ;;  %v7839_v57 = vunpack.i.l.bf16 %v7838_v13 }
 0x658   :  { %v5825_v52 = vsel %vm3220_vm10, %v5809_v51, %v7834_v15  ;;  %v5826_v19 = vsel %vm3220_vm10, %v5810_v34, %v7835_v54  ;;  %v5839_v42 = vsel %vm3350_vm12, %v5823_v32, %v7839_v57  ;;  %v5840_v50 = vsel %vm3350_vm12, %v5824_v38, %v7840_v43 }
 0x659   :  { %v14077_v53 = vpop.permute.xlu0 %7842  ;;  %v7848_v29 = vpop.permute.xlu1 %7847 }
 0x65a   :  { %v7850_v23 = vunpack.i.h.bf16 %v7848_v29  ;;  %v7849_v5 = vunpack.i.l.bf16 %v7848_v29  ;;  %v7845_v28 = vunpack.i.h.bf16 %v14077_v53  ;;  %v7844_v27 = vunpack.i.l.bf16 %v14077_v53 }
 0x65c   :  { %v5856_v35 = vsel %vm5851_vm14, %v5839_v42, %v7849_v5  ;;  %v5857_v20 = vsel %vm5851_vm14, %v5840_v50, %v7850_v23  ;;  %v5841_v33 = vsel %vm3350_vm12, %v5825_v52, %v7844_v27  ;;  %v5842_v26 = vsel %vm3350_vm12, %v5826_v19, %v7845_v28  ;;  %v4913_v27 = vld [vmem:[#allocation2 + $0x210] ss:$2 sm:$0xff] }
 0x65d   :  { %v14079_v25 = vpop.permute.xlu0 %7852  ;;  %v7858_v14 = vpop.permute.xlu1 %7857 }
 0x65e   :  { %v7860_v39 = vunpack.i.h.bf16 %v7858_v14  ;;  %v7859_v24 = vunpack.i.l.bf16 %v7858_v14  ;;  %v7855_v30 = vunpack.i.h.bf16 %v14079_v25  ;;  %v7854_v56 = vunpack.i.l.bf16 %v14079_v25 }
 0x660   :  { %v5873_v61 = vsel %vm5868_vm15, %v5856_v35, %v7859_v24  ;;  %v5874_v36 = vsel %vm5868_vm15, %v5857_v20, %v7860_v39  ;;  %v5858_v60 = vsel %vm5851_vm14, %v5841_v33, %v7854_v56  ;;  %v5859_v46 = vsel %vm5851_vm14, %v5842_v26, %v7855_v30 }
 0x661   :  { %v7863_v44 = vpop.permute.xlu0 %7862  ;;  %v7868_v0 = vpop.permute.xlu1 %7867  ;;  %v7725_v39 = vunpack.i.h.bf16 %v13981_v49 }
 0x662   :  { %v7870_v31 = vunpack.i.h.bf16 %v7868_v0  ;;  %v7869_v59 = vunpack.i.l.bf16 %v7868_v0  ;;  %v7865_v4 = vunpack.i.h.bf16 %v7863_v44  ;;  %v7864_v8 = vunpack.i.l.bf16 %v7863_v44 }
 0x663   :  { %v7714_v44 = vunpack.i.l.bf16 %v13973_v3  ;;  %v4909_v3 = vld [vmem:[#allocation2 + $0x1b0] ss:$2 sm:$0xff] }
 0x664   :  { %v5890_v29 = vsel %vm5885_vm0, %v5873_v61, %v7869_v59  ;;  %v5891_v25 = vsel %vm5885_vm0, %v5874_v36, %v7870_v31  ;;  %v5875_v55 = vsel %vm5868_vm15, %v5858_v60, %v7864_v8  ;;  %v5876_v48 = vsel %vm5868_vm15, %v5859_v46, %v7865_v4  ;;  %v4915_v31 = vld [vmem:[#allocation2 + $0x240] ss:$2 sm:$0xff] }
 0x665   :  { %v7873_v2 = vpop.permute.xlu0 %7872  ;;  %v7878_v41 = vpop.permute.xlu1 %7877  ;;  %v4911_v59 = vld [vmem:[#allocation2 + $0x1e0] ss:$2 sm:$0xff]  ;;  %v7720_v61 = vunpack.i.h.bf16 %v13983_v6  ;;  %v7719_v36 = vunpack.i.l.bf16 %v13983_v6 }
 0x666   :  { %v7880_v53 = vunpack.i.h.bf16 %v7878_v41  ;;  %v7879_v13 = vunpack.i.l.bf16 %v7878_v41  ;;  %v7875_v40 = vunpack.i.h.bf16 %v7873_v2  ;;  %v7874_v45 = vunpack.i.l.bf16 %v7873_v2 }
 0x668   :  { %v5907_v17 = vsel %vm5902_vm2, %v5890_v29, %v7879_v13  ;;  %v5908_v7 = vsel %vm5902_vm2, %v5891_v25, %v7880_v53  ;;  %v5892_v14 = vsel %vm5885_vm0, %v5875_v55, %v7874_v45  ;;  %v5893_v58 = vsel %vm5885_vm0, %v5876_v48, %v7875_v40 }
 0x669   :  { %v14106_v47 = vpop.permute.xlu0 %7882  ;;  %v7888_v22 = vpop.permute.xlu1 %7887  ;;  %v5924_v62 = vsel %vm5919_vm3, %v5907_v17, %v7709_v10  ;;  %v5925_v12 = vsel %vm5919_vm3, %v5908_v7, %v7710_v16 }
 0x66a   :  { %v7890_v54 = vunpack.i.h.bf16 %v7888_v22  ;;  %v7889_v15 = vunpack.i.l.bf16 %v7888_v22  ;;  %v5938_v63 = vpack.c.bf16 %v5925_v12, %v5924_v62  ;;  %v7885_v0 = vunpack.i.h.bf16 %v14106_v47 }
 0x66b   :  { %v7884_v38 = vunpack.i.l.bf16 %v14106_v47 }
 0x66c   :  { %v5909_v9 = vsel %vm5902_vm2, %v5892_v14, %v7889_v15  ;;  %v5910_v21 = vsel %vm5902_vm2, %v5893_v58, %v7890_v54  ;;  %6429 = vmatprep.mubr.msk.bf16.mxu1 %vm5983_vm4, %v5938_v63  ;;  %v5796_v4 = vsel %vm2963_vm1, %v4911_v59, %v7885_v0 }
 0x66d   :  { %v7898_v11 = vpop.permute.xlu0 %7897  ;;  %v7893_v10 = vpop.permute.xlu1 %7892  ;;  %v5926_v37 = vsel %vm5919_vm3, %v5909_v9, %v7714_v44  ;;  %v5927_v18 = vsel %vm5919_vm3, %v5910_v21, %v7715_v1  ;;  %v5795_v8 = vsel %vm2963_vm1, %v4909_v3, %v7884_v38 }
 0x66e   :  { %v5939_v51 = vpack.c.bf16 %v5927_v18, %v5926_v37  ;;  %v7895_v19 = vunpack.i.h.bf16 %v7893_v10  ;;  %v7894_v23 = vunpack.i.l.bf16 %v7893_v10  ;;  %v7900_v32 = vunpack.i.h.bf16 %v7898_v11 }
 0x66f   :  { %v7899_v1 = vunpack.i.l.bf16 %v7898_v11 }
 0x670   :  { %6430 = vmatmul.mubr.msk.bf16.gmra.mxu1 %vm5983_vm4, %v5939_v51  ;;  %v5798_v42 = vsel %vm2963_vm1, %v4915_v31, %v7895_v19  ;;  %v5797_v50 = vsel %vm2963_vm1, %v4913_v27, %v7894_v23  ;;  %v5812_v13 = vsel %vm3090_vm8, %v5796_v4, %v7900_v32 }
 0x671   :  { %v7903_v16 = vpop.permute.xlu0 %7902  ;;  %v7908_v43 = vpop.permute.xlu1 %7907  ;;  %v5811_v53 = vsel %vm3090_vm8, %v5795_v8, %v7899_v1 }
 0x672   :  { %v7905_v24 = vunpack.i.h.bf16 %v7903_v16  ;;  %v7904_v28 = vunpack.i.l.bf16 %v7903_v16  ;;  %v7910_v47 = vunpack.i.h.bf16 %v7908_v43  ;;  %v7909_v41 = vunpack.i.l.bf16 %v7908_v43 }
 0x674   :  { %v5813_v40 = vsel %vm3090_vm8, %v5797_v50, %v7904_v28  ;;  %v5814_v45 = vsel %vm3090_vm8, %v5798_v42, %v7905_v24  ;;  %v5828_v6 = vsel %vm3220_vm10, %v5812_v13, %v7910_v47  ;;  %v5827_v11 = vsel %vm3220_vm10, %v5811_v53, %v7909_v41 }
 0x675   :  { %v7913_v34 = vpop.permute.xlu0 %7912  ;;  %v7918_v52 = vpop.permute.xlu1 %7917 }
 0x676   :  { %v7915_v30 = vunpack.i.h.bf16 %v7913_v34  ;;  %v7914_v56 = vunpack.i.l.bf16 %v7913_v34  ;;  %v7920_v29 = vunpack.i.h.bf16 %v7918_v52  ;;  %v7919_v25 = vunpack.i.l.bf16 %v7918_v52 }
 0x678   :  { %v5829_v33 = vsel %vm3220_vm10, %v5813_v40, %v7914_v56  ;;  %v5830_v26 = vsel %vm3220_vm10, %v5814_v45, %v7915_v30  ;;  %v5843_v15 = vsel %vm3350_vm12, %v5827_v11, %v7919_v25  ;;  %v5844_v44 = vsel %vm3350_vm12, %v5828_v6, %v7920_v29  ;;  %v4923_v11 = vld [vmem:[#allocation2 + $0x300] ss:$2 sm:$0xff] }
 0x679   :  { %v14133_v57 = vpop.permute.xlu0 %7922  ;;  %v7928_v2 = vpop.permute.xlu1 %7927  ;;  %v7724_v30 = vunpack.i.l.bf16 %v13981_v49  ;;  %v4921_v49 = vld [vmem:[#allocation2 + $0x2d0] ss:$2 sm:$0xff] }
 0x67a   :  { %v7930_v17 = vunpack.i.h.bf16 %v7928_v2  ;;  %v7929_v7 = vunpack.i.l.bf16 %v7928_v2  ;;  %v7925_v12 = vunpack.i.h.bf16 %v14133_v57  ;;  %v7924_v55 = vunpack.i.l.bf16 %v14133_v57 }
 0x67c   :  { %v5860_v63 = vsel %vm5851_vm14, %v5843_v15, %v7929_v7  ;;  %v5861_v9 = vsel %vm5851_vm14, %v5844_v44, %v7930_v17  ;;  %v5846_v2 = vsel %vm3350_vm12, %v5830_v26, %v7925_v12 }
 0x67d   :  { %v14135_v5 = vpop.permute.xlu0 %7932  ;;  %v7938_v20 = vpop.permute.xlu1 %7937 }
 0x67e   :  { %v7940_v22 = vunpack.i.h.bf16 %v7938_v20  ;;  %v7939_v62 = vunpack.i.l.bf16 %v7938_v20  ;;  %v7935_v14 = vunpack.i.h.bf16 %v14135_v5  ;;  %v7934_v58 = vunpack.i.l.bf16 %v14135_v5 }
 0x67f   :  { %v5845_v5 = vsel %vm3350_vm12, %v5829_v33, %v7924_v55  ;;  %v4917_v55 = vld [vmem:[#allocation2 + $0x270] ss:$2 sm:$0xff] }
 0x680   :  { %v5877_v18 = vsel %vm5868_vm15, %v5860_v63, %v7939_v62  ;;  %v5878_v51 = vsel %vm5868_vm15, %v5861_v9, %v7940_v22  ;;  %v5862_v3 = vsel %vm5851_vm14, %v5845_v5, %v7934_v58  ;;  %v5863_v32 = vsel %vm5851_vm14, %v5846_v2, %v7935_v14 }
 0x681   :  { %v7943_v35 = vpop.permute.xlu0 %7942  ;;  %v7948_v46 = vpop.permute.xlu1 %7947 }
 0x682   :  { %v7950_v48 = vunpack.i.h.bf16 %v7948_v46  ;;  %v7949_v54 = vunpack.i.l.bf16 %v7948_v46  ;;  %v7945_v21 = vunpack.i.h.bf16 %v7943_v35  ;;  %v7944_v16 = vunpack.i.l.bf16 %v7943_v35 }
 0x684   :  { %v5894_v19 = vsel %vm5885_vm0, %v5877_v18, %v7949_v54  ;;  %v5895_v23 = vsel %vm5885_vm0, %v5878_v51, %v7950_v48  ;;  %v5879_v31 = vsel %vm5868_vm15, %v5862_v3, %v7944_v16  ;;  %v5880_v59 = vsel %vm5868_vm15, %v5863_v32, %v7945_v21  ;;  %v4919_v48 = vld [vmem:[#allocation2 + $0x2a0] ss:$2 sm:$0xff] }
 0x685   :  { %v7953_v60 = vpop.permute.xlu0 %7952  ;;  %v7958_v37 = vpop.permute.xlu1 %7957 }
 0x686   :  { %v7960_v34 = vunpack.i.h.bf16 %v7958_v37  ;;  %v7959_v43 = vunpack.i.l.bf16 %v7958_v37  ;;  %v7955_v57 = vunpack.i.h.bf16 %v7953_v60  ;;  %v7954_v52 = vunpack.i.l.bf16 %v7953_v60 }
 0x688   :  { %v5911_v0 = vsel %vm5902_vm2, %v5894_v19, %v7959_v43  ;;  %v5912_v38 = vsel %vm5902_vm2, %v5895_v23, %v7960_v34  ;;  %v5896_v56 = vsel %vm5885_vm0, %v5879_v31, %v7954_v52  ;;  %v5897_v35 = vsel %vm5885_vm0, %v5880_v59, %v7955_v57 }
 0x689   :  { %v14162_v10 = vpop.permute.xlu0 %7962  ;;  %v7968_v24 = vpop.permute.xlu1 %7967  ;;  %v5928_v28 = vsel %vm5919_vm3, %v5911_v0, %v7719_v36  ;;  %v5929_v27 = vsel %vm5919_vm3, %v5912_v38, %v7720_v61 }
 0x68a   :  { %v7970_v42 = vunpack.i.h.bf16 %v7968_v24  ;;  %v7969_v50 = vunpack.i.l.bf16 %v7968_v24  ;;  %v5940_v20 = vpack.c.bf16 %v5929_v27, %v5928_v28  ;;  %v7965_v7 = vunpack.i.h.bf16 %v14162_v10 }
 0x68b   :  { %v7964_v60 = vunpack.i.l.bf16 %v14162_v10 }
 0x68c   :  { %v5913_v4 = vsel %vm5902_vm2, %v5896_v56, %v7969_v50  ;;  %v5914_v8 = vsel %vm5902_vm2, %v5897_v35, %v7970_v42  ;;  %6433 = vmatprep.mubr.msk.bf16.mxu1 %vm5983_vm4, %v5940_v20  ;;  %v5800_v9 = vsel %vm2963_vm1, %v4919_v48, %v7965_v7 }
 0x68d   :  { %v7978_v1 = vpop.permute.xlu0 %7977  ;;  %v7973_v41 = vpop.permute.xlu1 %7972  ;;  %v5930_v61 = vsel %vm5919_vm3, %v5913_v4, %v7724_v30  ;;  %v5931_v36 = vsel %vm5919_vm3, %v5914_v8, %v7725_v39  ;;  %v5799_v21 = vsel %vm2963_vm1, %v4917_v55, %v7964_v60 }
 0x68e   :  { %v5941_v53 = vpack.c.bf16 %v5931_v36, %v5930_v61  ;;  %v7975_v25 = vunpack.i.h.bf16 %v7973_v41  ;;  %v7974_v33 = vunpack.i.l.bf16 %v7973_v41  ;;  %v7980_v46 = vunpack.i.h.bf16 %v7978_v1 }
 0x68f   :  { %v7979_v6 = vunpack.i.l.bf16 %v7978_v1 }
 0x690   :  { %6434 = vmatmul.mubr.msk.bf16.gmra.mxu1 %vm5983_vm4, %v5941_v53  ;;  %v5802_v62 = vsel %vm2963_vm1, %v4923_v11, %v7975_v25  ;;  %v5801_v12 = vsel %vm2963_vm1, %v4921_v49, %v7974_v33  ;;  %v5816_v34 = vsel %vm3090_vm8, %v5800_v9, %v7980_v46 }
 0x691   :  { %v7983_v47 = vpop.permute.xlu0 %7982  ;;  %v7988_v40 = vpop.permute.xlu1 %7987  ;;  %v5815_v51 = vsel %vm3090_vm8, %v5799_v21, %v7979_v6 }
 0x692   :  { %v7985_v39 = vunpack.i.h.bf16 %v7983_v47  ;;  %v7984_v22 = vunpack.i.l.bf16 %v7983_v47  ;;  %v7990_v44 = vunpack.i.h.bf16 %v7988_v40  ;;  %v7989_v14 = vunpack.i.l.bf16 %v7988_v40 }
 0x694   :  { %v5817_v43 = vsel %vm3090_vm8, %v5801_v12, %v7984_v22  ;;  %v5818_v57 = vsel %vm3090_vm8, %v5802_v62, %v7985_v39  ;;  %v5832_v23 = vsel %vm3220_vm10, %v5816_v34, %v7990_v44  ;;  %v5831_v5 = vsel %vm3220_vm10, %v5815_v51, %v7989_v14 }
 0x695   :  { %v7993_v13 = vpop.permute.xlu0 %7992  ;;  %v7998_v29 = vpop.permute.xlu1 %7997 }
 0x696   :  { %v7995_v54 = vunpack.i.h.bf16 %v7993_v13  ;;  %v7994_v15 = vunpack.i.l.bf16 %v7993_v13  ;;  %v8000_v37 = vunpack.i.h.bf16 %v7998_v29  ;;  %v7999_v18 = vunpack.i.l.bf16 %v7998_v29 }
 0x698   :  { %v5833_v52 = vsel %vm3220_vm10, %v5817_v43, %v7994_v15  ;;  %v5834_v19 = vsel %vm3220_vm10, %v5818_v57, %v7995_v54  ;;  %v5847_v27 = vsel %vm3350_vm12, %v5831_v5, %v7999_v18  ;;  %v5848_v31 = vsel %vm3350_vm12, %v5832_v23, %v8000_v37 }
 0x699   :  { %v8003_v45 = vpop.permute.xlu0 %8002  ;;  %v8008_v17 = vpop.permute.xlu1 %8007 }
 0x69a   :  { %v8005_v16 = vunpack.i.h.bf16 %v8003_v45  ;;  %v8004_v10 = vunpack.i.l.bf16 %v8003_v45  ;;  %v8010_v32 = vunpack.i.h.bf16 %v8008_v17  ;;  %v8009_v1 = vunpack.i.l.bf16 %v8008_v17 }
 0x69c   :  { %v5849_v24 = vsel %vm3350_vm12, %v5833_v52, %v8004_v10  ;;  %v5850_v28 = vsel %vm3350_vm12, %v5834_v19, %v8005_v16  ;;  %v5864_v36 = vsel %vm5851_vm14, %v5847_v27, %v8009_v1  ;;  %v5865_v53 = vsel %vm5851_vm14, %v5848_v31, %v8010_v32 }
 0x69d   :  { %v8013_v26 = vpop.permute.xlu0 %8012  ;;  %v8018_v63 = vpop.permute.xlu1 %8017 }
 0x69e   :  { %v8015_v38 = vunpack.i.h.bf16 %v8013_v26  ;;  %v8014_v3 = vunpack.i.l.bf16 %v8013_v26  ;;  %v8020_v50 = vunpack.i.h.bf16 %v8018_v63  ;;  %v8019_v30 = vunpack.i.l.bf16 %v8018_v63 }
 0x6a0   :  { %v5866_v41 = vsel %vm5851_vm14, %v5849_v24, %v8014_v3  ;;  %v5867_v61 = vsel %vm5851_vm14, %v5850_v28, %v8015_v38  ;;  %v5881_v26 = vsel %vm5868_vm15, %v5864_v36, %v8019_v30  ;;  %v5882_v17 = vsel %vm5868_vm15, %v5865_v53, %v8020_v50 }
 0x6a1   :  { %v8023_v58 = vpop.permute.xlu0 %8022  ;;  %v8028_v0 = vpop.permute.xlu1 %8027 }
 0x6a2   :  { %v8025_v59 = vunpack.i.h.bf16 %v8023_v58  ;;  %v8024_v42 = vunpack.i.l.bf16 %v8023_v58  ;;  %v8030_v20 = vunpack.i.h.bf16 %v8028_v0  ;;  %v8029_v4 = vunpack.i.l.bf16 %v8028_v0 }
 0x6a4   :  { %v5883_v25 = vsel %vm5868_vm15, %v5866_v41, %v8024_v42  ;;  %v5884_v33 = vsel %vm5868_vm15, %v5867_v61, %v8025_v59  ;;  %v5898_v46 = vsel %vm5885_vm0, %v5881_v26, %v8029_v4  ;;  %v5899_v6 = vsel %vm5885_vm0, %v5882_v17, %v8030_v20 }
 0x6a5   :  { %v8033_v2 = vpop.permute.xlu0 %8032  ;;  %v8038_v47 = vpop.permute.xlu1 %8037 }
 0x6a6   :  { %v8035_v56 = vunpack.i.h.bf16 %v8033_v2  ;;  %v8034_v35 = vunpack.i.l.bf16 %v8033_v2  ;;  %v8040_v45 = vunpack.i.h.bf16 %v8038_v47  ;;  %v8039_v29 = vunpack.i.l.bf16 %v8038_v47 }
 0x6a8   :  { %v5900_v7 = vsel %vm5885_vm0, %v5883_v25, %v8034_v35  ;;  %v5901_v60 = vsel %vm5885_vm0, %v5884_v33, %v8035_v56  ;;  %v5915_v54 = vsel %vm5902_vm2, %v5898_v46, %v8039_v29  ;;  %v5916_v15 = vsel %vm5902_vm2, %v5899_v6, %v8040_v45 }
 0x6a9   :  { %v8043_v8 = vpop.permute.xlu0 %8042  ;;  %v8048_v11 = vpop.permute.xlu1 %8047 }
 0x6aa   :  { %v8045_v13 = vunpack.i.h.bf16 %v8043_v8  ;;  %v8044_v40 = vunpack.i.l.bf16 %v8043_v8  ;;  %v8050_v62 = vunpack.i.h.bf16 %v8048_v11  ;;  %v8049_v12 = vunpack.i.l.bf16 %v8048_v11 }
 0x6ac   :  { %v5917_v55 = vsel %vm5902_vm2, %v5900_v7, %v8044_v40  ;;  %v5918_v48 = vsel %vm5902_vm2, %v5901_v60, %v8045_v13  ;;  %v5932_v58 = vsel %vm5919_vm3, %v5915_v54, %v8049_v12  ;;  %v5933_v63 = vsel %vm5919_vm3, %v5916_v15, %v8050_v62 }
 0x6ad   :  { %v8053_v49 = vpop.permute.xlu0 %8052  ;;  %v5942_v21 = vpack.c.bf16 %v5933_v63, %v5932_v58 }
 0x6ae   :  { %v8055_v39 = vunpack.i.h.bf16 %v8053_v49  ;;  %v8054_v22 = vunpack.i.l.bf16 %v8053_v49 }
 0x6af   :  { %6437 = vmatprep.mubr.msk.bf16.mxu1 %vm5983_vm4, %v5942_v21 }
 0x6b0   :  { %v5934_v44 = vsel %vm5919_vm3, %v5917_v55, %v8054_v22  ;;  %v5935_v14 = vsel %vm5919_vm3, %v5918_v48, %v8055_v39 }
 0x6b1   :  { %v5943_v9 = vpack.c.bf16 %v5935_v14, %v5934_v44 }
 0x6b3   :  { %6438 = vmatmul.mubr.msk.bf16.gmra.mxu1 %vm5983_vm4, %v5943_v9 }
 0x710   :  { %v6427_v16 = vpop.f32.mrf.mxu1 }
 0x711   :  { %6110 = vst [vmem:[#allocation3 + $0x10] sm:$0xff] %v6427_v16 }
 0x712   :  { %v6045_v10 = vpop.f32.mrf.mxu1 }
 0x713   :  { %6108 = vst [vmem:[#allocation3] sm:$0xff] %v6045_v10 }
 0x714   :  { %v6428_v37 = vpop.f32.mrf.mxu1 }
 0x715   :  { %6111 = vst [vmem:[#allocation3 + $0x18] sm:$0xff] %v6428_v37 }
 0x716   :  { %v6048_v18 = vpop.f32.mrf.mxu1 }
 0x717   :  { %6109 = vst [vmem:[#allocation3 + $0x8] sm:$0xff] %v6048_v18 }
 0x730   :  { %v6431_v51 = vpop.f32.mrf.mxu1 }
 0x731   :  { %6114 = vst [vmem:[#allocation3 + $0x30] sm:$0xff] %v6431_v51 }
 0x732   :  { %v6061_v34 = vpop.f32.mrf.mxu1 }
 0x733   :  { %6112 = vst [vmem:[#allocation3 + $0x20] sm:$0xff] %v6061_v34 }
 0x734   :  { %v6432_v43 = vpop.f32.mrf.mxu1 }
 0x735   :  { %6115 = vst [vmem:[#allocation3 + $0x38] sm:$0xff] %v6432_v43 }
 0x736   :  { %v6064_v57 = vpop.f32.mrf.mxu1 }
 0x737   :  { %6113 = vst [vmem:[#allocation3 + $0x28] sm:$0xff] %v6064_v57 }
 0x750   :  { %v6435_v52 = vpop.f32.mrf.mxu1 }
 0x751   :  { %6118 = vst [vmem:[#allocation3 + $0x50] sm:$0xff] %v6435_v52 }
 0x752   :  { %v6077_v19 = vpop.f32.mrf.mxu1 }
 0x753   :  { %6116 = vst [vmem:[#allocation3 + $0x40] sm:$0xff] %v6077_v19 }
 0x754   :  { %v6436_v23 = vpop.f32.mrf.mxu1 }
 0x755   :  { %6119 = vst [vmem:[#allocation3 + $0x58] sm:$0xff] %v6436_v23 }
 0x756   :  { %v6080_v5 = vpop.f32.mrf.mxu1 }
 0x757   :  { %6117 = vst [vmem:[#allocation3 + $0x48] sm:$0xff] %v6080_v5 }
 0x773   :  { %v6439_v2 = vpop.f32.mrf.mxu1 }
 0x774   :  { %6122 = vst [vmem:[#allocation3 + $0x70] sm:$0xff] %v6439_v2 }
 0x775   :  { %v6093_v0 = vpop.f32.mrf.mxu1 }
 0x776   :  { %6120 = vst [vmem:[#allocation3 + $0x60] sm:$0xff] %v6093_v0 }
 0x777   :  { %v6440_v38 = vpop.f32.mrf.mxu1 }
 0x778   :  { %6123 = vst [vmem:[#allocation3 + $0x78] sm:$0xff] %v6440_v38 }
 0x779   :  { %v6096_v3 = vpop.f32.mrf.mxu1 }
 0x77a   :  { %6121 = vst [vmem:[#allocation3 + $0x68] sm:$0xff] %v6096_v3 }
 0x77b   :  { %8129 = shalt.err (!%p8126_p4)
}
 0x77c   :  { %s8155_s12 = smov 128  }
 0x77d   :  { %6135 = dma.vmem_to_hbm [thread:$0]  %s6130_s13, 2048, %s14240_s7, [#allocation4], %s8155_s12, %s8155_s12, %s8144_s22  }
 0x77e   :  { %8138 = dma.done.wait [#allocation4], 2048  }
 0x77f   :  { %8139 = vsyncadd [#allocation4], 4294965248 }
 0x780   :  { %6139 = vsyncpa [#allocation4], 1 }

</bundles_post_ra>
